<compile_context>
chip_gen: v7x
topology: tpu7x:2x2x1
jax: 0.10.0
libtpu: 0.0.40
codegen_flags: <defaults>
</compile_context>

<pallas_src>
import functools

import numpy as np
import jax
import jax.numpy as jnp
from jax.experimental import pallas as pl
from jax.experimental.pallas import tpu as pltpu

EPS = 1e-5


# ---------------------------------------------------------------------------
# helpers
# ---------------------------------------------------------------------------

def pad_hw(x):
    """1-pixel zero padding ring for a 3x3 / padding=1 conv (NHWC)."""
    return jnp.pad(x, ((0, 0), (1, 1), (1, 1), (0, 0)))


# ---------------------------------------------------------------------------
# Kernel 1: direct 3x3 conv (+ optional second source) + bias + BatchNorm
#           (batch statistics) + ReLU, fully fused.
# ---------------------------------------------------------------------------

def _conv_bn_relu_kernel(*refs, num_srcs, eps):
    *src_refs, b_ref, g_ref, be_ref, o_ref, acc_ref = refs
    B, H, W, tn = o_ref.shape
    M = B * H * W

    acc_ref[...] = jnp.zeros_like(acc_ref)
    for s in range(num_srcs):
        x_ref = src_refs[2 * s]
        w_ref = src_refs[2 * s + 1]
        cin = x_ref.shape[-1]
        for ky in range(3):
            for kx in range(3):
                patch = x_ref[:, ky:ky + H, kx:kx + W, :].reshape(M, cin)
                acc_ref[...] += jnp.dot(patch, w_ref[ky, kx],
                                        preferred_element_type=jnp.float32)

    y = acc_ref[...] + b_ref[...]                     # conv bias, f32
    # BatchNorm (training-mode batch stats over all N*H*W rows of this
    # channel block), centered two-pass variance, then ReLU.
    mean = jnp.mean(y, axis=0, keepdims=True)
    cent = y - mean
    var = jnp.mean(cent * cent, axis=0, keepdims=True)
    y = cent * jax.lax.rsqrt(var + eps) * g_ref[...] + be_ref[...]
    y = jnp.maximum(y, 0.0)
    o_ref[...] = y.reshape(B, H, W, tn).astype(o_ref.dtype)


def conv3x3_bn_relu(sources, bias, gamma, beta):
    """sources: list of (x_padded NHWC bf16, w (3,3,Cin,Cout) bf16) whose
    contributions are summed (used to avoid the channel concat on the Up path)."""
    B, Hp, Wp, _ = sources[0][0].shape
    H, W = Hp - 2, Wp - 2
    M = B * H * W
    cout = sources[0][1].shape[-1]
    tn = cout if cout <= 128 else cout // 2     # >=2 parallel blocks on deep layers
    nblk = cout // tn

    in_specs, args = [], []
    for x, w in sources:
        cin = x.shape[-1]
        in_specs.append(pl.BlockSpec((B, Hp, Wp, cin), lambda j: (0, 0, 0, 0)))
        in_specs.append(pl.BlockSpec((3, 3, cin, tn), lambda j: (0, 0, 0, j)))
        args += [x, w]
    for v in (bias, gamma, beta):
        in_specs.append(pl.BlockSpec((1, tn), lambda j: (0, j)))
        args.append(v)

    kern = functools.partial(_conv_bn_relu_kernel,
                             num_srcs=len(sources), eps=EPS)
    return pl.pallas_call(
        kern,
        out_shape=jax.ShapeDtypeStruct((B, H, W, cout), jnp.bfloat16),
        grid=(nblk,),
        in_specs=in_specs,
        out_specs=pl.BlockSpec((B, H, W, tn), lambda j: (0, 0, 0, j)),
        scratch_shapes=[pltpu.VMEM((M, tn), jnp.float32)],
        compiler_params=pltpu.CompilerParams(
            dimension_semantics=("parallel",)),
    )(*args)


# ---------------------------------------------------------------------------
# Kernel 2: max-pool 2x2 (fully in-kernel, no XLA phase slices)
# ---------------------------------------------------------------------------

def _maxpool_kernel(x_ref, o_ref):
    H, W, C = x_ref.shape
    Ho, Wo = H // 2, W // 2
    even = x_ref[:, pl.ds(0, Wo, 2), :]               # (H, Wo, C)
    odd = x_ref[:, pl.ds(1, Wo, 2), :]
    m = jnp.maximum(even, odd).reshape(Ho, 2, Wo, C)  # pair rows (leading split)
    o_ref[...] = jnp.maximum(m[:, 0], m[:, 1])


def maxpool2x2(x):  # x: NHWC bf16
    B, H, W, C = x.shape
    return pl.pallas_call(
        _maxpool_kernel,
        out_shape=jax.ShapeDtypeStruct((B, H // 2, W // 2, C), x.dtype),
        grid=(B,),
        in_specs=[pl.BlockSpec((None, H, W, C), lambda b: (b, 0, 0, 0))],
        out_specs=pl.BlockSpec((None, H // 2, W // 2, C), lambda b: (b, 0, 0, 0)),
        compiler_params=pltpu.CompilerParams(
            dimension_semantics=("parallel",)),
    )(x)


# ---------------------------------------------------------------------------
# Kernel 3: row-operator GEMM (used twice per separable bilinear upsample)
# ---------------------------------------------------------------------------

def _rowop_kernel(a_ref, x_ref, o_ref):
    o_ref[...] = jnp.dot(a_ref[...], x_ref[...],
                         preferred_element_type=jnp.float32).astype(o_ref.dtype)


def _apply_row_operator(a, x):
    """x: (B, Q, L) bf16, a: (P, Q) bf16 -> (B, P, L) bf16 (per-batch GEMM)."""
    B, Q, L = x.shape
    P = a.shape[0]
    return pl.pallas_call(
        _rowop_kernel,
        out_shape=jax.ShapeDtypeStruct((B, P, L), jnp.bfloat16),
        grid=(B,),
        in_specs=[pl.BlockSpec((P, Q), lambda b: (0, 0)),
                  pl.BlockSpec((None, Q, L), lambda b: (b, 0, 0))],
        out_specs=pl.BlockSpec((None, P, L), lambda b: (b, 0, 0)),
        compiler_params=pltpu.CompilerParams(
            dimension_semantics=("parallel",)),
    )(a, x)


def _interp_matrix(n_in, n_out):
    A = np.zeros((n_out, n_in), dtype=np.float32)
    if n_in == 1:
        A[:, 0] = 1.0
        return A
    for o in range(n_out):
        src = o * (n_in - 1) / (n_out - 1)            # align_corners=True
        i0 = min(int(np.floor(src)), n_in - 1)
        i1 = min(i0 + 1, n_in - 1)
        f = src - i0
        A[o, i0] += 1.0 - f
        A[o, i1] += f
    return A


def _padded_up_operator(n):
    """(2n+2, n) operator: bilinear 2x upsample + a zero padding row/col ring."""
    A = np.zeros((2 * n + 2, n), dtype=np.float32)
    A[1:2 * n + 1, :] = _interp_matrix(n, 2 * n)
    return jnp.asarray(A, jnp.bfloat16)


def upsample2x_padded(x):
    """Separable bilinear 2x upsample (align_corners=True) of NHWC x, returned
    WITH the 1-pixel zero padding ring already applied (ready for conv taps)."""
    B, h, w, C = x.shape
    ah = _padded_up_operator(h)                       # (2h+2, h)
    aw = _padded_up_operator(w)                       # (2w+2, w)
    hp, wp = 2 * h + 2, 2 * w + 2
    t = _apply_row_operator(ah, x.reshape(B, h, w * C))          # (B, hp, w*C)
    t = t.reshape(B, hp, w, C).transpose(0, 2, 1, 3).reshape(B, w, hp * C)
    u = _apply_row_operator(aw, t)                                # (B, wp, hp*C)
    return u.reshape(B, wp, hp, C).transpose(0, 2, 1, 3)          # (B, hp, wp, C)


# ---------------------------------------------------------------------------
# Kernel 4: whole TransformerBlock (LN1 -> MHA -> +res -> LN2 -> MLP -> +res),
#           optional fused final 1x1 conv (outc).
# ---------------------------------------------------------------------------

def _transformer_kernel(x_ref, ln1g_ref, ln1b_ref, wqkv_ref, bqkv_ref,
                        wo_ref, bo_ref, ln2g_ref, ln2b_ref,
                        w1_ref, b1_ref, w2_ref, b2_ref, *rest,
                        nh, eps, final_proj):
    if final_proj:
        wp_ref, bp_ref, o_ref = rest
    else:
        (o_ref,) = rest

    x = x_ref[...].astype(jnp.float32)                # (S, C)
    S, C = x.shape
    dh = C // nh

    # LayerNorm 1 (fused into the qkv projection's lhs)
    mu = jnp.mean(x, axis=-1, keepdims=True)
    cent = x - mu
    var = jnp.mean(cent * cent, axis=-1, keepdims=True)
    xn = cent * jax.lax.rsqrt(var + eps) * ln1g_ref[...] + ln1b_ref[...]
    qkv = jnp.dot(xn.astype(jnp.bfloat16), wqkv_ref[...],
                  preferred_element_type=jnp.float32) + bqkv_ref[...]

    heads = []
    for h in range(nh):                               # 1/sqrt(dh) folded into q
        q = qkv[:, h * dh:(h + 1) * dh].astype(jnp.bfloat16)
        k = qkv[:, C + h * dh:C + (h + 1) * dh].astype(jnp.bfloat16)
        v = qkv[:, 2 * C + h * dh:2 * C + (h + 1) * dh].astype(jnp.bfloat16)
        s = jnp.dot(q, k.T, preferred_element_type=jnp.float32)
        m = jnp.max(s, axis=-1, keepdims=True)
        p = jnp.exp(s - m)
        l = jnp.sum(p, axis=-1, keepdims=True)
        p = p * pl.reciprocal(l, approx=True)         # EUP, off the VALU path
        heads.append(jnp.dot(p.astype(jnp.bfloat16), v,
                             preferred_element_type=jnp.float32))
    attn = jnp.concatenate(heads, axis=-1)            # (S, C) f32

    h1 = jnp.dot(attn.astype(jnp.bfloat16), wo_ref[...],
                 preferred_element_type=jnp.float32) + bo_ref[...] + x

    # LayerNorm 2 (fused into fc1's lhs)
    mu2 = jnp.mean(h1, axis=-1, keepdims=True)
    cent2 = h1 - mu2
    var2 = jnp.mean(cent2 * cent2, axis=-1, keepdims=True)
    hn = cent2 * jax.lax.rsqrt(var2 + eps) * ln2g_ref[...] + ln2b_ref[...]
    f = jnp.dot(hn.astype(jnp.bfloat16), w1_ref[...],
                preferred_element_type=jnp.float32) + b1_ref[...]
    f = jax.nn.gelu(f, approximate=False)             # PyTorch nn.GELU (erf)
    out = jnp.dot(f.astype(jnp.bfloat16), w2_ref[...],
                  preferred_element_type=jnp.float32) + b2_ref[...] + h1

    if final_proj:                                    # fused 1x1 outc conv
        y = jnp.dot(out.astype(jnp.bfloat16), wp_ref[...],
                    preferred_element_type=jnp.float32) + bp_ref[...]
        o_ref[...] = y.astype(o_ref.dtype)
    else:
        o_ref[...] = out.astype(o_ref.dtype)


def transformer_block(x, p, outc=None, nh=4):
    B, H, W, C = x.shape
    S = H * W
    tok = x.reshape(B, S, C)
    names = ["ln1_g", "ln1_b", "in_w", "in_b", "out_w", "out_b",
             "ln2_g", "ln2_b", "fc1_w", "fc1_b", "fc2_w", "fc2_b"]
    args = [tok] + [p[n] for n in names]
    if outc is not None:
        args += [outc["w"], outc["b"]]
        n_out = outc["w"].shape[-1]
        out_shape = jax.ShapeDtypeStruct((B, S, n_out), jnp.float32)
        out_spec = pl.BlockSpec((None, S, n_out), lambda b: (b, 0, 0))
    else:
        out_shape = jax.ShapeDtypeStruct((B, S, C), jnp.bfloat16)
        out_spec = pl.BlockSpec((None, S, C), lambda b: (b, 0, 0))

    in_specs = [pl.BlockSpec((None, S, C), lambda b: (b, 0, 0))]
    for a in args[1:]:
        r, c = a.shape
        in_specs.append(pl.BlockSpec((r, c), lambda b: (0, 0)))

    kern = functools.partial(_transformer_kernel, nh=nh, eps=EPS,
                             final_proj=outc is not None)
    y = pl.pallas_call(
        kern,
        out_shape=out_shape,
        grid=(B,),
        in_specs=in_specs,
        out_specs=out_spec,
        compiler_params=pltpu.CompilerParams(
            dimension_semantics=("parallel",)),
    )(*args)
    if outc is not None:
        return y                                      # (B, S, 128) f32
    return y.reshape(B, H, W, C)


# ---------------------------------------------------------------------------
# DoubleConv / Down / Up
# ---------------------------------------------------------------------------

def double_conv(x, p):
    y = conv3x3_bn_relu([(pad_hw(x), p["w1"])], p["b1"], p["g1"], p["be1"])
    y = conv3x3_bn_relu([(pad_hw(y), p["w2"])], p["b2"], p["g2"], p["be2"])
    return y


def down(x, p):
    return double_conv(maxpool2x2(x), p)


def up(x1, x2, p):
    """x1: deeper feature (upsampled 2x), x2: skip; torch.cat([x2, x1], dim=1)
    is realized by accumulating both split-K halves in one conv kernel."""
    x1u_pad = upsample2x_padded(x1)                   # padded, ready for taps
    y = conv3x3_bn_relu([(pad_hw(x2), p["w1a"]), (x1u_pad, p["w1b"])],
                        p["b1"], p["g1"], p["be1"])
    y = conv3x3_bn_relu([(pad_hw(y), p["w2"])], p["b2"], p["g2"], p["be2"])
    return y


# ---------------------------------------------------------------------------
# Parameter init (PyTorch layouts) + one-time kernel-layout preparation
# ---------------------------------------------------------------------------

def init_conv(key, cout, cin, k):
    k1, k2 = jax.random.split(key)
    scale = 1.0 / np.sqrt(cin * k * k)
    w = jax.random.normal(k1, (cout, cin, k, k), jnp.float32) * scale
    b = jax.random.normal(k2, (cout,), jnp.float32) * scale
    return w, b


def init_double_conv(key, cin, cout):
    ks = jax.random.split(key, 2)
    w1, b1 = init_conv(ks[0], cout, cin, 3)
    w2, b2 = init_conv(ks[1], cout, cout, 3)
    return dict(w1=w1, b1=b1, g1=jnp.ones((cout,), jnp.float32),
                be1=jnp.zeros((cout,), jnp.float32),
                w2=w2, b2=b2, g2=jnp.ones((cout,), jnp.float32),
                be2=jnp.zeros((cout,), jnp.float32))


def init_transformer(key, C):
    ks = jax.random.split(key, 4)
    s = 1.0 / np.sqrt(C)
    return dict(
        ln1_g=jnp.ones((C,), jnp.float32), ln1_b=jnp.zeros((C,), jnp.float32),
        in_w=jax.random.normal(ks[0], (3 * C, C), jnp.float32) * s,
        in_b=jnp.zeros((3 * C,), jnp.float32),
        out_w=jax.random.normal(ks[1], (C, C), jnp.float32) * s,
        out_b=jnp.zeros((C,), jnp.float32),
        ln2_g=jnp.ones((C,), jnp.float32), ln2_b=jnp.zeros((C,), jnp.float32),
        fc1_w=jax.random.normal(ks[2], (C, C), jnp.float32) * s,
        fc1_b=jnp.zeros((C,), jnp.float32),
        fc2_w=jax.random.normal(ks[3], (C, C), jnp.float32) * s,
        fc2_b=jnp.zeros((C,), jnp.float32),
    )


def init_unet_raw(key, in_ch=3, out_ch=3):
    ks = jax.random.split(key, 14)
    p = {}
    p["inc"] = init_double_conv(ks[0], in_ch, 64)
    p["down1"] = init_double_conv(ks[1], 64, 128)
    p["tr1"] = init_transformer(ks[2], 128)
    p["down2"] = init_double_conv(ks[3], 128, 256)
    p["tr2"] = init_transformer(ks[4], 256)
    p["down3"] = init_double_conv(ks[5], 256, 512)
    p["tr3"] = init_transformer(ks[6], 512)
    p["up3"] = init_double_conv(ks[7], 768, 256)
    p["tr4"] = init_transformer(ks[8], 256)
    p["up2"] = init_double_conv(ks[9], 384, 128)
    p["tr5"] = init_transformer(ks[10], 128)
    p["up1"] = init_double_conv(ks[11], 192, 64)
    p["tr6"] = init_transformer(ks[12], 64)
    wout, bout = init_conv(ks[13], out_ch, 64, 1)
    p["outc"] = dict(w=wout, b=bout)
    p["out_ch"] = out_ch
    return p


def _conv_w(w):  # (Cout, Cin, 3, 3) -> (3, 3, Cin, Cout) bf16
    return jnp.transpose(w, (2, 3, 1, 0)).astype(jnp.bfloat16)


def _prep_double_conv(raw, split=None):
    out = dict(
        b1=raw["b1"].reshape(1, -1).astype(jnp.float32),
        g1=raw["g1"].reshape(1, -1).astype(jnp.float32),
        be1=raw["be1"].reshape(1, -1).astype(jnp.float32),
        w2=_conv_w(raw["w2"]),
        b2=raw["b2"].reshape(1, -1).astype(jnp.float32),
        g2=raw["g2"].reshape(1, -1).astype(jnp.float32),
        be2=raw["be2"].reshape(1, -1).astype(jnp.float32),
    )
    if split is None:
        out["w1"] = _conv_w(raw["w1"])
    else:  # K split between skip channels [:split] and upsampled channels [split:]
        out["w1a"] = _conv_w(raw["w1"][:, :split])
        out["w1b"] = _conv_w(raw["w1"][:, split:])
    return out


def _prep_transformer(raw, C):
    dh = C // 4
    scale = 1.0 / np.sqrt(dh)
    qscale = jnp.concatenate([jnp.full((C,), scale, jnp.float32),
                              jnp.ones((2 * C,), jnp.float32)])
    in_w = jnp.transpose(raw["in_w"]) * qscale[None, :]   # fold 1/sqrt(dh) into q
    return dict(
        ln1_g=raw["ln1_g"].reshape(1, C).astype(jnp.float32),
        ln1_b=raw["ln1_b"].reshape(1, C).astype(jnp.float32),
        in_w=in_w.astype(jnp.bfloat16),
        in_b=(raw["in_b"] * qscale).reshape(1, 3 * C).astype(jnp.float32),
        out_w=jnp.transpose(raw["out_w"]).astype(jnp.bfloat16),
        out_b=raw["out_b"].reshape(1, C).astype(jnp.float32),
        ln2_g=raw["ln2_g"].reshape(1, C).astype(jnp.float32),
        ln2_b=raw["ln2_b"].reshape(1, C).astype(jnp.float32),
        fc1_w=jnp.transpose(raw["fc1_w"]).astype(jnp.bfloat16),
        fc1_b=raw["fc1_b"].reshape(1, C).astype(jnp.float32),
        fc2_w=jnp.transpose(raw["fc2_w"]).astype(jnp.bfloat16),
        fc2_b=raw["fc2_b"].reshape(1, C).astype(jnp.float32),
    )


def _prep_outc(raw, out_ch):
    w = jnp.transpose(raw["w"].reshape(out_ch, 64), (1, 0))     # (64, out_ch)
    pad_n = 128 - out_ch                                        # lane-dense store
    w = jnp.pad(w, ((0, 0), (0, pad_n))).astype(jnp.bfloat16)
    b = jnp.pad(raw["b"], (0, pad_n)).reshape(1, 128).astype(jnp.float32)
    return dict(w=w, b=b, cout=out_ch)


def prepare_params(raw):
    p = {}
    p["inc"] = _prep_double_conv(raw["inc"])
    p["down1"] = _prep_double_conv(raw["down1"])
    p["down2"] = _prep_double_conv(raw["down2"])
    p["down3"] = _prep_double_conv(raw["down3"])
    p["up3"] = _prep_double_conv(raw["up3"], split=256)   # 768 = 256(skip)+512(up)
    p["up2"] = _prep_double_conv(raw["up2"], split=128)   # 384 = 128+256
    p["up1"] = _prep_double_conv(raw["up1"], split=64)    # 192 = 64+128
    for name, C in (("tr1", 128), ("tr2", 256), ("tr3", 512),
                    ("tr4", 256), ("tr5", 128), ("tr6", 64)):
        p[name] = _prep_transformer(raw[name], C)
    p["outc"] = _prep_outc(raw["outc"], raw["out_ch"])
    return p


# ---------------------------------------------------------------------------
# Full UNet forward (mirrors UNet.forward; the print() side effect is omitted)
# ---------------------------------------------------------------------------

def unet_forward(x_nchw, p):
    x = jnp.transpose(x_nchw, (0, 2, 3, 1)).astype(jnp.bfloat16)   # NCHW -> NHWC
    e0 = double_conv(x, p["inc"])                                   # inc
    e1 = transformer_block(down(e0, p["down1"]), p["tr1"])          # enc_lev_1
    e2 = transformer_block(down(e1, p["down2"]), p["tr2"])          # enc_lev_2
    e3 = transformer_block(down(e2, p["down3"]), p["tr3"])          # enc_lev_3
    d3 = transformer_block(up(e3, e2, p["up3"]), p["tr4"])          # dec_lev_3
    d2 = transformer_block(up(d3, e1, p["up2"]), p["tr5"])          # dec_lev_2
    d1 = up(d2, e0, p["up1"])                                       # dec_lev_1
    B, H, W, _ = d1.shape
    y = transformer_block(d1, p["tr6"], outc=p["outc"])             # tr6 + outc fused
    y = y[:, :, :p["outc"]["cout"]].reshape(B, H, W, -1)
    return jnp.transpose(y, (0, 3, 1, 2))                           # NHWC -> NCHW


if __name__ == "__main__":
    key = jax.random.PRNGKey(0)
    kp, kx = jax.random.split(key)
    raw = init_unet_raw(kp, in_ch=3, out_ch=3)
    params = prepare_params(raw)                 # one-time layout preparation
    x = jax.random.normal(kx, (2, 3, 16, 16), jnp.float32)   # NCHW, like PyTorch
    y = unet_forward(x, params)
    y = jax.block_until_ready(y)
    assert y.shape == (2, 3, 16, 16), y.shape
    assert bool(jnp.all(jnp.isfinite(y)))
    print("KERNEL_OK")
</pallas_src>

<mosaic_0001>
module attributes {stable_mosaic.version = 11 : i64} {
  func.func @_conv_bn_relu_kernel(%arg0: i32, %arg1: memref<2x18x18x3xbf16, #tpu.memory_space<vmem>>, %arg2: memref<3x3x3x64xbf16, #tpu.memory_space<vmem>>, %arg3: memref<1x64xf32, #tpu.memory_space<vmem>>, %arg4: memref<1x64xf32, #tpu.memory_space<vmem>>, %arg5: memref<1x64xf32, #tpu.memory_space<vmem>>, %arg6: memref<2x16x16x64xbf16, #tpu.memory_space<vmem>>, %arg7: memref<512x64xf32, #tpu.memory_space<vmem>>) attributes {dimension_semantics = [#tpu.dimension_semantics<parallel>], iteration_bounds = array<i64: 1>, scalar_prefetch = 0 : i64, scratch_operands = 1 : i64, tpu.core_type = #tpu.core_type<tc>, window_params = [{pipeline_mode = #tpu.pipeline_mode<synchronous>, transform_indices = @transform_0, window_bounds = array<i64: 2, 18, 18, 3>}, {transform_indices = @transform_1, window_bounds = array<i64: 3, 3, 3, 64>}, {transform_indices = @transform_2, window_bounds = array<i64: 1, 64>}, {transform_indices = @transform_3, window_bounds = array<i64: 1, 64>}, {transform_indices = @transform_4, window_bounds = array<i64: 1, 64>}, {transform_indices = @transform_5, window_bounds = array<i64: 2, 16, 16, 64>}]} {
    %cst = arith.constant 0.000000e+00 : f32
    %0 = vector.broadcast %cst : f32 to vector<512x64xf32>
    %c0 = arith.constant 0 : index
    %c0_0 = arith.constant 0 : index
    %1 = vector.load %arg7[%c0, %c0_0] : memref<512x64xf32, #tpu.memory_space<vmem>>, vector<512x64xf32>
    tpu.vector_store %arg7[%c0, %c0_0], %0 {strides = array<i32>} : memref<512x64xf32, #tpu.memory_space<vmem>>, vector<512x64xf32>,
    %c0_1 = arith.constant 0 : index
    %c0_2 = arith.constant 0 : index
    %c0_3 = arith.constant 0 : index
    %c0_4 = arith.constant 0 : index
    %2 = vector.load %arg1[%c0_1, %c0_2, %c0_3, %c0_4] : memref<2x18x18x3xbf16, #tpu.memory_space<vmem>>, vector<2x16x16x3xbf16>
    %3 = vector.shape_cast %2 : vector<2x16x16x3xbf16> to vector<512x3xbf16>
    %c0_5 = arith.constant 0 : index
    %c0_6 = arith.constant 0 : index
    %4 = vector.load %arg7[%c0_5, %c0_6] : memref<512x64xf32, #tpu.memory_space<vmem>>, vector<512x64xf32>
    %c0_7 = arith.constant 0 : index
    %c0_8 = arith.constant 0 : index
    %c0_9 = arith.constant 0 : index
    %c0_10 = arith.constant 0 : index
    %5 = vector.load %arg2[%c0_7, %c0_8, %c0_9, %c0_10] : memref<3x3x3x64xbf16, #tpu.memory_space<vmem>>, vector<1x1x3x64xbf16>
    %6 = vector.shape_cast %5 : vector<1x1x3x64xbf16> to vector<3x64xbf16>
    %cst_11 = arith.constant dense<0.000000e+00> : vector<512x64xf32>
    %7 = tpu.matmul %3, %6, %cst_11 {dimension_numbers = #tpu.dot_dimension_numbers<[1], [0], [0], [1], [0, 0, 1, 1], [], []>} : vector<512x3xbf16>, vector<3x64xbf16>, vector<512x64xf32> -> vector<512x64xf32>
    %8 = arith.addf %4, %7 : vector<512x64xf32>
    %c0_12 = arith.constant 0 : index
    %c0_13 = arith.constant 0 : index
    %9 = vector.load %arg7[%c0_12, %c0_13] : memref<512x64xf32, #tpu.memory_space<vmem>>, vector<512x64xf32>
    tpu.vector_store %arg7[%c0_12, %c0_13], %8 {strides = array<i32>} : memref<512x64xf32, #tpu.memory_space<vmem>>, vector<512x64xf32>,
    %c0_14 = arith.constant 0 : index
    %c0_15 = arith.constant 0 : index
    %c1 = arith.constant 1 : index
    %c0_16 = arith.constant 0 : index
    %10 = vector.load %arg1[%c0_14, %c0_15, %c1, %c0_16] : memref<2x18x18x3xbf16, #tpu.memory_space<vmem>>, vector<2x16x16x3xbf16>
    %11 = vector.shape_cast %10 : vector<2x16x16x3xbf16> to vector<512x3xbf16>
    %c0_17 = arith.constant 0 : index
    %c0_18 = arith.constant 0 : index
    %12 = vector.load %arg7[%c0_17, %c0_18] : memref<512x64xf32, #tpu.memory_space<vmem>>, vector<512x64xf32>
    %c0_19 = arith.constant 0 : index
    %c1_20 = arith.constant 1 : index
    %c0_21 = arith.constant 0 : index
    %c0_22 = arith.constant 0 : index
    %13 = vector.load %arg2[%c0_19, %c1_20, %c0_21, %c0_22] : memref<3x3x3x64xbf16, #tpu.memory_space<vmem>>, vector<1x1x3x64xbf16>
    %14 = vector.shape_cast %13 : vector<1x1x3x64xbf16> to vector<3x64xbf16>
    %cst_23 = arith.constant dense<0.000000e+00> : vector<512x64xf32>
    %15 = tpu.matmul %11, %14, %cst_23 {dimension_numbers = #tpu.dot_dimension_numbers<[1], [0], [0], [1], [0, 0, 1, 1], [], []>} : vector<512x3xbf16>, vector<3x64xbf16>, vector<512x64xf32> -> vector<512x64xf32>
    %16 = arith.addf %12, %15 : vector<512x64xf32>
    %c0_24 = arith.constant 0 : index
    %c0_25 = arith.constant 0 : index
    %17 = vector.load %arg7[%c0_24, %c0_25] : memref<512x64xf32, #tpu.memory_space<vmem>>, vector<512x64xf32>
    tpu.vector_store %arg7[%c0_24, %c0_25], %16 {strides = array<i32>} : memref<512x64xf32, #tpu.memory_space<vmem>>, vector<512x64xf32>,
    %c0_26 = arith.constant 0 : index
    %c0_27 = arith.constant 0 : index
    %c2 = arith.constant 2 : index
    %c0_28 = arith.constant 0 : index
    %18 = vector.load %arg1[%c0_26, %c0_27, %c2, %c0_28] : memref<2x18x18x3xbf16, #tpu.memory_space<vmem>>, vector<2x16x16x3xbf16>
    %19 = vector.shape_cast %18 : vector<2x16x16x3xbf16> to vector<512x3xbf16>
    %c0_29 = arith.constant 0 : index
    %c0_30 = arith.constant 0 : index
    %20 = vector.load %arg7[%c0_29, %c0_30] : memref<512x64xf32, #tpu.memory_space<vmem>>, vector<512x64xf32>
    %c0_31 = arith.constant 0 : index
    %c2_32 = arith.constant 2 : index
    %c0_33 = arith.constant 0 : index
    %c0_34 = arith.constant 0 : index
    %21 = vector.load %arg2[%c0_31, %c2_32, %c0_33, %c0_34] : memref<3x3x3x64xbf16, #tpu.memory_space<vmem>>, vector<1x1x3x64xbf16>
    %22 = vector.shape_cast %21 : vector<1x1x3x64xbf16> to vector<3x64xbf16>
    %cst_35 = arith.constant dense<0.000000e+00> : vector<512x64xf32>
    %23 = tpu.matmul %19, %22, %cst_35 {dimension_numbers = #tpu.dot_dimension_numbers<[1], [0], [0], [1], [0, 0, 1, 1], [], []>} : vector<512x3xbf16>, vector<3x64xbf16>, vector<512x64xf32> -> vector<512x64xf32>
    %24 = arith.addf %20, %23 : vector<512x64xf32>
    %c0_36 = arith.constant 0 : index
    %c0_37 = arith.constant 0 : index
    %25 = vector.load %arg7[%c0_36, %c0_37] : memref<512x64xf32, #tpu.memory_space<vmem>>, vector<512x64xf32>
    tpu.vector_store %arg7[%c0_36, %c0_37], %24 {strides = array<i32>} : memref<512x64xf32, #tpu.memory_space<vmem>>, vector<512x64xf32>,
    %c0_38 = arith.constant 0 : index
    %c1_39 = arith.constant 1 : index
    %c0_40 = arith.constant 0 : index
    %c0_41 = arith.constant 0 : index
    %26 = vector.load %arg1[%c0_38, %c1_39, %c0_40, %c0_41] : memref<2x18x18x3xbf16, #tpu.memory_space<vmem>>, vector<2x16x16x3xbf16>
    %27 = vector.shape_cast %26 : vector<2x16x16x3xbf16> to vector<512x3xbf16>
    %c0_42 = arith.constant 0 : index
    %c0_43 = arith.constant 0 : index
    %28 = vector.load %arg7[%c0_42, %c0_43] : memref<512x64xf32, #tpu.memory_space<vmem>>, vector<512x64xf32>
    %c1_44 = arith.constant 1 : index
    %c0_45 = arith.constant 0 : index
    %c0_46 = arith.constant 0 : index
    %c0_47 = arith.constant 0 : index
    %29 = vector.load %arg2[%c1_44, %c0_45, %c0_46, %c0_47] : memref<3x3x3x64xbf16, #tpu.memory_space<vmem>>, vector<1x1x3x64xbf16>
    %30 = vector.shape_cast %29 : vector<1x1x3x64xbf16> to vector<3x64xbf16>
    %cst_48 = arith.constant dense<0.000000e+00> : vector<512x64xf32>
    %31 = tpu.matmul %27, %30, %cst_48 {dimension_numbers = #tpu.dot_dimension_numbers<[1], [0], [0], [1], [0, 0, 1, 1], [], []>} : vector<512x3xbf16>, vector<3x64xbf16>, vector<512x64xf32> -> vector<512x64xf32>
    %32 = arith.addf %28, %31 : vector<512x64xf32>
    %c0_49 = arith.constant 0 : index
    %c0_50 = arith.constant 0 : index
    %33 = vector.load %arg7[%c0_49, %c0_50] : memref<512x64xf32, #tpu.memory_space<vmem>>, vector<512x64xf32>
    tpu.vector_store %arg7[%c0_49, %c0_50], %32 {strides = array<i32>} : memref<512x64xf32, #tpu.memory_space<vmem>>, vector<512x64xf32>,
    %c0_51 = arith.constant 0 : index
    %c1_52 = arith.constant 1 : index
    %c1_53 = arith.constant 1 : index
    %c0_54 = arith.constant 0 : index
    %34 = vector.load %arg1[%c0_51, %c1_52, %c1_53, %c0_54] : memref<2x18x18x3xbf16, #tpu.memory_space<vmem>>, vector<2x16x16x3xbf16>
    %35 = vector.shape_cast %34 : vector<2x16x16x3xbf16> to vector<512x3xbf16>
    %c0_55 = arith.constant 0 : index
    %c0_56 = arith.constant 0 : index
    %36 = vector.load %arg7[%c0_55, %c0_56] : memref<512x64xf32, #tpu.memory_space<vmem>>, vector<512x64xf32>
    %c1_57 = arith.constant 1 : index
    %c1_58 = arith.constant 1 : index
    %c0_59 = arith.constant 0 : index
    %c0_60 = arith.constant 0 : index
    %37 = vector.load %arg2[%c1_57, %c1_58, %c0_59, %c0_60] : memref<3x3x3x64xbf16, #tpu.memory_space<vmem>>, vector<1x1x3x64xbf16>
    %38 = vector.shape_cast %37 : vector<1x1x3x64xbf16> to vector<3x64xbf16>
    %cst_61 = arith.constant dense<0.000000e+00> : vector<512x64xf32>
    %39 = tpu.matmul %35, %38, %cst_61 {dimension_numbers = #tpu.dot_dimension_numbers<[1], [0], [0], [1], [0, 0, 1, 1], [], []>} : vector<512x3xbf16>, vector<3x64xbf16>, vector<512x64xf32> -> vector<512x64xf32>
    %40 = arith.addf %36, %39 : vector<512x64xf32>
    %c0_62 = arith.constant 0 : index
    %c0_63 = arith.constant 0 : index
    %41 = vector.load %arg7[%c0_62, %c0_63] : memref<512x64xf32, #tpu.memory_space<vmem>>, vector<512x64xf32>
    tpu.vector_store %arg7[%c0_62, %c0_63], %40 {strides = array<i32>} : memref<512x64xf32, #tpu.memory_space<vmem>>, vector<512x64xf32>,
    %c0_64 = arith.constant 0 : index
    %c1_65 = arith.constant 1 : index
    %c2_66 = arith.constant 2 : index
    %c0_67 = arith.constant 0 : index
    %42 = vector.load %arg1[%c0_64, %c1_65, %c2_66, %c0_67] : memref<2x18x18x3xbf16, #tpu.memory_space<vmem>>, vector<2x16x16x3xbf16>
    %43 = vector.shape_cast %42 : vector<2x16x16x3xbf16> to vector<512x3xbf16>
    %c0_68 = arith.constant 0 : index
    %c0_69 = arith.constant 0 : index
    %44 = vector.load %arg7[%c0_68, %c0_69] : memref<512x64xf32, #tpu.memory_space<vmem>>, vector<512x64xf32>
    %c1_70 = arith.constant 1 : index
    %c2_71 = arith.constant 2 : index
    %c0_72 = arith.constant 0 : index
    %c0_73 = arith.constant 0 : index
    %45 = vector.load %arg2[%c1_70, %c2_71, %c0_72, %c0_73] : memref<3x3x3x64xbf16, #tpu.memory_space<vmem>>, vector<1x1x3x64xbf16>
    %46 = vector.shape_cast %45 : vector<1x1x3x64xbf16> to vector<3x64xbf16>
    %cst_74 = arith.constant dense<0.000000e+00> : vector<512x64xf32>
    %47 = tpu.matmul %43, %46, %cst_74 {dimension_numbers = #tpu.dot_dimension_numbers<[1], [0], [0], [1], [0, 0, 1, 1], [], []>} : vector<512x3xbf16>, vector<3x64xbf16>, vector<512x64xf32> -> vector<512x64xf32>
    %48 = arith.addf %44, %47 : vector<512x64xf32>
    %c0_75 = arith.constant 0 : index
    %c0_76 = arith.constant 0 : index
    %49 = vector.load %arg7[%c0_75, %c0_76] : memref<512x64xf32, #tpu.memory_space<vmem>>, vector<512x64xf32>
    tpu.vector_store %arg7[%c0_75, %c0_76], %48 {strides = array<i32>} : memref<512x64xf32, #tpu.memory_space<vmem>>, vector<512x64xf32>,
    %c0_77 = arith.constant 0 : index
    %c2_78 = arith.constant 2 : index
    %c0_79 = arith.constant 0 : index
    %c0_80 = arith.constant 0 : index
    %50 = vector.load %arg1[%c0_77, %c2_78, %c0_79, %c0_80] : memref<2x18x18x3xbf16, #tpu.memory_space<vmem>>, vector<2x16x16x3xbf16>
    %51 = vector.shape_cast %50 : vector<2x16x16x3xbf16> to vector<512x3xbf16>
    %c0_81 = arith.constant 0 : index
    %c0_82 = arith.constant 0 : index
    %52 = vector.load %arg7[%c0_81, %c0_82] : memref<512x64xf32, #tpu.memory_space<vmem>>, vector<512x64xf32>
    %c2_83 = arith.constant 2 : index
    %c0_84 = arith.constant 0 : index
    %c0_85 = arith.constant 0 : index
    %c0_86 = arith.constant 0 : index
    %53 = vector.load %arg2[%c2_83, %c0_84, %c0_85, %c0_86] : memref<3x3x3x64xbf16, #tpu.memory_space<vmem>>, vector<1x1x3x64xbf16>
    %54 = vector.shape_cast %53 : vector<1x1x3x64xbf16> to vector<3x64xbf16>
    %cst_87 = arith.constant dense<0.000000e+00> : vector<512x64xf32>
    %55 = tpu.matmul %51, %54, %cst_87 {dimension_numbers = #tpu.dot_dimension_numbers<[1], [0], [0], [1], [0, 0, 1, 1], [], []>} : vector<512x3xbf16>, vector<3x64xbf16>, vector<512x64xf32> -> vector<512x64xf32>
    %56 = arith.addf %52, %55 : vector<512x64xf32>
    %c0_88 = arith.constant 0 : index
    %c0_89 = arith.constant 0 : index
    %57 = vector.load %arg7[%c0_88, %c0_89] : memref<512x64xf32, #tpu.memory_space<vmem>>, vector<512x64xf32>
    tpu.vector_store %arg7[%c0_88, %c0_89], %56 {strides = array<i32>} : memref<512x64xf32, #tpu.memory_space<vmem>>, vector<512x64xf32>,
    %c0_90 = arith.constant 0 : index
    %c2_91 = arith.constant 2 : index
    %c1_92 = arith.constant 1 : index
    %c0_93 = arith.constant 0 : index
    %58 = vector.load %arg1[%c0_90, %c2_91, %c1_92, %c0_93] : memref<2x18x18x3xbf16, #tpu.memory_space<vmem>>, vector<2x16x16x3xbf16>
    %59 = vector.shape_cast %58 : vector<2x16x16x3xbf16> to vector<512x3xbf16>
    %c0_94 = arith.constant 0 : index
    %c0_95 = arith.constant 0 : index
    %60 = vector.load %arg7[%c0_94, %c0_95] : memref<512x64xf32, #tpu.memory_space<vmem>>, vector<512x64xf32>
    %c2_96 = arith.constant 2 : index
    %c1_97 = arith.constant 1 : index
    %c0_98 = arith.constant 0 : index
    %c0_99 = arith.constant 0 : index
    %61 = vector.load %arg2[%c2_96, %c1_97, %c0_98, %c0_99] : memref<3x3x3x64xbf16, #tpu.memory_space<vmem>>, vector<1x1x3x64xbf16>
    %62 = vector.shape_cast %61 : vector<1x1x3x64xbf16> to vector<3x64xbf16>
    %cst_100 = arith.constant dense<0.000000e+00> : vector<512x64xf32>
    %63 = tpu.matmul %59, %62, %cst_100 {dimension_numbers = #tpu.dot_dimension_numbers<[1], [0], [0], [1], [0, 0, 1, 1], [], []>} : vector<512x3xbf16>, vector<3x64xbf16>, vector<512x64xf32> -> vector<512x64xf32>
    %64 = arith.addf %60, %63 : vector<512x64xf32>
    %c0_101 = arith.constant 0 : index
    %c0_102 = arith.constant 0 : index
    %65 = vector.load %arg7[%c0_101, %c0_102] : memref<512x64xf32, #tpu.memory_space<vmem>>, vector<512x64xf32>
    tpu.vector_store %arg7[%c0_101, %c0_102], %64 {strides = array<i32>} : memref<512x64xf32, #tpu.memory_space<vmem>>, vector<512x64xf32>,
    %c0_103 = arith.constant 0 : index
    %c2_104 = arith.constant 2 : index
    %c2_105 = arith.constant 2 : index
    %c0_106 = arith.constant 0 : index
    %66 = vector.load %arg1[%c0_103, %c2_104, %c2_105, %c0_106] : memref<2x18x18x3xbf16, #tpu.memory_space<vmem>>, vector<2x16x16x3xbf16>
    %67 = vector.shape_cast %66 : vector<2x16x16x3xbf16> to vector<512x3xbf16>
    %c0_107 = arith.constant 0 : index
    %c0_108 = arith.constant 0 : index
    %68 = vector.load %arg7[%c0_107, %c0_108] : memref<512x64xf32, #tpu.memory_space<vmem>>, vector<512x64xf32>
    %c2_109 = arith.constant 2 : index
    %c2_110 = arith.constant 2 : index
    %c0_111 = arith.constant 0 : index
    %c0_112 = arith.constant 0 : index
    %69 = vector.load %arg2[%c2_109, %c2_110, %c0_111, %c0_112] : memref<3x3x3x64xbf16, #tpu.memory_space<vmem>>, vector<1x1x3x64xbf16>
    %70 = vector.shape_cast %69 : vector<1x1x3x64xbf16> to vector<3x64xbf16>
    %cst_113 = arith.constant dense<0.000000e+00> : vector<512x64xf32>
    %71 = tpu.matmul %67, %70, %cst_113 {dimension_numbers = #tpu.dot_dimension_numbers<[1], [0], [0], [1], [0, 0, 1, 1], [], []>} : vector<512x3xbf16>, vector<3x64xbf16>, vector<512x64xf32> -> vector<512x64xf32>
    %72 = arith.addf %68, %71 : vector<512x64xf32>
    %c0_114 = arith.constant 0 : index
    %c0_115 = arith.constant 0 : index
    %73 = vector.load %arg7[%c0_114, %c0_115] : memref<512x64xf32, #tpu.memory_space<vmem>>, vector<512x64xf32>
    tpu.vector_store %arg7[%c0_114, %c0_115], %72 {strides = array<i32>} : memref<512x64xf32, #tpu.memory_space<vmem>>, vector<512x64xf32>,
    %c0_116 = arith.constant 0 : index
    %c0_117 = arith.constant 0 : index
    %74 = vector.load %arg7[%c0_116, %c0_117] : memref<512x64xf32, #tpu.memory_space<vmem>>, vector<512x64xf32>
    %c0_118 = arith.constant 0 : index
    %c0_119 = arith.constant 0 : index
    %75 = vector.load %arg3[%c0_118, %c0_119] : memref<1x64xf32, #tpu.memory_space<vmem>>, vector<1x64xf32>
    %76 = vector.broadcast %75 : vector<1x64xf32> to vector<512x64xf32>
    %77 = arith.addf %74, %76 : vector<512x64xf32>
    %cst_120 = arith.constant dense<0.000000e+00> : vector<64xf32>
    %78 = vector.multi_reduction <add>, %77, %cst_120 [0] : vector<512x64xf32> to vector<64xf32>
    %79 = vector.shape_cast %78 : vector<64xf32> to vector<1x64xf32>
    %cst_121 = arith.constant 5.120000e+02 : f32
    %80 = vector.broadcast %cst_121 : f32 to vector<1x64xf32>
    %81 = arith.divf %79, %80 : vector<1x64xf32>
    %82 = vector.broadcast %81 : vector<1x64xf32> to vector<512x64xf32>
    %83 = arith.subf %77, %82 : vector<512x64xf32>
    %84 = arith.mulf %83, %83 : vector<512x64xf32>
    %cst_122 = arith.constant dense<0.000000e+00> : vector<64xf32>
    %85 = vector.multi_reduction <add>, %84, %cst_122 [0] : vector<512x64xf32> to vector<64xf32>
    %86 = vector.shape_cast %85 : vector<64xf32> to vector<1x64xf32>
    %cst_123 = arith.constant 5.120000e+02 : f32
    %87 = vector.broadcast %cst_123 : f32 to vector<1x64xf32>
    %88 = arith.divf %86, %87 : vector<1x64xf32>
    %cst_124 = arith.constant 9.99999974E-6 : f32
    %89 = vector.broadcast %cst_124 : f32 to vector<1x64xf32>
    %90 = arith.addf %88, %89 : vector<1x64xf32>
    %91 = math.rsqrt %90 : vector<1x64xf32>
    %92 = vector.broadcast %91 : vector<1x64xf32> to vector<512x64xf32>
    %93 = arith.mulf %83, %92 : vector<512x64xf32>
    %c0_125 = arith.constant 0 : index
    %c0_126 = arith.constant 0 : index
    %94 = vector.load %arg4[%c0_125, %c0_126] : memref<1x64xf32, #tpu.memory_space<vmem>>, vector<1x64xf32>
    %95 = vector.broadcast %94 : vector<1x64xf32> to vector<512x64xf32>
    %96 = arith.mulf %93, %95 : vector<512x64xf32>
    %c0_127 = arith.constant 0 : index
    %c0_128 = arith.constant 0 : index
    %97 = vector.load %arg5[%c0_127, %c0_128] : memref<1x64xf32, #tpu.memory_space<vmem>>, vector<1x64xf32>
    %98 = vector.broadcast %97 : vector<1x64xf32> to vector<512x64xf32>
    %99 = arith.addf %96, %98 : vector<512x64xf32>
    %cst_129 = arith.constant 0.000000e+00 : f32
    %100 = vector.broadcast %cst_129 : f32 to vector<512x64xf32>
    %101 = arith.maximumf %99, %100 : vector<512x64xf32>
    %102 = vector.shape_cast %101 : vector<512x64xf32> to vector<2x16x16x64xf32>
    %103 = arith.truncf %102 : vector<2x16x16x64xf32> to vector<2x16x16x64xbf16>
    %c0_130 = arith.constant 0 : index
    %c0_131 = arith.constant 0 : index
    %c0_132 = arith.constant 0 : index
    %c0_133 = arith.constant 0 : index
    %104 = vector.load %arg6[%c0_130, %c0_131, %c0_132, %c0_133] : memref<2x16x16x64xbf16, #tpu.memory_space<vmem>>, vector<2x16x16x64xbf16>
    tpu.vector_store %arg6[%c0_130, %c0_131, %c0_132, %c0_133], %103 {strides = array<i32>} : memref<2x16x16x64xbf16, #tpu.memory_space<vmem>>, vector<2x16x16x64xbf16>,
    return
  }
  func.func @transform_0(%arg0: i32) -> (i32, i32, i32, i32) {
    %c0_i32 = arith.constant 0 : i32
    %c0_i32_0 = arith.constant 0 : i32
    %c0_i32_1 = arith.constant 0 : i32
    %c0_i32_2 = arith.constant 0 : i32
    %c0_i32_3 = arith.constant 0 : i32
    return %c0_i32, %c0_i32_0, %c0_i32_1, %c0_i32_2 : i32, i32, i32, i32
  }
  func.func @transform_1(%arg0: i32) -> (i32, i32, i32, i32) {
    %c0_i32 = arith.constant 0 : i32
    %c0_i32_0 = arith.constant 0 : i32
    %c0_i32_1 = arith.constant 0 : i32
    %c0_i32_2 = arith.constant 0 : i32
    return %c0_i32, %c0_i32_0, %c0_i32_1, %arg0 : i32, i32, i32, i32
  }
  func.func @transform_2(%arg0: i32) -> (i32, i32) {
    %c0_i32 = arith.constant 0 : i32
    %c0_i32_0 = arith.constant 0 : i32
    return %c0_i32, %arg0 : i32, i32
  }
  func.func @transform_3(%arg0: i32) -> (i32, i32) {
    %c0_i32 = arith.constant 0 : i32
    %c0_i32_0 = arith.constant 0 : i32
    return %c0_i32, %arg0 : i32, i32
  }
  func.func @transform_4(%arg0: i32) -> (i32, i32) {
    %c0_i32 = arith.constant 0 : i32
    %c0_i32_0 = arith.constant 0 : i32
    return %c0_i32, %arg0 : i32, i32
  }
  func.func @transform_5(%arg0: i32) -> (i32, i32, i32, i32) {
    %c0_i32 = arith.constant 0 : i32
    %c0_i32_0 = arith.constant 0 : i32
    %c0_i32_1 = arith.constant 0 : i32
    %c0_i32_2 = arith.constant 0 : i32
    return %c0_i32, %c0_i32_0, %c0_i32_1, %arg0 : i32, i32, i32, i32
  }
}

</mosaic_0001>

<bundles_post_ra>
// kernel: tpu_custom_call.1
= control target key start
LH: loop header
LB: loop body
LE: loop exit
PB: predicated region body
PF: predicated region fallthrough
CT: control target
= control target key end

     0   :  { %vm473_vm0 = vcmask 1040384   ;;  %vm474_vm1 = vcmask 1041408   ;;  %v13910_v2 = vmov 65535   ;;  %vm376_vm2 = vcmask 23552   ;;  %s21441_s0 = inlined_call_operand.vmem [shape: bf16[2,18,18,3], index: 0, kind: input, shape index: {}]   ;;  %s21442_s1 = inlined_call_operand.vmem [shape: bf16[3,3,3,64], index: 1, kind: input, shape index: {}]   ;;  %s21443_s2 = inlined_call_operand.vmem [shape: f32[1,64], index: 2, kind: input, shape index: {}]   ;;  %s21444_s3 = inlined_call_operand.vmem [shape: f32[1,64], index: 3, kind: input, shape index: {}]   ;;  %s21445_s4 = inlined_call_operand.vmem [shape: f32[1,64], index: 4, kind: input, shape index: {}]   ;;  %s21446_s5 = inlined_call_operand.hbm [shape: bf16[2,16,16,64], index: 5, kind: output, shape index: {}]  }
   0x1   :  { %v215_v0 = vld [vmem:[%s21442_s1] sm:$0x3]  ;;  %v13787_v1 = vld [vmem:[%s21441_s0 + $0xd8] sm:$0xff]   ;;  %v475_v3 = vsel %vm473_vm0, 4294967295, %v13910_v2  ;;  %v13788_v6 = vld [vmem:[%s21441_s0 + $0xe4] sm:$0xff]   ;;  %vm2634_vm5 = vcmask 1042432  }
   0x2   :  { %v13951_v4 = vsel %vm474_vm1, %v475_v3, 0  ;;  %13220 = vmatprep.mubr.msk.bf16.mxu1 %vm376_vm2, %v13787_v1  ;;  %v11630_v7 = vld [vmem:[%s21442_s1 + $0x2] sm:$0x3]  ;;  %v13790_v10 = vld [vmem:[%s21441_s0 + $0xf0] sm:$0xff]   ;;  %v11727_v12 = vld [vmem:[%s21442_s1 + $0x4] sm:$0x3] }
   0x3   :  { %21514 = vst [vmem:[#allocation6_spill] sm:$0xff] %v13951_v4  ;;  %v478_v5 = vand.u32 %v13951_v4, %v215_v0  ;;  %v2023_v8 = vand.u32 %v11630_v7, %v13951_v4  ;;  %v13789_v9 = vld [vmem:[%s21441_s0] sm:$0xff]   ;;  %v13791_v11 = vld [vmem:[%s21441_s0 + $0xc] sm:$0xff]   ;;  %v3120_v13 = vand.u32 %v11727_v12, %v13951_v4  ;;  %v13793_v14 = vld [vmem:[%s21441_s0 + $0x18] sm:$0xff]   ;;  %vm993_vm3 = vsmask.f32 3328 }
   0x4   :  { %13188 = vmatprep.mubr.msk.bf16.mxu0 %vm376_vm2, %v13789_v9  ;;  %v13792_v15 = vld [vmem:[%s21441_s0 + $0xfc] sm:$0xff]   ;;  %v13794_v16 = vld [vmem:[%s21441_s0 + $0x108] sm:$0xff]   ;;  %v13797_v18 = vld [vmem:[%s21441_s0 + $0x30] sm:$0xff]   ;;  %vm994_vm4 = vsmask.f32 7440  ;;  %vm2635_vm6 = vcmask 1046532  }
   0x5   :  { %13780 = vmatprep.subr.bf16.mxu1 %v478_v5  ;;  %13186 = vmatprep.subr.bf16.mxu0 %v478_v5  ;;  %v13795_v17 = vld [vmem:[%s21441_s0 + $0x24] sm:$0xff]   ;;  %v13796_v19 = vld [vmem:[%s21441_s0 + $0x114] sm:$0xff]   ;;  %v13799_v21 = vld [vmem:[%s21441_s0 + $0x3c] sm:$0xff]   ;;  %vm22_vm9 = vcmask 523264  }
   0x6   :  { %13781 = vmatpush3.bf16.msra.mxu1 %v478_v5  ;;  %13187 = vmatpush3.bf16.msra.mxu0 %v478_v5  ;;  %v13798_v20 = vld [vmem:[%s21441_s0 + $0x120] sm:$0xff]   ;;  %v13801_v22 = vld [vmem:[%s21441_s0 + $0x48] sm:$0xff]   ;;  %v13802_v24 = vld [vmem:[%s21441_s0 + $0x138] sm:$0xff]  }
   0x7   :  { %13252 = vmatprep.subr.bf16.mxu1 %v2023_v8  ;;  %13318 = vmatprep.subr.bf16.mxu0 %v3120_v13  ;;  %v13800_v23 = vld [vmem:[%s21441_s0 + $0x12c] sm:$0xff]   ;;  %v13803_v25 = vld [vmem:[%s21441_s0 + $0x54] sm:$0xff]   ;;  %v13805_v26 = vld [vmem:[%s21441_s0 + $0x60] sm:$0xff]  }
   0x8   :  { %v897_v27 = vld [vmem:[%s21441_s0] sm:$0xf]  ;;  %v898_v28 = vld [vmem:[%s21441_s0 + $0x4] sm:$0xf]  ;;  %v899_v29 = vld [vmem:[%s21441_s0 + $0x8] sm:$0x1] }
   0x9   :  { %13221 = vmatmul.mubr.msk.bf16.vlgmr.msra.gmra.mrb[0].mxu1 %vm376_vm2, %v13788_v6  ;;  %13189 = vmatmul.mubr.msk.bf16.vlgmr.msra.gmra.mrb[0].mxu0 %vm376_vm2, %v13791_v11  ;;  %v997_v30 = vshrl.u32 %v897_v27, 16  ;;  %v1000_v31 = vshll.u32 %v897_v27, 16  ;;  %v1006_v32 = vshll.u32 %v898_v28, 16  ;;  %v13804_v33 = vld [vmem:[%s21441_s0 + $0x144] sm:$0xff]   ;;  %v1010_v34 = vshrl.u32 %v898_v28, 16  ;;  %v13806_v36 = vld [vmem:[%s21441_s0 + $0x150] sm:$0xff]   ;;  %vm14066_vm7 = vmor %vm993_vm3, %vm994_vm4 }
   0xa   :  { %13253 = vmatpush3.bf16.msra.mxu1 %v2023_v8  ;;  %13224 = vmatprep.mubr.msk.bf16.mxu1 %vm376_vm2, %v13790_v10  ;;  %v1016_v35 = vshll.u32 %v899_v29, 16  ;;  %v13807_v37 = vld [vmem:[%s21441_s0 + $0x6c] sm:$0xff]   ;;  %v902_v45 = vld [vmem:[%s21441_s0 + $0x14] sm:$0x1]  ;;  %v13809_v46 = vld [vmem:[%s21441_s0 + $0x78] sm:$0xff]  }
   0xb   :  { %13192 = vmatprep.mubr.msk.bf16.mxu0 %vm376_vm2, %v13793_v14  ;;  %13319 = vmatpush3.bf16.msra.mxu0 %v3120_v13  ;;  %v999_v38 = vrot.slane %v997_v30, 4  ;;  %v1002_v39 = vrot.slane %v1000_v31, 5  ;;  %v1008_v40 = vrot.slane %v1006_v32, 5  ;;  %v900_v41 = vld [vmem:[%s21441_s0 + $0xc] sm:$0xf]  ;;  %v1012_v42 = vrot.slane %v1010_v34, 4  ;;  %vm14113_vm8 = vmor %vm2634_vm5, %vm2635_vm6 }
   0xc   :  { %v1018_v43 = vrot.slane %v1016_v35, 5  ;;  %v901_v44 = vld [vmem:[%s21441_s0 + $0x10] sm:$0xf]  ;;  %v1021_v48 = vshrl.u32 %v900_v41, 16  ;;  %v1024_v49 = vshll.u32 %v900_v41, 16  ;;  %v1040_v55 = vshll.u32 %v902_v45, 16 }
   0xd   :  { %v1003_v47 = vor.u32 %v1002_v39, %v999_v38  ;;  %v1030_v50 = vshll.u32 %v901_v44, 16  ;;  %v11856_v51 = vld [vmem:[%s21442_s1 + $0x6] sm:$0x3]  ;;  %v1013_v53 = vor.u32 %v1012_v42, %v1008_v40  ;;  %v1034_v54 = vshrl.u32 %v901_v44, 16  ;;  %v903_v57 = vld [vmem:[%s21441_s0 + $0x18] sm:$0xf] }
   0xe   :  { %v14071_v56 = vand.u32 %v11856_v51, %v13951_v4  ;;  %v904_v58 = vld [vmem:[%s21441_s0 + $0x1c] sm:$0xf]  ;;  %v1023_v60 = vrot.slane %v1021_v48, 4  ;;  %v1026_v61 = vrot.slane %v1024_v49, 5  ;;  %v1042_v1 = vrot.slane %v1040_v55, 5  ;;  %v13810_v28 = vld [vmem:[%s21441_s0 + $0x168] sm:$0xff]  }
   0xf   :  { %v1004_v59 = vrot.slane %v1003_v47, 4  ;;  %v1032_v62 = vrot.slane %v1030_v50, 5  ;;  %v1014_v63 = vrot.slane %v1013_v53, 4  ;;  %v1036_v0 = vrot.slane %v1034_v54, 4  ;;  %v905_v6 = vld [vmem:[%s21441_s0 + $0x20] sm:$0x1] }
  0x10   :  { %v1045_v2 = vshrl.u32 %v903_v57, 16  ;;  %v1027_v5 = vor.u32 %v1026_v61, %v1023_v60  ;;  %v1048_v7 = vshll.u32 %v903_v57, 16  ;;  %v1054_v8 = vshll.u32 %v904_v58, 16  ;;  %v2442_v9 = vld [vmem:[%s21441_s0] sm:$0xe]  ;;  %13384 = vmatprep.subr.bf16.mxu1 %v14071_v56  ;;  %v13813_v29 = vld [vmem:[%s21441_s0 + $0x90] sm:$0xff]  }
  0x11   :  { %13225 = vmatmul.mubr.msk.bf16.gmra.mrb[4].mxu1 %vm376_vm2, %v13792_v15  ;;  %13193 = vmatmul.mubr.msk.bf16.gmra.mrb[4].mxu0 %vm376_vm2, %v13795_v17  ;;  %v1009_v3 = vsel %vm14066_vm7, %v1004_v59, %v1008_v40  ;;  %v1019_v10 = vsel %vm14066_vm7, %v1014_v63, %v1018_v43  ;;  %v1037_v11 = vor.u32 %v1036_v0, %v1032_v62  ;;  %v1058_v13 = vshrl.u32 %v904_v58, 16  ;;  %v2443_v14 = vld [vmem:[%s21441_s0 + $0x4] sm:$0xf]  ;;  %v2444_v15 = vld [vmem:[%s21441_s0 + $0x8] sm:$0x1] }
  0x12   :  { %13228 = vmatprep.mubr.msk.bf16.mxu1 %vm376_vm2, %v13794_v16  ;;  %13196 = vmatprep.mubr.msk.bf16.mxu0 %vm376_vm2, %v13797_v18  ;;  %v1047_v12 = vrot.slane %v1045_v2, 4  ;;  %v14100_v16 = vcombine.low %v1009_v3, %v1019_v10  ;;  %v1028_v17 = vrot.slane %v1027_v5, 4  ;;  %v1050_v18 = vrot.slane %v1048_v7, 5  ;;  %v907_v34 = vld [vmem:[%s21441_s0 + $0x28] sm:$0xf]  ;;  %v13812_v5 = vld [vmem:[%s21441_s0 + $0x174] sm:$0xff]  }
  0x13   :  { %v11695_v27 = vrot.slane %v2442_v9, 9  ;;  %v2639_v32 = vrot.slane %v2443_v14, 5  ;;  %v908_v38 = vld [vmem:[%s21441_s0 + $0x2c] sm:$0x1]  ;;  %v2445_v44 = vld [vmem:[%s21441_s0 + $0xc] sm:$0xe] }
  0x14   :  { %v1033_v30 = vsel %vm14066_vm7, %v1028_v17, %v1032_v62  ;;  %v1051_v31 = vor.u32 %v1050_v18, %v1047_v12  ;;  %v1078_v48 = vshll.u32 %v907_v34, 16  ;;  %v2446_v49 = vld [vmem:[%s21441_s0 + $0x10] sm:$0xf]  ;;  %v1082_v53 = vshrl.u32 %v907_v34, 16  ;;  %v2447_v55 = vld [vmem:[%s21441_s0 + $0x14] sm:$0x1] }
  0x15   :  { %v14137_v42 = vsel %vm14113_vm8, %v11695_v27, %v2639_v32  ;;  %v2641_v43 = vrot.slane %v2639_v32, 4  ;;  %v1088_v54 = vshll.u32 %v908_v38, 16  ;;  %v12017_v57 = vld [vmem:[%s21442_s1 + $0x8] sm:$0x3]  ;;  %v909_v62 = vld [vmem:[%s21441_s0 + $0x30] sm:$0xf] }
  0x16   :  { %v1052_v41 = vrot.slane %v1051_v31, 4  ;;  %v1080_v61 = vrot.slane %v1078_v48, 5  ;;  %v910_v63 = vld [vmem:[%s21441_s0 + $0x34] sm:$0xf]  ;;  %v11696_v3 = vrot.slane %v2445_v44, 9  ;;  %v13815_v7 = vld [vmem:[%s21441_s0 + $0x9c] sm:$0xff]  }
  0x17   :  { %v1090_v2 = vrot.slane %v1088_v54, 5  ;;  %v2646_v9 = vrot.slane %v2446_v49, 5  ;;  %v2649_v10 = vrot.slane %v2447_v55, 5  ;;  %v13817_v12 = vld [vmem:[%s21441_s0 + $0xa8] sm:$0xff]   ;;  %v911_v14 = vld [vmem:[%s21441_s0 + $0x38] sm:$0x1] }
  0x18   :  { %v1096_v17 = vshll.u32 %v909_v62, 16  ;;  %v1102_v18 = vshll.u32 %v910_v63, 16  ;;  %v2450_v34 = vld [vmem:[%s21441_s0 + $0x20] sm:$0x1]  ;;  %v914_v48 = vld [vmem:[%s21441_s0 + $0x44] sm:$0x1] }
  0x19   :  { %13229 = vmatmul.mubr.msk.bf16.gmra.mrb[8].mxu1 %vm376_vm2, %v13796_v19  ;;  %13197 = vmatmul.mubr.msk.bf16.gmra.mrb[8].mxu0 %vm376_vm2, %v13799_v21  ;;  %v1056_v19 = vrot.slane %v1054_v8, 5  ;;  %v13808_v21 = vld [vmem:[%s21441_s0 + $0x15c] sm:$0xff]   ;;  %v2451_v55 = vld [vmem:[%s21441_s0 + $0x24] sm:$0xe] }
  0x1a   :  { %13232 = vmatprep.mubr.msk.bf16.mxu1 %vm376_vm2, %v13798_v20  ;;  %13200 = vmatprep.mubr.msk.bf16.mxu0 %vm376_vm2, %v13801_v22  ;;  %v906_v20 = vld [vmem:[%s21441_s0 + $0x24] sm:$0xf]  ;;  %v1098_v27 = vrot.slane %v1096_v17, 5 }
  0x1b   :  { %v13811_v22 = vld [vmem:[%s21441_s0 + $0x84] sm:$0xff]   ;;  %v1069_v39 = vshrl.u32 %v906_v20, 16  ;;  %v1072_v47 = vshll.u32 %v906_v20, 16  ;;  %v1057_v50 = vsel %vm14066_vm7, %v1052_v41, %v1056_v19  ;;  %v14193_v20 = vsel %vm14113_vm8, %v11696_v3, %v2646_v9  ;;  %v913_v41 = vld [vmem:[%s21441_s0 + $0x40] sm:$0xf] }
  0x1d   :  { %v1074_v60 = vrot.slane %v1072_v47, 5 }
  0x21   :  { %13233 = vmatmul.mubr.msk.bf16.gmra.mrb[12].mxu1 %vm376_vm2, %v13800_v23  ;;  %13201 = vmatmul.mubr.msk.bf16.gmra.mrb[12].mxu0 %vm376_vm2, %v13803_v25  ;;  %v1038_v23 = vrot.slane %v1037_v11, 4  ;;  %v1064_v25 = vshll.u32 %v905_v6, 16  ;;  %v13814_v6 = vld [vmem:[%s21441_s0 + $0x180] sm:$0xff]   ;;  %v14183_v11 = vand.u32 %v12017_v57, %v13951_v4  ;;  %v13818_v57 = vld [vmem:[%s21441_s0 + $0xb4] sm:$0xff]  }
  0x22   :  { %13236 = vmatprep.mubr.msk.bf16.mxu1 %vm376_vm2, %v13802_v24  ;;  %13204 = vmatprep.mubr.msk.bf16.mxu0 %vm376_vm2, %v13805_v26  ;;  %v1060_v24 = vrot.slane %v1058_v13, 4  ;;  %v21517_v26 = vmov 0 }
  0x23   :  { %v21518_v26 = vsel %vm14113_vm8, 4294967295, %v21517_v26  ;;  %v1043_v35 = vsel %vm14066_vm7, %v1038_v23, %v1042_v1  ;;  %v1084_v1 = vrot.slane %v1082_v53, 4  ;;  %13450 = vmatprep.subr.bf16.mxu0 %v14183_v11  ;;  %v2448_v23 = vld [vmem:[%s21441_s0 + $0x18] sm:$0xe] }
  0x24   :  { %21519 = vst [vmem:[#allocation7_spill] sm:$0xff] %v21518_v26  ;;  %v14133_v40 = vcombine.low %v1033_v30, %v1043_v35  ;;  %v912_v35 = vld [vmem:[%s21441_s0 + $0x3c] sm:$0xf] }
  0x25   :  { %v1085_v13 = vor.u32 %v1084_v1, %v1080_v61  ;;  %v1117_v53 = vshrl.u32 %v912_v35, 16  ;;  %v1120_v54 = vshll.u32 %v912_v35, 16 }
  0x27   :  { %v1122_v3 = vrot.slane %v1120_v54, 5 }
  0x29   :  { %13237 = vmatmul.mubr.msk.bf16.gmra.mrb[16].mxu1 %vm376_vm2, %v13804_v33  ;;  %13205 = vmatmul.mubr.msk.bf16.gmra.mrb[16].mxu0 %vm376_vm2, %v13807_v37  ;;  %v2642_v33 = vrot.slane %v2444_v15, 5  ;;  %v1066_v37 = vrot.slane %v1064_v25, 5  ;;  %v1093_v15 = vshrl.u32 %v909_v62, 16  ;;  %v1126_v62 = vshll.u32 %v913_v41, 16 }
  0x2a   :  { %13240 = vmatprep.mubr.msk.bf16.mxu1 %vm376_vm2, %v13806_v36  ;;  %13208 = vmatprep.mubr.msk.bf16.mxu0 %vm376_vm2, %v13809_v46  ;;  %v1061_v36 = vor.u32 %v1060_v24, %v1056_v19  ;;  %v1071_v46 = vrot.slane %v1069_v39, 4  ;;  %v1086_v24 = vrot.slane %v1085_v13, 4  ;;  %v11697_v39 = vrot.slane %v2448_v23, 9 }
  0x2b   :  { %v14153_v51 = vsel %vm14113_vm8, %v2641_v43, %v2642_v33  ;;  %v1095_v25 = vrot.slane %v1093_v15, 4  ;;  %v1112_v33 = vshll.u32 %v911_v14, 16  ;;  %v13816_v43 = vld [vmem:[%s21441_s0 + $0x18c] sm:$0xff]  }
  0x2c   :  { %v1062_v45 = vrot.slane %v1061_v36, 4  ;;  %v11728_v59 = vcombine.low %v14137_v42, %v14153_v51  ;;  %v1075_v8 = vor.u32 %v1074_v60, %v1071_v46  ;;  %v1091_v36 = vsel %vm14066_vm7, %v1086_v24, %v1090_v2  ;;  %v917_v24 = vld [vmem:[%s21441_s0 + $0x50] sm:$0x1]  ;;  %v2455_v42 = vld [vmem:[%s21441_s0 + $0x34] sm:$0xf] }
  0x2d   :  { %v1099_v38 = vor.u32 %v1098_v27, %v1095_v25  ;;  %v1114_v46 = vrot.slane %v1112_v33, 5  ;;  %v1119_v2 = vrot.slane %v1117_v53, 4  ;;  %v919_v53 = vld [vmem:[%s21441_s0 + $0x58] sm:$0xf] }
  0x2e   :  { %v1067_v58 = vsel %vm14066_vm7, %v1062_v45, %v1066_v37  ;;  %v1076_v19 = vrot.slane %v1075_v8, 4 }
  0x2f   :  { %v14171_v0 = vcombine.low %v1057_v50, %v1067_v58  ;;  %v1100_v49 = vrot.slane %v1099_v38, 4  ;;  %v2656_v50 = vrot.slane %v2450_v34, 5  ;;  %v1123_v15 = vor.u32 %v1122_v3, %v1119_v2  ;;  %v2456_v38 = vld [vmem:[%s21441_s0 + $0x38] sm:$0x1]  ;;  %v2457_v3 = vld [vmem:[%s21441_s0 + $0x3c] sm:$0xe] }
  0x30   :  { %v1081_v30 = vsel %vm14066_vm7, %v1076_v19, %v1080_v61 }
  0x31   :  { %13241 = vmatmul.mubr.msk.bf16.gmra.mrb[20].mxu1 %vm376_vm2, %v13808_v21  ;;  %13209 = vmatmul.mubr.msk.bf16.gmra.mrb[20].mxu0 %vm376_vm2, %v13811_v22  ;;  %v2648_v21 = vrot.slane %v2646_v9, 4  ;;  %v1106_v22 = vshrl.u32 %v910_v63, 16  ;;  %v14228_v44 = vcombine.low %v1081_v30, %v1091_v36  ;;  %v2452_v63 = vld [vmem:[%s21441_s0 + $0x28] sm:$0xf]  ;;  %v1128_v9 = vrot.slane %v1126_v62, 5 }
  0x32   :  { %13244 = vmatprep.mubr.msk.bf16.mxu1 %vm376_vm2, %v13810_v28  ;;  %13212 = vmatprep.mubr.msk.bf16.mxu0 %vm376_vm2, %v13813_v29  ;;  %v1104_v28 = vrot.slane %v1102_v18, 5  ;;  %v2449_v29 = vld [vmem:[%s21441_s0 + $0x1c] sm:$0xf]  ;;  %v916_v18 = vld [vmem:[%s21441_s0 + $0x4c] sm:$0xf]  ;;  %v1124_v25 = vrot.slane %v1123_v15, 4 }
  0x33   :  { %v14208_v31 = vsel %vm14113_vm8, %v2648_v21, %v2649_v10  ;;  %v1108_v32 = vrot.slane %v1106_v22, 4  ;;  %v2653_v47 = vrot.slane %v2449_v29, 5  ;;  %v1136_v10 = vshll.u32 %v914_v48, 16  ;;  %v2454_v30 = vld [vmem:[%s21441_s0 + $0x30] sm:$0xe] }
  0x34   :  { %v11729_v37 = vcombine.low %v14193_v20, %v14208_v31  ;;  %v1105_v1 = vsel %vm14066_vm7, %v1100_v49, %v1104_v28  ;;  %v11698_v21 = vrot.slane %v2451_v55, 9  ;;  %v2660_v22 = vrot.slane %v2452_v63, 5 }
  0x35   :  { %v1109_v45 = vor.u32 %v1108_v32, %v1104_v28  ;;  %v14241_v60 = vsel %vm14113_vm8, %v11697_v39, %v2653_v47  ;;  %v2655_v61 = vrot.slane %v2653_v47, 4  ;;  %v1138_v19 = vrot.slane %v1136_v10, 5  ;;  %v2458_v10 = vld [vmem:[%s21441_s0 + $0x40] sm:$0xf] }
  0x36   :  { %v14283_v32 = vsel %vm14113_vm8, %v11698_v21, %v2660_v22  ;;  %v2662_v33 = vrot.slane %v2660_v22, 4  ;;  %v1150_v34 = vshll.u32 %v916_v18, 16  ;;  %v1129_v51 = vsel %vm14066_vm7, %v1124_v25, %v1128_v9  ;;  %v923_v25 = vld [vmem:[%s21441_s0 + $0x68] sm:$0x1] }
  0x37   :  { %v1110_v58 = vrot.slane %v1109_v45, 4  ;;  %v14255_v8 = vsel %vm14113_vm8, %v2655_v61, %v2656_v50  ;;  %v1160_v45 = vshll.u32 %v917_v24, 16  ;;  %v11699_v50 = vrot.slane %v2454_v30, 9  ;;  %v920_v61 = vld [vmem:[%s21441_s0 + $0x5c] sm:$0x1] }
  0x38   :  { %v11730_v14 = vcombine.low %v14241_v60, %v14255_v8  ;;  %v2670_v63 = vrot.slane %v2456_v38, 5  ;;  %v922_v60 = vld [vmem:[%s21441_s0 + $0x64] sm:$0xf] }
  0x39   :  { %13245 = vmatmul.mubr.msk.bf16.gmra.mrb[24].mxu1 %vm376_vm2, %v13812_v5  ;;  %13213 = vmatmul.mubr.msk.bf16.gmra.mrb[24].mxu0 %vm376_vm2, %v13815_v7  ;;  %v1130_v5 = vshrl.u32 %v913_v41, 16  ;;  %v1115_v7 = vsel %vm14066_vm7, %v1110_v58, %v1114_v46  ;;  %v1152_v41 = vrot.slane %v1150_v34, 5  ;;  %v918_v46 = vld [vmem:[%s21441_s0 + $0x54] sm:$0xf]  ;;  %v2667_v58 = vrot.slane %v2455_v42, 5 }
  0x3a   :  { %13248 = vmatprep.mubr.msk.bf16.mxu1 %vm376_vm2, %v13814_v6  ;;  %13216 = vmatprep.mubr.msk.bf16.mxu0 %vm376_vm2, %v13817_v12  ;;  %v2453_v6 = vld [vmem:[%s21441_s0 + $0x2c] sm:$0x1]  ;;  %v915_v12 = vld [vmem:[%s21441_s0 + $0x48] sm:$0xf]  ;;  %v14260_v13 = vcombine.low %v1105_v1, %v1115_v7  ;;  %v1165_v1 = vshrl.u32 %v918_v46, 16  ;;  %v1168_v2 = vshll.u32 %v918_v46, 16 }
  0x3b   :  { %v1132_v17 = vrot.slane %v1130_v5, 4  ;;  %v2663_v23 = vrot.slane %v2453_v6, 5  ;;  %v1141_v28 = vshrl.u32 %v915_v12, 16  ;;  %v1144_v29 = vshll.u32 %v915_v12, 16  ;;  %v2459_v12 = vld [vmem:[%s21441_s0 + $0x44] sm:$0x1] }
  0x3c   :  { %v2668_v6 = vsel %vm14113_vm8, %v11699_v50, %v2667_v58  ;;  %v2669_v7 = vrot.slane %v2667_v58, 4  ;;  %v1167_v20 = vrot.slane %v1165_v1, 4  ;;  %v1170_v31 = vrot.slane %v1168_v2, 5 }
  0x3d   :  { %v1133_v27 = vor.u32 %v1132_v17, %v1128_v9  ;;  %v1143_v35 = vrot.slane %v1141_v28, 4  ;;  %v1146_v36 = vrot.slane %v1144_v29, 5  ;;  %v14295_v39 = vsel %vm14113_vm8, %v2662_v33, %v2663_v23 }
  0x3e   :  { %v11731_v48 = vcombine.low %v14283_v32, %v14295_v39  ;;  %v1174_v9 = vshll.u32 %v919_v53, 16  ;;  %v1184_v17 = vshll.u32 %v920_v61, 16  ;;  %v1171_v21 = vor.u32 %v1170_v31, %v1167_v20  ;;  %v2460_v32 = vld [vmem:[%s21441_s0 + $0x48] sm:$0xe]  ;;  %v2462_v39 = vld [vmem:[%s21441_s0 + $0x50] sm:$0x1] }
  0x3f   :  { %v1147_v49 = vor.u32 %v1146_v36, %v1143_v35  ;;  %v2674_v23 = vrot.slane %v2458_v10, 5  ;;  %v2677_v24 = vrot.slane %v2459_v12, 5  ;;  %v1202_v42 = vshrl.u32 %v922_v60, 16  ;;  %v2464_v10 = vld [vmem:[%s21441_s0 + $0x58] sm:$0xf] }
  0x40   :  { %v1176_v15 = vrot.slane %v1174_v9, 5  ;;  %v1186_v8 = vrot.slane %v1184_v17, 5  ;;  %v1208_v46 = vshll.u32 %v923_v25, 16  ;;  %v11701_v50 = vrot.slane %v2460_v32, 9  ;;  %v2465_v12 = vld [vmem:[%s21441_s0 + $0x5c] sm:$0x1] }
  0x41   :  { %13249 = vmatmul.mubr.msk.bf16.gmra.mrb[28].mxu1 %vm376_vm2, %v13816_v43  ;;  %13217 = vmatmul.mubr.msk.bf16.gmra.mrb[28].mxu0 %vm376_vm2, %v13818_v57  ;;  %v1162_v57 = vrot.slane %v1160_v45, 5  ;;  %v1148_v62 = vrot.slane %v1147_v49, 4  ;;  %v2676_v34 = vrot.slane %v2674_v23, 4  ;;  %v1204_v45 = vrot.slane %v1202_v42, 4 }
  0x42   :  { %13254 = vmatprep.mubr.msk.bf16.mxu1 %vm376_vm2, %v14100_v16  ;;  %13320 = vmatprep.mubr.msk.bf16.mxu0 %vm376_vm2, %v11728_v59  ;;  %v1154_v16 = vshrl.u32 %v916_v18, 16  ;;  %v1134_v59 = vrot.slane %v1133_v27, 4  ;;  %v921_v18 = vld [vmem:[%s21441_s0 + $0x60] sm:$0xf]  ;;  %v1172_v27 = vrot.slane %v1171_v21, 4  ;;  %v1210_v58 = vrot.slane %v1208_v46, 5 }
  0x43   :  { %v1189_v29 = vshrl.u32 %v921_v18, 16  ;;  %v1192_v30 = vshll.u32 %v921_v18, 16  ;;  %v927_v18 = vld [vmem:[%s21441_s0 + $0x78] sm:$0xf]  ;;  %v2691_v25 = vrot.slane %v2465_v12, 5 }
  0x44   :  { %v1156_v43 = vrot.slane %v1154_v16, 4  ;;  %v1139_v47 = vsel %vm14066_vm7, %v1134_v59, %v1138_v19  ;;  %v1198_v16 = vshll.u32 %v922_v60, 16  ;;  %v1177_v59 = vsel %vm14066_vm7, %v1172_v27, %v1176_v15  ;;  %v929_v27 = vld [vmem:[%s21441_s0 + $0x80] sm:$0x1]  ;;  %v930_v46 = vld [vmem:[%s21441_s0 + $0x84] sm:$0xf] }
  0x45   :  { %v14307_v54 = vcombine.low %v1129_v51, %v1139_v47  ;;  %v2461_v51 = vld [vmem:[%s21441_s0 + $0x4c] sm:$0xf]  ;;  %v1191_v36 = vrot.slane %v1189_v29, 4  ;;  %v1194_v38 = vrot.slane %v1192_v30, 5  ;;  %v1237_v30 = vshrl.u32 %v927_v18, 16 }
  0x46   :  { %v1157_v55 = vor.u32 %v1156_v43, %v1152_v41  ;;  %v1200_v43 = vrot.slane %v1198_v16, 5  ;;  %v924_v47 = vld [vmem:[%s21441_s0 + $0x6c] sm:$0xf]  ;;  %v2681_v61 = vrot.slane %v2461_v51, 5  ;;  %v1240_v32 = vshll.u32 %v927_v18, 16 }
  0x47   :  { %v1213_v1 = vshrl.u32 %v924_v47, 16  ;;  %v1216_v2 = vshll.u32 %v924_v47, 16 }
  0x48   :  { %v1158_v5 = vrot.slane %v1157_v55, 4 }
  0x49   :  { %13255 = vmatmul.mubr.msk.bf16.vlgmr.msra.gmra.mrb[32].mxu1 %vm376_vm2, %v14133_v40  ;;  %13321 = vmatmul.mubr.msk.bf16.vlgmr.msra.gmra.mrb[32].mxu0 %vm376_vm2, %v11729_v37  ;;  %v1153_v40 = vsel %vm14066_vm7, %v1148_v62, %v1152_v41  ;;  %v1178_v37 = vshrl.u32 %v919_v53, 16  ;;  %v2678_v41 = vsel %vm14113_vm8, %v2676_v34, %v2677_v24  ;;  %v925_v53 = vld [vmem:[%s21441_s0 + $0x70] sm:$0xf]  ;;  %v1215_v20 = vrot.slane %v1213_v1, 4 }
  0x4a   :  { %13385 = vmatpush3.bf16.msra.mxu1 %v14071_v56  ;;  %13258 = vmatprep.mubr.msk.bf16.mxu1 %vm376_vm2, %v14171_v0  ;;  %v1163_v56 = vsel %vm14066_vm7, %v1158_v5, %v1162_v57  ;;  %v2671_v0 = vsel %vm14113_vm8, %v2669_v7, %v2670_v63  ;;  %v1205_v57 = vor.u32 %v1204_v45, %v1200_v43  ;;  %v2684_v63 = vrot.slane %v2462_v39, 5 }
  0x4b   :  { %13451 = vmatpush3.bf16.msra.mxu0 %v14183_v11  ;;  %13324 = vmatprep.mubr.msk.bf16.mxu0 %vm376_vm2, %v11730_v14  ;;  %v14346_v19 = vcombine.low %v1153_v40, %v1163_v56  ;;  %v11732_v11 = vcombine.low %v2668_v6, %v2671_v0  ;;  %v1180_v22 = vrot.slane %v1178_v37, 4  ;;  %v11700_v14 = vrot.slane %v2457_v3, 9  ;;  %v2463_v3 = vld [vmem:[%s21441_s0 + $0x54] sm:$0xe] }
  0x4c   :  { %v1206_v5 = vrot.slane %v1205_v57, 4  ;;  %v2682_v6 = vsel %vm14113_vm8, %v11701_v50, %v2681_v61  ;;  %v2683_v7 = vrot.slane %v2681_v61, 4  ;;  %v1222_v9 = vshll.u32 %v925_v53, 16  ;;  %v931_v50 = vld [vmem:[%s21441_s0 + $0x88] sm:$0xf] }
  0x4d   :  { %v1181_v28 = vor.u32 %v1180_v22, %v1176_v15  ;;  %v2675_v33 = vsel %vm14113_vm8, %v11700_v14, %v2674_v23  ;;  %v1218_v31 = vrot.slane %v1216_v2, 5  ;;  %v1226_v37 = vshrl.u32 %v925_v53, 16 }
  0x4e   :  { %v11733_v49 = vcombine.low %v2675_v33, %v2678_v41  ;;  %v1211_v56 = vsel %vm14066_vm7, %v1206_v5, %v1210_v58  ;;  %v2685_v0 = vsel %vm14113_vm8, %v2683_v7, %v2684_v63  ;;  %v1224_v15 = vrot.slane %v1222_v9, 5 }
  0x4f   :  { %v1182_v35 = vrot.slane %v1181_v28, 4  ;;  %v11734_v21 = vcombine.low %v2682_v6, %v2685_v0  ;;  %v1219_v22 = vor.u32 %v1218_v31, %v1215_v20  ;;  %v1228_v60 = vrot.slane %v1226_v37, 4  ;;  %v2471_v37 = vld [vmem:[%s21441_s0 + $0x74] sm:$0x1] }
  0x50   :  { %v11702_v23 = vrot.slane %v2463_v3, 9  ;;  %v2688_v24 = vrot.slane %v2464_v10, 5  ;;  %v1256_v45 = vshll.u32 %v929_v27, 16  ;;  %v1261_v1 = vshrl.u32 %v930_v46, 16  ;;  %v2469_v3 = vld [vmem:[%s21441_s0 + $0x6c] sm:$0xe] }
  0x51   :  { %13259 = vmatmul.mubr.msk.bf16.gmra.mrb[36].mxu1 %vm376_vm2, %v14228_v44  ;;  %13325 = vmatmul.mubr.msk.bf16.gmra.mrb[36].mxu0 %vm376_vm2, %v11731_v48  ;;  %v1187_v44 = vsel %vm14066_vm7, %v1182_v35, %v1186_v8  ;;  %v1195_v48 = vor.u32 %v1194_v38, %v1191_v36  ;;  %v928_v8 = vld [vmem:[%s21441_s0 + $0x7c] sm:$0xf]  ;;  %v1220_v28 = vrot.slane %v1219_v22, 4  ;;  %v1229_v29 = vor.u32 %v1228_v60, %v1224_v15  ;;  %v2468_v38 = vld [vmem:[%s21441_s0 + $0x68] sm:$0x1] }
  0x52   :  { %13262 = vmatprep.mubr.msk.bf16.mxu1 %vm376_vm2, %v14260_v13  ;;  %13328 = vmatprep.mubr.msk.bf16.mxu0 %vm376_vm2, %v11732_v11  ;;  %v14383_v55 = vcombine.low %v1177_v59, %v1187_v44  ;;  %v926_v13 = vld [vmem:[%s21441_s0 + $0x74] sm:$0x1]  ;;  %v2689_v33 = vsel %vm14113_vm8, %v11702_v23, %v2688_v24  ;;  %v2690_v34 = vrot.slane %v2688_v24, 4  ;;  %v1246_v16 = vshll.u32 %v928_v8, 16  ;;  %v2470_v10 = vld [vmem:[%s21441_s0 + $0x70] sm:$0xf] }
  0x53   :  { %v1196_v62 = vrot.slane %v1195_v48, 4  ;;  %v1232_v17 = vshll.u32 %v926_v13, 16  ;;  %v1250_v42 = vshrl.u32 %v928_v8, 16  ;;  %v1225_v51 = vsel %vm14066_vm7, %v1220_v28, %v1224_v15  ;;  %v932_v13 = vld [vmem:[%s21441_s0 + $0x8c] sm:$0x1] }
  0x54   :  { %v1230_v59 = vrot.slane %v1229_v29, 4  ;;  %v1239_v35 = vrot.slane %v1237_v30, 4  ;;  %v1242_v36 = vrot.slane %v1240_v32, 5  ;;  %v2692_v39 = vsel %vm14113_vm8, %v2690_v34, %v2691_v25  ;;  %v934_v60 = vld [vmem:[%s21441_s0 + $0x94] sm:$0xf] }
  0x55   :  { %v1201_v40 = vsel %vm14066_vm7, %v1196_v62, %v1200_v43  ;;  %v1234_v14 = vrot.slane %v1232_v17, 5  ;;  %v1248_v41 = vrot.slane %v1246_v16, 5  ;;  %v1252_v43 = vrot.slane %v1250_v42, 4  ;;  %v933_v17 = vld [vmem:[%s21441_s0 + $0x90] sm:$0xf] }
  0x56   :  { %v11639_v11 = vcombine.low %v1201_v40, %v1211_v56  ;;  %v11735_v44 = vcombine.low %v2689_v33, %v2692_v39  ;;  %v1258_v58 = vrot.slane %v1256_v45, 5  ;;  %v2698_v63 = vrot.slane %v2468_v38, 5  ;;  %v935_v25 = vld [vmem:[%s21441_s0 + $0x98] sm:$0x1]  ;;  %v2472_v32 = vld [vmem:[%s21441_s0 + $0x78] sm:$0xe] }
  0x57   :  { %v1235_v47 = vsel %vm14066_vm7, %v1230_v59, %v1234_v14  ;;  %v1253_v57 = vor.u32 %v1252_v43, %v1248_v41  ;;  %v1264_v2 = vshll.u32 %v930_v46, 16  ;;  %v1270_v9 = vshll.u32 %v931_v50, 16  ;;  %v2473_v42 = vld [vmem:[%s21441_s0 + $0x7c] sm:$0xf] }
  0x58   :  { %v11640_v53 = vcombine.low %v1225_v51, %v1235_v47  ;;  %v1263_v20 = vrot.slane %v1261_v1, 4  ;;  %v1280_v15 = vshll.u32 %v932_v13, 16  ;;  %v11704_v14 = vrot.slane %v2469_v3, 9  ;;  %v936_v45 = vld [vmem:[%s21441_s0 + $0x9c] sm:$0xf] }
  0x59   :  { %13263 = vmatmul.mubr.msk.bf16.gmra.mrb[40].mxu1 %vm376_vm2, %v14307_v54  ;;  %13329 = vmatmul.mubr.msk.bf16.gmra.mrb[40].mxu0 %vm376_vm2, %v11733_v49  ;;  %v2466_v54 = vld [vmem:[%s21441_s0 + $0x60] sm:$0xe]  ;;  %v1243_v49 = vor.u32 %v1242_v36, %v1239_v35  ;;  %v1254_v5 = vrot.slane %v1253_v57, 4  ;;  %v1266_v31 = vrot.slane %v1264_v2, 5  ;;  %v1272_v0 = vrot.slane %v1270_v9, 5 }
  0x5a   :  { %13266 = vmatprep.mubr.msk.bf16.mxu1 %vm376_vm2, %v14346_v19  ;;  %13332 = vmatprep.mubr.msk.bf16.mxu0 %vm376_vm2, %v11734_v21  ;;  %v2467_v19 = vld [vmem:[%s21441_s0 + $0x64] sm:$0xf]  ;;  %v11703_v48 = vrot.slane %v2466_v54, 9  ;;  %v1282_v8 = vrot.slane %v1280_v15, 5  ;;  %v2702_v23 = vrot.slane %v2470_v10, 5  ;;  %v2705_v24 = vrot.slane %v2471_v37, 5 }
  0x5b   :  { %v2695_v61 = vrot.slane %v2467_v19, 5  ;;  %v1244_v62 = vrot.slane %v1243_v49, 4  ;;  %v1259_v12 = vsel %vm14066_vm7, %v1254_v5, %v1258_v58  ;;  %v1267_v21 = vor.u32 %v1266_v31, %v1263_v20  ;;  %v2474_v36 = vld [vmem:[%s21441_s0 + $0x80] sm:$0x1]  ;;  %v2475_v2 = vld [vmem:[%s21441_s0 + $0x84] sm:$0xe] }
  0x5c   :  { %v1285_v29 = vshrl.u32 %v933_v17, 16  ;;  %v1288_v30 = vshll.u32 %v933_v17, 16  ;;  %v2703_v54 = vsel %vm14113_vm8, %v11704_v14, %v2702_v23  ;;  %v2704_v33 = vrot.slane %v2702_v23, 4  ;;  %v2476_v9 = vld [vmem:[%s21441_s0 + $0x88] sm:$0xf] }
  0x5d   :  { %v2696_v6 = vsel %vm14113_vm8, %v11703_v48, %v2695_v61  ;;  %v2697_v7 = vrot.slane %v2695_v61, 4  ;;  %v1249_v40 = vsel %vm14066_vm7, %v1244_v62, %v1248_v41  ;;  %v1268_v27 = vrot.slane %v1267_v21, 4  ;;  %v937_v48 = vld [vmem:[%s21441_s0 + $0xa0] sm:$0xf]  ;;  %v938_v61 = vld [vmem:[%s21441_s0 + $0xa4] sm:$0x1] }
  0x5e   :  { %v11641_v18 = vcombine.low %v1249_v40, %v1259_v12  ;;  %v1294_v34 = vshll.u32 %v934_v60, 16  ;;  %v1298_v16 = vshrl.u32 %v934_v60, 16  ;;  %v1287_v59 = vrot.slane %v1285_v29, 4  ;;  %v939_v15 = vld [vmem:[%s21441_s0 + $0xa8] sm:$0xf] }
  0x5f   :  { %v2699_v56 = vsel %vm14113_vm8, %v2697_v7, %v2698_v63  ;;  %v1273_v19 = vsel %vm14066_vm7, %v1268_v27, %v1272_v0  ;;  %v1290_v35 = vrot.slane %v1288_v30, 5  ;;  %v2706_v38 = vsel %vm14113_vm8, %v2704_v33, %v2705_v24  ;;  %v941_v24 = vld [vmem:[%s21441_s0 + $0xb0] sm:$0x1]  ;;  %v2478_v30 = vld [vmem:[%s21441_s0 + $0x90] sm:$0xe] }
  0x60   :  { %v1296_v39 = vrot.slane %v1294_v34, 5  ;;  %v1300_v41 = vrot.slane %v1298_v16, 4  ;;  %v1304_v43 = vshll.u32 %v935_v25, 16  ;;  %v11737_v47 = vcombine.low %v2703_v54, %v2706_v38  ;;  %v2479_v16 = vld [vmem:[%s21441_s0 + $0x94] sm:$0xf] }
  0x61   :  { %13267 = vmatmul.mubr.msk.bf16.gmra.mrb[44].mxu1 %vm376_vm2, %v14383_v55  ;;  %13333 = vmatmul.mubr.msk.bf16.gmra.mrb[44].mxu0 %vm376_vm2, %v11735_v44  ;;  %v1274_v55 = vshrl.u32 %v931_v50, 16  ;;  %v1291_v44 = vor.u32 %v1290_v35, %v1287_v59  ;;  %v11705_v49 = vrot.slane %v2472_v32, 9  ;;  %v2709_v58 = vrot.slane %v2473_v42, 5  ;;  %v2480_v35 = vld [vmem:[%s21441_s0 + $0x98] sm:$0x1] }
  0x62   :  { %13270 = vmatprep.mubr.msk.bf16.mxu1 %vm376_vm2, %v11639_v11  ;;  %v11736_v11 = vcombine.low %v2696_v6, %v2699_v56  ;;  %v1306_v57 = vrot.slane %v1304_v43, 5  ;;  %v2712_v62 = vrot.slane %v2474_v36, 5  ;;  %v1309_v63 = vshrl.u32 %v936_v45, 16  ;;  %v942_v43 = vld [vmem:[%s21441_s0 + $0xb4] sm:$0xf] }
  0x63   :  { %v1276_v22 = vrot.slane %v1274_v55, 4  ;;  %v1292_v13 = vrot.slane %v1291_v44, 4  ;;  %v1312_v1 = vshll.u32 %v936_v45, 16  ;;  %v2710_v5 = vsel %vm14113_vm8, %v11705_v49, %v2709_v58  ;;  %v2477_v55 = vld [vmem:[%s21441_s0 + $0x8c] sm:$0x1] }
  0x64   :  { %13336 = vmatprep.mubr.msk.bf16.mxu0 %vm376_vm2, %v11736_v11  ;;  %v2711_v6 = vrot.slane %v2709_v58, 4  ;;  %v1318_v7 = vshll.u32 %v937_v48, 16  ;;  %v1311_v40 = vrot.slane %v1309_v63, 4  ;;  %v1322_v31 = vshrl.u32 %v937_v48, 16  ;;  %v943_v49 = vld [vmem:[%s21441_s0 + $0xb8] sm:$0xf] }
  0x65   :  { %v1277_v28 = vor.u32 %v1276_v22, %v1272_v0  ;;  %v1297_v10 = vsel %vm14066_vm7, %v1292_v13, %v1296_v39  ;;  %v1314_v20 = vrot.slane %v1312_v1, 5  ;;  %v1328_v0 = vshll.u32 %v938_v61, 16  ;;  %v940_v22 = vld [vmem:[%s21441_s0 + $0xac] sm:$0xf]  ;;  %v944_v58 = vld [vmem:[%s21441_s0 + $0xbc] sm:$0x1] }
  0x66   :  { %v2713_v12 = vsel %vm14113_vm8, %v2711_v6, %v2712_v62  ;;  %v1320_v56 = vrot.slane %v1318_v7, 5  ;;  %v1324_v21 = vrot.slane %v1322_v31, 4  ;;  %v2716_v14 = vrot.slane %v2476_v9, 5  ;;  %v2481_v1 = vld [vmem:[%s21441_s0 + $0x9c] sm:$0xe] }
  0x67   :  { %v1278_v51 = vrot.slane %v1277_v28, 4  ;;  %v1315_v11 = vor.u32 %v1314_v20, %v1311_v40  ;;  %v1330_v60 = vrot.slane %v1328_v0, 5  ;;  %v2719_v23 = vrot.slane %v2477_v55, 5  ;;  %v2482_v7 = vld [vmem:[%s21441_s0 + $0xa0] sm:$0xf] }
  0x68   :  { %v1325_v27 = vor.u32 %v1324_v21, %v1320_v56  ;;  %v1333_v28 = vshrl.u32 %v939_v15, 16  ;;  %v1336_v29 = vshll.u32 %v939_v15, 16  ;;  %v2718_v54 = vrot.slane %v2716_v14, 4  ;;  %v2483_v31 = vld [vmem:[%s21441_s0 + $0xa4] sm:$0x1] }
  0x69   :  { %13271 = vmatmul.mubr.msk.bf16.gmra.mrb[48].mxu1 %vm376_vm2, %v11640_v53  ;;  %v1283_v46 = vsel %vm14066_vm7, %v1278_v51, %v1282_v8  ;;  %v1301_v53 = vor.u32 %v1300_v41, %v1296_v39  ;;  %13337 = vmatmul.mubr.msk.bf16.gmra.mrb[48].mxu0 %vm376_vm2, %v11737_v47  ;;  %v11706_v8 = vrot.slane %v2475_v2, 9  ;;  %v1316_v25 = vrot.slane %v1315_v11, 4  ;;  %v945_v0 = vld [vmem:[%s21441_s0 + $0xd8] sm:$0xf]  ;;  %v946_v21 = vld [vmem:[%s21441_s0 + $0xdc] sm:$0xf] }
  0x6a   :  { %13274 = vmatprep.mubr.msk.bf16.mxu1 %vm376_vm2, %v11641_v18  ;;  %v11642_v50 = vcombine.low %v1273_v19, %v1283_v46  ;;  %v11738_v18 = vcombine.low %v2710_v5, %v2713_v12  ;;  %v1342_v33 = vshll.u32 %v940_v22, 16  ;;  %v1346_v34 = vshrl.u32 %v940_v22, 16 }
  0x6b   :  { %v1302_v3 = vrot.slane %v1301_v53, 4  ;;  %v2717_v32 = vsel %vm14113_vm8, %v11706_v8, %v2716_v14  ;;  %v1321_v42 = vsel %vm14066_vm7, %v1316_v25, %v1320_v56  ;;  %v1326_v19 = vrot.slane %v1325_v27, 4 }
  0x6c   :  { %13340 = vmatprep.mubr.msk.bf16.mxu0 %vm376_vm2, %v11738_v18  ;;  %v1335_v51 = vrot.slane %v1333_v28, 4  ;;  %v1338_v59 = vrot.slane %v1336_v29, 5  ;;  %v2720_v36 = vsel %vm14113_vm8, %v2718_v54, %v2719_v23  ;;  %v1344_v38 = vrot.slane %v1342_v33, 5  ;;  %v947_v23 = vld [vmem:[%s21441_s0 + $0xe0] sm:$0x1] }
  0x6d   :  { %v1307_v37 = vsel %vm14066_vm7, %v1302_v3, %v1306_v57  ;;  %v1348_v39 = vrot.slane %v1346_v34, 4  ;;  %v1352_v41 = vshll.u32 %v941_v24, 16  ;;  %v1331_v45 = vsel %vm14066_vm7, %v1326_v19, %v1330_v60  ;;  %v2484_v29 = vld [vmem:[%s21441_s0 + $0xa8] sm:$0xe]  ;;  %v2485_v34 = vld [vmem:[%s21441_s0 + $0xac] sm:$0xf] }
  0x6e   :  { %v11643_v17 = vcombine.low %v1297_v10, %v1307_v37  ;;  %v11739_v46 = vcombine.low %v2717_v32, %v2720_v36  ;;  %v1339_v47 = vor.u32 %v1338_v59, %v1335_v51  ;;  %v11707_v44 = vrot.slane %v2478_v30, 9  ;;  %v2486_v59 = vld [vmem:[%s21441_s0 + $0xb0] sm:$0x1] }
  0x6f   :  { %v11644_v48 = vcombine.low %v1321_v42, %v1331_v45  ;;  %v1354_v53 = vrot.slane %v1352_v41, 5  ;;  %v2723_v57 = vrot.slane %v2479_v16, 5  ;;  %v2726_v13 = vrot.slane %v2480_v35, 5  ;;  %v948_v41 = vld [vmem:[%s21441_s0 + $0xe4] sm:$0xf] }
  0x70   :  { %v1340_v61 = vrot.slane %v1339_v47, 4  ;;  %v1357_v62 = vshrl.u32 %v942_v43, 16  ;;  %v1360_v63 = vshll.u32 %v942_v43, 16  ;;  %v1366_v6 = vshll.u32 %v943_v49, 16 }
  0x71   :  { %13275 = vmatmul.mubr.msk.bf16.gmra.mrb[52].mxu1 %vm376_vm2, %v11642_v50  ;;  %v1349_v50 = vor.u32 %v1348_v39, %v1344_v38  ;;  %13341 = vmatmul.mubr.msk.bf16.gmra.mrb[52].mxu0 %vm376_vm2, %v11739_v46  ;;  %v2724_v3 = vsel %vm14113_vm8, %v11707_v44, %v2723_v57  ;;  %v2725_v5 = vrot.slane %v2723_v57, 4  ;;  %v1370_v20 = vshrl.u32 %v943_v49, 16  ;;  %v949_v44 = vld [vmem:[%s21441_s0 + $0xe8] sm:$0xf]  ;;  %v950_v57 = vld [vmem:[%s21441_s0 + $0xec] sm:$0x1] }
  0x72   :  { %13278 = vmatprep.mubr.msk.bf16.mxu1 %vm376_vm2, %v11643_v17  ;;  %v1345_v9 = vsel %vm14066_vm7, %v1340_v61, %v1344_v38  ;;  %v1359_v10 = vrot.slane %v1357_v62, 4  ;;  %v1362_v40 = vrot.slane %v1360_v63, 5  ;;  %v1368_v12 = vrot.slane %v1366_v6, 5  ;;  %v2487_v63 = vld [vmem:[%s21441_s0 + $0xb4] sm:$0xe] }
  0x73   :  { %v1350_v2 = vrot.slane %v1349_v50, 4  ;;  %v2727_v37 = vsel %vm14113_vm8, %v2725_v5, %v2726_v13  ;;  %v1376_v56 = vshll.u32 %v944_v58, 16  ;;  %v1372_v11 = vrot.slane %v1370_v20, 4  ;;  %v2488_v6 = vld [vmem:[%s21441_s0 + $0xb8] sm:$0xf] }
  0x74   :  { %v11740_v17 = vcombine.low %v2724_v3, %v2727_v37  ;;  %v1363_v18 = vor.u32 %v1362_v40, %v1359_v10  ;;  %v11708_v60 = vrot.slane %v2481_v1, 9  ;;  %v2730_v8 = vrot.slane %v2482_v7, 5  ;;  %v2489_v20 = vld [vmem:[%s21441_s0 + $0xbc] sm:$0x1] }
  0x75   :  { %v1355_v55 = vsel %vm14066_vm7, %v1350_v2, %v1354_v53  ;;  %v1378_v22 = vrot.slane %v1376_v56, 5  ;;  %v2733_v14 = vrot.slane %v2483_v31, 5  ;;  %v1373_v25 = vor.u32 %v1372_v11, %v1368_v12  ;;  %v951_v56 = vld [vmem:[%s21441_s0 + $0xf0] sm:$0xf]  ;;  %v952_v11 = vld [vmem:[%s21441_s0 + $0xf4] sm:$0xf] }
  0x76   :  { %v11645_v15 = vcombine.low %v1345_v9, %v1355_v55  ;;  %13344 = vmatprep.mubr.msk.bf16.mxu0 %vm376_vm2, %v11740_v17  ;;  %v1364_v24 = vrot.slane %v1363_v18, 4  ;;  %v1381_v27 = vshrl.u32 %v945_v0, 16  ;;  %v1384_v28 = vshll.u32 %v945_v0, 16 }
  0x77   :  { %v2731_v30 = vsel %vm14113_vm8, %v11708_v60, %v2730_v8  ;;  %v2732_v32 = vrot.slane %v2730_v8, 4  ;;  %v1390_v54 = vshll.u32 %v946_v21, 16  ;;  %v1394_v33 = vshrl.u32 %v946_v21, 16 }
  0x78   :  { %v1369_v16 = vsel %vm14066_vm7, %v1364_v24, %v1368_v12  ;;  %v1374_v42 = vrot.slane %v1373_v25, 4  ;;  %v1383_v19 = vrot.slane %v1381_v27, 4  ;;  %v1386_v51 = vrot.slane %v1384_v28, 5  ;;  %v2490_v28 = vld [vmem:[%s21441_s0 + $0xd8] sm:$0xe] }
  0x79   :  { %13279 = vmatmul.mubr.msk.bf16.gmra.mrb[56].mxu1 %vm376_vm2, %v11644_v48  ;;  %v2734_v35 = vsel %vm14113_vm8, %v2732_v32, %v2733_v14  ;;  %v1392_v36 = vrot.slane %v1390_v54, 5  ;;  %v1396_v38 = vrot.slane %v1394_v33, 4  ;;  %v1400_v39 = vshll.u32 %v947_v23, 16  ;;  %v953_v14 = vld [vmem:[%s21441_s0 + $0xf8] sm:$0x1] }
  0x7a   :  { %13282 = vmatprep.mubr.msk.bf16.mxu1 %vm376_vm2, %v11645_v15  ;;  %v1379_v43 = vsel %vm14066_vm7, %v1374_v42, %v1378_v22  ;;  %v11741_v45 = vcombine.low %v2731_v30, %v2734_v35  ;;  %v1387_v46 = vor.u32 %v1386_v51, %v1383_v19  ;;  %v11709_v47 = vrot.slane %v2484_v29, 9  ;;  %v2491_v33 = vld [vmem:[%s21441_s0 + $0xdc] sm:$0xf]  ;;  %v2492_v51 = vld [vmem:[%s21441_s0 + $0xe0] sm:$0x1] }
  0x7b   :  { %v11646_v49 = vcombine.low %v1369_v16, %v1379_v43  ;;  %v1397_v48 = vor.u32 %v1396_v38, %v1392_v36  ;;  %v1402_v50 = vrot.slane %v1400_v39, 5  ;;  %v2737_v53 = vrot.slane %v2485_v34, 5  ;;  %v954_v39 = vld [vmem:[%s21441_s0 + $0xfc] sm:$0xf] }
  0x7c   :  { %13345 = vmatmul.mubr.msk.bf16.gmra.mrb[56].mxu0 %vm376_vm2, %v11741_v45  ;;  %v1388_v58 = vrot.slane %v1387_v46, 4  ;;  %v2740_v61 = vrot.slane %v2486_v59, 5  ;;  %v1405_v13 = vshrl.u32 %v948_v41, 16  ;;  %v1408_v62 = vshll.u32 %v948_v41, 16 }
  0x7d   :  { %v1398_v1 = vrot.slane %v1397_v48, 4  ;;  %v2738_v2 = vsel %vm14113_vm8, %v11709_v47, %v2737_v53  ;;  %v2739_v3 = vrot.slane %v2737_v53, 4  ;;  %v1414_v5 = vshll.u32 %v949_v44, 16  ;;  %v955_v47 = vld [vmem:[%s21441_s0 + $0x100] sm:$0xf] }
  0x7e   :  { %v1393_v7 = vsel %vm14066_vm7, %v1388_v58, %v1392_v36  ;;  %v1407_v9 = vrot.slane %v1405_v13, 4  ;;  %v1410_v10 = vrot.slane %v1408_v62, 5  ;;  %v1418_v40 = vshrl.u32 %v949_v44, 16  ;;  %v956_v53 = vld [vmem:[%s21441_s0 + $0x104] sm:$0x1] }
  0x7f   :  { %v1403_v31 = vsel %vm14066_vm7, %v1398_v1, %v1402_v50  ;;  %v2741_v55 = vsel %vm14113_vm8, %v2739_v3, %v2740_v61  ;;  %v1416_v37 = vrot.slane %v1414_v5, 5  ;;  %v1424_v12 = vshll.u32 %v950_v57, 16  ;;  %v2493_v62 = vld [vmem:[%s21441_s0 + $0xe4] sm:$0xe]  ;;  %v2494_v5 = vld [vmem:[%s21441_s0 + $0xe8] sm:$0xf] }
  0x80   :  { %v11647_v0 = vcombine.low %v1393_v7, %v1403_v31  ;;  %v11742_v15 = vcombine.low %v2738_v2, %v2741_v55  ;;  %v1411_v17 = vor.u32 %v1410_v10, %v1407_v9  ;;  %v1420_v18 = vrot.slane %v1418_v40, 4  ;;  %v2495_v40 = vld [vmem:[%s21441_s0 + $0xec] sm:$0x1] }
  0x81   :  { %13283 = vmatmul.mubr.msk.bf16.gmra.mrb[60].mxu1 %vm376_vm2, %v11646_v49  ;;  %v1426_v21 = vrot.slane %v1424_v12, 5  ;;  %v11710_v22 = vrot.slane %v2487_v63, 9  ;;  %v2744_v60 = vrot.slane %v2488_v6, 5  ;;  %v2747_v8 = vrot.slane %v2489_v20, 5  ;;  %v957_v12 = vld [vmem:[%s21441_s0 + $0x108] sm:$0xf] }
  0x82   :  { %13286 = vmatprep.mubr.msk.bf16.mxu1 %vm376_vm2, %v11647_v0  ;;  %13348 = vmatprep.mubr.msk.bf16.mxu0 %vm376_vm2, %v11742_v15  ;;  %v1412_v23 = vrot.slane %v1411_v17, 4  ;;  %v1421_v24 = vor.u32 %v1420_v18, %v1416_v37  ;;  %v1429_v25 = vshrl.u32 %v951_v56, 16  ;;  %v1432_v27 = vshll.u32 %v951_v56, 16  ;;  %v958_v18 = vld [vmem:[%s21441_s0 + $0x10c] sm:$0xf] }
  0x83   :  { %v2745_v29 = vsel %vm14113_vm8, %v11710_v22, %v2744_v60  ;;  %v2746_v30 = vrot.slane %v2744_v60, 4  ;;  %v1438_v32 = vshll.u32 %v952_v11, 16  ;;  %v1442_v54 = vshrl.u32 %v952_v11, 16 }
  0x84   :  { %v1417_v34 = vsel %vm14066_vm7, %v1412_v23, %v1416_v37  ;;  %v1422_v16 = vrot.slane %v1421_v24, 4  ;;  %v1431_v42 = vrot.slane %v1429_v25, 4  ;;  %v1434_v19 = vrot.slane %v1432_v27, 5  ;;  %v2496_v27 = vld [vmem:[%s21441_s0 + $0xf0] sm:$0xe] }
  0x85   :  { %v2748_v59 = vsel %vm14113_vm8, %v2746_v30, %v2747_v8  ;;  %v1440_v35 = vrot.slane %v1438_v32, 5  ;;  %v1444_v36 = vrot.slane %v1442_v54, 4  ;;  %v1448_v38 = vshll.u32 %v953_v14, 16  ;;  %v959_v8 = vld [vmem:[%s21441_s0 + $0x110] sm:$0x1] }
  0x86   :  { %v1427_v41 = vsel %vm14066_vm7, %v1422_v16, %v1426_v21  ;;  %v11743_v43 = vcombine.low %v2745_v29, %v2748_v59  ;;  %v1435_v45 = vor.u32 %v1434_v19, %v1431_v42  ;;  %v11711_v46 = vrot.slane %v2490_v28, 9  ;;  %v2497_v54 = vld [vmem:[%s21441_s0 + $0xf4] sm:$0xf]  ;;  %v2498_v19 = vld [vmem:[%s21441_s0 + $0xf8] sm:$0x1] }
  0x87   :  { %v11648_v44 = vcombine.low %v1417_v34, %v1427_v41  ;;  %v1445_v49 = vor.u32 %v1444_v36, %v1440_v35  ;;  %v1450_v48 = vrot.slane %v1448_v38, 5  ;;  %v2751_v50 = vrot.slane %v2491_v33, 5  ;;  %v960_v38 = vld [vmem:[%s21441_s0 + $0x114] sm:$0xf] }
  0x88   :  { %13349 = vmatmul.mubr.msk.bf16.gmra.mrb[60].mxu0 %vm376_vm2, %v11743_v43  ;;  %v1436_v57 = vrot.slane %v1435_v45, 4  ;;  %v2754_v58 = vrot.slane %v2492_v51, 5  ;;  %v1453_v61 = vshrl.u32 %v954_v39, 16  ;;  %v1456_v13 = vshll.u32 %v954_v39, 16 }
  0x89   :  { %13287 = vmatmul.mubr.msk.bf16.gmra.mrb[64].mxu1 %vm376_vm2, %v11648_v44  ;;  %v1446_v63 = vrot.slane %v1445_v49, 4  ;;  %v2752_v1 = vsel %vm14113_vm8, %v11711_v46, %v2751_v50  ;;  %v2753_v2 = vrot.slane %v2751_v50, 4  ;;  %v1462_v3 = vshll.u32 %v955_v47, 16  ;;  %v961_v46 = vld [vmem:[%s21441_s0 + $0x118] sm:$0xf] }
  0x8a   :  { %v1441_v6 = vsel %vm14066_vm7, %v1436_v57, %v1440_v35  ;;  %v1455_v7 = vrot.slane %v1453_v61, 4  ;;  %v1458_v9 = vrot.slane %v1456_v13, 5  ;;  %v1466_v10 = vshrl.u32 %v955_v47, 16  ;;  %v962_v50 = vld [vmem:[%s21441_s0 + $0x11c] sm:$0x1] }
  0x8b   :  { %v1451_v20 = vsel %vm14066_vm7, %v1446_v63, %v1450_v48  ;;  %v2755_v31 = vsel %vm14113_vm8, %v2753_v2, %v2754_v58  ;;  %v1464_v55 = vrot.slane %v1462_v3, 5  ;;  %v1472_v37 = vshll.u32 %v956_v53, 16  ;;  %v2499_v13 = vld [vmem:[%s21441_s0 + $0xfc] sm:$0xe]  ;;  %v2500_v3 = vld [vmem:[%s21441_s0 + $0x100] sm:$0xf] }
  0x8c   :  { %v11649_v56 = vcombine.low %v1441_v6, %v1451_v20  ;;  %v11744_v0 = vcombine.low %v2752_v1, %v2755_v31  ;;  %v1459_v15 = vor.u32 %v1458_v9, %v1455_v7  ;;  %v1468_v17 = vrot.slane %v1466_v10, 4  ;;  %v2501_v10 = vld [vmem:[%s21441_s0 + $0x104] sm:$0x1] }
  0x8d   :  { %v1474_v11 = vrot.slane %v1472_v37, 5  ;;  %v11712_v21 = vrot.slane %v2493_v62, 9  ;;  %v2758_v22 = vrot.slane %v2494_v5, 5  ;;  %v2761_v60 = vrot.slane %v2495_v40, 5  ;;  %v963_v37 = vld [vmem:[%s21441_s0 + $0x120] sm:$0xf] }
  0x8e   :  { %13290 = vmatprep.mubr.msk.bf16.mxu1 %vm376_vm2, %v11649_v56  ;;  %13352 = vmatprep.mubr.msk.bf16.mxu0 %vm376_vm2, %v11744_v0  ;;  %v1460_v14 = vrot.slane %v1459_v15, 4  ;;  %v1469_v23 = vor.u32 %v1468_v17, %v1464_v55  ;;  %v1477_v24 = vshrl.u32 %v957_v12, 16  ;;  %v1480_v25 = vshll.u32 %v957_v12, 16  ;;  %v964_v17 = vld [vmem:[%s21441_s0 + $0x124] sm:$0xf] }
  0x8f   :  { %v2759_v28 = vsel %vm14113_vm8, %v11712_v21, %v2758_v22  ;;  %v2760_v29 = vrot.slane %v2758_v22, 4  ;;  %v1486_v30 = vshll.u32 %v958_v18, 16  ;;  %v1490_v32 = vshrl.u32 %v958_v18, 16 }
  0x90   :  { %v1465_v33 = vsel %vm14066_vm7, %v1460_v14, %v1464_v55  ;;  %v1470_v34 = vrot.slane %v1469_v23, 4  ;;  %v1479_v16 = vrot.slane %v1477_v24, 4  ;;  %v1482_v42 = vrot.slane %v1480_v25, 5  ;;  %v2502_v25 = vld [vmem:[%s21441_s0 + $0x108] sm:$0xe] }
  0x91   :  { %v2762_v51 = vsel %vm14113_vm8, %v2760_v29, %v2761_v60  ;;  %v1488_v59 = vrot.slane %v1486_v30, 5  ;;  %v1492_v35 = vrot.slane %v1490_v32, 4  ;;  %v1496_v36 = vshll.u32 %v959_v8, 16  ;;  %v965_v60 = vld [vmem:[%s21441_s0 + $0x128] sm:$0x1] }
  0x92   :  { %v1475_v39 = vsel %vm14066_vm7, %v1470_v34, %v1474_v11  ;;  %v11745_v41 = vcombine.low %v2759_v28, %v2762_v51  ;;  %v1483_v43 = vor.u32 %v1482_v42, %v1479_v16  ;;  %v11713_v45 = vrot.slane %v2496_v27, 9  ;;  %v2503_v32 = vld [vmem:[%s21441_s0 + $0x10c] sm:$0xf]  ;;  %v2504_v42 = vld [vmem:[%s21441_s0 + $0x110] sm:$0x1] }
  0x93   :  { %v11650_v47 = vcombine.low %v1465_v33, %v1475_v39  ;;  %v1493_v44 = vor.u32 %v1492_v35, %v1488_v59  ;;  %v1498_v49 = vrot.slane %v1496_v36, 5  ;;  %v2765_v48 = vrot.slane %v2497_v54, 5  ;;  %v966_v36 = vld [vmem:[%s21441_s0 + $0x12c] sm:$0xf] }
  0x94   :  { %13353 = vmatmul.mubr.msk.bf16.gmra.mrb[64].mxu0 %vm376_vm2, %v11745_v41  ;;  %v1484_v53 = vrot.slane %v1483_v43, 4  ;;  %v2768_v57 = vrot.slane %v2498_v19, 5  ;;  %v1501_v58 = vshrl.u32 %v960_v38, 16  ;;  %v1504_v61 = vshll.u32 %v960_v38, 16 }
  0x95   :  { %13291 = vmatmul.mubr.msk.bf16.gmra.mrb[68].mxu1 %vm376_vm2, %v11650_v47  ;;  %v1494_v62 = vrot.slane %v1493_v44, 4  ;;  %v2766_v63 = vsel %vm14113_vm8, %v11713_v45, %v2765_v48  ;;  %v2767_v1 = vrot.slane %v2765_v48, 4  ;;  %v1510_v2 = vshll.u32 %v961_v46, 16  ;;  %v967_v45 = vld [vmem:[%s21441_s0 + $0x130] sm:$0xf] }
  0x96   :  { %v1489_v5 = vsel %vm14066_vm7, %v1484_v53, %v1488_v59  ;;  %v1503_v6 = vrot.slane %v1501_v58, 4  ;;  %v1506_v7 = vrot.slane %v1504_v61, 5  ;;  %v1514_v9 = vshrl.u32 %v961_v46, 16  ;;  %v968_v48 = vld [vmem:[%s21441_s0 + $0x134] sm:$0x1] }
  0x97   :  { %v1499_v40 = vsel %vm14066_vm7, %v1494_v62, %v1498_v49  ;;  %v2769_v20 = vsel %vm14113_vm8, %v2767_v1, %v2768_v57  ;;  %v1512_v31 = vrot.slane %v1510_v2, 5  ;;  %v1520_v55 = vshll.u32 %v962_v50, 16  ;;  %v2505_v61 = vld [vmem:[%s21441_s0 + $0x114] sm:$0xe]  ;;  %v2506_v2 = vld [vmem:[%s21441_s0 + $0x118] sm:$0xf] }
  0x98   :  { %v11651_v12 = vcombine.low %v1489_v5, %v1499_v40  ;;  %v11746_v56 = vcombine.low %v2766_v63, %v2769_v20  ;;  %v1507_v0 = vor.u32 %v1506_v7, %v1503_v6  ;;  %v1516_v15 = vrot.slane %v1514_v9, 4  ;;  %v2507_v9 = vld [vmem:[%s21441_s0 + $0x11c] sm:$0x1] }
  0x99   :  { %v1522_v18 = vrot.slane %v1520_v55, 5  ;;  %v11714_v11 = vrot.slane %v2499_v13, 9  ;;  %v2772_v21 = vrot.slane %v2500_v3, 5  ;;  %v2775_v22 = vrot.slane %v2501_v10, 5  ;;  %v969_v55 = vld [vmem:[%s21441_s0 + $0x138] sm:$0xf] }
  0x9a   :  { %13294 = vmatprep.mubr.msk.bf16.mxu1 %vm376_vm2, %v11651_v12  ;;  %13356 = vmatprep.mubr.msk.bf16.mxu0 %vm376_vm2, %v11746_v56  ;;  %v1508_v8 = vrot.slane %v1507_v0, 4  ;;  %v1517_v14 = vor.u32 %v1516_v15, %v1512_v31  ;;  %v1525_v23 = vshrl.u32 %v963_v37, 16  ;;  %v1528_v24 = vshll.u32 %v963_v37, 16  ;;  %v970_v15 = vld [vmem:[%s21441_s0 + $0x13c] sm:$0xf] }
  0x9b   :  { %v2773_v27 = vsel %vm14113_vm8, %v11714_v11, %v2772_v21  ;;  %v2774_v28 = vrot.slane %v2772_v21, 4  ;;  %v1534_v29 = vshll.u32 %v964_v17, 16  ;;  %v1538_v30 = vshrl.u32 %v964_v17, 16  ;;  %v971_v17 = vld [vmem:[%s21441_s0 + $0x140] sm:$0x1] }
  0x9c   :  { %v1513_v54 = vsel %vm14066_vm7, %v1508_v8, %v1512_v31  ;;  %v1518_v33 = vrot.slane %v1517_v14, 4  ;;  %v1527_v34 = vrot.slane %v1525_v23, 4  ;;  %v1530_v16 = vrot.slane %v1528_v24, 5 }
  0x9d   :  { %v2776_v19 = vsel %vm14113_vm8, %v2774_v28, %v2775_v22  ;;  %v1536_v51 = vrot.slane %v1534_v29, 5  ;;  %v1540_v59 = vrot.slane %v1538_v30, 4  ;;  %v1544_v35 = vshll.u32 %v965_v60, 16  ;;  %v2508_v60 = vld [vmem:[%s21441_s0 + $0x120] sm:$0xe] }
  0x9e   :  { %v1523_v38 = vsel %vm14066_vm7, %v1518_v33, %v1522_v18  ;;  %v11747_v39 = vcombine.low %v2773_v27, %v2776_v19  ;;  %v1531_v41 = vor.u32 %v1530_v16, %v1527_v34  ;;  %v11715_v43 = vrot.slane %v2502_v25, 9  ;;  %v2509_v25 = vld [vmem:[%s21441_s0 + $0x124] sm:$0xf] }
  0x9f   :  { %v11652_v46 = vcombine.low %v1513_v54, %v1523_v38  ;;  %v1541_v47 = vor.u32 %v1540_v59, %v1536_v51  ;;  %v1546_v44 = vrot.slane %v1544_v35, 5  ;;  %v2779_v49 = vrot.slane %v2503_v32, 5  ;;  %v2510_v32 = vld [vmem:[%s21441_s0 + $0x128] sm:$0x1] }
  0xa0   :  { %13357 = vmatmul.mubr.msk.bf16.gmra.mrb[68].mxu0 %vm376_vm2, %v11747_v39  ;;  %v1532_v50 = vrot.slane %v1531_v41, 4  ;;  %v2782_v53 = vrot.slane %v2504_v42, 5  ;;  %v1549_v57 = vshrl.u32 %v966_v36, 16  ;;  %v1552_v58 = vshll.u32 %v966_v36, 16  ;;  %v972_v42 = vld [vmem:[%s21441_s0 + $0x144] sm:$0xf] }
  0xa1   :  { %13295 = vmatmul.mubr.msk.bf16.gmra.mrb[72].mxu1 %vm376_vm2, %v11652_v46  ;;  %v1542_v13 = vrot.slane %v1541_v47, 4  ;;  %v2780_v62 = vsel %vm14113_vm8, %v11715_v43, %v2779_v49  ;;  %v2781_v63 = vrot.slane %v2779_v49, 4  ;;  %v1558_v1 = vshll.u32 %v967_v45, 16  ;;  %v973_v36 = vld [vmem:[%s21441_s0 + $0x148] sm:$0xf] }
  0xa2   :  { %v1537_v3 = vsel %vm14066_vm7, %v1532_v50, %v1536_v51  ;;  %v1551_v5 = vrot.slane %v1549_v57, 4  ;;  %v1554_v6 = vrot.slane %v1552_v58, 5  ;;  %v1562_v7 = vshrl.u32 %v967_v45, 16  ;;  %v974_v49 = vld [vmem:[%s21441_s0 + $0x14c] sm:$0x1] }
  0xa3   :  { %v1547_v10 = vsel %vm14066_vm7, %v1542_v13, %v1546_v44  ;;  %v2783_v40 = vsel %vm14113_vm8, %v2781_v63, %v2782_v53  ;;  %v1560_v20 = vrot.slane %v1558_v1, 5  ;;  %v1568_v31 = vshll.u32 %v968_v48, 16  ;;  %v2511_v58 = vld [vmem:[%s21441_s0 + $0x12c] sm:$0xe] }
  0xa4   :  { %v11653_v37 = vcombine.low %v1537_v3, %v1547_v10  ;;  %v11748_v12 = vcombine.low %v2780_v62, %v2783_v40  ;;  %v1555_v56 = vor.u32 %v1554_v6, %v1551_v5  ;;  %v1564_v0 = vrot.slane %v1562_v7, 4 }
  0xa5   :  { %v1570_v18 = vrot.slane %v1568_v31, 5  ;;  %v11716_v11 = vrot.slane %v2505_v61, 9  ;;  %v2786_v21 = vrot.slane %v2506_v2, 5  ;;  %v2789_v22 = vrot.slane %v2507_v9, 5  ;;  %v2512_v61 = vld [vmem:[%s21441_s0 + $0x130] sm:$0xf] }
  0xa6   :  { %13298 = vmatprep.mubr.msk.bf16.mxu1 %vm376_vm2, %v11653_v37  ;;  %13360 = vmatprep.mubr.msk.bf16.mxu0 %vm376_vm2, %v11748_v12  ;;  %v1556_v8 = vrot.slane %v1555_v56, 4  ;;  %v1565_v14 = vor.u32 %v1564_v0, %v1560_v20  ;;  %v1573_v23 = vshrl.u32 %v969_v55, 16  ;;  %v1576_v24 = vshll.u32 %v969_v55, 16  ;;  %v2513_v2 = vld [vmem:[%s21441_s0 + $0x134] sm:$0x1] }
  0xa7   :  { %v2787_v27 = vsel %vm14113_vm8, %v11716_v11, %v2786_v21  ;;  %v2788_v28 = vrot.slane %v2786_v21, 4  ;;  %v1582_v29 = vshll.u32 %v970_v15, 16  ;;  %v1586_v30 = vshrl.u32 %v970_v15, 16  ;;  %v975_v9 = vld [vmem:[%s21441_s0 + $0x150] sm:$0xf] }
  0xa8   :  { %v1561_v54 = vsel %vm14066_vm7, %v1556_v8, %v1560_v20  ;;  %v1566_v33 = vrot.slane %v1565_v14, 4  ;;  %v1575_v34 = vrot.slane %v1573_v23, 4  ;;  %v1578_v16 = vrot.slane %v1576_v24, 5  ;;  %v976_v55 = vld [vmem:[%s21441_s0 + $0x154] sm:$0xf] }
  0xa9   :  { %v2790_v19 = vsel %vm14113_vm8, %v2788_v28, %v2789_v22  ;;  %v1584_v51 = vrot.slane %v1582_v29, 5  ;;  %v1588_v59 = vrot.slane %v1586_v30, 4  ;;  %v1592_v35 = vshll.u32 %v971_v17, 16  ;;  %v977_v15 = vld [vmem:[%s21441_s0 + $0x158] sm:$0x1] }
  0xaa   :  { %v1571_v38 = vsel %vm14066_vm7, %v1566_v33, %v1570_v18  ;;  %v11749_v39 = vcombine.low %v2787_v27, %v2790_v19  ;;  %v1579_v41 = vor.u32 %v1578_v16, %v1575_v34  ;;  %v11717_v43 = vrot.slane %v2508_v60, 9  ;;  %v2514_v22 = vld [vmem:[%s21441_s0 + $0x138] sm:$0xe]  ;;  %v2515_v24 = vld [vmem:[%s21441_s0 + $0x13c] sm:$0xf] }
  0xab   :  { %v11654_v45 = vcombine.low %v1561_v54, %v1571_v38  ;;  %v1589_v46 = vor.u32 %v1588_v59, %v1584_v51  ;;  %v1594_v47 = vrot.slane %v1592_v35, 5  ;;  %v2793_v44 = vrot.slane %v2509_v25, 5  ;;  %v2516_v30 = vld [vmem:[%s21441_s0 + $0x140] sm:$0x1] }
  0xac   :  { %13361 = vmatmul.mubr.msk.bf16.gmra.mrb[72].mxu0 %vm376_vm2, %v11749_v39  ;;  %v1580_v48 = vrot.slane %v1579_v41, 4  ;;  %v2796_v50 = vrot.slane %v2510_v32, 5  ;;  %v1597_v53 = vshrl.u32 %v972_v42, 16  ;;  %v1600_v57 = vshll.u32 %v972_v42, 16  ;;  %v978_v32 = vld [vmem:[%s21441_s0 + $0x15c] sm:$0xf] }
  0xad   :  { %13299 = vmatmul.mubr.msk.bf16.gmra.mrb[76].mxu1 %vm376_vm2, %v11654_v45  ;;  %v1590_v13 = vrot.slane %v1589_v46, 4  ;;  %v2794_v62 = vsel %vm14113_vm8, %v11717_v43, %v2793_v44  ;;  %v2795_v63 = vrot.slane %v2793_v44, 4  ;;  %v1606_v1 = vshll.u32 %v973_v36, 16  ;;  %v979_v41 = vld [vmem:[%s21441_s0 + $0x160] sm:$0xf] }
  0xae   :  { %v1585_v3 = vsel %vm14066_vm7, %v1580_v48, %v1584_v51  ;;  %v1599_v5 = vrot.slane %v1597_v53, 4  ;;  %v1602_v6 = vrot.slane %v1600_v57, 5  ;;  %v1610_v7 = vshrl.u32 %v973_v36, 16  ;;  %v980_v44 = vld [vmem:[%s21441_s0 + $0x164] sm:$0x1] }
  0xaf   :  { %v1595_v10 = vsel %vm14066_vm7, %v1590_v13, %v1594_v47  ;;  %v2797_v40 = vsel %vm14113_vm8, %v2795_v63, %v2796_v50  ;;  %v1608_v20 = vrot.slane %v1606_v1, 5  ;;  %v1616_v31 = vshll.u32 %v974_v49, 16  ;;  %v2517_v57 = vld [vmem:[%s21441_s0 + $0x144] sm:$0xe]  ;;  %v2519_v1 = vld [vmem:[%s21441_s0 + $0x14c] sm:$0x1] }
  0xb0   :  { %v11655_v37 = vcombine.low %v1585_v3, %v1595_v10  ;;  %v11750_v12 = vcombine.low %v2794_v62, %v2797_v40  ;;  %v1603_v56 = vor.u32 %v1602_v6, %v1599_v5  ;;  %v1612_v0 = vrot.slane %v1610_v7, 4  ;;  %v981_v7 = vld [vmem:[%s21441_s0 + $0x168] sm:$0xf] }
  0xb1   :  { %v1618_v17 = vrot.slane %v1616_v31, 5  ;;  %v11718_v18 = vrot.slane %v2511_v58, 9  ;;  %v2800_v11 = vrot.slane %v2512_v61, 5  ;;  %v2803_v21 = vrot.slane %v2513_v2, 5  ;;  %v2518_v58 = vld [vmem:[%s21441_s0 + $0x148] sm:$0xf] }
  0xb2   :  { %13302 = vmatprep.mubr.msk.bf16.mxu1 %vm376_vm2, %v11655_v37  ;;  %13364 = vmatprep.mubr.msk.bf16.mxu0 %vm376_vm2, %v11750_v12  ;;  %v1604_v60 = vrot.slane %v1603_v56, 4  ;;  %v1613_v8 = vor.u32 %v1612_v0, %v1608_v20  ;;  %v1621_v14 = vshrl.u32 %v975_v9, 16  ;;  %v1624_v23 = vshll.u32 %v975_v9, 16  ;;  %v982_v31 = vld [vmem:[%s21441_s0 + $0x16c] sm:$0xf] }
  0xb3   :  { %v2801_v25 = vsel %vm14113_vm8, %v11718_v18, %v2800_v11  ;;  %v2802_v27 = vrot.slane %v2800_v11, 4  ;;  %v1630_v28 = vshll.u32 %v976_v55, 16  ;;  %v1634_v29 = vshrl.u32 %v976_v55, 16  ;;  %v983_v0 = vld [vmem:[%s21441_s0 + $0x170] sm:$0x1] }
  0xb4   :  { %v1609_v54 = vsel %vm14066_vm7, %v1604_v60, %v1608_v20  ;;  %v1614_v33 = vrot.slane %v1613_v8, 4  ;;  %v1623_v34 = vrot.slane %v1621_v14, 4  ;;  %v1626_v16 = vrot.slane %v1624_v23, 5  ;;  %v2521_v23 = vld [vmem:[%s21441_s0 + $0x154] sm:$0xf] }
  0xb5   :  { %v2804_v42 = vsel %vm14113_vm8, %v2802_v27, %v2803_v21  ;;  %v1632_v19 = vrot.slane %v1630_v28, 5  ;;  %v1636_v51 = vrot.slane %v1634_v29, 4  ;;  %v1640_v59 = vshll.u32 %v977_v15, 16  ;;  %v2520_v21 = vld [vmem:[%s21441_s0 + $0x150] sm:$0xe] }
  0xb6   :  { %v1619_v35 = vsel %vm14066_vm7, %v1614_v33, %v1618_v17  ;;  %v11751_v36 = vcombine.low %v2801_v25, %v2804_v42  ;;  %v1627_v38 = vor.u32 %v1626_v16, %v1623_v34  ;;  %v11719_v39 = vrot.slane %v2514_v22, 9  ;;  %v2522_v29 = vld [vmem:[%s21441_s0 + $0x158] sm:$0x1] }
  0xb7   :  { %v11656_v43 = vcombine.low %v1609_v54, %v1619_v35  ;;  %v1637_v45 = vor.u32 %v1636_v51, %v1632_v19  ;;  %v1642_v46 = vrot.slane %v1640_v59, 5  ;;  %v2807_v47 = vrot.slane %v2515_v24, 5  ;;  %v984_v51 = vld [vmem:[%s21441_s0 + $0x174] sm:$0xf] }
  0xb8   :  { %13365 = vmatmul.mubr.msk.bf16.gmra.mrb[76].mxu0 %vm376_vm2, %v11751_v36  ;;  %v1628_v49 = vrot.slane %v1627_v38, 4  ;;  %v2810_v48 = vrot.slane %v2516_v30, 5  ;;  %v1645_v50 = vshrl.u32 %v978_v32, 16  ;;  %v1648_v53 = vshll.u32 %v978_v32, 16 }
  0xb9   :  { %13303 = vmatmul.mubr.msk.bf16.gmra.mrb[80].mxu1 %vm376_vm2, %v11656_v43  ;;  %v1638_v61 = vrot.slane %v1637_v45, 4  ;;  %v2808_v13 = vsel %vm14113_vm8, %v11719_v39, %v2807_v47  ;;  %v2809_v62 = vrot.slane %v2807_v47, 4  ;;  %v1654_v63 = vshll.u32 %v979_v41, 16  ;;  %v985_v39 = vld [vmem:[%s21441_s0 + $0x178] sm:$0xf] }
  0xba   :  { %v1633_v2 = vsel %vm14066_vm7, %v1628_v49, %v1632_v19  ;;  %v1647_v3 = vrot.slane %v1645_v50, 4  ;;  %v1650_v5 = vrot.slane %v1648_v53, 5  ;;  %v1658_v6 = vshrl.u32 %v979_v41, 16  ;;  %v986_v41 = vld [vmem:[%s21441_s0 + $0x17c] sm:$0x1] }
  0xbb   :  { %v1643_v9 = vsel %vm14066_vm7, %v1638_v61, %v1642_v46  ;;  %v2811_v10 = vsel %vm14113_vm8, %v2809_v62, %v2810_v48  ;;  %v1656_v40 = vrot.slane %v1654_v63, 5  ;;  %v1664_v20 = vshll.u32 %v980_v44, 16  ;;  %v2523_v53 = vld [vmem:[%s21441_s0 + $0x15c] sm:$0xe]  ;;  %v2525_v63 = vld [vmem:[%s21441_s0 + $0x164] sm:$0x1] }
  0xbc   :  { %v11657_v55 = vcombine.low %v1633_v2, %v1643_v9  ;;  %v11752_v37 = vcombine.low %v2808_v13, %v2811_v10  ;;  %v1651_v12 = vor.u32 %v1650_v5, %v1647_v3  ;;  %v1660_v56 = vrot.slane %v1658_v6, 4  ;;  %v987_v6 = vld [vmem:[%s21441_s0 + $0x180] sm:$0xf] }
  0xbd   :  { %v1666_v15 = vrot.slane %v1664_v20, 5  ;;  %v11720_v17 = vrot.slane %v2517_v57, 9  ;;  %v2814_v18 = vrot.slane %v2518_v58, 5  ;;  %v2817_v11 = vrot.slane %v2519_v1, 5  ;;  %v2524_v57 = vld [vmem:[%s21441_s0 + $0x160] sm:$0xf] }
  0xbe   :  { %13306 = vmatprep.mubr.msk.bf16.mxu1 %vm376_vm2, %v11657_v55  ;;  %13368 = vmatprep.mubr.msk.bf16.mxu0 %vm376_vm2, %v11752_v37  ;;  %v1652_v22 = vrot.slane %v1651_v12, 4  ;;  %v1661_v60 = vor.u32 %v1660_v56, %v1656_v40  ;;  %v1669_v8 = vshrl.u32 %v981_v7, 16  ;;  %v1672_v14 = vshll.u32 %v981_v7, 16  ;;  %v988_v12 = vld [vmem:[%s21441_s0 + $0x184] sm:$0xf] }
  0xbf   :  { %v2815_v24 = vsel %vm14113_vm8, %v11720_v17, %v2814_v18  ;;  %v2816_v25 = vrot.slane %v2814_v18, 4  ;;  %v1678_v27 = vshll.u32 %v982_v31, 16  ;;  %v1682_v28 = vshrl.u32 %v982_v31, 16  ;;  %v989_v56 = vld [vmem:[%s21441_s0 + $0x188] sm:$0x1] }
  0xc0   :  { %v1657_v30 = vsel %vm14066_vm7, %v1652_v22, %v1656_v40  ;;  %v1662_v32 = vrot.slane %v1661_v60, 4  ;;  %v1671_v54 = vrot.slane %v1669_v8, 4  ;;  %v1674_v33 = vrot.slane %v1672_v14, 5  ;;  %v2527_v14 = vld [vmem:[%s21441_s0 + $0x16c] sm:$0xf] }
  0xc1   :  { %v2818_v34 = vsel %vm14113_vm8, %v2816_v25, %v2817_v11  ;;  %v1680_v16 = vrot.slane %v1678_v27, 5  ;;  %v1684_v42 = vrot.slane %v1682_v28, 4  ;;  %v1688_v19 = vshll.u32 %v983_v0, 16  ;;  %v2526_v11 = vld [vmem:[%s21441_s0 + $0x168] sm:$0xe] }
  0xc2   :  { %v1667_v59 = vsel %vm14066_vm7, %v1662_v32, %v1666_v15  ;;  %v11753_v35 = vcombine.low %v2815_v24, %v2818_v34  ;;  %v1675_v36 = vor.u32 %v1674_v33, %v1671_v54  ;;  %v11721_v38 = vrot.slane %v2520_v21, 9  ;;  %v2528_v54 = vld [vmem:[%s21441_s0 + $0x170] sm:$0x1] }
  0xc3   :  { %v11658_v43 = vcombine.low %v1657_v30, %v1667_v59  ;;  %v1685_v45 = vor.u32 %v1684_v42, %v1680_v16  ;;  %v1690_v46 = vrot.slane %v1688_v19, 5  ;;  %v2821_v47 = vrot.slane %v2521_v23, 5  ;;  %v990_v19 = vld [vmem:[%s21441_s0 + $0x18c] sm:$0xf] }
  0xc4   :  { %13369 = vmatmul.mubr.msk.bf16.gmra.mrb[80].mxu0 %vm376_vm2, %v11753_v35  ;;  %v1676_v44 = vrot.slane %v1675_v36, 4  ;;  %v2824_v49 = vrot.slane %v2522_v29, 5  ;;  %v1693_v48 = vshrl.u32 %v984_v51, 16  ;;  %v1696_v50 = vshll.u32 %v984_v51, 16 }
  0xc5   :  { %13307 = vmatmul.mubr.msk.bf16.gmra.mrb[84].mxu1 %vm376_vm2, %v11658_v43  ;;  %v1686_v58 = vrot.slane %v1685_v45, 4  ;;  %v2822_v61 = vsel %vm14113_vm8, %v11721_v38, %v2821_v47  ;;  %v2823_v13 = vrot.slane %v2821_v47, 4  ;;  %v1702_v62 = vshll.u32 %v985_v39, 16  ;;  %v991_v38 = vld [vmem:[%s21441_s0 + $0x190] sm:$0xf] }
  0xc6   :  { %v1681_v1 = vsel %vm14066_vm7, %v1676_v44, %v1680_v16  ;;  %v1695_v2 = vrot.slane %v1693_v48, 4  ;;  %v1698_v3 = vrot.slane %v1696_v50, 5  ;;  %v1706_v5 = vshrl.u32 %v985_v39, 16  ;;  %v2529_v50 = vld [vmem:[%s21441_s0 + $0x174] sm:$0xe] }
  0xc7   :  { %v1691_v7 = vsel %vm14066_vm7, %v1686_v58, %v1690_v46  ;;  %v2825_v9 = vsel %vm14113_vm8, %v2823_v13, %v2824_v49  ;;  %v1704_v10 = vrot.slane %v1702_v62, 5  ;;  %v1712_v40 = vshll.u32 %v986_v41, 16  ;;  %v992_v46 = vld [vmem:[%s21441_s0 + $0x194] sm:$0x1] }
  0xc8   :  { %v11659_v20 = vcombine.low %v1681_v1, %v1691_v7  ;;  %v11754_v31 = vcombine.low %v2822_v61, %v2825_v9  ;;  %v1699_v55 = vor.u32 %v1698_v3, %v1695_v2  ;;  %v1708_v37 = vrot.slane %v1706_v5, 4  ;;  %v2533_v1 = vld [vmem:[%s21441_s0 + $0x184] sm:$0xf]  ;;  %v2534_v7 = vld [vmem:[%s21441_s0 + $0x188] sm:$0x1] }
  0xc9   :  { %v1714_v0 = vrot.slane %v1712_v40, 5  ;;  %v11722_v15 = vrot.slane %v2523_v53, 9  ;;  %v2828_v17 = vrot.slane %v2524_v57, 5  ;;  %v2831_v18 = vrot.slane %v2525_v63, 5  ;;  %v2530_v53 = vld [vmem:[%s21441_s0 + $0x178] sm:$0xf] }
  0xca   :  { %13310 = vmatprep.mubr.msk.bf16.mxu1 %vm376_vm2, %v11659_v20  ;;  %13372 = vmatprep.mubr.msk.bf16.mxu0 %vm376_vm2, %v11754_v31  ;;  %v1700_v21 = vrot.slane %v1699_v55, 4  ;;  %v1709_v22 = vor.u32 %v1708_v37, %v1704_v10  ;;  %v1717_v60 = vshrl.u32 %v987_v6, 16  ;;  %v1720_v8 = vshll.u32 %v987_v6, 16  ;;  %v2531_v57 = vld [vmem:[%s21441_s0 + $0x17c] sm:$0x1] }
  0xcb   :  { %v2829_v23 = vsel %vm14113_vm8, %v11722_v15, %v2828_v17  ;;  %v2830_v24 = vrot.slane %v2828_v17, 4  ;;  %v1726_v25 = vshll.u32 %v988_v12, 16  ;;  %v1730_v27 = vshrl.u32 %v988_v12, 16  ;;  %v2532_v63 = vld [vmem:[%s21441_s0 + $0x180] sm:$0xe] }
  0xcc   :  { %v1705_v28 = vsel %vm14066_vm7, %v1700_v21, %v1704_v10  ;;  %v1710_v29 = vrot.slane %v1709_v22, 4  ;;  %v1719_v30 = vrot.slane %v1717_v60, 4  ;;  %v1722_v32 = vrot.slane %v1720_v8, 5  ;;  %v2535_v31 = vld [vmem:[%s21441_s0 + $0x18c] sm:$0xe] }
  0xcd   :  { %v2832_v33 = vsel %vm14113_vm8, %v2830_v24, %v2831_v18  ;;  %v1728_v34 = vrot.slane %v1726_v25, 5  ;;  %v1732_v16 = vrot.slane %v1730_v27, 4  ;;  %v1736_v42 = vshll.u32 %v989_v56, 16  ;;  %v2537_v15 = vld [vmem:[%s21441_s0 + $0x194] sm:$0x1] }
  0xce   :  { %v1715_v51 = vsel %vm14066_vm7, %v1710_v29, %v1714_v0  ;;  %v11755_v59 = vcombine.low %v2829_v23, %v2832_v33  ;;  %v1723_v35 = vor.u32 %v1722_v32, %v1719_v30  ;;  %v11723_v36 = vrot.slane %v2526_v11, 9  ;;  %v2536_v0 = vld [vmem:[%s21441_s0 + $0x190] sm:$0xf]  ;;  %v12210_v17 = vld [vmem:[%s21442_s1 + $0xa] sm:$0x3] }
  0xcf   :  { %v11660_v39 = vcombine.low %v1705_v28, %v1715_v51  ;;  %v1733_v41 = vor.u32 %v1732_v16, %v1728_v34  ;;  %v1738_v43 = vrot.slane %v1736_v42, 5  ;;  %v2835_v45 = vrot.slane %v2527_v14, 5  ;;  %v11921_v14 = vld [vmem:[%s21441_s0 + $0xc] sm:$0xf] }
  0xd0   :  { %13373 = vmatmul.mubr.msk.bf16.gmra.mrb[84].mxu0 %vm376_vm2, %v11755_v59  ;;  %v1724_v47 = vrot.slane %v1723_v35, 4  ;;  %v2838_v44 = vrot.slane %v2528_v54, 5  ;;  %v1741_v49 = vshrl.u32 %v990_v19, 16  ;;  %v1744_v48 = vshll.u32 %v990_v19, 16 }
  0xd1   :  { %13311 = vmatmul.mubr.msk.bf16.gmra.mrb[88].mxu1 %vm376_vm2, %v11660_v39  ;;  %v1734_v58 = vrot.slane %v1733_v41, 4  ;;  %v2836_v61 = vsel %vm14113_vm8, %v11723_v36, %v2835_v45  ;;  %v2837_v13 = vrot.slane %v2835_v45, 4  ;;  %v1750_v62 = vshll.u32 %v991_v38, 16 }
  0xd2   :  { %v1729_v2 = vsel %vm14066_vm7, %v1724_v47, %v1728_v34  ;;  %v1743_v3 = vrot.slane %v1741_v49, 4  ;;  %v1746_v5 = vrot.slane %v1744_v48, 5  ;;  %v1754_v6 = vshrl.u32 %v991_v38, 16  ;;  %v11922_v38 = vld [vmem:[%s21441_s0 + $0x10] sm:$0xf] }
  0xd3   :  { %v1739_v9 = vsel %vm14066_vm7, %v1734_v58, %v1738_v43  ;;  %v2839_v10 = vsel %vm14113_vm8, %v2837_v13, %v2838_v44  ;;  %v1752_v40 = vrot.slane %v1750_v62, 5  ;;  %v1760_v20 = vshll.u32 %v992_v46, 16  ;;  %v11923_v46 = vld [vmem:[%s21441_s0 + $0x14] sm:$0x1]  ;;  %v13819_v48 = vld [vmem:[%s21441_s0 + $0xc] sm:$0xff]  }
  0xd4   :  { %v11661_v55 = vcombine.low %v1729_v2, %v1739_v9  ;;  %v11756_v37 = vcombine.low %v2836_v61, %v2839_v10  ;;  %v1747_v12 = vor.u32 %v1746_v5, %v1743_v3  ;;  %v1756_v56 = vrot.slane %v1754_v6, 4  ;;  %v12339_v6 = vld [vmem:[%s21442_s1 + $0xc] sm:$0x3] }
  0xd5   :  { %v1762_v21 = vrot.slane %v1760_v20, 5  ;;  %v11724_v22 = vrot.slane %v2529_v50, 9  ;;  %v2842_v60 = vrot.slane %v2530_v53, 5  ;;  %v2845_v8 = vrot.slane %v2531_v57, 5  ;;  %v11924_v53 = vld [vmem:[%s21441_s0 + $0x18] sm:$0xf] }
  0xd6   :  { %13314 = vmatprep.mubr.msk.bf16.mxu1 %vm376_vm2, %v11661_v55  ;;  %13376 = vmatprep.mubr.msk.bf16.mxu0 %vm376_vm2, %v11756_v37  ;;  %v1748_v25 = vrot.slane %v1747_v12, 4  ;;  %v1757_v27 = vor.u32 %v1756_v56, %v1752_v40  ;;  %v11725_v28 = vrot.slane %v2532_v63, 9  ;;  %v2849_v29 = vrot.slane %v2533_v1, 5  ;;  %v11925_v57 = vld [vmem:[%s21441_s0 + $0x1c] sm:$0xf] }
  0xd7   :  { %v2843_v54 = vsel %vm14113_vm8, %v11724_v22, %v2842_v60  ;;  %v2844_v33 = vrot.slane %v2842_v60, 4  ;;  %v2852_v34 = vrot.slane %v2534_v7, 5  ;;  %v11726_v16 = vrot.slane %v2535_v31, 9  ;;  %v11926_v63 = vld [vmem:[%s21441_s0 + $0x20] sm:$0x1] }
  0xd8   :  { %v1753_v51 = vsel %vm14066_vm7, %v1748_v25, %v1752_v40  ;;  %v1758_v59 = vrot.slane %v1757_v27, 4  ;;  %v2850_v35 = vsel %vm14113_vm8, %v11725_v28, %v2849_v29  ;;  %v2851_v36 = vrot.slane %v2849_v29, 4  ;;  %v11927_v7 = vld [vmem:[%s21441_s0 + $0x24] sm:$0xf]  ;;  %v13820_v29 = vld [vmem:[%s21441_s0 + $0x18] sm:$0xff]  }
  0xd9   :  { %v2846_v39 = vsel %vm14113_vm8, %v2844_v33, %v2845_v8  ;;  %v2856_v41 = vrot.slane %v2536_v0, 5  ;;  %v2859_v43 = vrot.slane %v2537_v15, 5  ;;  %v15082_v45 = vand.u32 %v12210_v17, %v13951_v4 }
  0xda   :  { %v1763_v47 = vsel %vm14066_vm7, %v1758_v59, %v1762_v21  ;;  %v11757_v44 = vcombine.low %v2843_v54, %v2846_v39  ;;  %v2853_v49 = vsel %vm14113_vm8, %v2851_v36, %v2852_v34  ;;  %v4443_v50 = vshrl.u32 %v11921_v14, 16  ;;  %v13821_v54 = vld [vmem:[%s21441_s0 + $0x24] sm:$0xff]   ;;  %v11929_v39 = vld [vmem:[%s21441_s0 + $0x2c] sm:$0x1] }
  0xdb   :  { %v11662_v58 = vcombine.low %v1753_v51, %v1763_v47  ;;  %v11758_v61 = vcombine.low %v2850_v35, %v2853_v49  ;;  %v2857_v13 = vsel %vm14113_vm8, %v11726_v16, %v2856_v41  ;;  %v2858_v62 = vrot.slane %v2856_v41, 4  ;;  %13516 = vmatprep.subr.bf16.mxu1 %v15082_v45  ;;  %v11928_v59 = vld [vmem:[%s21441_s0 + $0x28] sm:$0xf] }
  0xdc   :  { %v15049_v18 = vpop.f32.mrb[0].mxu1  ;;  %v15051_v11 = vpop.f32.mrb[0].mxu0  ;;  %13377 = vmatmul.mubr.msk.bf16.gmra.mrb[88].mxu0 %vm376_vm2, %v11757_v44  ;;  %v4445_v1 = vrot.slane %v4443_v50, 4  ;;  %v4446_v2 = vshll.u32 %v11921_v14, 16  ;;  %v4452_v3 = vshll.u32 %v11922_v38, 16  ;;  %v4456_v5 = vshrl.u32 %v11922_v38, 16 }
  0xdd   :  { %v15056_v23 = vpop.f32.mrb[1].mxu1  ;;  %v15058_v24 = vpop.f32.mrb[1].mxu0  ;;  %13315 = vmatmul.mubr.msk.bf16.gmra.mrb[92].mxu1 %vm376_vm2, %v11662_v58  ;;  %13380 = vmatprep.mubr.msk.bf16.mxu0 %vm376_vm2, %v11758_v61  ;;  %v2860_v40 = vsel %vm14113_vm8, %v2858_v62, %v2859_v43  ;;  %v4462_v20 = vshll.u32 %v11923_v46, 16  ;;  %v4467_v31 = vshrl.u32 %v11924_v53, 16  ;;  %v4470_v55 = vshll.u32 %v11924_v53, 16 }
  0xde   :  { %v15062_v30 = vpop.f32.mrb[2].mxu1  ;;  %v15064_v32 = vpop.f32.mrb[2].mxu0  ;;  %13386 = vmatprep.mubr.msk.bf16.mxu1 %vm376_vm2, %v13819_v48  ;;  %v11759_v56 = vcombine.low %v2857_v13, %v2860_v40  ;;  %v4448_v0 = vrot.slane %v4446_v2, 5  ;;  %v4454_v15 = vrot.slane %v4452_v3, 5  ;;  %v4458_v17 = vrot.slane %v4456_v5, 4 }
  0xdf   :  { %v15068_v42 = vpop.f32.mrb[3].mxu1  ;;  %v15070_v19 = vpop.f32.mrb[3].mxu0  ;;  %v4464_v60 = vrot.slane %v4462_v20, 5  ;;  %v4469_v8 = vrot.slane %v4467_v31, 4  ;;  %v4472_v14 = vrot.slane %v4470_v55, 5  ;;  %v4476_v25 = vshll.u32 %v11925_v57, 16 }
  0xe0   :  { %v4449_v33 = vor.u32 %v4448_v0, %v4445_v1  ;;  %v4459_v34 = vor.u32 %v4458_v17, %v4454_v15  ;;  %v4480_v16 = vshrl.u32 %v11925_v57, 16  ;;  %v4486_v51 = vshll.u32 %v11926_v63, 16  ;;  %v11930_v57 = vld [vmem:[%s21441_s0 + $0x30] sm:$0xf]  ;;  %v11931_v63 = vld [vmem:[%s21441_s0 + $0x34] sm:$0xf] }
  0xe1   :  { %v4473_v35 = vor.u32 %v4472_v14, %v4469_v8  ;;  %v4478_v36 = vrot.slane %v4476_v25, 5  ;;  %v15144_v38 = vand.u32 %v12339_v6, %v13951_v4  ;;  %v4491_v41 = vshrl.u32 %v11927_v7, 16  ;;  %v11932_v40 = vld [vmem:[%s21441_s0 + $0x38] sm:$0x1]  ;;  %v15182_v17 = vld [vmem:[%s21441_s0 + $0x3c] sm:$0xf] }
  0xe2   :  { %v4450_v43 = vrot.slane %v4449_v33, 4  ;;  %v4460_v46 = vrot.slane %v4459_v34, 4  ;;  %v4482_v47 = vrot.slane %v4480_v16, 4  ;;  %v4488_v44 = vrot.slane %v4486_v51, 5 }
  0xe3   :  { %v4474_v49 = vrot.slane %v4473_v35, 4  ;;  %13582 = vmatprep.subr.bf16.mxu0 %v15144_v38  ;;  %v4493_v48 = vrot.slane %v4491_v41, 4  ;;  %v4494_v50 = vshll.u32 %v11927_v7, 16  ;;  %v4500_v53 = vshll.u32 %v11928_v59, 16 }
  0xe4   :  { %v15113_v9 = vpop.f32.mrb[4].mxu1  ;;  %v15115_v10 = vpop.f32.mrb[4].mxu0  ;;  %13381 = vmatmul.mubr.msk.bf16.gmra.mrb[92].mxu0 %vm376_vm2, %v11759_v56  ;;  %v4455_v58 = vsel %vm14066_vm7, %v4450_v43, %v4454_v15  ;;  %v4465_v61 = vsel %vm14066_vm7, %v4460_v46, %v4464_v60  ;;  %v4483_v13 = vor.u32 %v4482_v47, %v4478_v36  ;;  %v4504_v62 = vshrl.u32 %v11928_v59, 16  ;;  %v15219_v47 = vld [vmem:[%s21441_s0 + $0x40] sm:$0xf] }
  0xe5   :  { %v15121_v37 = vpop.f32.mrb[5].mxu1  ;;  %v15123_v12 = vpop.f32.mrb[5].mxu0  ;;  %13387 = vmatmul.mubr.msk.bf16.vlgmr.msra.gmra.mrb[96].mxu1 %vm376_vm2, %v13820_v29  ;;  %v12018_v3 = vcombine.low %v4455_v58, %v4465_v61  ;;  %v4479_v5 = vsel %vm14066_vm7, %v4474_v49, %v4478_v36  ;;  %v4496_v6 = vrot.slane %v4494_v50, 5  ;;  %v15168_v7 = vrot.slane %v4500_v53, 5  ;;  %v15228_v50 = vld [vmem:[%s21441_s0 + $0x44] sm:$0x1] }
  0xe6   :  { %v15126_v21 = vpop.f32.mrb[6].mxu1  ;;  %v15128_v22 = vpop.f32.mrb[6].mxu0  ;;  %13517 = vmatpush3.bf16.msra.mxu1 %v15082_v45  ;;  %13390 = vmatprep.mubr.msk.bf16.mxu1 %vm376_vm2, %v13821_v54  ;;  %v4484_v55 = vrot.slane %v4483_v13, 4  ;;  %v4506_v56 = vrot.slane %v4504_v62, 4  ;;  %v4510_v0 = vshll.u32 %v11929_v39, 16  ;;  %v4515_v15 = vshrl.u32 %v11930_v57, 16 }
  0xe7   :  { %v15130_v27 = vpop.f32.mrb[7].mxu1  ;;  %v15132_v28 = vpop.f32.mrb[7].mxu0  ;;  %13452 = vmatprep.mubr.msk.bf16.mxu0 %vm376_vm2, %v12018_v3  ;;  %v15192_v45 = vld [vmem:[%s21441_s0 + $0x30] sm:$0xff]   ;;  %v4497_v14 = vor.u32 %v4496_v6, %v4493_v48  ;;  %v4518_v25 = vshll.u32 %v11930_v57, 16  ;;  %v4524_v29 = vshll.u32 %v11931_v63, 16  ;;  %v4528_v54 = vshrl.u32 %v11931_v63, 16 }
  0xe8   :  { %v4489_v16 = vsel %vm14066_vm7, %v4484_v55, %v4488_v44  ;;  %v4507_v51 = vor.u32 %v4506_v56, %v15168_v7  ;;  %v15201_v59 = vrot.slane %v4510_v0, 5  ;;  %v15203_v35 = vrot.slane %v4515_v15, 4  ;;  %v15208_v39 = vld [vmem:[%s21441_s0 + $0x3c] sm:$0xff]   ;;  %v15240_v61 = vld [vmem:[%s21441_s0 + $0x48] sm:$0xf] }
  0xe9   :  { %v12019_v36 = vcombine.low %v4479_v5, %v4489_v16  ;;  %v15210_v41 = vrot.slane %v4497_v14, 4  ;;  %v15212_v43 = vrot.slane %v4518_v25, 5  ;;  %v15214_v46 = vrot.slane %v4524_v29, 5  ;;  %v11937_v6 = vld [vmem:[%s21441_s0 + $0x4c] sm:$0xf] }
  0xea   :  { %v15221_v44 = vrot.slane %v4507_v51, 4  ;;  %v15223_v49 = vrot.slane %v4528_v54, 4  ;;  %v4534_v48 = vshll.u32 %v11932_v40, 16  ;;  %v4539_v58 = vshrl.u32 %v15182_v17, 16 }
  0xeb   :  { %v4503_v53 = vsel %vm14066_vm7, %v15210_v41, %v15168_v7  ;;  %v4521_v57 = vor.u32 %v15212_v43, %v15203_v35  ;;  %v13911_v3 = vmov 0.0   ;;  %v4542_v5 = vshll.u32 %v15182_v17, 16 }
  0xec   :  { %v15161_v1 = vpop.f32.mrb[8].mxu1  ;;  %v15163_v2 = vpop.f32.mrb[8].mxu0  ;;  %13453 = vmatmul.mubr.msk.bf16.vlgmr.msra.gmra.mrb[96].mxu0 %vm376_vm2, %v12019_v36  ;;  %v4513_v13 = vsel %vm14066_vm7, %v15221_v44, %v15201_v59  ;;  %v4531_v62 = vor.u32 %v15223_v49, %v15214_v46  ;;  %v15249_v63 = vrot.slane %v4534_v48, 5  ;;  %57 = vst.msk [vmem:[#allocation2 + $0x110] sm:$0xff] %vm22_vm9, %v13911_v3  ;;  %23 = vst.msk [vmem:[#allocation2] sm:$0xff] %vm22_vm9, %v13911_v3  ;;  %v4541_v15 = vrot.slane %v4539_v58, 4 }
  0xed   :  { %v15173_v20 = vpop.f32.mrb[9].mxu1  ;;  %v15175_v31 = vpop.f32.mrb[9].mxu0  ;;  %24 = vst.msk [vmem:[#allocation2 + $0x8] sm:$0xff] %vm22_vm9, %v13911_v3  ;;  %25 = vst.msk [vmem:[#allocation2 + $0x10] sm:$0xff] %vm22_vm9, %v13911_v3  ;;  %13391 = vmatmul.mubr.msk.bf16.gmra.mrb[100].mxu1 %vm376_vm2, %v15192_v45  ;;  %13583 = vmatpush3.bf16.msra.mxu0 %v15144_v38  ;;  %v12020_v56 = vcombine.low %v4503_v53, %v4513_v13  ;;  %v4522_v0 = vrot.slane %v4521_v57, 4  ;;  %v4548_v38 = vshll.u32 %v15219_v47, 16 }
  0xee   :  { %v15184_v60 = vpop.f32.mrb[10].mxu1  ;;  %v15186_v8 = vpop.f32.mrb[10].mxu0  ;;  %26 = vst.msk [vmem:[#allocation2 + $0x18] sm:$0xff] %vm22_vm9, %v13911_v3  ;;  %27 = vst.msk [vmem:[#allocation2 + $0x20] sm:$0xff] %vm22_vm9, %v13911_v3  ;;  %v11938_v45 = vld [vmem:[%s21441_s0 + $0x50] sm:$0x1]  ;;  %13394 = vmatprep.mubr.msk.bf16.mxu1 %vm376_vm2, %v15208_v39 }
  0xef   :  { %v15194_v33 = vpop.f32.mrb[11].mxu1  ;;  %v15196_v34 = vpop.f32.mrb[11].mxu0  ;;  %28 = vst.msk [vmem:[#allocation2 + $0x28] sm:$0xff] %vm22_vm9, %v13911_v3  ;;  %29 = vst.msk [vmem:[#allocation2 + $0x30] sm:$0xff] %vm22_vm9, %v13911_v3  ;;  %v4532_v7 = vrot.slane %v4531_v62, 4  ;;  %v4544_v29 = vrot.slane %v4542_v5, 5  ;;  %13456 = vmatprep.mubr.msk.bf16.mxu0 %vm376_vm2, %v12020_v56  ;;  %v4527_v59 = vsel %vm14066_vm7, %v4522_v0, %v15214_v46 }
  0xf0   :  { %30 = vst.msk [vmem:[#allocation2 + $0x38] sm:$0xff] %vm22_vm9, %v13911_v3  ;;  %31 = vst.msk [vmem:[#allocation2 + $0x40] sm:$0xff] %vm22_vm9, %v13911_v3  ;;  %v4552_v17 = vshrl.u32 %v15219_v47, 16  ;;  %v4558_v54 = vshll.u32 %v15228_v50, 16  ;;  %v15428_v35 = vrot.slane %v4548_v38, 5  ;;  %v4563_v36 = vshrl.u32 %v15240_v61, 16 }
  0xf1   :  { %32 = vst.msk [vmem:[#allocation2 + $0x48] sm:$0xff] %vm22_vm9, %v13911_v3  ;;  %33 = vst.msk [vmem:[#allocation2 + $0x50] sm:$0xff] %vm22_vm9, %v13911_v3  ;;  %v4566_v39 = vshll.u32 %v15240_v61, 16  ;;  %v4537_v47 = vsel %vm14066_vm7, %v4532_v7, %v15249_v63  ;;  %v4545_v44 = vor.u32 %v4544_v29, %v4541_v15  ;;  %v15442_v46 = vld [vmem:[%s21441_s0 + $0x54] sm:$0xf]  ;;  %v13824_v50 = vld [vmem:[%s21441_s0 + $0x48] sm:$0xff]  }
  0xf2   :  { %34 = vst.msk [vmem:[#allocation2 + $0x58] sm:$0xff] %vm22_vm9, %v13911_v3  ;;  %35 = vst.msk [vmem:[#allocation2 + $0x60] sm:$0xff] %vm22_vm9, %v13911_v3  ;;  %v4554_v49 = vrot.slane %v4552_v17, 4  ;;  %v4560_v48 = vrot.slane %v4558_v54, 5  ;;  %v12021_v53 = vcombine.low %v4527_v59, %v4537_v47  ;;  %v4565_v57 = vrot.slane %v4563_v36, 4  ;;  %v13825_v13 = vld [vmem:[%s21441_s0 + $0x54] sm:$0xff]  }
  0xf3   :  { %36 = vst.msk [vmem:[#allocation2 + $0x68] sm:$0xff] %vm22_vm9, %v13911_v3  ;;  %37 = vst.msk [vmem:[#allocation2 + $0x70] sm:$0xff] %vm22_vm9, %v13911_v3  ;;  %v4568_v58 = vrot.slane %v4566_v39, 5  ;;  %v4572_v61 = vshll.u32 %v11937_v6, 16  ;;  %v4546_v62 = vrot.slane %v4545_v44, 4  ;;  %v4582_v5 = vshll.u32 %v11938_v45, 16 }
  0xf4   :  { %38 = vst.msk [vmem:[#allocation2 + $0x78] sm:$0xff] %vm22_vm9, %v13911_v3  ;;  %39 = vst.msk [vmem:[#allocation2 + $0x80] sm:$0xff] %vm22_vm9, %v13911_v3  ;;  %v15383_v40 = vpop.f32.mrb[12].mxu1  ;;  %v15385_v55 = vpop.f32.mrb[12].mxu0  ;;  %v4555_v63 = vor.u32 %v4554_v49, %v15428_v35  ;;  %v185_v56 = vld [vmem:[#allocation2 + $0x110] sm:$0xff]  ;;  %v4587_v29 = vshrl.u32 %v15442_v46, 16  ;;  %13457 = vmatmul.mubr.msk.bf16.gmra.mrb[100].mxu0 %vm376_vm2, %v12021_v53 }
  0xf5   :  { %40 = vst.msk [vmem:[#allocation2 + $0x88] sm:$0xff] %vm22_vm9, %v13911_v3  ;;  %41 = vst.msk [vmem:[#allocation2 + $0x90] sm:$0xff] %vm22_vm9, %v13911_v3  ;;  %v15409_v14 = vpop.f32.mrb[13].mxu1  ;;  %v15411_v25 = vpop.f32.mrb[13].mxu0  ;;  %v4569_v38 = vor.u32 %v4568_v58, %v4565_v57  ;;  %v15451_v7 = vrot.slane %v4572_v61, 5  ;;  %v4590_v17 = vshll.u32 %v15442_v46, 16  ;;  %v803_v54 = vadd.f32 %v15049_v18, %v185_v56  ;;  %13395 = vmatmul.mubr.msk.bf16.gmra.mrb[104].mxu1 %vm376_vm2, %v13824_v50 }
  0xf6   :  { %42 = vst.msk [vmem:[#allocation2 + $0x98] sm:$0xff] %vm22_vm9, %v13911_v3  ;;  %43 = vst.msk [vmem:[#allocation2 + $0xa0] sm:$0xff] %vm22_vm9, %v13911_v3  ;;  %v15420_v16 = vpop.f32.mrb[14].mxu1  ;;  %v15422_v51 = vpop.f32.mrb[14].mxu0  ;;  %v4551_v45 = vsel %vm14066_vm7, %v4546_v62, %v15428_v35  ;;  %v153_v39 = vld [vmem:[#allocation2 + $0x10] sm:$0xff]  ;;  %v4556_v18 = vrot.slane %v4555_v63, 4  ;;  %13398 = vmatprep.mubr.msk.bf16.mxu1 %vm376_vm2, %v13825_v13 }
  0xf7   :  { %44 = vst.msk [vmem:[#allocation2 + $0xa8] sm:$0xff] %vm22_vm9, %v13911_v3  ;;  %45 = vst.msk [vmem:[#allocation2 + $0xb0] sm:$0xff] %vm22_vm9, %v13911_v3  ;;  %v15432_v41 = vpop.f32.mrb[15].mxu1  ;;  %v15434_v43 = vpop.f32.mrb[15].mxu0  ;;  %v4570_v53 = vrot.slane %v4569_v38, 4  ;;  %v151_v57 = vld [vmem:[#allocation2] sm:$0xff] }
  0xf8   :  { %46 = vst.msk [vmem:[#allocation2 + $0xb8] sm:$0xff] %vm22_vm9, %v13911_v3  ;;  %47 = vst.msk [vmem:[#allocation2 + $0xc0] sm:$0xff] %vm22_vm9, %v13911_v3  ;;  %v154_v58 = vld [vmem:[#allocation2 + $0x18] sm:$0xff]  ;;  %v4584_v50 = vrot.slane %v4582_v5, 5  ;;  %v769_v62 = vadd.f32 %v15058_v24, %v151_v57  ;;  %v4561_v38 = vsel %vm14066_vm7, %v4556_v18, %v4560_v48  ;;  %v11942_v5 = vld [vmem:[%s21441_s0 + $0x60] sm:$0xf] }
  0xf9   :  { %48 = vst.msk [vmem:[#allocation2 + $0xc8] sm:$0xff] %vm22_vm9, %v13911_v3  ;;  %49 = vst.msk [vmem:[#allocation2 + $0xd0] sm:$0xff] %vm22_vm9, %v13911_v3  ;;  %v11940_v35 = vld [vmem:[%s21441_s0 + $0x58] sm:$0xf]  ;;  %v11941_v13 = vld [vmem:[%s21441_s0 + $0x5c] sm:$0x1]  ;;  %v12022_v48 = vcombine.low %v4551_v45, %v4561_v38 }
  0xfa   :  { %50 = vst.msk [vmem:[#allocation2 + $0xd8] sm:$0xff] %vm22_vm9, %v13911_v3  ;;  %51 = vst.msk [vmem:[#allocation2 + $0xe0] sm:$0xff] %vm22_vm9, %v13911_v3  ;;  %v13826_v45 = vld [vmem:[%s21441_s0 + $0x60] sm:$0xff]   ;;  %v4592_v18 = vrot.slane %v4590_v17, 5  ;;  %v4606_v57 = vshll.u32 %v11941_v13, 16 }
  0xfb   :  { %52 = vst.msk [vmem:[#allocation2 + $0xe8] sm:$0xff] %vm22_vm9, %v13911_v3  ;;  %53 = vst.msk [vmem:[#allocation2 + $0xf0] sm:$0xff] %vm22_vm9, %v13911_v3  ;;  %13460 = vmatprep.mubr.msk.bf16.mxu0 %vm376_vm2, %v12022_v48  ;;  %v11944_v17 = vld [vmem:[%s21441_s0 + $0x68] sm:$0x1]  ;;  %v155_v38 = vld [vmem:[#allocation2 + $0x20] sm:$0xff] }
  0xfc   :  { %54 = vst.msk [vmem:[#allocation2 + $0xf8] sm:$0xff] %vm22_vm9, %v13911_v3  ;;  %55 = vst.msk [vmem:[#allocation2 + $0x100] sm:$0xff] %vm22_vm9, %v13911_v3  ;;  %v15462_v44 = vpop.f32.mrb[16].mxu1  ;;  %v15464_v49 = vpop.f32.mrb[16].mxu0 }
  0xfd   :  { %56 = vst.msk [vmem:[#allocation2 + $0x108] sm:$0xff] %vm22_vm9, %v13911_v3  ;;  %58 = vst.msk [vmem:[#allocation2 + $0x118] sm:$0xff] %vm22_vm9, %v13911_v3  ;;  %13399 = vmatmul.mubr.msk.bf16.gmra.mrb[108].mxu1 %vm376_vm2, %v13826_v45  ;;  %v158_v45 = vld [vmem:[#allocation2 + $0x38] sm:$0xff] }
  0xfe   :  { %59 = vst.msk [vmem:[#allocation2 + $0x120] sm:$0xff] %vm22_vm9, %v13911_v3  ;;  %60 = vst.msk [vmem:[#allocation2 + $0x128] sm:$0xff] %vm22_vm9, %v13911_v3 }
  0xff   :  { %61 = vst.msk [vmem:[#allocation2 + $0x130] sm:$0xff] %vm22_vm9, %v13911_v3  ;;  %62 = vst.msk [vmem:[#allocation2 + $0x138] sm:$0xff] %vm22_vm9, %v13911_v3 }
 0x100   :  { %63 = vst.msk [vmem:[#allocation2 + $0x140] sm:$0xff] %vm22_vm9, %v13911_v3  ;;  %64 = vst.msk [vmem:[#allocation2 + $0x148] sm:$0xff] %vm22_vm9, %v13911_v3 }
 0x101   :  { %65 = vst.msk [vmem:[#allocation2 + $0x150] sm:$0xff] %vm22_vm9, %v13911_v3  ;;  %66 = vst.msk [vmem:[#allocation2 + $0x158] sm:$0xff] %vm22_vm9, %v13911_v3 }
 0x102   :  { %67 = vst.msk [vmem:[#allocation2 + $0x160] sm:$0xff] %vm22_vm9, %v13911_v3  ;;  %68 = vst.msk [vmem:[#allocation2 + $0x168] sm:$0xff] %vm22_vm9, %v13911_v3 }
 0x103   :  { %69 = vst.msk [vmem:[#allocation2 + $0x170] sm:$0xff] %vm22_vm9, %v13911_v3  ;;  %70 = vst.msk [vmem:[#allocation2 + $0x178] sm:$0xff] %vm22_vm9, %v13911_v3  ;;  %v183_v0 = vld [vmem:[#allocation2 + $0x100] sm:$0xff] }
 0x104   :  { %71 = vst.msk [vmem:[#allocation2 + $0x180] sm:$0xff] %vm22_vm9, %v13911_v3  ;;  %72 = vst.msk [vmem:[#allocation2 + $0x188] sm:$0xff] %vm22_vm9, %v13911_v3  ;;  %v186_v15 = vld [vmem:[#allocation2 + $0x118] sm:$0xff]  ;;  %v801_v59 = vadd.f32 %v15056_v23, %v183_v0  ;;  %v15478_v0 = vpop.f32.mrb[17].mxu1 }
 0x105   :  { %73 = vst.msk [vmem:[#allocation2 + $0x190] sm:$0xff] %vm22_vm9, %v13911_v3  ;;  %74 = vst.msk [vmem:[#allocation2 + $0x198] sm:$0xff] %vm22_vm9, %v13911_v3  ;;  %v804_v36 = vadd.f32 %v15062_v30, %v186_v15  ;;  %v187_v30 = vld [vmem:[#allocation2 + $0x120] sm:$0xff]  ;;  %v188_v56 = vld [vmem:[#allocation2 + $0x128] sm:$0xff]  ;;  %v15480_v15 = vpop.f32.mrb[17].mxu0 }
 0x106   :  { %75 = vst.msk [vmem:[#allocation2 + $0x1a0] sm:$0xff] %vm22_vm9, %v13911_v3  ;;  %76 = vst.msk [vmem:[#allocation2 + $0x1a8] sm:$0xff] %vm22_vm9, %v13911_v3  ;;  %v189_v47 = vld [vmem:[#allocation2 + $0x130] sm:$0xff]  ;;  %v190_v63 = vld [vmem:[#allocation2 + $0x138] sm:$0xff]  ;;  %v805_v24 = vadd.f32 %v15121_v37, %v187_v30  ;;  %v772_v37 = vadd.f32 %v15064_v32, %v154_v58  ;;  %v806_v32 = vadd.f32 %v15130_v27, %v188_v56  ;;  %v4611_v30 = vshrl.u32 %v11942_v5, 16 }
 0x107   :  { %77 = vst.msk [vmem:[#allocation2 + $0x1b0] sm:$0xff] %vm22_vm9, %v13911_v3  ;;  %78 = vst.msk [vmem:[#allocation2 + $0x1b8] sm:$0xff] %vm22_vm9, %v13911_v3  ;;  %v807_v61 = vadd.f32 %v15113_v9, %v189_v47  ;;  %v4614_v58 = vshll.u32 %v11942_v5, 16  ;;  %v4608_v56 = vrot.slane %v4606_v57, 5  ;;  %v191_v48 = vld [vmem:[#allocation2 + $0x140] sm:$0xff]  ;;  %v773_v57 = vadd.f32 %v15123_v12, %v155_v38 }
 0x108   :  { %79 = vst.msk [vmem:[#allocation2 + $0x1c0] sm:$0xff] %vm22_vm9, %v13911_v3  ;;  %80 = vst.msk [vmem:[#allocation2 + $0x1c8] sm:$0xff] %vm22_vm9, %v13911_v3  ;;  %v11945_v5 = vld [vmem:[%s21441_s0 + $0x6c] sm:$0xf]  ;;  %v11947_v12 = vld [vmem:[%s21441_s0 + $0x74] sm:$0x1] }
 0x109   :  { %81 = vst.msk [vmem:[#allocation2 + $0x1d0] sm:$0xff] %vm22_vm9, %v13911_v3  ;;  %82 = vst.msk [vmem:[#allocation2 + $0x1d8] sm:$0xff] %vm22_vm9, %v13911_v3 }
 0x10a   :  { %83 = vst.msk [vmem:[#allocation2 + $0x1e0] sm:$0xff] %vm22_vm9, %v13911_v3  ;;  %84 = vst.msk [vmem:[#allocation2 + $0x1e8] sm:$0xff] %vm22_vm9, %v13911_v3 }
 0x10b   :  { %85 = vst.msk [vmem:[#allocation2 + $0x1f0] sm:$0xff] %vm22_vm9, %v13911_v3  ;;  %86 = vst.msk [vmem:[#allocation2 + $0x1f8] sm:$0xff] %vm22_vm9, %v13911_v3  ;;  %v4576_v3 = vshrl.u32 %v11937_v6, 16  ;;  %v184_v6 = vld [vmem:[#allocation2 + $0x108] sm:$0xff] }
 0x10c   :  { %v802_v46 = vadd.f32 %v15068_v42, %v184_v6  ;;  %867 = vst.msk [vmem:[#allocation2 + $0x110] sm:$0xff] %vm22_vm9, %v803_v54  ;;  %865 = vst.msk [vmem:[#allocation2 + $0x100] sm:$0xff] %vm22_vm9, %v801_v59  ;;  %v771_v42 = vadd.f32 %v15051_v11, %v153_v39  ;;  %v4575_v11 = vsel %vm14066_vm7, %v4570_v53, %v15451_v7  ;;  %v15496_v54 = vpop.f32.mrb[18].mxu1  ;;  %v15498_v59 = vpop.f32.mrb[18].mxu0  ;;  %v11943_v6 = vld [vmem:[%s21441_s0 + $0x64] sm:$0xf] }
 0x10d   :  { %v4578_v23 = vrot.slane %v4576_v3, 4  ;;  %868 = vst.msk [vmem:[#allocation2 + $0x118] sm:$0xff] %vm22_vm9, %v804_v36  ;;  %v152_v3 = vld [vmem:[#allocation2 + $0x8] sm:$0xff]  ;;  %871 = vst.msk [vmem:[#allocation2 + $0x130] sm:$0xff] %vm22_vm9, %v807_v61  ;;  %v15509_v39 = vpop.f32.mrb[19].mxu1  ;;  %v15511_v47 = vpop.f32.mrb[19].mxu0 }
 0x10e   :  { %866 = vst.msk [vmem:[#allocation2 + $0x108] sm:$0xff] %vm22_vm9, %v802_v46  ;;  %835 = vst.msk [vmem:[#allocation2 + $0x10] sm:$0xff] %vm22_vm9, %v771_v42  ;;  %v770_v36 = vadd.f32 %v15070_v19, %v152_v3  ;;  %v13827_v19 = vld [vmem:[%s21441_s0 + $0x6c] sm:$0xff]   ;;  %v4596_v53 = vshll.u32 %v11940_v35, 16  ;;  %v4620_v42 = vshll.u32 %v11943_v6, 16 }
 0x10f   :  { %v4579_v9 = vor.u32 %v4578_v23, %v15451_v7  ;;  %833 = vst.msk [vmem:[#allocation2] sm:$0xff] %vm22_vm9, %v769_v62  ;;  %v808_v7 = vadd.f32 %v15126_v21, %v190_v63  ;;  %869 = vst.msk [vmem:[#allocation2 + $0x120] sm:$0xff] %vm22_vm9, %v805_v24  ;;  %v4589_v21 = vrot.slane %v4587_v29, 4  ;;  %v4600_v23 = vshrl.u32 %v11940_v35, 16  ;;  %v157_v61 = vld [vmem:[#allocation2 + $0x30] sm:$0xff]  ;;  %13402 = vmatprep.mubr.msk.bf16.mxu1 %vm376_vm2, %v13827_v19 }
 0x110   :  { %836 = vst.msk [vmem:[#allocation2 + $0x18] sm:$0xff] %vm22_vm9, %v772_v37  ;;  %834 = vst.msk [vmem:[#allocation2 + $0x8] sm:$0xff] %vm22_vm9, %v770_v36  ;;  %v4598_v63 = vrot.slane %v4596_v53, 5  ;;  %v193_v35 = vld [vmem:[#allocation2 + $0x150] sm:$0xff]  ;;  %v4616_v24 = vrot.slane %v4614_v58, 5  ;;  %v15532_v13 = vrot.slane %v4620_v42, 5  ;;  %v775_v36 = vadd.f32 %v15115_v10, %v157_v61 }
 0x111   :  { %v4580_v46 = vrot.slane %v4579_v9, 4  ;;  %872 = vst.msk [vmem:[#allocation2 + $0x138] sm:$0xff] %vm22_vm9, %v808_v7  ;;  %870 = vst.msk [vmem:[#allocation2 + $0x128] sm:$0xff] %vm22_vm9, %v806_v32  ;;  %v4593_v29 = vor.u32 %v4592_v18, %v4589_v21  ;;  %v4602_v3 = vrot.slane %v4600_v23, 4  ;;  %v4624_v37 = vshrl.u32 %v11943_v6, 16  ;;  %v156_v32 = vld [vmem:[#allocation2 + $0x28] sm:$0xff] }
 0x112   :  { %v4630_v7 = vshll.u32 %v11944_v17, 16  ;;  %v15540_v21 = vpop.f32.mrb[20].mxu1  ;;  %v811_v23 = vadd.f32 %v15161_v1, %v193_v35  ;;  %v11946_v6 = vld [vmem:[%s21441_s0 + $0x70] sm:$0xf]  ;;  %v15551_v10 = vpop.f32.mrb[20].mxu0  ;;  %839 = vst.msk [vmem:[#allocation2 + $0x30] sm:$0xff] %vm22_vm9, %v775_v36  ;;  %v809_v58 = vadd.f32 %v15173_v20, %v191_v48  ;;  %v776_v61 = vadd.f32 %v15128_v22, %v158_v45 }
 0x113   :  { %v4585_v27 = vsel %vm14066_vm7, %v4580_v46, %v4584_v50  ;;  %v4594_v9 = vrot.slane %v4593_v29, 4  ;;  %v4613_v50 = vrot.slane %v4611_v30, 4  ;;  %v194_v46 = vld [vmem:[#allocation2 + $0x158] sm:$0xff]  ;;  %v192_v30 = vld [vmem:[#allocation2 + $0x148] sm:$0xff]  ;;  %v15549_v19 = vpop.f32.mrb[21].mxu1  ;;  %v4626_v29 = vrot.slane %v4624_v37, 4 }
 0x114   :  { %v12023_v62 = vcombine.low %v4575_v11, %v4585_v27  ;;  %v4603_v11 = vor.u32 %v4602_v3, %v4598_v63  ;;  %v4632_v17 = vrot.slane %v4630_v7, 5  ;;  %v13828_v1 = vld [vmem:[%s21441_s0 + $0x78] sm:$0xff]   ;;  %875 = vst.msk [vmem:[#allocation2 + $0x150] sm:$0xff] %vm22_vm9, %v811_v23  ;;  %837 = vst.msk [vmem:[#allocation2 + $0x20] sm:$0xff] %vm22_vm9, %v773_v57  ;;  %v15569_v3 = vpop.f32.mrb[22].mxu1  ;;  %v15571_v35 = vpop.f32.mrb[21].mxu0  ;;  %v810_v22 = vadd.f32 %v15194_v33, %v192_v30 }
 0x115   :  { %v4599_v18 = vsel %vm14066_vm7, %v4594_v9, %v4598_v63  ;;  %v4617_v53 = vor.u32 %v4616_v24, %v4613_v50  ;;  %v774_v63 = vadd.f32 %v15132_v28, %v156_v32  ;;  %v11948_v20 = vld [vmem:[%s21441_s0 + $0x78] sm:$0xf]  ;;  %v4627_v9 = vor.u32 %v4626_v29, %v15532_v13  ;;  %873 = vst.msk [vmem:[#allocation2 + $0x140] sm:$0xff] %vm22_vm9, %v809_v58  ;;  %v13829_v28 = vld [vmem:[%s21441_s0 + $0x84] sm:$0xff]   ;;  %v11949_v50 = vld [vmem:[%s21441_s0 + $0x7c] sm:$0xf] }
 0x116   :  { %13461 = vmatmul.mubr.msk.bf16.gmra.mrb[104].mxu0 %vm376_vm2, %v12023_v62  ;;  %v4604_v27 = vrot.slane %v4603_v11, 4  ;;  %v812_v62 = vadd.f32 %v15184_v60, %v194_v46  ;;  %v4635_v60 = vshrl.u32 %v11945_v5, 16  ;;  %v15584_v24 = vpop.f32.mrb[23].mxu1  ;;  %v15586_v48 = vpop.f32.mrb[22].mxu0  ;;  %840 = vst.msk [vmem:[#allocation2 + $0x38] sm:$0xff] %vm22_vm9, %v776_v61  ;;  %v4638_v33 = vshll.u32 %v11945_v5, 16  ;;  %13403 = vmatmul.mubr.msk.bf16.gmra.mrb[112].mxu1 %vm376_vm2, %v13828_v1 }
 0x117   :  { %v4618_v42 = vrot.slane %v4617_v53, 4  ;;  %838 = vst.msk [vmem:[#allocation2 + $0x28] sm:$0xff] %vm22_vm9, %v774_v63  ;;  %v4644_v37 = vshll.u32 %v11946_v6, 16  ;;  %v11950_v7 = vld [vmem:[%s21441_s0 + $0x80] sm:$0x1]  ;;  %v15597_v36 = vpop.f32.mrb[23].mxu0  ;;  %13406 = vmatprep.mubr.msk.bf16.mxu1 %vm376_vm2, %v13829_v28 }
 0x118   :  { %v4609_v38 = vsel %vm14066_vm7, %v4604_v27, %v4608_v56  ;;  %876 = vst.msk [vmem:[#allocation2 + $0x158] sm:$0xff] %vm22_vm9, %v812_v62  ;;  %v4628_v45 = vrot.slane %v4627_v9, 4  ;;  %874 = vst.msk [vmem:[#allocation2 + $0x148] sm:$0xff] %vm22_vm9, %v810_v22  ;;  %v4637_v46 = vrot.slane %v4635_v60, 4  ;;  %v4648_v32 = vshrl.u32 %v11946_v6, 16  ;;  %v161_v30 = vld [vmem:[#allocation2 + $0x50] sm:$0xff] }
 0x119   :  { %v12024_v56 = vcombine.low %v4599_v18, %v4609_v38  ;;  %v4623_v11 = vsel %vm14066_vm7, %v4618_v42, %v15532_v13  ;;  %v4654_v13 = vshll.u32 %v11947_v12, 16  ;;  %v15600_v18 = vpop.f32.mrb[24].mxu1  ;;  %v4640_v5 = vrot.slane %v4638_v33, 5  ;;  %v197_v42 = vld [vmem:[#allocation2 + $0x170] sm:$0xff]  ;;  %v159_v61 = vld [vmem:[#allocation2 + $0x40] sm:$0xff] }
 0x11a   :  { %v4646_v53 = vrot.slane %v4644_v37, 5  ;;  %v4659_v23 = vshrl.u32 %v11948_v20, 16  ;;  %v4662_v57 = vshll.u32 %v11948_v20, 16  ;;  %v15604_v27 = vpop.f32.mrb[25].mxu1  ;;  %v4633_v29 = vsel %vm14066_vm7, %v4628_v45, %v4632_v17  ;;  %v13830_v20 = vld [vmem:[%s21441_s0 + $0x90] sm:$0xff]   ;;  %v15616_v17 = vpop.f32.mrb[24].mxu0 }
 0x11b   :  { %13464 = vmatprep.mubr.msk.bf16.mxu0 %vm376_vm2, %v12024_v56  ;;  %v4650_v6 = vrot.slane %v4648_v32, 4  ;;  %v4656_v58 = vrot.slane %v4654_v13, 5  ;;  %v4668_v12 = vshll.u32 %v11949_v50, 16  ;;  %v15609_v62 = vpop.f32.mrb[26].mxu1  ;;  %v12025_v1 = vcombine.low %v4623_v11, %v4633_v29  ;;  %21520 = vst [vmem:[#allocation8_spill] sm:$0xff] %v15616_v17  ;;  %v195_v37 = vld [vmem:[#allocation2 + $0x160] sm:$0xff] }
 0x11c   :  { %v4641_v63 = vor.u32 %v4640_v5, %v4637_v46  ;;  %v4661_v38 = vrot.slane %v4659_v23, 4  ;;  %v4664_v9 = vrot.slane %v4662_v57, 5  ;;  %v15614_v22 = vpop.f32.mrb[27].mxu1  ;;  %v4672_v56 = vshrl.u32 %v11949_v50, 16  ;;  %v162_v45 = vld [vmem:[#allocation2 + $0x58] sm:$0xff]  ;;  %v196_v57 = vld [vmem:[#allocation2 + $0x168] sm:$0xff] }
 0x11d   :  { %v4651_v28 = vor.u32 %v4650_v6, %v4646_v53  ;;  %v15618_v60 = vrot.slane %v4668_v12, 5  ;;  %v4678_v33 = vshll.u32 %v11950_v7, 16  ;;  %v13831_v11 = vld [vmem:[%s21441_s0 + $0x9c] sm:$0xff]   ;;  %v11951_v46 = vld [vmem:[%s21441_s0 + $0x84] sm:$0xf]  ;;  %v779_v5 = vadd.f32 %v15163_v2, %v161_v30  ;;  %v160_v7 = vld [vmem:[#allocation2 + $0x48] sm:$0xff] }
 0x11e   :  { %13465 = vmatmul.mubr.msk.bf16.gmra.mrb[108].mxu0 %vm376_vm2, %v12025_v1  ;;  %v4642_v32 = vrot.slane %v4641_v63, 4  ;;  %v4665_v13 = vor.u32 %v4664_v9, %v4661_v38  ;;  %v815_v23 = vadd.f32 %v15383_v40, %v197_v42  ;;  %v198_v50 = vld [vmem:[#allocation2 + $0x178] sm:$0xff]  ;;  %v4674_v6 = vrot.slane %v4672_v56, 4  ;;  %v15630_v26 = vpop.f32.mrb[25].mxu0  ;;  %v11952_v30 = vld [vmem:[%s21441_s0 + $0x88] sm:$0xf]  ;;  %13407 = vmatmul.mubr.msk.bf16.gmra.mrb[116].mxu1 %vm376_vm2, %v13830_v20 }
 0x11f   :  { %v4652_v29 = vrot.slane %v4651_v28, 4  ;;  %v4680_v12 = vrot.slane %v4678_v33, 5  ;;  %v777_v4 = vadd.f32 %v15175_v31, %v159_v61  ;;  %843 = vst.msk [vmem:[#allocation2 + $0x50] sm:$0xff] %vm22_vm9, %v779_v5  ;;  %v813_v2 = vadd.f32 %v15409_v14, %v195_v37  ;;  %v11953_v14 = vld [vmem:[%s21441_s0 + $0x8c] sm:$0x1]  ;;  %v15653_v63 = vpop.f32.mrb[28].mxu1  ;;  %13410 = vmatprep.mubr.msk.bf16.mxu1 %vm376_vm2, %v13831_v11 }
 0x120   :  { %v4647_v17 = vsel %vm14066_vm7, %v4642_v32, %v4646_v53  ;;  %v4666_v1 = vrot.slane %v4665_v13, 4  ;;  %879 = vst.msk [vmem:[#allocation2 + $0x170] sm:$0xff] %vm22_vm9, %v815_v23  ;;  %v780_v40 = vadd.f32 %v15186_v8, %v162_v45  ;;  %v4675_v42 = vor.u32 %v4674_v6, %v15618_v60  ;;  %v11954_v8 = vld [vmem:[%s21441_s0 + $0x90] sm:$0xf]  ;;  %v15665_v9 = vpop.f32.mrb[29].mxu1  ;;  %v13832_v11 = vld [vmem:[%s21441_s0 + $0xa8] sm:$0xff]  }
 0x121   :  { %v4657_v31 = vsel %vm14066_vm7, %v4652_v29, %v4656_v58  ;;  %841 = vst.msk [vmem:[#allocation2 + $0x40] sm:$0xff] %vm22_vm9, %v777_v4  ;;  %v816_v53 = vadd.f32 %v15420_v16, %v198_v50  ;;  %v778_v61 = vadd.f32 %v15196_v34, %v160_v7  ;;  %877 = vst.msk [vmem:[#allocation2 + $0x160] sm:$0xff] %vm22_vm9, %v813_v2  ;;  %v4683_v16 = vshrl.u32 %v11951_v46, 16  ;;  %v11955_v58 = vld [vmem:[%s21441_s0 + $0x94] sm:$0xf]  ;;  %v15675_v37 = vpop.f32.mrb[30].mxu1 }
 0x122   :  { %v12026_v38 = vcombine.low %v4647_v17, %v4657_v31  ;;  %v4671_v4 = vsel %vm14066_vm7, %v4666_v1, %v15618_v60  ;;  %844 = vst.msk [vmem:[#allocation2 + $0x58] sm:$0xff] %vm22_vm9, %v780_v40  ;;  %v814_v34 = vadd.f32 %v15432_v41, %v196_v57  ;;  %v15667_v17 = vpop.f32.mrb[26].mxu0  ;;  %v4676_v20 = vrot.slane %v4675_v42, 4  ;;  %v11956_v41 = vld [vmem:[%s21441_s0 + $0x98] sm:$0x1]  ;;  %v165_v33 = vld [vmem:[#allocation2 + $0x70] sm:$0xff] }
 0x123   :  { %880 = vst.msk [vmem:[#allocation2 + $0x178] sm:$0xff] %vm22_vm9, %v816_v53  ;;  %842 = vst.msk [vmem:[#allocation2 + $0x48] sm:$0xff] %vm22_vm9, %v778_v61  ;;  %v4686_v28 = vshll.u32 %v11951_v46, 16  ;;  %v4692_v60 = vshll.u32 %v11952_v30, 16  ;;  %v4696_v56 = vshrl.u32 %v11952_v30, 16  ;;  %v15677_v45 = vpop.f32.mrb[27].mxu0 }
 0x124   :  { %13468 = vmatprep.mubr.msk.bf16.mxu0 %vm376_vm2, %v12026_v38  ;;  %878 = vst.msk [vmem:[#allocation2 + $0x168] sm:$0xff] %vm22_vm9, %v814_v34  ;;  %v4685_v32 = vrot.slane %v4683_v16, 4  ;;  %v4702_v13 = vshll.u32 %v11953_v14, 16  ;;  %v4707_v46 = vshrl.u32 %v11954_v8, 16  ;;  %v4710_v5 = vshll.u32 %v11954_v8, 16  ;;  %v201_v23 = vld [vmem:[#allocation2 + $0x190] sm:$0xff] }
 0x125   :  { %v15684_v50 = vpop.f32.mrb[31].mxu1  ;;  %v4681_v7 = vsel %vm14066_vm7, %v4676_v20, %v4680_v12  ;;  %v4688_v57 = vrot.slane %v4686_v28, 5  ;;  %v4694_v29 = vrot.slane %v4692_v60, 5  ;;  %v4698_v6 = vrot.slane %v4696_v56, 4  ;;  %v15688_v1 = vpop.f32.mrb[28].mxu0  ;;  %v13833_v42 = vld [vmem:[%s21441_s0 + $0xb4] sm:$0xff]  }
 0x126   :  { %v12027_v2 = vcombine.low %v4671_v4, %v4681_v7  ;;  %v4704_v40 = vrot.slane %v4702_v13, 5  ;;  %v4709_v30 = vrot.slane %v4707_v46, 4  ;;  %v4712_v31 = vrot.slane %v4710_v5, 5  ;;  %v163_v38 = vld [vmem:[#allocation2 + $0x60] sm:$0xff]  ;;  %v166_v12 = vld [vmem:[#allocation2 + $0x78] sm:$0xff]  ;;  %v164_v56 = vld [vmem:[#allocation2 + $0x68] sm:$0xff]  ;;  %13411 = vmatmul.mubr.msk.bf16.gmra.mrb[120].mxu1 %vm376_vm2, %v13832_v11 }
 0x127   :  { %v4689_v53 = vor.u32 %v4688_v57, %v4685_v32  ;;  %v4699_v61 = vor.u32 %v4698_v6, %v4694_v29  ;;  %v4716_v14 = vshll.u32 %v11955_v58, 16  ;;  %v4720_v8 = vshrl.u32 %v11955_v58, 16  ;;  %v199_v34 = vld [vmem:[#allocation2 + $0x180] sm:$0xff]  ;;  %v202_v60 = vld [vmem:[#allocation2 + $0x198] sm:$0xff]  ;;  %13414 = vmatprep.mubr.msk.bf16.mxu1 %vm376_vm2, %v13833_v42 }
 0x128   :  { %13469 = vmatmul.mubr.msk.bf16.gmra.mrb[112].mxu0 %vm376_vm2, %v12027_v2  ;;  %v4713_v16 = vor.u32 %v4712_v31, %v4709_v30  ;;  %v4726_v20 = vshll.u32 %v11956_v41, 16  ;;  %v783_v4 = vadd.f32 %v15385_v55, %v165_v33  ;;  %v819_v28 = vadd.f32 %v15462_v44, %v201_v23  ;;  %v11957_v32 = vld [vmem:[%s21441_s0 + $0x9c] sm:$0xf]  ;;  %v200_v41 = vld [vmem:[#allocation2 + $0x188] sm:$0xff]  ;;  %v11958_v33 = vld [vmem:[%s21441_s0 + $0xa0] sm:$0xf] }
 0x129   :  { %v4690_v13 = vrot.slane %v4689_v53, 4  ;;  %v4700_v46 = vrot.slane %v4699_v61, 4  ;;  %v4718_v58 = vrot.slane %v4716_v14, 5  ;;  %v4722_v5 = vrot.slane %v4720_v8, 4  ;;  %v15719_v30 = vpop.f32.mrb[32].mxu1  ;;  %v15721_v31 = vpop.f32.mrb[29].mxu0 }
 0x12a   :  { %v4714_v7 = vrot.slane %v4713_v16, 4  ;;  %v4728_v57 = vrot.slane %v4726_v20, 5  ;;  %847 = vst.msk [vmem:[#allocation2 + $0x70] sm:$0xff] %vm22_vm9, %v783_v4  ;;  %883 = vst.msk [vmem:[#allocation2 + $0x190] sm:$0xff] %vm22_vm9, %v819_v28  ;;  %v781_v55 = vadd.f32 %v15411_v25, %v163_v38  ;;  %v817_v44 = vadd.f32 %v15478_v0, %v199_v34  ;;  %v11959_v25 = vld [vmem:[%s21441_s0 + $0xa4] sm:$0x1] }
 0x12b   :  { %v4695_v23 = vsel %vm14066_vm7, %v4690_v13, %v4694_v29  ;;  %v4705_v11 = vsel %vm14066_vm7, %v4700_v46, %v4704_v40  ;;  %v4723_v6 = vor.u32 %v4722_v5, %v4718_v58  ;;  %v784_v2 = vadd.f32 %v15422_v51, %v166_v12  ;;  %v11960_v0 = vld [vmem:[%s21441_s0 + $0xa8] sm:$0xf]  ;;  %v13834_v53 = vld [vmem:[%s21441_s0 + $0xc0] sm:$0xff]   ;;  %v11961_v61 = vld [vmem:[%s21441_s0 + $0xac] sm:$0xf]  ;;  %v15735_v14 = vpop.f32.mrb[33].mxu1 }
 0x12c   :  { %v12028_v29 = vcombine.low %v4695_v23, %v4705_v11  ;;  %v4719_v40 = vsel %vm14066_vm7, %v4714_v7, %v4718_v58  ;;  %845 = vst.msk [vmem:[#allocation2 + $0x60] sm:$0xff] %vm22_vm9, %v781_v55  ;;  %881 = vst.msk [vmem:[#allocation2 + $0x180] sm:$0xff] %vm22_vm9, %v817_v44  ;;  %v820_v51 = vadd.f32 %v15496_v54, %v202_v60  ;;  %v15737_v8 = vpop.f32.mrb[30].mxu0  ;;  %v4731_v54 = vshrl.u32 %v11957_v32, 16  ;;  %v169_v16 = vld [vmem:[#allocation2 + $0x90] sm:$0xff]  ;;  %v13835_v20 = vld [vmem:[%s21441_s0 + $0xe4] sm:$0xff]  }
 0x12d   :  { %v782_v42 = vadd.f32 %v15434_v43, %v164_v56  ;;  %v4724_v38 = vrot.slane %v4723_v6, 4  ;;  %848 = vst.msk [vmem:[#allocation2 + $0x78] sm:$0xff] %vm22_vm9, %v784_v2  ;;  %v818_v34 = vadd.f32 %v15509_v39, %v200_v41  ;;  %v4734_v12 = vshll.u32 %v11957_v32, 16  ;;  %v11962_v43 = vld [vmem:[%s21441_s0 + $0xb0] sm:$0x1]  ;;  %v15747_v4 = vpop.f32.mrb[34].mxu1 }
 0x12e   :  { %v15749_v28 = vpop.f32.mrb[31].mxu0  ;;  %13472 = vmatprep.mubr.msk.bf16.mxu0 %vm376_vm2, %v12028_v29  ;;  %884 = vst.msk [vmem:[#allocation2 + $0x198] sm:$0xff] %vm22_vm9, %v820_v51  ;;  %v4740_v39 = vshll.u32 %v11958_v33, 16  ;;  %v4744_v60 = vshrl.u32 %v11958_v33, 16  ;;  %v4750_v56 = vshll.u32 %v11959_v25, 16  ;;  %v4755_v32 = vshrl.u32 %v11960_v0, 16  ;;  %13415 = vmatmul.mubr.msk.bf16.gmra.mrb[124].mxu1 %vm376_vm2, %v13834_v53 }
 0x12f   :  { %846 = vst.msk [vmem:[#allocation2 + $0x68] sm:$0xff] %vm22_vm9, %v782_v42  ;;  %v15754_v13 = vpop.f32.mrb[35].mxu1  ;;  %v15756_v46 = vpop.f32.mrb[32].mxu0  ;;  %v4729_v58 = vsel %vm14066_vm7, %v4724_v38, %v4728_v57  ;;  %882 = vst.msk [vmem:[#allocation2 + $0x188] sm:$0xff] %vm22_vm9, %v818_v34  ;;  %v4733_v5 = vrot.slane %v4731_v54, 4  ;;  %v4736_v7 = vrot.slane %v4734_v12, 5  ;;  %v787_v38 = vadd.f32 %v15464_v49, %v169_v16  ;;  %13418 = vmatprep.mubr.msk.bf16.mxu1 %vm376_vm2, %v13835_v20 }
 0x130   :  { %21521 = vst [vmem:[#allocation9_spill] sm:$0xff] %v15754_v13  ;;  %21522 = vst [vmem:[#allocation10_spill] sm:$0xff] %v15756_v46  ;;  %v4758_v55 = vshll.u32 %v11960_v0, 16  ;;  %v205_v44 = vld [vmem:[#allocation2 + $0x1b0] sm:$0xff]  ;;  %v12029_v41 = vcombine.low %v4719_v40, %v4729_v58  ;;  %v4742_v23 = vrot.slane %v4740_v39, 5  ;;  %v4746_v11 = vrot.slane %v4744_v60, 4 }
 0x131   :  { %v4752_v6 = vrot.slane %v4750_v56, 5  ;;  %v15761_v33 = vpop.f32.mrb[33].mxu0  ;;  %v4737_v2 = vor.u32 %v4736_v7, %v4733_v5  ;;  %v4757_v25 = vrot.slane %v4755_v32, 4  ;;  %v4764_v51 = vshll.u32 %v11961_v61, 16  ;;  %v167_v42 = vld [vmem:[#allocation2 + $0x80] sm:$0xff]  ;;  %v15763_v13 = vpop.f32.mrb[36].mxu1 }
 0x132   :  { %v4760_v29 = vrot.slane %v4758_v55, 5  ;;  %v203_v46 = vld [vmem:[#allocation2 + $0x1a0] sm:$0xff]  ;;  %13473 = vmatmul.mubr.msk.bf16.gmra.mrb[116].mxu0 %vm376_vm2, %v12029_v41  ;;  %v4747_v57 = vor.u32 %v4746_v11, %v4742_v23  ;;  %v4768_v0 = vshrl.u32 %v11961_v61, 16  ;;  %v4774_v40 = vshll.u32 %v11962_v43, 16  ;;  %v170_v34 = vld [vmem:[#allocation2 + $0x98] sm:$0xff]  ;;  %v168_v12 = vld [vmem:[#allocation2 + $0x88] sm:$0xff] }
 0x133   :  { %v206_v54 = vld [vmem:[#allocation2 + $0x1b8] sm:$0xff]  ;;  %v11963_v39 = vld [vmem:[%s21441_s0 + $0xb4] sm:$0xf]  ;;  %v4738_v60 = vrot.slane %v4737_v2, 4  ;;  %v4766_v32 = vrot.slane %v4764_v51, 5  ;;  %v823_v58 = vadd.f32 %v15540_v21, %v205_v44  ;;  %851 = vst.msk [vmem:[#allocation2 + $0x90] sm:$0xff] %vm22_vm9, %v787_v38  ;;  %v785_v49 = vadd.f32 %v15480_v15, %v167_v42 }
 0x134   :  { %v4761_v56 = vor.u32 %v4760_v29, %v4757_v25  ;;  %v4748_v5 = vrot.slane %v4747_v57, 4  ;;  %v4770_v53 = vrot.slane %v4768_v0, 4  ;;  %v4776_v61 = vrot.slane %v4774_v40, 5  ;;  %v204_v43 = vld [vmem:[#allocation2 + $0x1a8] sm:$0xff]  ;;  %v15775_v16 = vpop.f32.mrb[37].mxu1  ;;  %v13836_v41 = vld [vmem:[%s21441_s0 + $0xf0] sm:$0xff]  }
 0x135   :  { %v4743_v7 = vsel %vm14066_vm7, %v4738_v60, %v4742_v23  ;;  %887 = vst.msk [vmem:[#allocation2 + $0x1b0] sm:$0xff] %vm22_vm9, %v823_v58  ;;  %v821_v21 = vadd.f32 %v15549_v19, %v203_v46  ;;  %v788_v20 = vadd.f32 %v15498_v59, %v170_v34  ;;  %v11964_v44 = vld [vmem:[%s21441_s0 + $0xb8] sm:$0xf]  ;;  %v11965_v15 = vld [vmem:[%s21441_s0 + $0xbc] sm:$0x1]  ;;  %849 = vst.msk [vmem:[#allocation2 + $0x80] sm:$0xff] %vm22_vm9, %v785_v49 }
 0x136   :  { %v4762_v55 = vrot.slane %v4761_v56, 4  ;;  %v4753_v23 = vsel %vm14066_vm7, %v4748_v5, %v4752_v6  ;;  %v4771_v11 = vor.u32 %v4770_v53, %v4766_v32  ;;  %v824_v59 = vadd.f32 %v15569_v3, %v206_v54  ;;  %v11966_v46 = vld [vmem:[%s21441_s0 + $0xc0] sm:$0xf]  ;;  %v15799_v2 = vpop.f32.mrb[38].mxu1  ;;  %v15801_v25 = vpop.f32.mrb[34].mxu0  ;;  %v173_v58 = vld [vmem:[#allocation2 + $0xb0] sm:$0xff]  ;;  %13419 = vmatmul.mubr.msk.bf16.gmra.mrb[128].mxu1 %vm376_vm2, %v13836_v41 }
 0x137   :  { %v786_v19 = vadd.f32 %v15511_v47, %v168_v12  ;;  %v12030_v29 = vcombine.low %v4743_v7, %v4753_v23  ;;  %885 = vst.msk [vmem:[#allocation2 + $0x1a0] sm:$0xff] %vm22_vm9, %v821_v21  ;;  %852 = vst.msk [vmem:[#allocation2 + $0x98] sm:$0xff] %vm22_vm9, %v788_v20  ;;  %v822_v3 = vadd.f32 %v15584_v24, %v204_v43  ;;  %v4779_v6 = vshrl.u32 %v11963_v39, 16  ;;  %v11967_v47 = vld [vmem:[%s21441_s0 + $0xc4] sm:$0xf]  ;;  %v13837_v42 = vld [vmem:[%s21441_s0 + $0xfc] sm:$0xff]  }
 0x138   :  { %v4767_v51 = vsel %vm14066_vm7, %v4762_v55, %v4766_v32  ;;  %v15814_v57 = vpop.f32.mrb[39].mxu1  ;;  %v15816_v0 = vpop.f32.mrb[35].mxu0  ;;  %v4772_v40 = vrot.slane %v4771_v11, 4  ;;  %888 = vst.msk [vmem:[#allocation2 + $0x1b8] sm:$0xff] %vm22_vm9, %v824_v59  ;;  %v4782_v38 = vshll.u32 %v11963_v39, 16  ;;  %v4788_v24 = vshll.u32 %v11964_v44, 16  ;;  %13422 = vmatprep.mubr.msk.bf16.mxu1 %vm376_vm2, %v13837_v42 }
 0x139   :  { %850 = vst.msk [vmem:[#allocation2 + $0x88] sm:$0xff] %vm22_vm9, %v786_v19  ;;  %v4792_v34 = vshrl.u32 %v11964_v44, 16  ;;  %v11968_v54 = vld [vmem:[%s21441_s0 + $0xc8] sm:$0x1]  ;;  %13476 = vmatprep.mubr.msk.bf16.mxu0 %vm376_vm2, %v12030_v29  ;;  %886 = vst.msk [vmem:[#allocation2 + $0x1a8] sm:$0xff] %vm22_vm9, %v822_v3  ;;  %v4781_v12 = vrot.slane %v4779_v6, 4  ;;  %v791_v6 = vadd.f32 %v15551_v10, %v173_v58 }
 0x13a   :  { %v4798_v60 = vshll.u32 %v11965_v15, 16  ;;  %v4803_v56 = vshrl.u32 %v11966_v46, 16  ;;  %v4806_v32 = vshll.u32 %v11966_v46, 16  ;;  %v4777_v5 = vsel %vm14066_vm7, %v4772_v40, %v4776_v61  ;;  %v209_v43 = vld [vmem:[#allocation2 + $0x1d0] sm:$0xff]  ;;  %v171_v7 = vld [vmem:[#allocation2 + $0xa0] sm:$0xff]  ;;  %v15828_v55 = vpop.f32.mrb[40].mxu1 }
 0x13b   :  { %v4784_v53 = vrot.slane %v4782_v38, 5  ;;  %v4790_v39 = vrot.slane %v4788_v24, 5  ;;  %v4794_v49 = vrot.slane %v4792_v34, 4  ;;  %v12031_v21 = vcombine.low %v4767_v51, %v4777_v5  ;;  %v15831_v15 = vpop.f32.mrb[36].mxu0  ;;  %v207_v46 = vld [vmem:[#allocation2 + $0x1c0] sm:$0xff]  ;;  %v174_v29 = vld [vmem:[#allocation2 + $0xb8] sm:$0xff] }
 0x13c   :  { %v4800_v20 = vrot.slane %v4798_v60, 5  ;;  %v4805_v44 = vrot.slane %v4803_v56, 4  ;;  %v4808_v23 = vrot.slane %v4806_v32, 5  ;;  %v4812_v61 = vshll.u32 %v11967_v47, 16  ;;  %v13838_v41 = vld [vmem:[%s21441_s0 + $0x108] sm:$0xff]   ;;  %v210_v40 = vld [vmem:[#allocation2 + $0x1d8] sm:$0xff] }
 0x13d   :  { %v4785_v11 = vor.u32 %v4784_v53, %v4781_v12  ;;  %v4795_v59 = vor.u32 %v4794_v49, %v4790_v39  ;;  %v4816_v19 = vshrl.u32 %v11967_v47, 16  ;;  %13477 = vmatmul.mubr.msk.bf16.gmra.mrb[120].mxu0 %vm376_vm2, %v12031_v21  ;;  %v4822_v3 = vshll.u32 %v11968_v54, 16  ;;  %v172_v38 = vld [vmem:[#allocation2 + $0xa8] sm:$0xff]  ;;  %v11969_v47 = vld [vmem:[%s21441_s0 + $0xe4] sm:$0xf]  ;;  %v13839_v24 = vld [vmem:[%s21441_s0 + $0x114] sm:$0xff]  }
 0x13e   :  { %v4809_v51 = vor.u32 %v4808_v23, %v4805_v44  ;;  %v827_v42 = vadd.f32 %v15600_v18, %v209_v43  ;;  %v15845_v34 = vpop.f32.mrb[41].mxu1  ;;  %v4814_v56 = vrot.slane %v4812_v61, 5  ;;  %v208_v32 = vld [vmem:[#allocation2 + $0x1c8] sm:$0xff]  ;;  %v15853_v58 = vpop.f32.mrb[37].mxu0  ;;  %855 = vst.msk [vmem:[#allocation2 + $0xb0] sm:$0xff] %vm22_vm9, %v791_v6  ;;  %v789_v49 = vadd.f32 %v15571_v35, %v171_v7  ;;  %13423 = vmatmul.mubr.msk.bf16.gmra.mrb[132].mxu1 %vm376_vm2, %v13838_v41 }
 0x13f   :  { %v4786_v12 = vrot.slane %v4785_v11, 4  ;;  %v4796_v60 = vrot.slane %v4795_v59, 4  ;;  %v4818_v54 = vrot.slane %v4816_v19, 4  ;;  %v11970_v10 = vld [vmem:[%s21441_s0 + $0xe8] sm:$0xf]  ;;  %v4824_v53 = vrot.slane %v4822_v3, 5  ;;  %13426 = vmatprep.mubr.msk.bf16.mxu1 %vm376_vm2, %v13839_v24 }
 0x140   :  { %v11971_v18 = vld [vmem:[%s21441_s0 + $0xec] sm:$0x1]  ;;  %v4810_v5 = vrot.slane %v4809_v51, 4  ;;  %891 = vst.msk [vmem:[#allocation2 + $0x1d0] sm:$0xff] %vm22_vm9, %v827_v42  ;;  %v825_v43 = vadd.f32 %v15604_v27, %v207_v46  ;;  %v11972_v21 = vld [vmem:[%s21441_s0 + $0xf0] sm:$0xf]  ;;  %v792_v19 = vadd.f32 %v15586_v48, %v174_v29  ;;  %v790_v51 = vadd.f32 %v15597_v36, %v172_v38 }
 0x141   :  { %v15862_v44 = vpop.f32.mrb[42].mxu1  ;;  %v15864_v23 = vpop.f32.mrb[38].mxu0  ;;  %v4791_v11 = vsel %vm14066_vm7, %v4786_v12, %v4790_v39  ;;  %v4801_v59 = vsel %vm14066_vm7, %v4796_v60, %v4800_v20  ;;  %v4819_v61 = vor.u32 %v4818_v54, %v4814_v56  ;;  %853 = vst.msk [vmem:[#allocation2 + $0xa0] sm:$0xff] %vm22_vm9, %v789_v49  ;;  %v828_v39 = vadd.f32 %v15609_v62, %v210_v40  ;;  %v11973_v48 = vld [vmem:[%s21441_s0 + $0xf4] sm:$0xf] }
 0x142   :  { %v15871_v35 = vpop.f32.mrb[43].mxu1  ;;  %v15873_v27 = vpop.f32.mrb[39].mxu0  ;;  %v12032_v7 = vcombine.low %v4791_v11, %v4801_v59  ;;  %v4815_v46 = vsel %vm14066_vm7, %v4810_v5, %v4814_v56  ;;  %889 = vst.msk [vmem:[#allocation2 + $0x1c0] sm:$0xff] %vm22_vm9, %v825_v43  ;;  %856 = vst.msk [vmem:[#allocation2 + $0xb8] sm:$0xff] %vm22_vm9, %v792_v19  ;;  %v826_v29 = vadd.f32 %v15614_v22, %v208_v32  ;;  %v4827_v3 = vshrl.u32 %v11969_v47, 16  ;;  %v177_v42 = vld [vmem:[#allocation2 + $0xd0] sm:$0xff] }
 0x143   :  { %v4820_v20 = vrot.slane %v4819_v61, 4  ;;  %v4830_v6 = vshll.u32 %v11969_v47, 16  ;;  %v15887_v12 = vpop.f32.mrb[44].mxu1  ;;  %892 = vst.msk [vmem:[#allocation2 + $0x1d8] sm:$0xff] %vm22_vm9, %v828_v39  ;;  %854 = vst.msk [vmem:[#allocation2 + $0xa8] sm:$0xff] %vm22_vm9, %v790_v51  ;;  %v4836_v36 = vshll.u32 %v11970_v10, 16 }
 0x144   :  { %13480 = vmatprep.mubr.msk.bf16.mxu0 %vm376_vm2, %v12032_v7  ;;  %v4840_v62 = vshrl.u32 %v11970_v10, 16  ;;  %v4846_v40 = vshll.u32 %v11971_v18, 16  ;;  %v4851_v38 = vshrl.u32 %v11972_v21, 16  ;;  %v213_v60 = vld [vmem:[#allocation2 + $0x1f0] sm:$0xff]  ;;  %890 = vst.msk [vmem:[#allocation2 + $0x1c8] sm:$0xff] %vm22_vm9, %v826_v29  ;;  %v4829_v41 = vrot.slane %v4827_v3, 4 }
 0x145   :  { %v4825_v22 = vsel %vm14066_vm7, %v4820_v20, %v4824_v53  ;;  %v4832_v47 = vrot.slane %v4830_v6, 5  ;;  %v11974_v56 = vld [vmem:[%s21441_s0 + $0xf8] sm:$0x1]  ;;  %v4854_v54 = vshll.u32 %v11972_v21, 16  ;;  %v13840_v32 = vld [vmem:[%s21441_s0 + $0x120] sm:$0xff]   ;;  %v15902_v10 = vpop.f32.mrb[40].mxu0 }
 0x146   :  { %21523 = vst [vmem:[#allocation11_spill] sm:$0xff] %v15902_v10  ;;  %v12033_v18 = vcombine.low %v4815_v46, %v4825_v22  ;;  %v4838_v24 = vrot.slane %v4836_v36, 5  ;;  %v4842_v5 = vrot.slane %v4840_v62, 4  ;;  %v4848_v49 = vrot.slane %v4846_v40, 5  ;;  %v175_v53 = vld [vmem:[#allocation2 + $0xc0] sm:$0xff]  ;;  %v178_v11 = vld [vmem:[#allocation2 + $0xd8] sm:$0xff]  ;;  %13427 = vmatmul.mubr.msk.bf16.gmra.mrb[136].mxu1 %vm376_vm2, %v13840_v32 }
 0x147   :  { %v211_v43 = vld [vmem:[#allocation2 + $0x1e0] sm:$0xff]  ;;  %v13841_v59 = vld [vmem:[%s21441_s0 + $0x12c] sm:$0xff]   ;;  %v4833_v61 = vor.u32 %v4832_v47, %v4829_v41  ;;  %v4853_v19 = vrot.slane %v4851_v38, 4  ;;  %v4856_v21 = vrot.slane %v4854_v54, 5  ;;  %v4860_v7 = vshll.u32 %v11973_v48, 16  ;;  %v214_v39 = vld [vmem:[#allocation2 + $0x1f8] sm:$0xff] }
 0x148   :  { %v176_v51 = vld [vmem:[#allocation2 + $0xc8] sm:$0xff]  ;;  %v15907_v20 = vpop.f32.mrb[45].mxu1  ;;  %13481 = vmatmul.mubr.msk.bf16.gmra.mrb[124].mxu0 %vm376_vm2, %v12033_v18  ;;  %v4843_v46 = vor.u32 %v4842_v5, %v4838_v24  ;;  %v4864_v29 = vshrl.u32 %v11973_v48, 16  ;;  %v4870_v3 = vshll.u32 %v11974_v56, 16  ;;  %v21525_v6 = vld [vmem:[#allocation8_spill] sm:$0xff]  ;;  %v15914_v22 = vpop.f32.mrb[41].mxu0  ;;  %13430 = vmatprep.mubr.msk.bf16.mxu1 %vm376_vm2, %v13841_v59 }
 0x149   :  { %21524 = vst [vmem:[#allocation12_spill] sm:$0xff] %v15907_v20  ;;  %v795_v36 = vadd.f32 %v21525_v6, %v177_v42  ;;  %v212_v62 = vld [vmem:[#allocation2 + $0x1e8] sm:$0xff]  ;;  %v11975_v40 = vld [vmem:[%s21441_s0 + $0xfc] sm:$0xf]  ;;  %v15916_v38 = vpop.f32.mrb[46].mxu1  ;;  %v4834_v41 = vrot.slane %v4833_v61, 4  ;;  %v4857_v47 = vor.u32 %v4856_v21, %v4853_v19  ;;  %v831_v20 = vadd.f32 %v15653_v63, %v213_v60 }
 0x14a   :  { %v4862_v54 = vrot.slane %v4860_v7, 5  ;;  %v15919_v18 = vpop.f32.mrb[42].mxu0  ;;  %v15921_v48 = vpop.f32.mrb[47].mxu1  ;;  %v4844_v56 = vrot.slane %v4843_v46, 4  ;;  %v4866_v42 = vrot.slane %v4864_v29, 4  ;;  %v4872_v5 = vrot.slane %v4870_v3, 5 }
 0x14b   :  { %859 = vst.msk [vmem:[#allocation2 + $0xd0] sm:$0xff] %vm22_vm9, %v795_v36  ;;  %v793_v6 = vadd.f32 %v15630_v26, %v175_v53  ;;  %v15925_v10 = vpop.f32.mrb[43].mxu0  ;;  %v4839_v61 = vsel %vm14066_vm7, %v4834_v41, %v4838_v24  ;;  %v4858_v19 = vrot.slane %v4857_v47, 4  ;;  %895 = vst.msk [vmem:[#allocation2 + $0x1f0] sm:$0xff] %vm22_vm9, %v831_v20  ;;  %v829_v63 = vadd.f32 %v15665_v9, %v211_v43  ;;  %v11976_v21 = vld [vmem:[%s21441_s0 + $0x100] sm:$0xf] }
 0x14c   :  { %v796_v60 = vadd.f32 %v15667_v17, %v178_v11  ;;  %v11977_v26 = vld [vmem:[%s21441_s0 + $0x104] sm:$0x1]  ;;  %v4849_v24 = vsel %vm14066_vm7, %v4844_v56, %v4848_v49  ;;  %v4867_v53 = vor.u32 %v4866_v42, %v4862_v54  ;;  %v832_v9 = vadd.f32 %v15675_v37, %v214_v39  ;;  %v11978_v43 = vld [vmem:[%s21441_s0 + $0x108] sm:$0xf]  ;;  %v11979_v37 = vld [vmem:[%s21441_s0 + $0x10c] sm:$0xf] }
 0x14d   :  { %857 = vst.msk [vmem:[#allocation2 + $0xc0] sm:$0xff] %vm22_vm9, %v793_v6  ;;  %v794_v17 = vadd.f32 %v15677_v45, %v176_v51  ;;  %v12034_v11 = vcombine.low %v4839_v61, %v4849_v24  ;;  %v4863_v32 = vsel %vm14066_vm7, %v4858_v19, %v4862_v54  ;;  %893 = vst.msk [vmem:[#allocation2 + $0x1e0] sm:$0xff] %vm22_vm9, %v829_v63  ;;  %v4875_v7 = vshrl.u32 %v11975_v40, 16  ;;  %v13842_v45 = vld [vmem:[%s21441_s0 + $0x138] sm:$0xff]   ;;  %v15959_v59 = vpop.f32.mrb[48].mxu1  ;;  %v13843_v29 = vld [vmem:[%s21441_s0 + $0x144] sm:$0xff]  }
 0x14e   :  { %860 = vst.msk [vmem:[#allocation2 + $0xd8] sm:$0xff] %vm22_vm9, %v796_v60  ;;  %v830_v49 = vadd.f32 %v15684_v50, %v212_v62  ;;  %v4868_v39 = vrot.slane %v4867_v53, 4  ;;  %896 = vst.msk [vmem:[#allocation2 + $0x1f8] sm:$0xff] %vm22_vm9, %v832_v9  ;;  %v4878_v51 = vshll.u32 %v11975_v40, 16  ;;  %v4884_v20 = vshll.u32 %v11976_v21, 16  ;;  %v181_v47 = vld [vmem:[#allocation2 + $0xf0] sm:$0xff]  ;;  %13431 = vmatmul.mubr.msk.bf16.gmra.mrb[140].mxu1 %vm376_vm2, %v13842_v45 }
 0x14f   :  { %858 = vst.msk [vmem:[#allocation2 + $0xc8] sm:$0xff] %vm22_vm9, %v794_v17  ;;  %v4888_v46 = vshrl.u32 %v11976_v21, 16  ;;  %v11980_v50 = vld [vmem:[%s21441_s0 + $0x110] sm:$0x1]  ;;  %13484 = vmatprep.mubr.msk.bf16.mxu0 %vm376_vm2, %v12034_v11  ;;  %v4877_v3 = vrot.slane %v4875_v7, 4  ;;  %v4894_v36 = vshll.u32 %v11977_v26, 16  ;;  %13434 = vmatprep.mubr.msk.bf16.mxu1 %vm376_vm2, %v13843_v29 }
 0x150   :  { %894 = vst.msk [vmem:[#allocation2 + $0x1e8] sm:$0xff] %vm22_vm9, %v830_v49  ;;  %v4899_v62 = vshrl.u32 %v11978_v43, 16  ;;  %v4902_v41 = vshll.u32 %v11978_v43, 16  ;;  %v15971_v40 = vpop.f32.mrb[44].mxu0  ;;  %v4873_v54 = vsel %vm14066_vm7, %v4868_v39, %v4872_v5  ;;  %v4880_v56 = vrot.slane %v4878_v51, 5  ;;  %v1766_v61 = vld [vmem:[#allocation2 + $0x10] sm:$0xff] }
 0x151   :  { %v4886_v42 = vrot.slane %v4884_v20, 5  ;;  %v4890_v6 = vrot.slane %v4888_v46, 4  ;;  %v15975_v19 = vpop.f32.mrb[49].mxu1  ;;  %v15977_v63 = vpop.f32.mrb[45].mxu0  ;;  %v12035_v60 = vcombine.low %v4863_v32, %v4873_v54  ;;  %v4896_v21 = vrot.slane %v4894_v36, 5  ;;  %v179_v53 = vld [vmem:[#allocation2 + $0xe0] sm:$0xff] }
 0x152   :  { %v4901_v24 = vrot.slane %v4899_v62, 4  ;;  %v4904_v26 = vrot.slane %v4902_v41, 5  ;;  %v15979_v9 = vpop.f32.mrb[50].mxu1  ;;  %v15981_v17 = vpop.f32.mrb[46].mxu0  ;;  %v4881_v43 = vor.u32 %v4880_v56, %v4877_v3  ;;  %v4908_v5 = vshll.u32 %v11979_v37, 16  ;;  %v1764_v7 = vld [vmem:[#allocation2] sm:$0xff] }
 0x153   :  { %v4891_v11 = vor.u32 %v4890_v6, %v4886_v42  ;;  %v4912_v49 = vshrl.u32 %v11979_v37, 16  ;;  %v15983_v39 = vpop.f32.mrb[51].mxu1  ;;  %v15985_v51 = vpop.f32.mrb[47].mxu0  ;;  %13485 = vmatmul.mubr.msk.bf16.gmra.mrb[128].mxu0 %vm376_vm2, %v12035_v60  ;;  %v4918_v20 = vshll.u32 %v11980_v50, 16  ;;  %v799_v46 = vadd.f32 %v15688_v1, %v181_v47  ;;  %v182_v62 = vld [vmem:[#allocation2 + $0xf8] sm:$0xff]  ;;  %v180_v41 = vld [vmem:[#allocation2 + $0xe8] sm:$0xff] }
 0x154   :  { %21526 = vst [vmem:[#allocation8_spill] sm:$0xff] %v15985_v51  ;;  %v4905_v32 = vor.u32 %v4904_v26, %v4901_v24  ;;  %v2316_v36 = vadd.f32 %v15719_v30, %v1766_v61  ;;  %v4882_v3 = vrot.slane %v4881_v43, 4  ;;  %v4910_v37 = vrot.slane %v4908_v5, 5  ;;  %v1767_v6 = vld [vmem:[#allocation2 + $0x18] sm:$0xff]  ;;  %v11981_v51 = vld [vmem:[%s21441_s0 + $0x114] sm:$0xf] }
 0x155   :  { %v4892_v54 = vrot.slane %v4891_v11, 4  ;;  %v4914_v56 = vrot.slane %v4912_v49, 4  ;;  %v4920_v60 = vrot.slane %v4918_v20, 5  ;;  %863 = vst.msk [vmem:[#allocation2 + $0xf0] sm:$0xff] %vm22_vm9, %v799_v46  ;;  %v797_v1 = vadd.f32 %v15721_v31, %v179_v53  ;;  %v11982_v45 = vld [vmem:[%s21441_s0 + $0x118] sm:$0xf] }
 0x156   :  { %v4906_v50 = vrot.slane %v4905_v32, 4  ;;  %2380 = vst.msk [vmem:[#allocation2 + $0x10] sm:$0xff] %vm22_vm9, %v2316_v36  ;;  %v2314_v30 = vadd.f32 %v15735_v14, %v1764_v7  ;;  %v4887_v47 = vsel %vm14066_vm7, %v4882_v3, %v4886_v42  ;;  %v800_v24 = vadd.f32 %v15737_v8, %v182_v62  ;;  %v11983_v26 = vld [vmem:[%s21441_s0 + $0x11c] sm:$0x1]  ;;  %v11984_v31 = vld [vmem:[%s21441_s0 + $0x120] sm:$0xf] }
 0x157   :  { %v4897_v29 = vsel %vm14066_vm7, %v4892_v54, %v4896_v21  ;;  %v4915_v61 = vor.u32 %v4914_v56, %v4910_v37  ;;  %861 = vst.msk [vmem:[#allocation2 + $0xe0] sm:$0xff] %vm22_vm9, %v797_v1  ;;  %v2317_v42 = vadd.f32 %v15747_v4, %v1767_v6  ;;  %v798_v8 = vadd.f32 %v15749_v28, %v180_v41  ;;  %v1765_v21 = vld [vmem:[#allocation2 + $0x8] sm:$0xff]  ;;  %v11985_v43 = vld [vmem:[%s21441_s0 + $0x124] sm:$0xf]  ;;  %v13844_v11 = vld [vmem:[%s21441_s0 + $0x150] sm:$0xff]   ;;  %v16025_v5 = vpop.f32.mrb[52].mxu1 }
 0x158   :  { %v12036_v14 = vcombine.low %v4887_v47, %v4897_v29  ;;  %v4911_v53 = vsel %vm14066_vm7, %v4906_v50, %v4910_v37  ;;  %2378 = vst.msk [vmem:[#allocation2] sm:$0xff] %vm22_vm9, %v2314_v30  ;;  %v16027_v49 = vpop.f32.mrb[48].mxu0  ;;  %864 = vst.msk [vmem:[#allocation2 + $0xf8] sm:$0xff] %vm22_vm9, %v800_v24  ;;  %v21527_v32 = vld [vmem:[#allocation9_spill] sm:$0xff]  ;;  %v4923_v20 = vshrl.u32 %v11981_v51, 16  ;;  %v4926_v28 = vshll.u32 %v11981_v51, 16  ;;  %13435 = vmatmul.mubr.msk.bf16.gmra.mrb[144].mxu1 %vm376_vm2, %v13844_v11 }
 0x159   :  { %v4916_v7 = vrot.slane %v4915_v61, 4  ;;  %v2315_v4 = vadd.f32 %v21527_v32, %v1765_v21  ;;  %v11986_v46 = vld [vmem:[%s21441_s0 + $0x128] sm:$0x1]  ;;  %v13845_v36 = vld [vmem:[%s21441_s0 + $0x15c] sm:$0xff]   ;;  %v16037_v62 = vpop.f32.mrb[53].mxu1  ;;  %v16039_v41 = vpop.f32.mrb[49].mxu0 }
 0x15a   :  { %13488 = vmatprep.mubr.msk.bf16.mxu0 %vm376_vm2, %v12036_v14  ;;  %2381 = vst.msk [vmem:[#allocation2 + $0x18] sm:$0xff] %vm22_vm9, %v2317_v42  ;;  %862 = vst.msk [vmem:[#allocation2 + $0xe8] sm:$0xff] %vm22_vm9, %v798_v8  ;;  %v4932_v3 = vshll.u32 %v11982_v45, 16  ;;  %v4936_v51 = vshrl.u32 %v11982_v45, 16  ;;  %v4942_v54 = vshll.u32 %v11983_v26, 16  ;;  %v4947_v37 = vshrl.u32 %v11984_v31, 16  ;;  %13438 = vmatprep.mubr.msk.bf16.mxu1 %vm376_vm2, %v13845_v36 }
 0x15b   :  { %v16044_v56 = vpop.f32.mrb[54].mxu1  ;;  %v16046_v6 = vpop.f32.mrb[50].mxu0  ;;  %v4921_v50 = vsel %vm14066_vm7, %v4916_v7, %v4920_v60  ;;  %2379 = vst.msk [vmem:[#allocation2 + $0x8] sm:$0xff] %vm22_vm9, %v2315_v4  ;;  %v4925_v1 = vrot.slane %v4923_v20, 4  ;;  %v4928_v30 = vrot.slane %v4926_v28, 5  ;;  %v4950_v47 = vshll.u32 %v11984_v31, 16 }
 0x15c   :  { %v16051_v29 = vpop.f32.mrb[55].mxu1  ;;  %v16053_v61 = vpop.f32.mrb[51].mxu0  ;;  %v12037_v24 = vcombine.low %v4911_v53, %v4921_v50  ;;  %v4934_v45 = vrot.slane %v4932_v3, 5  ;;  %v4938_v26 = vrot.slane %v4936_v51, 4  ;;  %v4944_v14 = vrot.slane %v4942_v54, 5  ;;  %v1770_v60 = vld [vmem:[#allocation2 + $0x30] sm:$0xff] }
 0x15d   :  { %v4929_v42 = vor.u32 %v4928_v30, %v4925_v1  ;;  %v4949_v8 = vrot.slane %v4947_v37, 4  ;;  %v4952_v21 = vrot.slane %v4950_v47, 5  ;;  %v4956_v32 = vshll.u32 %v11985_v43, 16  ;;  %v2863_v7 = vld [vmem:[#allocation2 + $0x10] sm:$0xff]  ;;  %v13846_v28 = vld [vmem:[%s21441_s0 + $0x168] sm:$0xff]   ;;  %v21528_v54 = vld [vmem:[#allocation10_spill] sm:$0xff] }
 0x15e   :  { %13489 = vmatmul.mubr.msk.bf16.gmra.mrb[132].mxu0 %vm376_vm2, %v12037_v24  ;;  %v4939_v31 = vor.u32 %v4938_v26, %v4934_v45  ;;  %v4960_v4 = vshrl.u32 %v11985_v43, 16  ;;  %v4966_v20 = vshll.u32 %v11986_v46, 16  ;;  %v2320_v53 = vadd.f32 %v15763_v13, %v1770_v60  ;;  %v1768_v50 = vld [vmem:[#allocation2 + $0x20] sm:$0xff]  ;;  %v1771_v30 = vld [vmem:[#allocation2 + $0x38] sm:$0xff]  ;;  %v16066_v43 = vpop.f32.mrb[56].mxu1 }
 0x15f   :  { %v4930_v11 = vrot.slane %v4929_v42, 4  ;;  %v4953_v3 = vor.u32 %v4952_v21, %v4949_v8  ;;  %v4958_v51 = vrot.slane %v4956_v32, 5  ;;  %v3413_v37 = vadd.f32 %v21528_v54, %v2863_v7  ;;  %v2861_v1 = vld [vmem:[#allocation2] sm:$0xff]  ;;  %v13847_v36 = vld [vmem:[%s21441_s0 + $0x174] sm:$0xff]   ;;  %v11987_v26 = vld [vmem:[%s21441_s0 + $0x12c] sm:$0xf] }
 0x160   :  { %v4940_v46 = vrot.slane %v4939_v31, 4  ;;  %v4962_v13 = vrot.slane %v4960_v4, 4  ;;  %v4968_v47 = vrot.slane %v4966_v20, 5  ;;  %2384 = vst.msk [vmem:[#allocation2 + $0x30] sm:$0xff] %vm22_vm9, %v2320_v53  ;;  %v2318_v24 = vadd.f32 %v15775_v16, %v1768_v50  ;;  %v16073_v42 = vpop.f32.mrb[52].mxu0  ;;  %v1769_v31 = vld [vmem:[#allocation2 + $0x28] sm:$0xff]  ;;  %13439 = vmatmul.mubr.msk.bf16.gmra.mrb[148].mxu1 %vm376_vm2, %v13846_v28 }
 0x161   :  { %v4935_v8 = vsel %vm14066_vm7, %v4930_v11, %v4934_v45  ;;  %v4954_v21 = vrot.slane %v4953_v3, 4  ;;  %3477 = vst.msk [vmem:[#allocation2 + $0x10] sm:$0xff] %vm22_vm9, %v3413_v37  ;;  %v3411_v32 = vadd.f32 %v15761_v33, %v2861_v1  ;;  %v2321_v60 = vadd.f32 %v15799_v2, %v1771_v30  ;;  %v2864_v7 = vld [vmem:[#allocation2 + $0x18] sm:$0xff]  ;;  %v11988_v16 = vld [vmem:[%s21441_s0 + $0x130] sm:$0xf]  ;;  %v16094_v3 = vpop.f32.mrb[57].mxu1  ;;  %13442 = vmatprep.mubr.msk.bf16.mxu1 %vm376_vm2, %v13847_v36 }
 0x162   :  { %v4945_v4 = vsel %vm14066_vm7, %v4940_v46, %v4944_v14  ;;  %v4963_v20 = vor.u32 %v4962_v13, %v4958_v51  ;;  %2382 = vst.msk [vmem:[#allocation2 + $0x20] sm:$0xff] %vm22_vm9, %v2318_v24  ;;  %v3414_v45 = vadd.f32 %v15801_v25, %v2864_v7  ;;  %v2319_v53 = vadd.f32 %v15814_v57, %v1769_v31  ;;  %v2862_v11 = vld [vmem:[#allocation2 + $0x8] sm:$0xff]  ;;  %v11989_v33 = vld [vmem:[%s21441_s0 + $0x134] sm:$0x1]  ;;  %v11990_v2 = vld [vmem:[%s21441_s0 + $0x138] sm:$0xf] }
 0x163   :  { %v12038_v54 = vcombine.low %v4935_v8, %v4945_v4  ;;  %v4959_v14 = vsel %vm14066_vm7, %v4954_v21, %v4958_v51  ;;  %3475 = vst.msk [vmem:[#allocation2] sm:$0xff] %vm22_vm9, %v3411_v32  ;;  %2385 = vst.msk [vmem:[#allocation2 + $0x38] sm:$0xff] %vm22_vm9, %v2321_v60  ;;  %v3412_v25 = vadd.f32 %v15816_v0, %v2862_v11  ;;  %v4971_v57 = vshrl.u32 %v11987_v26, 16  ;;  %v11991_v37 = vld [vmem:[%s21441_s0 + $0x13c] sm:$0xf]  ;;  %v16113_v21 = vpop.f32.mrb[53].mxu0 }
 0x164   :  { %v4964_v50 = vrot.slane %v4963_v20, 4  ;;  %3478 = vst.msk [vmem:[#allocation2 + $0x18] sm:$0xff] %vm22_vm9, %v3414_v45  ;;  %2383 = vst.msk [vmem:[#allocation2 + $0x28] sm:$0xff] %vm22_vm9, %v2319_v53  ;;  %v4974_v1 = vshll.u32 %v11987_v26, 16  ;;  %v4980_v30 = vshll.u32 %v11988_v16, 16  ;;  %v4984_v46 = vshrl.u32 %v11988_v16, 16 }
 0x165   :  { %v11992_v51 = vld [vmem:[%s21441_s0 + $0x140] sm:$0x1]  ;;  %13492 = vmatprep.mubr.msk.bf16.mxu0 %vm376_vm2, %v12038_v54  ;;  %3476 = vst.msk [vmem:[#allocation2 + $0x8] sm:$0xff] %vm22_vm9, %v3412_v25  ;;  %v4973_v0 = vrot.slane %v4971_v57, 4  ;;  %v4990_v13 = vshll.u32 %v11989_v33, 16  ;;  %v4995_v24 = vshrl.u32 %v11990_v2, 16 }
 0x166   :  { %v4998_v8 = vshll.u32 %v11990_v2, 16  ;;  %v4969_v26 = vsel %vm14066_vm7, %v4964_v50, %v4968_v47  ;;  %v4976_v32 = vrot.slane %v4974_v1, 5  ;;  %v4982_v60 = vrot.slane %v4980_v30, 5  ;;  %v13848_v28 = vld [vmem:[%s21441_s0 + $0x180] sm:$0xff]   ;;  %v16120_v31 = vpop.f32.mrb[58].mxu1  ;;  %v16122_v16 = vpop.f32.mrb[54].mxu0 }
 0x167   :  { %v4986_v7 = vrot.slane %v4984_v46, 4  ;;  %21529 = vst [vmem:[#allocation9_spill] sm:$0xff] %v16122_v16  ;;  %v12039_v4 = vcombine.low %v4959_v14, %v4969_v26  ;;  %v4992_v20 = vrot.slane %v4990_v13, 5  ;;  %v4997_v45 = vrot.slane %v4995_v24, 4  ;;  %v2867_v53 = vld [vmem:[#allocation2 + $0x30] sm:$0xff]  ;;  %v16124_v11 = vpop.f32.mrb[59].mxu1 }
 0x168   :  { %v5000_v36 = vrot.slane %v4998_v8, 5  ;;  %21530 = vst [vmem:[#allocation10_spill] sm:$0xff] %v16124_v11  ;;  %v16126_v33 = vpop.f32.mrb[55].mxu0  ;;  %v4977_v47 = vor.u32 %v4976_v32, %v4973_v0  ;;  %v5004_v54 = vshll.u32 %v11991_v37, 16  ;;  %v5008_v25 = vshrl.u32 %v11991_v37, 16  ;;  %v1774_v57 = vld [vmem:[#allocation2 + $0x50] sm:$0xff]  ;;  %13443 = vmatmul.mubr.msk.bf16.gmra.mrb[152].mxu1 %vm376_vm2, %v13848_v28 }
 0x169   :  { %21531 = vst [vmem:[#allocation13_spill] sm:$0xff] %v16126_v33  ;;  %v4987_v2 = vor.u32 %v4986_v7, %v4982_v60  ;;  %v1772_v50 = vld [vmem:[#allocation2 + $0x40] sm:$0xff]  ;;  %v13849_v1 = vld [vmem:[%s21441_s0 + $0x18c] sm:$0xff]   ;;  %13493 = vmatmul.mubr.msk.bf16.gmra.mrb[136].mxu0 %vm376_vm2, %v12039_v4  ;;  %v5014_v30 = vshll.u32 %v11992_v51, 16  ;;  %v2324_v46 = vadd.f32 %v15828_v55, %v1774_v57  ;;  %v3417_v13 = vadd.f32 %v15831_v15, %v2867_v53  ;;  %v1775_v7 = vld [vmem:[#allocation2 + $0x58] sm:$0xff] }
 0x16a   :  { %v5001_v14 = vor.u32 %v5000_v36, %v4997_v45  ;;  %v2865_v24 = vld [vmem:[#allocation2 + $0x20] sm:$0xff]  ;;  %v4978_v37 = vrot.slane %v4977_v47, 4  ;;  %v5006_v26 = vrot.slane %v5004_v54, 5  ;;  %v5010_v32 = vrot.slane %v5008_v25, 4  ;;  %v2868_v33 = vld [vmem:[#allocation2 + $0x38] sm:$0xff]  ;;  %v1773_v51 = vld [vmem:[#allocation2 + $0x48] sm:$0xff]  ;;  %13446 = vmatprep.mubr.msk.bf16.mxu1 %vm376_vm2, %v13849_v1 }
 0x16b   :  { %v11993_v0 = vld [vmem:[%s21441_s0 + $0x144] sm:$0xf]  ;;  %v4988_v8 = vrot.slane %v4987_v2, 4  ;;  %v5016_v16 = vrot.slane %v5014_v30, 5  ;;  %2388 = vst.msk [vmem:[#allocation2 + $0x50] sm:$0xff] %vm22_vm9, %v2324_v46  ;;  %3481 = vst.msk [vmem:[#allocation2 + $0x30] sm:$0xff] %vm22_vm9, %v3417_v13  ;;  %v2322_v55 = vadd.f32 %v15845_v34, %v1772_v50  ;;  %v3415_v15 = vadd.f32 %v15853_v58, %v2865_v24 }
 0x16c   :  { %v5002_v11 = vrot.slane %v5001_v14, 4  ;;  %v2866_v4 = vld [vmem:[#allocation2 + $0x28] sm:$0xff]  ;;  %v4983_v45 = vsel %vm14066_vm7, %v4978_v37, %v4982_v60  ;;  %v5011_v53 = vor.u32 %v5010_v32, %v5006_v26  ;;  %v2325_v47 = vadd.f32 %v15862_v44, %v1775_v7  ;;  %v11996_v58 = vld [vmem:[%s21441_s0 + $0x150] sm:$0xf]  ;;  %v11997_v25 = vld [vmem:[%s21441_s0 + $0x154] sm:$0xf] }
 0x16d   :  { %v4993_v36 = vsel %vm14066_vm7, %v4988_v8, %v4992_v20  ;;  %v11994_v2 = vld [vmem:[%s21441_s0 + $0x148] sm:$0xf]  ;;  %v11995_v34 = vld [vmem:[%s21441_s0 + $0x14c] sm:$0x1]  ;;  %2386 = vst.msk [vmem:[#allocation2 + $0x40] sm:$0xff] %vm22_vm9, %v2322_v55  ;;  %3479 = vst.msk [vmem:[#allocation2 + $0x20] sm:$0xff] %vm22_vm9, %v3415_v15  ;;  %v3418_v44 = vadd.f32 %v15864_v23, %v2868_v33  ;;  %v2323_v54 = vadd.f32 %v15871_v35, %v1773_v51 }
 0x16e   :  { %v12040_v60 = vcombine.low %v4983_v45, %v4993_v36  ;;  %v5007_v20 = vsel %vm14066_vm7, %v5002_v11, %v5006_v26  ;;  %v5012_v57 = vrot.slane %v5011_v53, 4  ;;  %2389 = vst.msk [vmem:[#allocation2 + $0x58] sm:$0xff] %vm22_vm9, %v2325_v47  ;;  %v3416_v28 = vadd.f32 %v15873_v27, %v2866_v4  ;;  %v11998_v14 = vld [vmem:[%s21441_s0 + $0x158] sm:$0x1]  ;;  %v16171_v23 = vpop.f32.mrb[60].mxu1  ;;  %v16173_v35 = vpop.f32.mrb[56].mxu0 }
 0x16f   :  { %v5019_v11 = vshrl.u32 %v11993_v0, 16  ;;  %v5022_v50 = vshll.u32 %v11993_v0, 16  ;;  %3482 = vst.msk [vmem:[#allocation2 + $0x38] sm:$0xff] %vm22_vm9, %v3418_v44  ;;  %2387 = vst.msk [vmem:[#allocation2 + $0x48] sm:$0xff] %vm22_vm9, %v2323_v54  ;;  %v5028_v33 = vshll.u32 %v11994_v2, 16  ;;  %v5032_v1 = vshrl.u32 %v11994_v2, 16 }
 0x170   :  { %13496 = vmatprep.mubr.msk.bf16.mxu0 %vm376_vm2, %v12040_v60  ;;  %v5038_v30 = vshll.u32 %v11995_v34, 16  ;;  %v5043_v27 = vshrl.u32 %v11996_v58, 16  ;;  %v16178_v46 = vpop.f32.mrb[61].mxu1  ;;  %v5017_v13 = vsel %vm14066_vm7, %v5012_v57, %v5016_v16  ;;  %3480 = vst.msk [vmem:[#allocation2 + $0x28] sm:$0xff] %vm22_vm9, %v3416_v28  ;;  %v5046_v37 = vshll.u32 %v11996_v58, 16  ;;  %v13850_v8 = vld [vmem:[%s21441_s0 + $0x198] sm:$0xff]  }
 0x171   :  { %v5021_v24 = vrot.slane %v5019_v11, 4  ;;  %v5024_v0 = vrot.slane %v5022_v50, 5  ;;  %v16186_v26 = vpop.f32.mrb[57].mxu0  ;;  %v16188_v32 = vpop.f32.mrb[62].mxu1  ;;  %v12041_v7 = vcombine.low %v5007_v20, %v5017_v13  ;;  %v5030_v55 = vrot.slane %v5028_v33, 5  ;;  %v1778_v2 = vld [vmem:[#allocation2 + $0x70] sm:$0xff]  ;;  %13447 = vmatmul.mubr.msk.bf16.gmra.mrb[156].mxu1 %vm376_vm2, %v13850_v8 }
 0x172   :  { %v5034_v15 = vrot.slane %v5032_v1, 4  ;;  %v5040_v51 = vrot.slane %v5038_v30, 5  ;;  %v16190_v4 = vpop.f32.mrb[58].mxu0  ;;  %v16192_v16 = vpop.f32.mrb[63].mxu1  ;;  %v5045_v36 = vrot.slane %v5043_v27, 4  ;;  %v5048_v53 = vrot.slane %v5046_v37, 5 }
 0x173   :  { %v5025_v45 = vor.u32 %v5024_v0, %v5021_v24  ;;  %v5052_v47 = vshll.u32 %v11997_v25, 16  ;;  %v2871_v34 = vld [vmem:[#allocation2 + $0x50] sm:$0xff]  ;;  %v16194_v58 = vpop.f32.mrb[59].mxu0  ;;  %13497 = vmatmul.mubr.msk.bf16.gmra.mrb[140].mxu0 %vm376_vm2, %v12041_v7  ;;  %v5056_v44 = vshrl.u32 %v11997_v25, 16  ;;  %v5062_v20 = vshll.u32 %v11998_v14, 16  ;;  %v1776_v57 = vld [vmem:[#allocation2 + $0x60] sm:$0xff] }
 0x174   :  { %v5035_v60 = vor.u32 %v5034_v15, %v5030_v55  ;;  %v2328_v54 = vadd.f32 %v15887_v12, %v1778_v2  ;;  %v1779_v28 = vld [vmem:[#allocation2 + $0x78] sm:$0xff]  ;;  %v5049_v50 = vor.u32 %v5048_v53, %v5045_v36  ;;  %v21532_v1 = vld [vmem:[#allocation11_spill] sm:$0xff]  ;;  %v2869_v27 = vld [vmem:[#allocation2 + $0x40] sm:$0xff] }
 0x175   :  { %v5026_v11 = vrot.slane %v5025_v45, 4  ;;  %v5054_v33 = vrot.slane %v5052_v47, 5  ;;  %v3421_v30 = vadd.f32 %v21532_v1, %v2871_v34  ;;  %v1777_v13 = vld [vmem:[#allocation2 + $0x68] sm:$0xff]  ;;  %v11999_v24 = vld [vmem:[%s21441_s0 + $0x15c] sm:$0xf]  ;;  %v5058_v25 = vrot.slane %v5056_v44, 4 }
 0x176   :  { %v5036_v0 = vrot.slane %v5035_v60, 4  ;;  %v5064_v14 = vrot.slane %v5062_v20, 5  ;;  %2392 = vst.msk [vmem:[#allocation2 + $0x70] sm:$0xff] %vm22_vm9, %v2328_v54  ;;  %v21533_v12 = vld [vmem:[#allocation12_spill] sm:$0xff]  ;;  %v2872_v7 = vld [vmem:[#allocation2 + $0x58] sm:$0xff]  ;;  %v5050_v45 = vrot.slane %v5049_v50, 4  ;;  %v3419_v36 = vadd.f32 %v15914_v22, %v2869_v27 }
 0x177   :  { %v2326_v37 = vadd.f32 %v21533_v12, %v1776_v57  ;;  %v5031_v15 = vsel %vm14066_vm7, %v5026_v11, %v5030_v55  ;;  %3485 = vst.msk [vmem:[#allocation2 + $0x50] sm:$0xff] %vm22_vm9, %v3421_v30  ;;  %v2329_v53 = vadd.f32 %v15916_v38, %v1779_v28  ;;  %v2870_v47 = vld [vmem:[#allocation2 + $0x48] sm:$0xff]  ;;  %v12000_v8 = vld [vmem:[%s21441_s0 + $0x160] sm:$0xf]  ;;  %v5059_v34 = vor.u32 %v5058_v25, %v5054_v33  ;;  %v12001_v22 = vld [vmem:[%s21441_s0 + $0x164] sm:$0x1] }
 0x178   :  { %v5041_v2 = vsel %vm14066_vm7, %v5036_v0, %v5040_v51  ;;  %v3422_v55 = vadd.f32 %v15919_v18, %v2872_v7  ;;  %v2327_v60 = vadd.f32 %v15921_v48, %v1777_v13  ;;  %v12002_v38 = vld [vmem:[%s21441_s0 + $0x168] sm:$0xf]  ;;  %v5055_v20 = vsel %vm14066_vm7, %v5050_v45, %v5054_v33  ;;  %3483 = vst.msk [vmem:[#allocation2 + $0x40] sm:$0xff] %vm22_vm9, %v3419_v36  ;;  %v12003_v48 = vld [vmem:[%s21441_s0 + $0x16c] sm:$0xf]  ;;  %v16232_v54 = vpop.f32.mrb[64].mxu1 }
 0x179   :  { %2390 = vst.msk [vmem:[#allocation2 + $0x60] sm:$0xff] %vm22_vm9, %v2326_v37  ;;  %v12042_v44 = vcombine.low %v5031_v15, %v5041_v2  ;;  %2393 = vst.msk [vmem:[#allocation2 + $0x78] sm:$0xff] %vm22_vm9, %v2329_v53  ;;  %v3420_v18 = vadd.f32 %v15925_v10, %v2870_v47  ;;  %v5067_v51 = vshrl.u32 %v11999_v24, 16  ;;  %v16234_v57 = vpop.f32.mrb[60].mxu0  ;;  %v5060_v28 = vrot.slane %v5059_v34, 4  ;;  %v16241_v1 = vpop.f32.mrb[65].mxu1 }
 0x17a   :  { %3486 = vst.msk [vmem:[#allocation2 + $0x58] sm:$0xff] %vm22_vm9, %v3422_v55  ;;  %2391 = vst.msk [vmem:[#allocation2 + $0x68] sm:$0xff] %vm22_vm9, %v2327_v60  ;;  %v5070_v11 = vshll.u32 %v11999_v24, 16  ;;  %v5076_v50 = vshll.u32 %v12000_v8, 16  ;;  %v5080_v33 = vshrl.u32 %v12000_v8, 16  ;;  %v5086_v27 = vshll.u32 %v12001_v22, 16 }
 0x17b   :  { %v12004_v10 = vld [vmem:[%s21441_s0 + $0x170] sm:$0x1]  ;;  %13500 = vmatprep.mubr.msk.bf16.mxu0 %vm376_vm2, %v12042_v44  ;;  %3484 = vst.msk [vmem:[#allocation2 + $0x48] sm:$0xff] %vm22_vm9, %v3420_v18  ;;  %v5069_v30 = vrot.slane %v5067_v51, 4  ;;  %v5091_v13 = vshrl.u32 %v12002_v38, 16  ;;  %v5094_v0 = vshll.u32 %v12002_v38, 16  ;;  %v5065_v24 = vsel %vm14066_vm7, %v5060_v28, %v5064_v14 }
 0x17c   :  { %v16245_v25 = vpop.f32.mrb[61].mxu0  ;;  %v5072_v12 = vrot.slane %v5070_v11, 5  ;;  %v5078_v37 = vrot.slane %v5076_v50, 5  ;;  %v5082_v7 = vrot.slane %v5080_v33, 4  ;;  %v16249_v15 = vpop.f32.mrb[66].mxu1  ;;  %v12043_v36 = vcombine.low %v5055_v20, %v5065_v24  ;;  %v1782_v44 = vld [vmem:[#allocation2 + $0x90] sm:$0xff] }
 0x17d   :  { %v16251_v45 = vpop.f32.mrb[62].mxu0  ;;  %v5088_v53 = vrot.slane %v5086_v27, 5  ;;  %v5093_v47 = vrot.slane %v5091_v13, 4  ;;  %v5096_v8 = vrot.slane %v5094_v0, 5  ;;  %v2875_v2 = vld [vmem:[#allocation2 + $0x70] sm:$0xff]  ;;  %v16253_v34 = vpop.f32.mrb[67].mxu1  ;;  %v2332_v20 = vadd.f32 %v15959_v59, %v1782_v44 }
 0x17e   :  { %v16255_v55 = vpop.f32.mrb[63].mxu0  ;;  %v5073_v60 = vor.u32 %v5072_v12, %v5069_v30  ;;  %v5083_v22 = vor.u32 %v5082_v7, %v5078_v37  ;;  %v5100_v38 = vshll.u32 %v12003_v48, 16  ;;  %v5104_v14 = vshrl.u32 %v12003_v48, 16  ;;  %v1780_v18 = vld [vmem:[#allocation2 + $0x80] sm:$0xff]  ;;  %13501 = vmatmul.mubr.msk.bf16.gmra.mrb[144].mxu0 %vm376_vm2, %v12043_v36  ;;  %v12005_v33 = vld [vmem:[%s21441_s0 + $0x174] sm:$0xf] }
 0x17f   :  { %v5097_v51 = vor.u32 %v5096_v8, %v5093_v47  ;;  %v5110_v28 = vshll.u32 %v12004_v10, 16  ;;  %v3425_v11 = vadd.f32 %v15971_v40, %v2875_v2  ;;  %v1783_v48 = vld [vmem:[#allocation2 + $0x98] sm:$0xff]  ;;  %2396 = vst.msk [vmem:[#allocation2 + $0x90] sm:$0xff] %vm22_vm9, %v2332_v20  ;;  %v2330_v59 = vadd.f32 %v15975_v19, %v1780_v18  ;;  %v1781_v10 = vld [vmem:[#allocation2 + $0x88] sm:$0xff]  ;;  %v16290_v44 = vpop.f32.mrb[68].mxu1 }
 0x180   :  { %v2873_v50 = vld [vmem:[#allocation2 + $0x60] sm:$0xff]  ;;  %v5074_v27 = vrot.slane %v5073_v60, 4  ;;  %v5084_v30 = vrot.slane %v5083_v22, 4  ;;  %v5102_v13 = vrot.slane %v5100_v38, 5  ;;  %v5106_v0 = vrot.slane %v5104_v14, 4  ;;  %v2876_v24 = vld [vmem:[#allocation2 + $0x78] sm:$0xff] }
 0x181   :  { %v5098_v12 = vrot.slane %v5097_v51, 4  ;;  %v5112_v7 = vrot.slane %v5110_v28, 5  ;;  %3489 = vst.msk [vmem:[#allocation2 + $0x70] sm:$0xff] %vm22_vm9, %v3425_v11  ;;  %v3423_v40 = vadd.f32 %v15977_v63, %v2873_v50  ;;  %v2874_v36 = vld [vmem:[#allocation2 + $0x68] sm:$0xff]  ;;  %v2333_v60 = vadd.f32 %v15979_v9, %v1783_v48  ;;  %v12006_v22 = vld [vmem:[%s21441_s0 + $0x178] sm:$0xf] }
 0x182   :  { %v5079_v47 = vsel %vm14066_vm7, %v5074_v27, %v5078_v37  ;;  %v5089_v8 = vsel %vm14066_vm7, %v5084_v30, %v5088_v53  ;;  %v5107_v2 = vor.u32 %v5106_v0, %v5102_v13  ;;  %v12007_v19 = vld [vmem:[%s21441_s0 + $0x17c] sm:$0x1]  ;;  %v12008_v63 = vld [vmem:[%s21441_s0 + $0x180] sm:$0xf]  ;;  %2394 = vst.msk [vmem:[#allocation2 + $0x80] sm:$0xff] %vm22_vm9, %v2330_v59  ;;  %v3426_v9 = vadd.f32 %v15981_v17, %v2876_v24  ;;  %v21534_v51 = vld [vmem:[#allocation8_spill] sm:$0xff] }
 0x183   :  { %v12044_v38 = vcombine.low %v5079_v47, %v5089_v8  ;;  %v5103_v37 = vsel %vm14066_vm7, %v5098_v12, %v5102_v13  ;;  %3487 = vst.msk [vmem:[#allocation2 + $0x60] sm:$0xff] %vm22_vm9, %v3423_v40  ;;  %v2331_v53 = vadd.f32 %v15983_v39, %v1781_v10  ;;  %v12009_v14 = vld [vmem:[%s21441_s0 + $0x184] sm:$0xf]  ;;  %2397 = vst.msk [vmem:[#allocation2 + $0x98] sm:$0xff] %vm22_vm9, %v2333_v60  ;;  %v5115_v20 = vshrl.u32 %v12005_v33, 16  ;;  %v16297_v17 = vpop.f32.mrb[64].mxu0 }
 0x184   :  { %v5108_v18 = vrot.slane %v5107_v2, 4  ;;  %v3424_v28 = vadd.f32 %v21534_v51, %v2874_v36  ;;  %v5118_v11 = vshll.u32 %v12005_v33, 16  ;;  %v12010_v50 = vld [vmem:[%s21441_s0 + $0x188] sm:$0x1]  ;;  %v16299_v39 = vpop.f32.mrb[69].mxu1  ;;  %3490 = vst.msk [vmem:[#allocation2 + $0x78] sm:$0xff] %vm22_vm9, %v3426_v9 }
 0x185   :  { %13504 = vmatprep.mubr.msk.bf16.mxu0 %vm376_vm2, %v12044_v38  ;;  %2395 = vst.msk [vmem:[#allocation2 + $0x88] sm:$0xff] %vm22_vm9, %v2331_v53  ;;  %v5124_v27 = vshll.u32 %v12006_v22, 16  ;;  %v5128_v30 = vshrl.u32 %v12006_v22, 16  ;;  %v5134_v13 = vshll.u32 %v12007_v19, 16  ;;  %v5139_v0 = vshrl.u32 %v12008_v63, 16  ;;  %v16304_v48 = vpop.f32.mrb[65].mxu0 }
 0x186   :  { %v5113_v33 = vsel %vm14066_vm7, %v5108_v18, %v5112_v7  ;;  %3488 = vst.msk [vmem:[#allocation2 + $0x68] sm:$0xff] %vm22_vm9, %v3424_v28  ;;  %v5117_v24 = vrot.slane %v5115_v20, 4  ;;  %v5120_v12 = vrot.slane %v5118_v11, 5  ;;  %v5142_v59 = vshll.u32 %v12008_v63, 16  ;;  %v16309_v40 = vpop.f32.mrb[70].mxu1  ;;  %v16311_v10 = vpop.f32.mrb[66].mxu0 }
 0x187   :  { %v12045_v36 = vcombine.low %v5103_v37, %v5113_v33  ;;  %v5126_v47 = vrot.slane %v5124_v27, 5  ;;  %v5130_v8 = vrot.slane %v5128_v30, 4  ;;  %v5136_v2 = vrot.slane %v5134_v13, 5  ;;  %v16313_v60 = vpop.f32.mrb[71].mxu1  ;;  %v16315_v22 = vpop.f32.mrb[67].mxu0  ;;  %v1786_v53 = vld [vmem:[#allocation2 + $0xb0] sm:$0xff] }
 0x188   :  { %v5121_v19 = vor.u32 %v5120_v12, %v5117_v24  ;;  %v5141_v38 = vrot.slane %v5139_v0, 4  ;;  %v5144_v7 = vrot.slane %v5142_v59, 5  ;;  %v5148_v9 = vshll.u32 %v12009_v14, 16  ;;  %v2879_v18 = vld [vmem:[#allocation2 + $0x90] sm:$0xff]  ;;  %v1784_v20 = vld [vmem:[#allocation2 + $0xa0] sm:$0xff]  ;;  %v1787_v11 = vld [vmem:[#allocation2 + $0xb8] sm:$0xff] }
 0x189   :  { %13505 = vmatmul.mubr.msk.bf16.gmra.mrb[148].mxu0 %vm376_vm2, %v12045_v36  ;;  %v5131_v63 = vor.u32 %v5130_v8, %v5126_v47  ;;  %v5152_v51 = vshrl.u32 %v12009_v14, 16  ;;  %v5158_v28 = vshll.u32 %v12010_v50, 16  ;;  %v2336_v37 = vadd.f32 %v16025_v5, %v1786_v53  ;;  %v12011_v27 = vld [vmem:[%s21441_s0 + $0x18c] sm:$0xf]  ;;  %v2877_v24 = vld [vmem:[#allocation2 + $0x80] sm:$0xff] }
 0x18a   :  { %v5122_v30 = vrot.slane %v5121_v19, 4  ;;  %v5145_v13 = vor.u32 %v5144_v7, %v5141_v38  ;;  %v5150_v0 = vrot.slane %v5148_v9, 5  ;;  %v3429_v33 = vadd.f32 %v16027_v49, %v2879_v18  ;;  %v1785_v12 = vld [vmem:[#allocation2 + $0xa8] sm:$0xff]  ;;  %v12012_v14 = vld [vmem:[%s21441_s0 + $0x190] sm:$0xf]  ;;  %v2880_v8 = vld [vmem:[#allocation2 + $0x98] sm:$0xff] }
 0x18b   :  { %v5132_v50 = vrot.slane %v5131_v63, 4  ;;  %v5154_v59 = vrot.slane %v5152_v51, 4  ;;  %v5160_v5 = vrot.slane %v5158_v28, 5  ;;  %2400 = vst.msk [vmem:[#allocation2 + $0xb0] sm:$0xff] %vm22_vm9, %v2336_v37  ;;  %v2334_v36 = vadd.f32 %v16037_v62, %v1784_v20  ;;  %v12013_v53 = vld [vmem:[%s21441_s0 + $0x194] sm:$0x1] }
 0x18c   :  { %v5127_v19 = vsel %vm14066_vm7, %v5122_v30, %v5126_v47  ;;  %v5146_v38 = vrot.slane %v5145_v13, 4  ;;  %3493 = vst.msk [vmem:[#allocation2 + $0x90] sm:$0xff] %vm22_vm9, %v3429_v33  ;;  %v3427_v49 = vadd.f32 %v16039_v41, %v2877_v24  ;;  %v2337_v7 = vadd.f32 %v16044_v56, %v1787_v11  ;;  %v2878_v9 = vld [vmem:[#allocation2 + $0x88] sm:$0xff]  ;;  %v12083_v56 = vld [vmem:[%s21441_s0 + $0x10] sm:$0xf]  ;;  %v16358_v20 = vpop.f32.mrb[72].mxu1 }
 0x18d   :  { %v12082_v62 = vld [vmem:[%s21441_s0 + $0xc] sm:$0xe]  ;;  %v5137_v18 = vsel %vm14066_vm7, %v5132_v50, %v5136_v2  ;;  %v5155_v47 = vor.u32 %v5154_v59, %v5150_v0  ;;  %2398 = vst.msk [vmem:[#allocation2 + $0xa0] sm:$0xff] %vm22_vm9, %v2334_v36  ;;  %v3430_v63 = vadd.f32 %v16046_v6, %v2880_v8  ;;  %v2335_v41 = vadd.f32 %v16051_v29, %v1785_v12  ;;  %v12084_v6 = vld [vmem:[%s21441_s0 + $0x14] sm:$0x1]  ;;  %v16360_v11 = vpop.f32.mrb[68].mxu0 }
 0x18e   :  { %v12046_v51 = vcombine.low %v5127_v19, %v5137_v18  ;;  %v5151_v28 = vsel %vm14066_vm7, %v5146_v38, %v5150_v0  ;;  %3491 = vst.msk [vmem:[#allocation2 + $0x80] sm:$0xff] %vm22_vm9, %v3427_v49  ;;  %2401 = vst.msk [vmem:[#allocation2 + $0xb8] sm:$0xff] %vm22_vm9, %v2337_v7  ;;  %v3428_v2 = vadd.f32 %v16053_v61, %v2878_v9  ;;  %v5163_v37 = vshrl.u32 %v12011_v27, 16  ;;  %v12014_v29 = vld [vmem:[%s21441_s0 + $0x198] sm:$0xf]  ;;  %v16370_v12 = vpop.f32.mrb[73].mxu1 }
 0x18f   :  { %21535 = vst [vmem:[#allocation11_spill] sm:$0xff] %v16360_v11  ;;  %v5156_v30 = vrot.slane %v5155_v47, 4  ;;  %3494 = vst.msk [vmem:[#allocation2 + $0x98] sm:$0xff] %vm22_vm9, %v3430_v63  ;;  %v5166_v13 = vshll.u32 %v12011_v27, 16  ;;  %v5172_v61 = vshll.u32 %v12012_v14, 16  ;;  %v5176_v0 = vshrl.u32 %v12012_v14, 16 }
 0x190   :  { %2399 = vst.msk [vmem:[#allocation2 + $0xa8] sm:$0xff] %vm22_vm9, %v2335_v41  ;;  %v12015_v33 = vld [vmem:[%s21441_s0 + $0x19c] sm:$0xf]  ;;  %v12016_v24 = vld [vmem:[%s21441_s0 + $0x1a0] sm:$0x1]  ;;  %v16372_v50 = vpop.f32.mrb[69].mxu0  ;;  %13508 = vmatprep.mubr.msk.bf16.mxu0 %vm376_vm2, %v12046_v51 }
 0x191   :  { %21536 = vst [vmem:[#allocation12_spill] sm:$0xff] %v16372_v50  ;;  %3492 = vst.msk [vmem:[#allocation2 + $0x88] sm:$0xff] %vm22_vm9, %v3428_v2  ;;  %v5165_v59 = vrot.slane %v5163_v37, 4  ;;  %v5182_v27 = vshll.u32 %v12013_v53, 16  ;;  %v12178_v36 = vrot.slane %v12082_v62, 9  ;;  %v6082_v14 = vrot.slane %v12083_v56, 5 }
 0x192   :  { %v16376_v8 = vpop.f32.mrb[74].mxu1  ;;  %v16378_v19 = vpop.f32.mrb[70].mxu0  ;;  %v5161_v38 = vsel %vm14066_vm7, %v5156_v30, %v5160_v5  ;;  %v5168_v49 = vrot.slane %v5166_v13, 5  ;;  %v5174_v7 = vrot.slane %v5172_v61, 5  ;;  %v5178_v9 = vrot.slane %v5176_v0, 4 }
 0x193   :  { %21537 = vst [vmem:[#allocation8_spill] sm:$0xff] %v16378_v19  ;;  %v16382_v18 = vpop.f32.mrb[75].mxu1  ;;  %v16384_v47 = vpop.f32.mrb[71].mxu0  ;;  %v12047_v63 = vcombine.low %v5151_v28, %v5161_v38  ;;  %v5184_v41 = vrot.slane %v5182_v27, 5  ;;  %v6083_v53 = vsel %vm14113_vm8, %v12178_v36, %v6082_v14  ;;  %v6084_v62 = vrot.slane %v6082_v14, 4 }
 0x194   :  { %21538 = vst [vmem:[#allocation14_spill] sm:$0xff] %v16382_v18  ;;  %21539 = vst [vmem:[#allocation15_spill] sm:$0xff] %v16384_v47  ;;  %v5169_v56 = vor.u32 %v5168_v49, %v5165_v59  ;;  %v5179_v2 = vor.u32 %v5178_v9, %v5174_v7  ;;  %v6085_v37 = vrot.slane %v12084_v6, 5  ;;  %v5187_v19 = vshrl.u32 %v12014_v29, 16  ;;  %v12085_v5 = vld [vmem:[%s21441_s0 + $0x18] sm:$0xe] }
 0x195   :  { %v12086_v30 = vld [vmem:[%s21441_s0 + $0x1c] sm:$0xf]  ;;  %13509 = vmatmul.mubr.msk.bf16.gmra.mrb[152].mxu0 %vm376_vm2, %v12047_v63  ;;  %v5190_v28 = vshll.u32 %v12014_v29, 16  ;;  %v5196_v13 = vshll.u32 %v12015_v33, 16  ;;  %v5200_v61 = vshrl.u32 %v12015_v33, 16  ;;  %v5206_v0 = vshll.u32 %v12016_v24, 16 }
 0x196   :  { %v12087_v59 = vld [vmem:[%s21441_s0 + $0x20] sm:$0x1]  ;;  %v12500_v6 = vld [vmem:[%s21442_s1 + $0xe] sm:$0x3]  ;;  %v5170_v27 = vrot.slane %v5169_v56, 4  ;;  %v5180_v36 = vrot.slane %v5179_v2, 4  ;;  %v6086_v14 = vsel %vm14113_vm8, %v6084_v62, %v6085_v37 }
 0x197   :  { %v5189_v38 = vrot.slane %v5187_v19, 4  ;;  %v12211_v49 = vcombine.low %v6083_v53, %v6086_v14  ;;  %v5192_v9 = vrot.slane %v5190_v28, 5  ;;  %v5198_v29 = vrot.slane %v5196_v13, 5  ;;  %v2883_v33 = vld [vmem:[#allocation2 + $0xb0] sm:$0xff]  ;;  %v1788_v53 = vld [vmem:[#allocation2 + $0xc0] sm:$0xff]  ;;  %v1791_v28 = vld [vmem:[#allocation2 + $0xd8] sm:$0xff] }
 0x198   :  { %v5202_v63 = vrot.slane %v5200_v61, 4  ;;  %v5175_v24 = vsel %vm14066_vm7, %v5170_v27, %v5174_v7  ;;  %v5185_v47 = vsel %vm14066_vm7, %v5180_v36, %v5184_v41  ;;  %v5208_v50 = vrot.slane %v5206_v0, 5  ;;  %v1790_v18 = vld [vmem:[#allocation2 + $0xd0] sm:$0xff]  ;;  %v2881_v37 = vld [vmem:[#allocation2 + $0xa0] sm:$0xff]  ;;  %v2884_v13 = vld [vmem:[#allocation2 + $0xb8] sm:$0xff] }
 0x199   :  { %v12179_v11 = vrot.slane %v12085_v5, 9  ;;  %v12048_v56 = vcombine.low %v5175_v24, %v5185_v47  ;;  %13518 = vmatprep.mubr.msk.bf16.mxu1 %vm376_vm2, %v12211_v49  ;;  %v5193_v2 = vor.u32 %v5192_v9, %v5189_v38  ;;  %v6089_v19 = vrot.slane %v12086_v30, 5  ;;  %v16411_v7 = vld [vmem:[%s21441_s0 + $0x24] sm:$0xe]  ;;  %v1789_v27 = vld [vmem:[#allocation2 + $0xc8] sm:$0xff] }
 0x19a   :  { %v5203_v62 = vor.u32 %v5202_v63, %v5198_v29  ;;  %v6092_v61 = vrot.slane %v12087_v59, 5  ;;  %v21541_v41 = vld [vmem:[#allocation6_spill] sm:$0xff]  ;;  %v2340_v47 = vadd.f32 %v16066_v43, %v1790_v18  ;;  %v3433_v5 = vadd.f32 %v16073_v42, %v2883_v33  ;;  %v16421_v30 = vld [vmem:[%s21441_s0 + $0x28] sm:$0xf]  ;;  %v16426_v36 = vld [vmem:[%s21441_s0 + $0x2c] sm:$0x1] }
 0x19b   :  { %v16414_v0 = vand.u32 %v12500_v6, %v21541_v41  ;;  %v16431_v59 = vld [vmem:[%s21441_s0 + $0x30] sm:$0xe]  ;;  %v16436_v43 = vld [vmem:[%s21441_s0 + $0x34] sm:$0xf]  ;;  %v16438_v42 = vpop.f32.mrb[76].mxu1  ;;  %v16440_v18 = vpop.f32.mrb[72].mxu0  ;;  %13512 = vmatprep.mubr.msk.bf16.mxu0 %vm376_vm2, %v12048_v56  ;;  %v6090_v38 = vsel %vm14113_vm8, %v12179_v11, %v6089_v19  ;;  %v2338_v56 = vadd.f32 %v16094_v3, %v1788_v53  ;;  %v3431_v11 = vadd.f32 %v16113_v21, %v2881_v37 }
 0x19c   :  { %21542 = vst [vmem:[#allocation7_spill] sm:$0xff] %v16440_v18  ;;  %v5194_v6 = vrot.slane %v5193_v2, 4  ;;  %v5204_v14 = vrot.slane %v5203_v62, 4  ;;  %v6091_v49 = vrot.slane %v6089_v19, 4  ;;  %v2882_v9 = vld [vmem:[#allocation2 + $0xa8] sm:$0xff]  ;;  %v13851_v63 = vld [vmem:[%s21441_s0 + $0x18] sm:$0xff]   ;;  %v2341_v2 = vadd.f32 %v16120_v31, %v1791_v28 }
 0x19d   :  { %v16448_v33 = vpop.f32.mrb[77].mxu1  ;;  %v16450_v24 = vpop.f32.mrb[73].mxu0  ;;  %13648 = vmatprep.subr.bf16.mxu1 %v16414_v0  ;;  %2404 = vst.msk [vmem:[#allocation2 + $0xd0] sm:$0xff] %vm22_vm9, %v2340_v47  ;;  %3497 = vst.msk [vmem:[#allocation2 + $0xb0] sm:$0xff] %vm22_vm9, %v3433_v5  ;;  %v21545_v62 = vld [vmem:[#allocation9_spill] sm:$0xff]  ;;  %v21546_v53 = vld [vmem:[#allocation10_spill] sm:$0xff] }
 0x19e   :  { %21543 = vst [vmem:[#allocation6_spill] sm:$0xff] %v16448_v33  ;;  %21544 = vst [vmem:[#allocation16_spill] sm:$0xff] %v16450_v24  ;;  %v3434_v19 = vadd.f32 %v21545_v62, %v2884_v13  ;;  %v12093_v18 = vld [vmem:[%s21441_s0 + $0x38] sm:$0x1]  ;;  %v12693_v24 = vld [vmem:[%s21442_s1 + $0x10] sm:$0x3]  ;;  %v5199_v3 = vsel %vm14066_vm7, %v5194_v6, %v5198_v29  ;;  %v5209_v21 = vsel %vm14066_vm7, %v5204_v14, %v5208_v50 }
 0x19f   :  { %v16465_v33 = vpop.f32.mrb[78].mxu1  ;;  %v16467_v47 = vpop.f32.mrb[74].mxu0  ;;  %v6093_v31 = vsel %vm14113_vm8, %v6091_v49, %v6092_v61  ;;  %v2339_v37 = vadd.f32 %v21546_v53, %v1789_v27  ;;  %v1794_v28 = vld [vmem:[#allocation2 + $0xf0] sm:$0xff]  ;;  %v12094_v13 = vld [vmem:[%s21441_s0 + $0x3c] sm:$0xe]  ;;  %v12049_v50 = vcombine.low %v5199_v3, %v5209_v21  ;;  %2402 = vst.msk [vmem:[#allocation2 + $0xc0] sm:$0xff] %vm22_vm9, %v2338_v56 }
 0x1a0   :  { %v16482_v5 = vld [vmem:[%s21441_s0 + $0x40] sm:$0xf]  ;;  %v16484_v62 = vpop.f32.mrb[79].mxu1  ;;  %v16486_v29 = vpop.f32.mrb[75].mxu0  ;;  %v12212_v6 = vcombine.low %v6090_v38, %v6093_v31  ;;  %3495 = vst.msk [vmem:[#allocation2 + $0xa0] sm:$0xff] %vm22_vm9, %v3431_v11  ;;  %2405 = vst.msk [vmem:[#allocation2 + $0xd8] sm:$0xff] %vm22_vm9, %v2341_v2 }
 0x1a1   :  { %3498 = vst.msk [vmem:[#allocation2 + $0xb8] sm:$0xff] %vm22_vm9, %v3434_v19  ;;  %v21547_v61 = vld [vmem:[#allocation13_spill] sm:$0xff]  ;;  %v12180_v14 = vrot.slane %v16411_v7, 9  ;;  %v1792_v49 = vld [vmem:[#allocation2 + $0xe0] sm:$0xff]  ;;  %2403 = vst.msk [vmem:[#allocation2 + $0xc8] sm:$0xff] %vm22_vm9, %v2339_v37  ;;  %v6096_v53 = vrot.slane %v16421_v30, 5  ;;  %13513 = vmatmul.mubr.msk.bf16.gmra.mrb[156].mxu0 %vm376_vm2, %v12049_v50  ;;  %v16508_v30 = vand.u32 %v12693_v24, %v21541_v41 }
 0x1a2   :  { %v3432_v27 = vadd.f32 %v21547_v61, %v2882_v9  ;;  %v6099_v3 = vrot.slane %v16426_v36, 5  ;;  %v12181_v38 = vrot.slane %v16431_v59, 9  ;;  %v6103_v56 = vrot.slane %v16436_v43, 5  ;;  %v1795_v11 = vld [vmem:[#allocation2 + $0xf8] sm:$0xff]  ;;  %v16502_v2 = vld [vmem:[%s21441_s0 + $0x44] sm:$0x1]  ;;  %13519 = vmatmul.mubr.msk.bf16.vlgmr.msra.gmra.mrb[160].mxu1 %vm376_vm2, %v12212_v6  ;;  %13584 = vmatprep.mubr.msk.bf16.mxu0 %vm376_vm2, %v13851_v63 }
 0x1a3   :  { %v6106_v7 = vrot.slane %v12093_v18, 5  ;;  %v2344_v36 = vadd.f32 %v16171_v23, %v1794_v28  ;;  %v2342_v59 = vadd.f32 %v16178_v46, %v1792_v49  ;;  %v1793_v43 = vld [vmem:[#allocation2 + $0xe8] sm:$0xff]  ;;  %13649 = vmatpush3.bf16.msra.mxu1 %v16414_v0  ;;  %v6097_v18 = vsel %vm14113_vm8, %v12180_v14, %v6096_v53  ;;  %13714 = vmatprep.subr.bf16.mxu0 %v16508_v30  ;;  %v16536_v37 = vld [vmem:[%s21441_s0 + $0x50] sm:$0x1]  ;;  %v16554_v14 = vld [vmem:[%s21441_s0 + $0x58] sm:$0xf] }
 0x1a4   :  { %3496 = vst.msk [vmem:[#allocation2 + $0xa8] sm:$0xff] %vm22_vm9, %v3432_v27  ;;  %v12097_v9 = vld [vmem:[%s21441_s0 + $0x48] sm:$0xe]  ;;  %v12098_v19 = vld [vmem:[%s21441_s0 + $0x4c] sm:$0xf]  ;;  %v6098_v41 = vrot.slane %v6096_v53, 4  ;;  %v6104_v23 = vsel %vm14113_vm8, %v12181_v38, %v6103_v56  ;;  %v2345_v0 = vadd.f32 %v16188_v32, %v1795_v11  ;;  %v2343_v21 = vadd.f32 %v16192_v16, %v1793_v43 }
 0x1a5   :  { %v6105_v46 = vrot.slane %v6103_v56, 4  ;;  %v13852_v24 = vld [vmem:[%s21441_s0 + $0x24] sm:$0xff]   ;;  %2408 = vst.msk [vmem:[#allocation2 + $0xf0] sm:$0xff] %vm22_vm9, %v2344_v36  ;;  %2406 = vst.msk [vmem:[#allocation2 + $0xe0] sm:$0xff] %vm22_vm9, %v2342_v59  ;;  %v12182_v31 = vrot.slane %v12094_v13, 9  ;;  %v6110_v63 = vrot.slane %v16482_v5, 5 }
 0x1a6   :  { %v1798_v28 = vld [vmem:[#allocation2 + $0x110] sm:$0xff]  ;;  %v6100_v50 = vsel %vm14113_vm8, %v6098_v41, %v6099_v3  ;;  %v6113_v32 = vrot.slane %v16502_v2, 5  ;;  %v12183_v13 = vrot.slane %v12097_v9, 9  ;;  %v1796_v5 = vld [vmem:[#allocation2 + $0x100] sm:$0xff]  ;;  %2409 = vst.msk [vmem:[#allocation2 + $0xf8] sm:$0xff] %vm22_vm9, %v2345_v0  ;;  %2407 = vst.msk [vmem:[#allocation2 + $0xe8] sm:$0xff] %vm22_vm9, %v2343_v21 }
 0x1a7   :  { %v6107_v6 = vsel %vm14113_vm8, %v6105_v46, %v6106_v7  ;;  %v2887_v61 = vld [vmem:[#allocation2 + $0xd0] sm:$0xff]  ;;  %v12213_v49 = vcombine.low %v6097_v18, %v6100_v50  ;;  %v6111_v38 = vsel %vm14113_vm8, %v12182_v31, %v6110_v63  ;;  %v1799_v56 = vld [vmem:[#allocation2 + $0x118] sm:$0xff]  ;;  %v16569_v2 = vld [vmem:[%s21441_s0 + $0x64] sm:$0xf]  ;;  %v16571_v7 = vpop.f32.mrb[76].mxu0  ;;  %v6112_v59 = vrot.slane %v6110_v63, 4 }
 0x1a8   :  { %v13853_v16 = vld [vmem:[%s21441_s0 + $0x30] sm:$0xff]   ;;  %v12214_v53 = vcombine.low %v6104_v23, %v6107_v6  ;;  %v3437_v3 = vadd.f32 %v16173_v35, %v2887_v61  ;;  %v16564_v11 = vld [vmem:[%s21441_s0 + $0x5c] sm:$0x1]  ;;  %v2885_v35 = vld [vmem:[#allocation2 + $0xc0] sm:$0xff]  ;;  %v6117_v43 = vrot.slane %v12098_v19, 5  ;;  %v6120_v9 = vrot.slane %v16536_v37, 5 }
 0x1a9   :  { %v16549_v27 = vld [vmem:[%s21441_s0 + $0x54] sm:$0xe]  ;;  %v2888_v36 = vld [vmem:[#allocation2 + $0xd8] sm:$0xff]  ;;  %v2348_v18 = vadd.f32 %v16232_v54, %v1798_v28  ;;  %v16578_v41 = vld [vmem:[%s21441_s0 + $0x60] sm:$0xe]  ;;  %v16580_v23 = vpop.f32.mrb[80].mxu1  ;;  %13522 = vmatprep.mubr.msk.bf16.mxu1 %vm376_vm2, %v12213_v49  ;;  %v3435_v46 = vadd.f32 %v16186_v26, %v2885_v35  ;;  %v2346_v21 = vadd.f32 %v16241_v1, %v1796_v5  ;;  %v2349_v54 = vadd.f32 %v16249_v15, %v1799_v56 }
 0x1aa   :  { %3501 = vst.msk [vmem:[#allocation2 + $0xd0] sm:$0xff] %vm22_vm9, %v3437_v3  ;;  %v3438_v0 = vadd.f32 %v16190_v4, %v2888_v36  ;;  %v2886_v19 = vld [vmem:[#allocation2 + $0xc8] sm:$0xff]  ;;  %v16588_v31 = vpop.f32.mrb[81].mxu1  ;;  %v16590_v63 = vpop.f32.mrb[77].mxu0  ;;  %v6114_v28 = vsel %vm14113_vm8, %v6112_v59, %v6113_v32  ;;  %v16597_v50 = vsel %vm14113_vm8, %v12183_v13, %v6117_v43  ;;  %v6119_v26 = vrot.slane %v6117_v43, 4  ;;  %13523 = vmatmul.mubr.msk.bf16.gmra.mrb[164].mxu1 %vm376_vm2, %v12214_v53  ;;  %v1802_v3 = vld [vmem:[#allocation2 + $0x130] sm:$0xff] }
 0x1ab   :  { %v3436_v37 = vadd.f32 %v16194_v58, %v2886_v19  ;;  %2412 = vst.msk [vmem:[#allocation2 + $0x110] sm:$0xff] %vm22_vm9, %v2348_v18  ;;  %v1797_v4 = vld [vmem:[#allocation2 + $0x108] sm:$0xff]  ;;  %v16600_v1 = vpop.f32.mrb[82].mxu1  ;;  %v16602_v15 = vpop.f32.mrb[78].mxu0  ;;  %13585 = vmatmul.mubr.msk.bf16.vlgmr.msra.gmra.mrb[160].mxu0 %vm376_vm2, %v13852_v24  ;;  %3499 = vst.msk [vmem:[#allocation2 + $0xc0] sm:$0xff] %vm22_vm9, %v3435_v46  ;;  %v12215_v58 = vcombine.low %v6111_v38, %v6114_v28  ;;  %v12184_v61 = vrot.slane %v16549_v27, 9 }
 0x1ac   :  { %3502 = vst.msk [vmem:[#allocation2 + $0xd8] sm:$0xff] %vm22_vm9, %v3438_v0  ;;  %2410 = vst.msk [vmem:[#allocation2 + $0x100] sm:$0xff] %vm22_vm9, %v2346_v21  ;;  %v2347_v6 = vadd.f32 %v16253_v34, %v1797_v4  ;;  %v6124_v32 = vrot.slane %v16554_v14, 5  ;;  %v16616_v13 = vld [vmem:[%s21441_s0 + $0x68] sm:$0x1]  ;;  %v16618_v24 = vpop.f32.mrb[83].mxu1  ;;  %13715 = vmatpush3.bf16.msra.mxu0 %v16508_v30  ;;  %13588 = vmatprep.mubr.msk.bf16.mxu0 %vm376_vm2, %v13853_v16  ;;  %v6121_v34 = vsel %vm14113_vm8, %v6119_v26, %v6120_v9 }
 0x1ad   :  { %2413 = vst.msk [vmem:[#allocation2 + $0x118] sm:$0xff] %vm22_vm9, %v2349_v54  ;;  %v16620_v5 = vpop.f32.mrb[79].mxu0  ;;  %3500 = vst.msk [vmem:[#allocation2 + $0xc8] sm:$0xff] %vm22_vm9, %v3436_v37  ;;  %v2891_v27 = vld [vmem:[#allocation2 + $0xf0] sm:$0xff]  ;;  %v2889_v14 = vld [vmem:[#allocation2 + $0xe0] sm:$0xff]  ;;  %v6127_v49 = vrot.slane %v16564_v11, 5  ;;  %13526 = vmatprep.mubr.msk.bf16.mxu1 %vm376_vm2, %v12215_v58  ;;  %v12216_v43 = vcombine.low %v16597_v50, %v6121_v34  ;;  %v2352_v21 = vadd.f32 %v16290_v44, %v1802_v3 }
 0x1ae   :  { %v6131_v53 = vrot.slane %v16569_v2, 5  ;;  %v1800_v38 = vld [vmem:[#allocation2 + $0x120] sm:$0xff]  ;;  %v16632_v56 = vld [vmem:[%s21441_s0 + $0x6c] sm:$0xe]  ;;  %v3441_v16 = vadd.f32 %v16234_v57, %v2891_v27  ;;  %v3439_v35 = vadd.f32 %v16245_v25, %v2889_v14  ;;  %2411 = vst.msk [vmem:[#allocation2 + $0x108] sm:$0xff] %vm22_vm9, %v2347_v6  ;;  %v12185_v11 = vrot.slane %v16578_v41, 9 }
 0x1af   :  { %v13854_v30 = vld [vmem:[%s21441_s0 + $0x3c] sm:$0xff]   ;;  %v1801_v36 = vld [vmem:[#allocation2 + $0x128] sm:$0xff]  ;;  %v12107_v59 = vld [vmem:[%s21441_s0 + $0x70] sm:$0xf]  ;;  %v6125_v46 = vsel %vm14113_vm8, %v12184_v61, %v6124_v32  ;;  %v6126_v57 = vrot.slane %v6124_v32, 4  ;;  %v2350_v54 = vadd.f32 %v16299_v39, %v1800_v38  ;;  %2416 = vst.msk [vmem:[#allocation2 + $0x130] sm:$0xff] %vm22_vm9, %v2352_v21 }
 0x1b0   :  { %v1803_v2 = vld [vmem:[#allocation2 + $0x138] sm:$0xff]  ;;  %v2890_v18 = vld [vmem:[#allocation2 + $0xe8] sm:$0xff]  ;;  %v6133_v0 = vrot.slane %v6131_v53, 4  ;;  %v12108_v25 = vld [vmem:[%s21441_s0 + $0x74] sm:$0x1]  ;;  %3505 = vst.msk [vmem:[#allocation2 + $0xf0] sm:$0xff] %vm22_vm9, %v3441_v16  ;;  %v2351_v39 = vadd.f32 %v16313_v60, %v1801_v36  ;;  %v16693_v3 = vsel %vm14113_vm8, %v12185_v11, %v6131_v53 }
 0x1b1   :  { %v2892_v9 = vld [vmem:[#allocation2 + $0xf8] sm:$0xff]  ;;  %3503 = vst.msk [vmem:[#allocation2 + $0xe0] sm:$0xff] %vm22_vm9, %v3439_v35  ;;  %v3440_v19 = vadd.f32 %v16255_v55, %v2890_v18  ;;  %v6128_v50 = vsel %vm14113_vm8, %v6126_v57, %v6127_v49  ;;  %v6134_v55 = vrot.slane %v16616_v13, 5  ;;  %v2353_v44 = vadd.f32 %v16309_v40, %v1803_v2  ;;  %2414 = vst.msk [vmem:[#allocation2 + $0x120] sm:$0xff] %vm22_vm9, %v2350_v54  ;;  %v16683_v61 = vld [vmem:[%s21441_s0 + $0x80] sm:$0x1] }
 0x1b2   :  { %v3442_v41 = vadd.f32 %v16251_v45, %v2892_v9  ;;  %v16660_v37 = vld [vmem:[%s21441_s0 + $0x78] sm:$0xe]  ;;  %v16665_v28 = vld [vmem:[%s21441_s0 + $0x7c] sm:$0xf]  ;;  %v13855_v45 = vld [vmem:[%s21441_s0 + $0x48] sm:$0xff]   ;;  %v12217_v26 = vcombine.low %v6125_v46, %v6128_v50  ;;  %v12186_v58 = vrot.slane %v16632_v56, 9  ;;  %13527 = vmatmul.mubr.msk.bf16.gmra.mrb[168].mxu1 %vm376_vm2, %v12216_v43 }
 0x1b3   :  { %3504 = vst.msk [vmem:[#allocation2 + $0xe8] sm:$0xff] %vm22_vm9, %v3440_v19  ;;  %v2895_v4 = vld [vmem:[#allocation2 + $0x110] sm:$0xff]  ;;  %v6138_v6 = vrot.slane %v12107_v59, 5  ;;  %v2893_v32 = vld [vmem:[#allocation2 + $0x100] sm:$0xff]  ;;  %2417 = vst.msk [vmem:[#allocation2 + $0x138] sm:$0xff] %vm22_vm9, %v2353_v44  ;;  %v6141_v34 = vrot.slane %v12108_v25, 5  ;;  %13589 = vmatmul.mubr.msk.bf16.gmra.mrb[164].mxu0 %vm376_vm2, %v13854_v30 }
 0x1b4   :  { %3506 = vst.msk [vmem:[#allocation2 + $0xf8] sm:$0xff] %vm22_vm9, %v3442_v41  ;;  %v1806_v40 = vld [vmem:[#allocation2 + $0x150] sm:$0xff]  ;;  %v3445_v60 = vadd.f32 %v16297_v17, %v2895_v4  ;;  %v2896_v13 = vld [vmem:[#allocation2 + $0x118] sm:$0xff]  ;;  %2415 = vst.msk [vmem:[#allocation2 + $0x128] sm:$0xff] %vm22_vm9, %v2351_v39  ;;  %v6145_v27 = vrot.slane %v16665_v28, 5  ;;  %v3443_v17 = vadd.f32 %v16304_v48, %v2893_v32  ;;  %v16707_v30 = vpop.f32.mrb[80].mxu0  ;;  %13530 = vmatprep.mubr.msk.bf16.mxu1 %vm376_vm2, %v12217_v26  ;;  %13592 = vmatprep.mubr.msk.bf16.mxu0 %vm376_vm2, %v13855_v45 }
 0x1b5   :  { %v1804_v14 = vld [vmem:[#allocation2 + $0x140] sm:$0xff]  ;;  %v1807_v49 = vld [vmem:[#allocation2 + $0x158] sm:$0xff]  ;;  %v3446_v38 = vadd.f32 %v16311_v10, %v2896_v13  ;;  %v6140_v56 = vrot.slane %v6138_v6, 4  ;;  %v1805_v16 = vld [vmem:[#allocation2 + $0x148] sm:$0xff]  ;;  %v6135_v48 = vsel %vm14113_vm8, %v6133_v0, %v6134_v55  ;;  %v16716_v53 = vsel %vm14113_vm8, %v12186_v58, %v6138_v6  ;;  %v16725_v43 = vpop.f32.mrb[84].mxu1  ;;  %v16727_v9 = vpop.f32.mrb[81].mxu0 }
 0x1b6   :  { %v16700_v35 = vld [vmem:[%s21441_s0 + $0x84] sm:$0xe]  ;;  %v16705_v2 = vld [vmem:[%s21441_s0 + $0x88] sm:$0xf]  ;;  %3509 = vst.msk [vmem:[#allocation2 + $0x110] sm:$0xff] %vm22_vm9, %v3445_v60  ;;  %v12187_v11 = vrot.slane %v16660_v37, 9  ;;  %v2356_v36 = vadd.f32 %v16358_v20, %v1806_v40  ;;  %v2354_v20 = vadd.f32 %v16370_v12, %v1804_v14  ;;  %v2357_v57 = vadd.f32 %v16376_v8, %v1807_v49 }
 0x1b7   :  { %v2894_v10 = vld [vmem:[#allocation2 + $0x108] sm:$0xff]  ;;  %3507 = vst.msk [vmem:[#allocation2 + $0x100] sm:$0xff] %vm22_vm9, %v3443_v17  ;;  %3510 = vst.msk [vmem:[#allocation2 + $0x118] sm:$0xff] %vm22_vm9, %v3446_v38  ;;  %v6142_v46 = vsel %vm14113_vm8, %v6140_v56, %v6141_v34  ;;  %v16736_v0 = vpop.f32.mrb[85].mxu1  ;;  %v16738_v25 = vpop.f32.mrb[82].mxu0  ;;  %v13856_v41 = vld [vmem:[%s21441_s0 + $0x54] sm:$0xff]   ;;  %v12218_v28 = vcombine.low %v16693_v3, %v6135_v48 }
 0x1b8   :  { %v16723_v59 = vld [vmem:[%s21441_s0 + $0x8c] sm:$0x1]  ;;  %v3444_v18 = vadd.f32 %v16315_v22, %v2894_v10  ;;  %v13857_v19 = vld [vmem:[%s21441_s0 + $0x60] sm:$0xff]   ;;  %v6147_v22 = vrot.slane %v6145_v27, 4  ;;  %v6148_v21 = vrot.slane %v16683_v61, 5  ;;  %2420 = vst.msk [vmem:[#allocation2 + $0x150] sm:$0xff] %vm22_vm9, %v2356_v36  ;;  %v12219_v50 = vcombine.low %v16716_v53, %v6142_v46 }
 0x1b9   :  { %v21548_v12 = vld [vmem:[#allocation14_spill] sm:$0xff]  ;;  %v16749_v8 = vpop.f32.mrb[86].mxu1  ;;  %v16751_v37 = vpop.f32.mrb[83].mxu0  ;;  %2418 = vst.msk [vmem:[#allocation2 + $0x140] sm:$0xff] %vm22_vm9, %v2354_v20  ;;  %2421 = vst.msk [vmem:[#allocation2 + $0x158] sm:$0xff] %vm22_vm9, %v2357_v57  ;;  %v6152_v45 = vrot.slane %v16705_v2, 5  ;;  %v16778_v14 = vsel %vm14113_vm8, %v12187_v11, %v6145_v27 }
 0x1ba   :  { %v2355_v54 = vadd.f32 %v21548_v12, %v1805_v16  ;;  %3508 = vst.msk [vmem:[#allocation2 + $0x108] sm:$0xff] %vm22_vm9, %v3444_v18  ;;  %v16762_v55 = vld [vmem:[%s21441_s0 + $0x94] sm:$0xf]  ;;  %v1808_v39 = vld [vmem:[#allocation2 + $0x160] sm:$0xff]  ;;  %v16764_v26 = vpop.f32.mrb[87].mxu1  ;;  %v12188_v6 = vrot.slane %v16700_v35, 9  ;;  %13531 = vmatmul.mubr.msk.bf16.gmra.mrb[172].mxu1 %vm376_vm2, %v12218_v28 }
 0x1bb   :  { %v1810_v44 = vld [vmem:[#allocation2 + $0x170] sm:$0xff]  ;;  %v2897_v58 = vld [vmem:[#allocation2 + $0x120] sm:$0xff]  ;;  %v6155_v61 = vrot.slane %v16723_v59, 5  ;;  %v1811_v34 = vld [vmem:[#allocation2 + $0x178] sm:$0xff]  ;;  %v6154_v35 = vrot.slane %v6152_v45, 4  ;;  %v6159_v11 = vrot.slane %v16762_v55, 5  ;;  %13593 = vmatmul.mubr.msk.bf16.gmra.mrb[168].mxu0 %vm376_vm2, %v13856_v41  ;;  %13534 = vmatprep.mubr.msk.bf16.mxu1 %vm376_vm2, %v12219_v50 }
 0x1bc   :  { %v2899_v4 = vld [vmem:[#allocation2 + $0x130] sm:$0xff]  ;;  %2419 = vst.msk [vmem:[#allocation2 + $0x148] sm:$0xff] %vm22_vm9, %v2355_v54  ;;  %v2360_v60 = vadd.f32 %v16438_v42, %v1810_v44  ;;  %v21549_v32 = vld [vmem:[#allocation6_spill] sm:$0xff]  ;;  %v21550_v49 = vld [vmem:[#allocation11_spill] sm:$0xff]  ;;  %v16789_v42 = vsel %vm14113_vm8, %v6147_v22, %v6148_v21  ;;  %v2361_v18 = vadd.f32 %v16465_v33, %v1811_v34  ;;  %13596 = vmatprep.mubr.msk.bf16.mxu0 %vm376_vm2, %v13857_v19 }
 0x1bd   :  { %v16772_v40 = vld [vmem:[%s21441_s0 + $0x90] sm:$0xe]  ;;  %v2358_v13 = vadd.f32 %v21549_v32, %v1808_v39  ;;  %v3449_v3 = vadd.f32 %v21550_v49, %v2899_v4  ;;  %v2900_v56 = vld [vmem:[#allocation2 + $0x138] sm:$0xff]  ;;  %v2898_v16 = vld [vmem:[#allocation2 + $0x128] sm:$0xff]  ;;  %v16818_v57 = vsel %vm14113_vm8, %v12188_v6, %v6152_v45  ;;  %v16822_v33 = vsel %vm14113_vm8, %v6154_v35, %v6155_v61 }
 0x1be   :  { %v21551_v17 = vld [vmem:[#allocation12_spill] sm:$0xff]  ;;  %v16785_v2 = vld [vmem:[%s21441_s0 + $0xa0] sm:$0xf]  ;;  %v21553_v27 = vld [vmem:[#allocation15_spill] sm:$0xff]  ;;  %2424 = vst.msk [vmem:[#allocation2 + $0x170] sm:$0xff] %vm22_vm9, %v2360_v60  ;;  %v12220_v19 = vcombine.low %v16778_v14, %v16789_v42  ;;  %v12189_v21 = vrot.slane %v16772_v40, 9  ;;  %v12221_v60 = vcombine.low %v16818_v57, %v16822_v33 }
 0x1bf   :  { %v3447_v38 = vadd.f32 %v21551_v17, %v2897_v58  ;;  %v21552_v48 = vld [vmem:[#allocation8_spill] sm:$0xff]  ;;  %v3448_v53 = vadd.f32 %v21553_v27, %v2898_v16  ;;  %2422 = vst.msk [vmem:[#allocation2 + $0x160] sm:$0xff] %vm22_vm9, %v2358_v13  ;;  %v1809_v36 = vld [vmem:[#allocation2 + $0x168] sm:$0xff]  ;;  %3513 = vst.msk [vmem:[#allocation2 + $0x130] sm:$0xff] %vm22_vm9, %v3449_v3  ;;  %v6166_v54 = vrot.slane %v16785_v2, 5  ;;  %v6161_v45 = vrot.slane %v6159_v11, 4 }
 0x1c0   :  { %v3450_v10 = vadd.f32 %v21552_v48, %v2900_v56  ;;  %v16803_v59 = vld [vmem:[%s21441_s0 + $0x98] sm:$0x1]  ;;  %v2359_v46 = vadd.f32 %v16484_v62, %v1809_v36  ;;  %v16810_v20 = vld [vmem:[%s21441_s0 + $0x9c] sm:$0xe]  ;;  %v16827_v62 = vld [vmem:[%s21441_s0 + $0xa4] sm:$0x1] }
 0x1c1   :  { %3511 = vst.msk [vmem:[#allocation2 + $0x120] sm:$0xff] %vm22_vm9, %v3447_v38  ;;  %3512 = vst.msk [vmem:[#allocation2 + $0x128] sm:$0xff] %vm22_vm9, %v3448_v53  ;;  %v16832_v41 = vld [vmem:[%s21441_s0 + $0xac] sm:$0xf]  ;;  %v2903_v12 = vld [vmem:[#allocation2 + $0x150] sm:$0xff]  ;;  %v6162_v44 = vrot.slane %v16803_v59, 5 }
 0x1c2   :  { %3514 = vst.msk [vmem:[#allocation2 + $0x138] sm:$0xff] %vm22_vm9, %v3450_v10  ;;  %v13858_v22 = vld [vmem:[%s21441_s0 + $0x6c] sm:$0xff]   ;;  %2425 = vst.msk [vmem:[#allocation2 + $0x178] sm:$0xff] %vm22_vm9, %v2361_v18  ;;  %v13859_v50 = vld [vmem:[%s21441_s0 + $0x78] sm:$0xff]   ;;  %v12190_v49 = vrot.slane %v16810_v20, 9  ;;  %v16861_v38 = vpop.f32.mrb[84].mxu0  ;;  %13535 = vmatmul.mubr.msk.bf16.gmra.mrb[176].mxu1 %vm376_vm2, %v12220_v19 }
 0x1c3   :  { %2423 = vst.msk [vmem:[#allocation2 + $0x168] sm:$0xff] %vm22_vm9, %v2359_v46  ;;  %v1814_v28 = vld [vmem:[#allocation2 + $0x190] sm:$0xff]  ;;  %v21554_v39 = vld [vmem:[#allocation7_spill] sm:$0xff]  ;;  %v2901_v58 = vld [vmem:[#allocation2 + $0x140] sm:$0xff]  ;;  %v6173_v16 = vrot.slane %v16832_v41, 5  ;;  %v16874_v42 = vpop.f32.mrb[88].mxu1  ;;  %13597 = vmatmul.mubr.msk.bf16.gmra.mrb[172].mxu0 %vm376_vm2, %v13858_v22  ;;  %13538 = vmatprep.mubr.msk.bf16.mxu1 %vm376_vm2, %v12221_v60 }
 0x1c4   :  { %v3453_v4 = vadd.f32 %v21554_v39, %v2903_v12  ;;  %v2904_v6 = vld [vmem:[#allocation2 + $0x158] sm:$0xff]  ;;  %v16853_v61 = vld [vmem:[%s21441_s0 + $0xa8] sm:$0xe]  ;;  %v2364_v40 = vadd.f32 %v16580_v23, %v1814_v28  ;;  %v21555_v32 = vld [vmem:[#allocation16_spill] sm:$0xff]  ;;  %v16876_v48 = vpop.f32.mrb[85].mxu0  ;;  %v6169_v10 = vrot.slane %v16827_v62, 5  ;;  %13600 = vmatprep.mubr.msk.bf16.mxu0 %vm376_vm2, %v13859_v50 }
 0x1c5   :  { %v3451_v13 = vadd.f32 %v21555_v32, %v2901_v58  ;;  %v3454_v34 = vadd.f32 %v16467_v47, %v2904_v6  ;;  %v2902_v14 = vld [vmem:[#allocation2 + $0x148] sm:$0xff]  ;;  %v1812_v3 = vld [vmem:[#allocation2 + $0x180] sm:$0xff]  ;;  %v1815_v17 = vld [vmem:[#allocation2 + $0x198] sm:$0xff]  ;;  %v16882_v59 = vpop.f32.mrb[89].mxu1  ;;  %v12191_v57 = vrot.slane %v16853_v61, 9  ;;  %v6175_v22 = vrot.slane %v6173_v16, 4 }
 0x1c6   :  { %3517 = vst.msk [vmem:[#allocation2 + $0x150] sm:$0xff] %vm22_vm9, %v3453_v4  ;;  %v3452_v56 = vadd.f32 %v16486_v29, %v2902_v14  ;;  %v16868_v23 = vld [vmem:[%s21441_s0 + $0xb0] sm:$0x1]  ;;  %2428 = vst.msk [vmem:[#allocation2 + $0x190] sm:$0xff] %vm22_vm9, %v2364_v40  ;;  %v2362_v47 = vadd.f32 %v16588_v31, %v1812_v3  ;;  %v2365_v35 = vadd.f32 %v16600_v1, %v1815_v17  ;;  %v1813_v2 = vld [vmem:[#allocation2 + $0x188] sm:$0xff]  ;;  %v6168_v29 = vrot.slane %v6166_v54, 4 }
 0x1c7   :  { %3515 = vst.msk [vmem:[#allocation2 + $0x140] sm:$0xff] %vm22_vm9, %v3451_v13  ;;  %3518 = vst.msk [vmem:[#allocation2 + $0x158] sm:$0xff] %vm22_vm9, %v3454_v34  ;;  %v2907_v27 = vld [vmem:[#allocation2 + $0x170] sm:$0xff]  ;;  %v2905_v53 = vld [vmem:[#allocation2 + $0x160] sm:$0xff]  ;;  %v2363_v36 = vadd.f32 %v16618_v24, %v1813_v2  ;;  %v16884_v31 = vpop.f32.mrb[86].mxu0  ;;  %v16896_v24 = vpop.f32.mrb[90].mxu1  ;;  %v16957_v60 = vsel %vm14113_vm8, %v12191_v57, %v6173_v16 }
 0x1c8   :  { %3516 = vst.msk [vmem:[#allocation2 + $0x148] sm:$0xff] %vm22_vm9, %v3452_v56  ;;  %v3457_v1 = vadd.f32 %v16571_v7, %v2907_v27  ;;  %2426 = vst.msk [vmem:[#allocation2 + $0x180] sm:$0xff] %vm22_vm9, %v2362_v47  ;;  %v3455_v18 = vadd.f32 %v16590_v63, %v2905_v53  ;;  %v16894_v46 = vld [vmem:[%s21441_s0 + $0xb8] sm:$0xf]  ;;  %v16898_v20 = vpop.f32.mrb[87].mxu0  ;;  %v16906_v7 = vsel %vm14113_vm8, %v12189_v21, %v6159_v11  ;;  %v6176_v33 = vrot.slane %v16868_v23, 5 }
 0x1c9   :  { %2429 = vst.msk [vmem:[#allocation2 + $0x198] sm:$0xff] %vm22_vm9, %v2365_v35  ;;  %v16910_v63 = vsel %vm14113_vm8, %v6161_v45, %v6162_v44  ;;  %2427 = vst.msk [vmem:[#allocation2 + $0x188] sm:$0xff] %vm22_vm9, %v2363_v36  ;;  %v16918_v62 = vld [vmem:[%s21441_s0 + $0xb4] sm:$0xe]  ;;  %v1816_v41 = vld [vmem:[#allocation2 + $0x1a0] sm:$0xff]  ;;  %v16920_v19 = vpop.f32.mrb[91].mxu1  ;;  %v6167_v11 = vsel %vm14113_vm8, %v12190_v49, %v6166_v54  ;;  %v6170_v50 = vsel %vm14113_vm8, %v6168_v29, %v6169_v10 }
 0x1ca   :  { %v1818_v55 = vld [vmem:[#allocation2 + $0x1b0] sm:$0xff]  ;;  %3521 = vst.msk [vmem:[#allocation2 + $0x170] sm:$0xff] %vm22_vm9, %v3457_v1  ;;  %3519 = vst.msk [vmem:[#allocation2 + $0x160] sm:$0xff] %vm22_vm9, %v3455_v18  ;;  %v2908_v21 = vld [vmem:[#allocation2 + $0x178] sm:$0xff]  ;;  %v2366_v45 = vadd.f32 %v16736_v0, %v1816_v41  ;;  %v6180_v58 = vrot.slane %v16894_v46, 5  ;;  %v12222_v40 = vcombine.low %v16906_v7, %v16910_v63  ;;  %v12223_v34 = vcombine.low %v6167_v11, %v6170_v50 }
 0x1cb   :  { %v2906_v12 = vld [vmem:[#allocation2 + $0x168] sm:$0xff]  ;;  %v2368_v28 = vadd.f32 %v16725_v43, %v1818_v55  ;;  %v1819_v44 = vld [vmem:[#allocation2 + $0x1b8] sm:$0xff]  ;;  %v3458_v54 = vadd.f32 %v16602_v15, %v2908_v21  ;;  %v13861_v43 = vld [vmem:[%s21441_s0 + $0x90] sm:$0xff]   ;;  %v16978_v14 = vsel %vm14113_vm8, %v6175_v22, %v6176_v33  ;;  %v12192_v49 = vrot.slane %v16918_v62, 9  ;;  %v13316_v62 = vpop.f32.mrb[92].mxu1 }
 0x1cc   :  { %v13860_v39 = vld [vmem:[%s21441_s0 + $0x84] sm:$0xff]   ;;  %v3456_v4 = vadd.f32 %v16620_v5, %v2906_v12  ;;  %v12126_v0 = vld [vmem:[%s21441_s0 + $0xbc] sm:$0x1]  ;;  %2430 = vst.msk [vmem:[#allocation2 + $0x1a0] sm:$0xff] %vm22_vm9, %v2366_v45  ;;  %v2369_v15 = vadd.f32 %v16749_v8, %v1819_v44  ;;  %v16964_v32 = vld [vmem:[%s21441_s0 + $0xc0] sm:$0xe]  ;;  %13539 = vmatmul.mubr.msk.bf16.gmra.mrb[180].mxu1 %vm376_vm2, %v12222_v40  ;;  %v12224_v63 = vcombine.low %v16957_v60, %v16978_v14 }
 0x1cd   :  { %v1817_v6 = vld [vmem:[#allocation2 + $0x1a8] sm:$0xff]  ;;  %v16947_v61 = vld [vmem:[%s21441_s0 + $0xc4] sm:$0xf]  ;;  %2432 = vst.msk [vmem:[#allocation2 + $0x1b0] sm:$0xff] %vm22_vm9, %v2368_v28  ;;  %3522 = vst.msk [vmem:[#allocation2 + $0x178] sm:$0xff] %vm22_vm9, %v3458_v54  ;;  %v6182_v56 = vrot.slane %v6180_v58, 4  ;;  %13601 = vmatmul.mubr.msk.bf16.gmra.mrb[176].mxu0 %vm376_vm2, %v13860_v39  ;;  %13542 = vmatprep.mubr.msk.bf16.mxu1 %vm376_vm2, %v12223_v34  ;;  %v17033_v11 = vsel %vm14113_vm8, %v12192_v49, %v6180_v58 }
 0x1ce   :  { %v2367_v5 = vadd.f32 %v16764_v26, %v1817_v6  ;;  %3520 = vst.msk [vmem:[#allocation2 + $0x168] sm:$0xff] %vm22_vm9, %v3456_v4  ;;  %v16969_v8 = vld [vmem:[%s21441_s0 + $0xc8] sm:$0x1]  ;;  %v2911_v26 = vld [vmem:[#allocation2 + $0x190] sm:$0xff]  ;;  %2433 = vst.msk [vmem:[#allocation2 + $0x1b8] sm:$0xff] %vm22_vm9, %v2369_v15  ;;  %v6183_v23 = vrot.slane %v12126_v0, 5  ;;  %13604 = vmatprep.mubr.msk.bf16.mxu0 %vm376_vm2, %v13861_v43 }
 0x1cf   :  { %v16974_v13 = vld [vmem:[%s21441_s0 + $0xe8] sm:$0xf]  ;;  %v3461_v3 = vadd.f32 %v16707_v30, %v2911_v26  ;;  %v1822_v17 = vld [vmem:[#allocation2 + $0x1d0] sm:$0xff]  ;;  %v6187_v16 = vrot.slane %v16947_v61, 5  ;;  %v2909_v47 = vld [vmem:[#allocation2 + $0x180] sm:$0xff]  ;;  %v12193_v57 = vrot.slane %v16964_v32, 9 }
 0x1d0   :  { %2431 = vst.msk [vmem:[#allocation2 + $0x1a8] sm:$0xff] %vm22_vm9, %v2367_v5  ;;  %v2912_v35 = vld [vmem:[#allocation2 + $0x198] sm:$0xff]  ;;  %v16988_v2 = vld [vmem:[%s21441_s0 + $0xe4] sm:$0xe]  ;;  %v16993_v30 = vld [vmem:[%s21441_s0 + $0xec] sm:$0x1]  ;;  %v2372_v29 = vadd.f32 %v16874_v42, %v1822_v17  ;;  %v3459_v27 = vadd.f32 %v16727_v9, %v2909_v47  ;;  %v17037_v22 = vsel %vm14113_vm8, %v6182_v56, %v6183_v23 }
 0x1d1   :  { %v1820_v10 = vld [vmem:[#allocation2 + $0x1c0] sm:$0xff]  ;;  %3525 = vst.msk [vmem:[#allocation2 + $0x190] sm:$0xff] %vm22_vm9, %v3461_v3  ;;  %v3462_v53 = vadd.f32 %v16738_v25, %v2912_v35  ;;  %v2910_v36 = vld [vmem:[#allocation2 + $0x188] sm:$0xff]  ;;  %v17002_v1 = vld [vmem:[%s21441_s0 + $0xf4] sm:$0xf]  ;;  %v6194_v7 = vrot.slane %v16974_v13, 5  ;;  %v12225_v23 = vcombine.low %v17033_v11, %v17037_v22 }
 0x1d2   :  { %v1823_v18 = vld [vmem:[#allocation2 + $0x1d8] sm:$0xff]  ;;  %v1821_v46 = vld [vmem:[#allocation2 + $0x1c8] sm:$0xff]  ;;  %v3460_v42 = vadd.f32 %v16751_v37, %v2910_v36  ;;  %2436 = vst.msk [vmem:[#allocation2 + $0x1d0] sm:$0xff] %vm22_vm9, %v2372_v29  ;;  %v2370_v9 = vadd.f32 %v16882_v59, %v1820_v10  ;;  %v17010_v25 = vpop.f32.mrb[88].mxu0  ;;  %v6190_v33 = vrot.slane %v16969_v8, 5  ;;  %3523 = vst.msk [vmem:[#allocation2 + $0x180] sm:$0xff] %vm22_vm9, %v3459_v27  ;;  %v17095_v29 = vsel %vm14113_vm8, %v12193_v57, %v6187_v16 }
 0x1d3   :  { %3526 = vst.msk [vmem:[#allocation2 + $0x198] sm:$0xff] %vm22_vm9, %v3462_v53  ;;  %v2373_v37 = vadd.f32 %v16896_v24, %v1823_v18  ;;  %v17024_v59 = vld [vmem:[%s21441_s0 + $0x100] sm:$0xf]  ;;  %v17026_v55 = vpop.f32.mrb[89].mxu0  ;;  %v6189_v24 = vrot.slane %v6187_v16, 4  ;;  %v2371_v44 = vadd.f32 %v16920_v19, %v1821_v46  ;;  %v2299_v39 = vpop.f32.mrb[93].mxu1 }
 0x1d4   :  { %v13862_v41 = vld [vmem:[%s21441_s0 + $0x9c] sm:$0xff]   ;;  %3524 = vst.msk [vmem:[#allocation2 + $0x188] sm:$0xff] %vm22_vm9, %v3460_v42  ;;  %v17045_v21 = vld [vmem:[%s21441_s0 + $0xf0] sm:$0xe]  ;;  %v17050_v12 = vld [vmem:[%s21441_s0 + $0xf8] sm:$0x1]  ;;  %13543 = vmatmul.mubr.msk.bf16.gmra.mrb[184].mxu1 %vm376_vm2, %v12224_v63 }
 0x1d5   :  { %v2915_v28 = vld [vmem:[#allocation2 + $0x1b0] sm:$0xff]  ;;  %2434 = vst.msk [vmem:[#allocation2 + $0x1c0] sm:$0xff] %vm22_vm9, %v2370_v9  ;;  %v2913_v45 = vld [vmem:[#allocation2 + $0x1a0] sm:$0xff]  ;;  %v17054_v50 = vpop.f32.mrb[90].mxu0  ;;  %v13863_v54 = vld [vmem:[%s21441_s0 + $0xa8] sm:$0xff]   ;;  %v12194_v4 = vrot.slane %v16988_v2, 9  ;;  %v17099_v10 = vsel %vm14113_vm8, %v6189_v24, %v6190_v33  ;;  %13605 = vmatmul.mubr.msk.bf16.gmra.mrb[180].mxu0 %vm376_vm2, %v13862_v41  ;;  %13546 = vmatprep.mubr.msk.bf16.mxu1 %vm376_vm2, %v12225_v23 }
 0x1d6   :  { %v6197_v58 = vrot.slane %v16993_v30, 5  ;;  %v3465_v6 = vadd.f32 %v16861_v38, %v2915_v28  ;;  %v3463_v43 = vadd.f32 %v16876_v48, %v2913_v45  ;;  %2437 = vst.msk [vmem:[#allocation2 + $0x1d8] sm:$0xff] %vm22_vm9, %v2373_v37  ;;  %v17067_v19 = vld [vmem:[%s21441_s0 + $0x10c] sm:$0xf]  ;;  %v1826_v0 = vld [vmem:[#allocation2 + $0x1f0] sm:$0xff]  ;;  %v1824_v15 = vld [vmem:[#allocation2 + $0x1e0] sm:$0xff]  ;;  %13608 = vmatprep.mubr.msk.bf16.mxu0 %vm376_vm2, %v13863_v54 }
 0x1d7   :  { %v13317_v5 = vpop.f32.mrb[94].mxu1  ;;  %v17069_v40 = vpop.f32.mrb[91].mxu0  ;;  %v6196_v32 = vrot.slane %v6194_v7, 4  ;;  %v6201_v8 = vrot.slane %v17002_v1, 5  ;;  %v2916_v38 = vld [vmem:[#allocation2 + $0x1b8] sm:$0xff]  ;;  %2435 = vst.msk [vmem:[#allocation2 + $0x1c8] sm:$0xff] %vm22_vm9, %v2371_v44  ;;  %v2376_v49 = vadd.f32 %v13316_v62, %v1826_v0  ;;  %v2374_v3 = vadd.f32 %v2299_v39, %v1824_v15 }
 0x1d8   :  { %v2914_v48 = vld [vmem:[#allocation2 + $0x1a8] sm:$0xff]  ;;  %v17078_v26 = vld [vmem:[%s21441_s0 + $0xfc] sm:$0xe]  ;;  %v17083_v34 = vld [vmem:[%s21441_s0 + $0x104] sm:$0x1]  ;;  %v2302_v56 = vpop.f32.mrb[95].mxu1  ;;  %v3466_v47 = vadd.f32 %v16884_v31, %v2916_v38  ;;  %v17118_v16 = vsel %vm14113_vm8, %v12194_v4, %v6194_v7 }
 0x1d9   :  { %v1827_v17 = vld [vmem:[#allocation2 + $0x1f8] sm:$0xff]  ;;  %3529 = vst.msk [vmem:[#allocation2 + $0x1b0] sm:$0xff] %vm22_vm9, %v3465_v6  ;;  %3527 = vst.msk [vmem:[#allocation2 + $0x1a0] sm:$0xff] %vm22_vm9, %v3463_v43  ;;  %v3464_v35 = vadd.f32 %v16898_v20, %v2914_v48  ;;  %v1825_v30 = vld [vmem:[#allocation2 + $0x1e8] sm:$0xff]  ;;  %v6208_v27 = vrot.slane %v17024_v59, 5  ;;  %v12195_v53 = vrot.slane %v17045_v21, 9  ;;  %v17142_v7 = vsel %vm14113_vm8, %v6196_v32, %v6197_v58 }
 0x1da   :  { %v2377_v2 = vadd.f32 %v13317_v5, %v1827_v17  ;;  %v17105_v31 = vld [vmem:[%s21441_s0 + $0x108] sm:$0xe]  ;;  %v17110_v20 = vld [vmem:[%s21441_s0 + $0x110] sm:$0x1]  ;;  %2440 = vst.msk [vmem:[#allocation2 + $0x1f0] sm:$0xff] %vm22_vm9, %v2376_v49  ;;  %2438 = vst.msk [vmem:[#allocation2 + $0x1e0] sm:$0xff] %vm22_vm9, %v2374_v3  ;;  %v2375_v61 = vadd.f32 %v2302_v56, %v1825_v30  ;;  %v12227_v38 = vcombine.low %v17118_v16, %v17142_v7 }
 0x1db   :  { %v6204_v36 = vrot.slane %v17050_v12, 5  ;;  %3530 = vst.msk [vmem:[#allocation2 + $0x1b8] sm:$0xff] %vm22_vm9, %v3466_v47  ;;  %3528 = vst.msk [vmem:[#allocation2 + $0x1a8] sm:$0xff] %vm22_vm9, %v3464_v35  ;;  %v2919_v18 = vld [vmem:[#allocation2 + $0x1d0] sm:$0xff]  ;;  %v17133_v13 = vld [vmem:[%s21441_s0 + $0x118] sm:$0xf] }
 0x1dc   :  { %2441 = vst.msk [vmem:[#allocation2 + $0x1f8] sm:$0xff] %vm22_vm9, %v2377_v2  ;;  %v17128_v46 = vld [vmem:[%s21441_s0 + $0x114] sm:$0xe]  ;;  %v17146_v9 = vrot.slane %v6201_v8, 4  ;;  %v6215_v57 = vrot.slane %v17067_v19, 5  ;;  %v3469_v33 = vadd.f32 %v17010_v25, %v2919_v18  ;;  %2439 = vst.msk [vmem:[#allocation2 + $0x1e8] sm:$0xff] %vm22_vm9, %v2375_v61  ;;  %v12226_v25 = vcombine.low %v17095_v29, %v17099_v10 }
 0x1dd   :  { %v3606_v42 = vld [vmem:[#allocation2 + $0x10] sm:$0xff]  ;;  %v17154_v60 = vld [vmem:[%s21441_s0 + $0x11c] sm:$0x1]  ;;  %v17159_v14 = vld [vmem:[%s21441_s0 + $0x124] sm:$0xf]  ;;  %v13382_v63 = vpop.f32.mrb[92].mxu0 }
 0x1de   :  { %v3604_v37 = vld [vmem:[#allocation2] sm:$0xff]  ;;  %v17164_v62 = vld [vmem:[%s21441_s0 + $0x130] sm:$0xf]  ;;  %v12196_v41 = vrot.slane %v17078_v26, 9  ;;  %v6211_v11 = vrot.slane %v17083_v34, 5  ;;  %v12197_v22 = vrot.slane %v17105_v31, 9  ;;  %13547 = vmatmul.mubr.msk.bf16.gmra.mrb[188].mxu1 %vm376_vm2, %v12226_v25 }
 0x1df   :  { %v2917_v24 = vld [vmem:[#allocation2 + $0x1c0] sm:$0xff]  ;;  %v17181_v45 = vld [vmem:[%s21441_s0 + $0x128] sm:$0x1]  ;;  %v13388_v44 = vpop.f32.mrb[96].mxu1  ;;  %v3396_v39 = vpop.f32.mrb[93].mxu0  ;;  %v13864_v54 = vld [vmem:[%s21441_s0 + $0xb4] sm:$0xff]   ;;  %13550 = vmatprep.mubr.msk.bf16.mxu1 %vm376_vm2, %v12227_v38 }
 0x1e0   :  { %v17176_v28 = vld [vmem:[%s21441_s0 + $0x120] sm:$0xe]  ;;  %v6210_v4 = vrot.slane %v6208_v27, 4  ;;  %v6218_v58 = vrot.slane %v17110_v20, 5  ;;  %3533 = vst.msk [vmem:[#allocation2 + $0x1d0] sm:$0xff] %vm22_vm9, %v3469_v33  ;;  %v3467_v6 = vadd.f32 %v17026_v55, %v2917_v24  ;;  %v2920_v43 = vld [vmem:[#allocation2 + $0x1d8] sm:$0xff]  ;;  %v4220_v0 = vadd.f32 %v13388_v44, %v3606_v42  ;;  %13609 = vmatmul.mubr.msk.bf16.gmra.mrb[184].mxu0 %vm376_vm2, %v13864_v54 }
 0x1e1   :  { %v3963_v15 = vpop.f32.mrb[97].mxu1  ;;  %v13383_v5 = vpop.f32.mrb[94].mxu0  ;;  %v3607_v32 = vld [vmem:[#allocation2 + $0x18] sm:$0xff]  ;;  %v3470_v48 = vadd.f32 %v17054_v50, %v2920_v43  ;;  %v2918_v49 = vld [vmem:[#allocation2 + $0x1c8] sm:$0xff]  ;;  %v6222_v3 = vrot.slane %v17133_v13, 5  ;;  %v17202_v47 = vrot.slane %v6215_v57, 4  ;;  %v17281_v12 = vsel %vm14113_vm8, %v12196_v41, %v6208_v27 }
 0x1e2   :  { %v4218_v17 = vadd.f32 %v3963_v15, %v3604_v37  ;;  %v13389_v56 = vpop.f32.mrb[98].mxu1  ;;  %v3399_v23 = vpop.f32.mrb[95].mxu0  ;;  %v17198_v55 = vld [vmem:[%s21441_s0 + $0x12c] sm:$0xe]  ;;  %3531 = vst.msk [vmem:[#allocation2 + $0x1c0] sm:$0xff] %vm22_vm9, %v3467_v6  ;;  %v3468_v35 = vadd.f32 %v17069_v40, %v2918_v49  ;;  %v12198_v50 = vrot.slane %v17128_v46, 9 }
 0x1e3   :  { %4284 = vst.msk [vmem:[#allocation2 + $0x10] sm:$0xff] %vm22_vm9, %v4220_v0  ;;  %v4221_v2 = vadd.f32 %v13389_v56, %v3607_v32  ;;  %v3605_v30 = vld [vmem:[#allocation2 + $0x8] sm:$0xff]  ;;  %v3966_v61 = vpop.f32.mrb[99].mxu1  ;;  %v17211_v16 = vld [vmem:[%s21441_s0 + $0x134] sm:$0x1]  ;;  %v13865_v40 = vld [vmem:[%s21441_s0 + $0xc0] sm:$0xff]   ;;  %v17251_v56 = vsel %vm14113_vm8, %v12195_v53, %v6201_v8  ;;  %v17287_v8 = vsel %vm14113_vm8, %v6210_v4, %v6211_v11 }
 0x1e4   :  { %v17216_v18 = vld [vmem:[%s21441_s0 + $0x13c] sm:$0xf]  ;;  %3534 = vst.msk [vmem:[#allocation2 + $0x1d8] sm:$0xff] %vm22_vm9, %v3470_v48  ;;  %v6225_v42 = vrot.slane %v17154_v60, 5  ;;  %v6229_v7 = vrot.slane %v17159_v14, 5  ;;  %v2923_v33 = vld [vmem:[#allocation2 + $0x1f0] sm:$0xff]  ;;  %v4219_v24 = vadd.f32 %v3966_v61, %v3605_v30  ;;  %13612 = vmatprep.mubr.msk.bf16.mxu0 %vm376_vm2, %v13865_v40  ;;  %v17401_v19 = vsel %vm14113_vm8, %v12198_v50, %v6222_v3 }
 0x1e5   :  { %v2921_v37 = vld [vmem:[#allocation2 + $0x1e0] sm:$0xff]  ;;  %4282 = vst.msk [vmem:[#allocation2] sm:$0xff] %vm22_vm9, %v4218_v17  ;;  %v6236_v44 = vrot.slane %v17164_v62, 5  ;;  %v17229_v6 = vld [vmem:[%s21441_s0 + $0x138] sm:$0xe]  ;;  %3532 = vst.msk [vmem:[#allocation2 + $0x1c8] sm:$0xff] %vm22_vm9, %v3468_v35  ;;  %v3473_v32 = vadd.f32 %v13382_v63, %v2923_v33  ;;  %v17258_v63 = vsel %vm14113_vm8, %v17146_v9, %v6204_v36 }
 0x1e6   :  { %v17234_v43 = vld [vmem:[%s21441_s0 + $0x140] sm:$0x1]  ;;  %v12199_v0 = vrot.slane %v17176_v28, 9  ;;  %v6232_v15 = vrot.slane %v17181_v45, 5  ;;  %v3471_v48 = vadd.f32 %v3396_v39, %v2921_v37  ;;  %v2924_v49 = vld [vmem:[#allocation2 + $0x1f8] sm:$0xff]  ;;  %4285 = vst.msk [vmem:[#allocation2 + $0x18] sm:$0xff] %vm22_vm9, %v4221_v2 }
 0x1e7   :  { %v17243_v17 = vld [vmem:[%s21441_s0 + $0x144] sm:$0xe]  ;;  %v17262_v39 = vrot.slane %v6222_v3, 4  ;;  %v3474_v35 = vadd.f32 %v13383_v5, %v2924_v49  ;;  %v2922_v2 = vld [vmem:[#allocation2 + $0x1e8] sm:$0xff]  ;;  %4283 = vst.msk [vmem:[#allocation2 + $0x8] sm:$0xff] %vm22_vm9, %v4219_v24  ;;  %v3610_v1 = vld [vmem:[#allocation2 + $0x30] sm:$0xff] }
 0x1e8   :  { %v17268_v21 = vld [vmem:[%s21441_s0 + $0x148] sm:$0xf]  ;;  %3537 = vst.msk [vmem:[#allocation2 + $0x1f0] sm:$0xff] %vm22_vm9, %v3473_v32  ;;  %3535 = vst.msk [vmem:[#allocation2 + $0x1e0] sm:$0xff] %vm22_vm9, %v3471_v48  ;;  %v3472_v29 = vadd.f32 %v3399_v23, %v2922_v2  ;;  %v13454_v59 = vpop.f32.mrb[96].mxu0  ;;  %v3608_v53 = vld [vmem:[#allocation2 + $0x20] sm:$0xff]  ;;  %v17428_v13 = vsel %vm14113_vm8, %v12199_v0, %v6229_v7 }
 0x1e9   :  { %v17295_v26 = vld [vmem:[%s21441_s0 + $0x14c] sm:$0x1]  ;;  %v17300_v34 = vld [vmem:[%s21441_s0 + $0x154] sm:$0xf]  ;;  %v17306_v27 = vrot.slane %v6229_v7, 4  ;;  %3538 = vst.msk [vmem:[#allocation2 + $0x1f8] sm:$0xff] %vm22_vm9, %v3474_v35  ;;  %v17420_v46 = vsel %vm14113_vm8, %v17262_v39, %v6225_v42 }
 0x1ea   :  { %v17311_v36 = vrot.slane %v6236_v44, 4  ;;  %v6243_v25 = vrot.slane %v17216_v18, 5  ;;  %v13392_v41 = vpop.f32.mrb[100].mxu1  ;;  %v5505_v11 = vpop.f32.mrb[97].mxu0  ;;  %v3611_v54 = vld [vmem:[#allocation2 + $0x38] sm:$0xff]  ;;  %v13866_v5 = vld [vmem:[%s21441_s0 + $0xcc] sm:$0xff]  }
 0x1eb   :  { %v17318_v4 = vld [vmem:[%s21441_s0 + $0x150] sm:$0xe]  ;;  %3536 = vst.msk [vmem:[#allocation2 + $0x1e8] sm:$0xff] %vm22_vm9, %v3472_v29  ;;  %v4224_v30 = vadd.f32 %v13392_v41, %v3610_v1  ;;  %v3979_v61 = vpop.f32.mrb[101].mxu1  ;;  %v13455_v40 = vpop.f32.mrb[98].mxu0  ;;  %v3609_v33 = vld [vmem:[#allocation2 + $0x28] sm:$0xff]  ;;  %v12228_v1 = vcombine.low %v17251_v56, %v17258_v63  ;;  %v12229_v41 = vcombine.low %v17281_v12, %v17287_v8  ;;  %13613 = vmatmul.mubr.msk.bf16.gmra.mrb[188].mxu0 %vm376_vm2, %v13866_v5 }
 0x1ec   :  { %v17329_v37 = vld [vmem:[%s21441_s0 + $0x158] sm:$0x1]  ;;  %v5212_v24 = vld [vmem:[#allocation2 + $0x10] sm:$0xff]  ;;  %v4222_v32 = vadd.f32 %v3979_v61, %v3608_v53  ;;  %v13393_v48 = vpop.f32.mrb[102].mxu1  ;;  %v5508_v49 = vpop.f32.mrb[99].mxu0  ;;  %v6250_v2 = vrot.slane %v17268_v21, 5  ;;  %v17441_v14 = vsel %vm14113_vm8, %v17306_v27, %v6232_v15 }
 0x1ed   :  { %v6257_v29 = vrot.slane %v17300_v34, 5  ;;  %4288 = vst.msk [vmem:[#allocation2 + $0x30] sm:$0xff] %vm22_vm9, %v4224_v30  ;;  %v5762_v23 = vadd.f32 %v13454_v59, %v5212_v24  ;;  %v5210_v38 = vld [vmem:[#allocation2] sm:$0xff]  ;;  %v4225_v9 = vadd.f32 %v13393_v48, %v3611_v54  ;;  %v3982_v53 = vpop.f32.mrb[103].mxu1  ;;  %v13867_v61 = vld [vmem:[%s21441_s0 + $0xf0] sm:$0xff]   ;;  %v17344_v35 = vrot.slane %v6243_v25, 4  ;;  %13551 = vmatmul.mubr.msk.bf16.gmra.mrb[192].mxu1 %vm376_vm2, %v12228_v1 }
 0x1ee   :  { %4286 = vst.msk [vmem:[#allocation2 + $0x20] sm:$0xff] %vm22_vm9, %v4222_v32  ;;  %v5760_v56 = vadd.f32 %v5505_v11, %v5210_v38  ;;  %v5213_v63 = vld [vmem:[#allocation2 + $0x18] sm:$0xff]  ;;  %v4223_v10 = vadd.f32 %v3982_v53, %v3609_v33  ;;  %v6253_v12 = vrot.slane %v17295_v26, 5  ;;  %v5211_v59 = vld [vmem:[#allocation2 + $0x8] sm:$0xff]  ;;  %v12203_v54 = vrot.slane %v17318_v4, 9  ;;  %v13458_v20 = vpop.f32.mrb[100].mxu0  ;;  %13554 = vmatprep.mubr.msk.bf16.mxu1 %vm376_vm2, %v12229_v41  ;;  %13616 = vmatprep.mubr.msk.bf16.mxu0 %vm376_vm2, %v13867_v61 }
 0x1ef   :  { %5826 = vst.msk [vmem:[#allocation2 + $0x10] sm:$0xff] %vm22_vm9, %v5762_v23  ;;  %4289 = vst.msk [vmem:[#allocation2 + $0x38] sm:$0xff] %vm22_vm9, %v4225_v9  ;;  %v5763_v8 = vadd.f32 %v13455_v40, %v5213_v63  ;;  %v17354_v30 = vld [vmem:[%s21441_s0 + $0x15c] sm:$0xe]  ;;  %v17359_v11 = vld [vmem:[%s21441_s0 + $0x160] sm:$0xf]  ;;  %v5761_v38 = vadd.f32 %v5508_v49, %v5211_v59  ;;  %v17393_v32 = vsel %vm14113_vm8, %v17202_v47, %v6218_v58 }
 0x1f0   :  { %5824 = vst.msk [vmem:[#allocation2] sm:$0xff] %vm22_vm9, %v5760_v56  ;;  %4287 = vst.msk [vmem:[#allocation2 + $0x28] sm:$0xff] %vm22_vm9, %v4223_v10  ;;  %v17365_v9 = vrot.slane %v6250_v2, 4  ;;  %v6260_v23 = vrot.slane %v17329_v37, 5  ;;  %v3614_v40 = vld [vmem:[#allocation2 + $0x50] sm:$0xff]  ;;  %v17386_v10 = vsel %vm14113_vm8, %v12197_v22, %v6215_v57  ;;  %v17406_v31 = vrot.slane %v6257_v29, 4 }
 0x1f1   :  { %v17371_v33 = vld [vmem:[%s21441_s0 + $0x164] sm:$0x1]  ;;  %v17376_v24 = vld [vmem:[%s21441_s0 + $0x168] sm:$0xe]  ;;  %5827 = vst.msk [vmem:[#allocation2 + $0x18] sm:$0xff] %vm22_vm9, %v5763_v8  ;;  %5825 = vst.msk [vmem:[#allocation2 + $0x8] sm:$0xff] %vm22_vm9, %v5761_v38 }
 0x1f2   :  { %v3612_v57 = vld [vmem:[#allocation2 + $0x40] sm:$0xff]  ;;  %v17411_v22 = vld [vmem:[%s21441_s0 + $0x16c] sm:$0xf]  ;;  %v13396_v58 = vpop.f32.mrb[104].mxu1  ;;  %v5521_v3 = vpop.f32.mrb[101].mxu0  ;;  %v3615_v47 = vld [vmem:[#allocation2 + $0x58] sm:$0xff] }
 0x1f3   :  { %v12204_v60 = vrot.slane %v17354_v30, 9  ;;  %v6264_v50 = vrot.slane %v17359_v11, 5  ;;  %v13868_v42 = vld [vmem:[%s21441_s0 + $0xfc] sm:$0xff]   ;;  %v4228_v28 = vadd.f32 %v13396_v58, %v3614_v40  ;;  %v3995_v7 = vpop.f32.mrb[105].mxu1  ;;  %v13459_v0 = vpop.f32.mrb[102].mxu0  ;;  %v3613_v39 = vld [vmem:[#allocation2 + $0x48] sm:$0xff] }
 0x1f4   :  { %v6267_v5 = vrot.slane %v17371_v33, 5  ;;  %v17447_v48 = vld [vmem:[%s21441_s0 + $0x170] sm:$0x1]  ;;  %v12205_v49 = vrot.slane %v17376_v24, 9  ;;  %v13869_v45 = vld [vmem:[%s21441_s0 + $0x108] sm:$0xff]   ;;  %v21556_v15 = vrot.slane %v17198_v55, 9  ;;  %v4226_v61 = vadd.f32 %v3995_v7, %v3612_v57  ;;  %13617 = vmatmul.mubr.msk.bf16.gmra.mrb[192].mxu0 %vm376_vm2, %v13868_v42 }
 0x1f5   :  { %v21557_v1 = vrot.slane %v17211_v16, 5  ;;  %v5216_v53 = vld [vmem:[#allocation2 + $0x30] sm:$0xff]  ;;  %v13397_v56 = vpop.f32.mrb[106].mxu1  ;;  %v5524_v63 = vpop.f32.mrb[103].mxu0  ;;  %v6271_v8 = vrot.slane %v17411_v22, 5  ;;  %v12230_v55 = vcombine.low %v17386_v10, %v17393_v32  ;;  %4292 = vst.msk [vmem:[#allocation2 + $0x50] sm:$0xff] %vm22_vm9, %v4228_v28  ;;  %v12231_v57 = vcombine.low %v17401_v19, %v17420_v46  ;;  %13620 = vmatprep.mubr.msk.bf16.mxu0 %vm376_vm2, %v13869_v45 }
 0x1f6   :  { %v17459_v27 = vsel %vm14113_vm8, %v21556_v15, %v6236_v44  ;;  %v17472_v62 = vld [vmem:[%s21441_s0 + $0x178] sm:$0xf]  ;;  %v5766_v16 = vadd.f32 %v13458_v20, %v5216_v53  ;;  %v5214_v44 = vld [vmem:[#allocation2 + $0x20] sm:$0xff]  ;;  %v3998_v59 = vpop.f32.mrb[107].mxu1  ;;  %v17480_v38 = vld [vmem:[%s21441_s0 + $0x174] sm:$0xe]  ;;  %v17563_v45 = vsel %vm14113_vm8, %v17365_v9, %v6253_v12 }
 0x1f7   :  { %v17466_v41 = vsel %vm14113_vm8, %v17311_v36, %v21557_v1  ;;  %v4229_v36 = vadd.f32 %v13397_v56, %v3615_v47  ;;  %v17485_v40 = vld [vmem:[%s21441_s0 + $0x17c] sm:$0x1]  ;;  %4290 = vst.msk [vmem:[#allocation2 + $0x40] sm:$0xff] %vm22_vm9, %v4226_v61  ;;  %v5764_v10 = vadd.f32 %v5521_v3, %v5214_v44  ;;  %v4227_v20 = vadd.f32 %v3998_v59, %v3613_v39  ;;  %v5215_v15 = vld [vmem:[#allocation2 + $0x28] sm:$0xff]  ;;  %v17502_v46 = vld [vmem:[%s21441_s0 + $0x180] sm:$0xe] }
 0x1f8   :  { %v5217_v32 = vld [vmem:[#allocation2 + $0x38] sm:$0xff]  ;;  %v6278_v58 = vrot.slane %v17472_v62, 5  ;;  %v12232_v47 = vcombine.low %v17428_v13, %v17441_v14  ;;  %v12233_v28 = vcombine.low %v17459_v27, %v17466_v41  ;;  %5830 = vst.msk [vmem:[#allocation2 + $0x30] sm:$0xff] %vm22_vm9, %v5766_v16  ;;  %v6266_v19 = vrot.slane %v6264_v50, 4  ;;  %v17507_v3 = vld [vmem:[%s21441_s0 + $0x184] sm:$0xf]  ;;  %13555 = vmatmul.mubr.msk.bf16.gmra.mrb[196].mxu1 %vm376_vm2, %v12230_v55 }
 0x1f9   :  { %4293 = vst.msk [vmem:[#allocation2 + $0x58] sm:$0xff] %vm22_vm9, %v4229_v36  ;;  %v5767_v7 = vadd.f32 %v13459_v0, %v5217_v32  ;;  %v21558_v39 = vrot.slane %v17229_v6, 9  ;;  %5828 = vst.msk [vmem:[#allocation2 + $0x20] sm:$0xff] %vm22_vm9, %v5764_v10  ;;  %v5765_v1 = vadd.f32 %v5524_v63, %v5215_v15  ;;  %v6274_v53 = vrot.slane %v17447_v48, 5  ;;  %v17523_v61 = vld [vmem:[%s21441_s0 + $0x188] sm:$0x1]  ;;  %13558 = vmatprep.mubr.msk.bf16.mxu1 %vm376_vm2, %v12231_v57 }
 0x1fa   :  { %4291 = vst.msk [vmem:[#allocation2 + $0x48] sm:$0xff] %vm22_vm9, %v4227_v20  ;;  %v6285_v18 = vrot.slane %v17507_v3, 5  ;;  %v21559_v6 = vrot.slane %v17234_v43, 5  ;;  %v21560_v48 = vrot.slane %v17243_v17, 9  ;;  %v6273_v42 = vrot.slane %v6271_v8, 4  ;;  %v3618_v63 = vld [vmem:[#allocation2 + $0x70] sm:$0xff] }
 0x1fb   :  { %v17515_v0 = vsel %vm14113_vm8, %v21558_v39, %v6243_v25  ;;  %5831 = vst.msk [vmem:[#allocation2 + $0x38] sm:$0xff] %vm22_vm9, %v5767_v7  ;;  %v3616_v43 = vld [vmem:[#allocation2 + $0x60] sm:$0xff]  ;;  %v12206_v55 = vrot.slane %v17480_v38, 9  ;;  %5829 = vst.msk [vmem:[#allocation2 + $0x28] sm:$0xff] %vm22_vm9, %v5765_v1  ;;  %v13400_v17 = vpop.f32.mrb[108].mxu1  ;;  %v3619_v21 = vld [vmem:[#allocation2 + $0x78] sm:$0xff]  ;;  %v17571_v59 = vsel %vm14113_vm8, %v12203_v54, %v6257_v29  ;;  %v17578_v38 = vsel %vm14113_vm8, %v17406_v31, %v6260_v23 }
 0x1fc   :  { %v17533_v25 = vsel %vm14113_vm8, %v17344_v35, %v21559_v6  ;;  %v17541_v56 = vsel %vm14113_vm8, %v21560_v48, %v6250_v2  ;;  %v6280_v35 = vrot.slane %v6278_v58, 4  ;;  %v6281_v2 = vrot.slane %v17485_v40, 5  ;;  %v13870_v36 = vld [vmem:[%s21441_s0 + $0x114] sm:$0xff]   ;;  %v13462_v40 = vpop.f32.mrb[104].mxu0  ;;  %v4011_v57 = vpop.f32.mrb[109].mxu1  ;;  %v3617_v12 = vld [vmem:[#allocation2 + $0x68] sm:$0xff] }
 0x1fd   :  { %v12207_v16 = vrot.slane %v17502_v46, 9  ;;  %v6288_v44 = vrot.slane %v17523_v61, 5  ;;  %v4232_v26 = vadd.f32 %v13400_v17, %v3618_v63  ;;  %v17583_v34 = vld [vmem:[%s21441_s0 + $0x18c] sm:$0xe]  ;;  %v17588_v4 = vld [vmem:[%s21441_s0 + $0x190] sm:$0xf]  ;;  %v17599_v29 = vsel %vm14113_vm8, %v12204_v60, %v6264_v50  ;;  %13621 = vmatmul.mubr.msk.bf16.gmra.mrb[196].mxu0 %vm376_vm2, %v13870_v36 }
 0x1fe   :  { %v13871_v37 = vld [vmem:[%s21441_s0 + $0x120] sm:$0xff]   ;;  %v17607_v54 = vsel %vm14113_vm8, %v12205_v49, %v6271_v8  ;;  %v5220_v9 = vld [vmem:[#allocation2 + $0x50] sm:$0xff]  ;;  %v4230_v23 = vadd.f32 %v4011_v57, %v3616_v43  ;;  %v5537_v31 = vpop.f32.mrb[105].mxu0  ;;  %v13401_v10 = vpop.f32.mrb[110].mxu1  ;;  %v6287_v11 = vrot.slane %v6285_v18, 4  ;;  %v17618_v24 = vsel %vm14113_vm8, %v6266_v19, %v6267_v5 }
 0x1ff   :  { %v12174_v30 = vld [vmem:[%s21441_s0 + $0x194] sm:$0x1]  ;;  %4296 = vst.msk [vmem:[#allocation2 + $0x70] sm:$0xff] %vm22_vm9, %v4232_v26  ;;  %v5770_v22 = vadd.f32 %v13462_v40, %v5220_v9  ;;  %v5218_v60 = vld [vmem:[#allocation2 + $0x40] sm:$0xff]  ;;  %v4233_v50 = vadd.f32 %v13401_v10, %v3619_v21  ;;  %v13463_v49 = vpop.f32.mrb[106].mxu0  ;;  %v4014_v8 = vpop.f32.mrb[111].mxu1  ;;  %v17626_v5 = vsel %vm14113_vm8, %v6273_v42, %v6274_v53  ;;  %v17634_v48 = vsel %vm14113_vm8, %v12206_v55, %v6278_v58 }
 0x200   :  { %v6292_v32 = vrot.slane %v17588_v4, 5  ;;  %4294 = vst.msk [vmem:[#allocation2 + $0x60] sm:$0xff] %vm22_vm9, %v4230_v23  ;;  %v5768_v20 = vadd.f32 %v5537_v31, %v5218_v60  ;;  %v5221_v7 = vld [vmem:[#allocation2 + $0x58] sm:$0xff]  ;;  %v4231_v15 = vadd.f32 %v4014_v8, %v3617_v12  ;;  %v5540_v39 = vpop.f32.mrb[107].mxu0  ;;  %v12208_v33 = vrot.slane %v17583_v34, 9  ;;  %13559 = vmatmul.mubr.msk.bf16.gmra.mrb[200].mxu1 %vm376_vm2, %v12232_v47  ;;  %13624 = vmatprep.mubr.msk.bf16.mxu0 %vm376_vm2, %v13871_v37  ;;  %v3620_v36 = vld [vmem:[#allocation2 + $0x80] sm:$0xff] }
 0x201   :  { %v6295_v1 = vrot.slane %v12174_v30, 5  ;;  %5834 = vst.msk [vmem:[#allocation2 + $0x50] sm:$0xff] %vm22_vm9, %v5770_v22  ;;  %4297 = vst.msk [vmem:[#allocation2 + $0x78] sm:$0xff] %vm22_vm9, %v4233_v50  ;;  %v5771_v19 = vadd.f32 %v13463_v49, %v5221_v7  ;;  %v5219_v6 = vld [vmem:[#allocation2 + $0x48] sm:$0xff]  ;;  %v12175_v43 = vld [vmem:[%s21441_s0 + $0x198] sm:$0xe]  ;;  %v17646_v62 = vsel %vm14113_vm8, %v6280_v35, %v6281_v2  ;;  %v12234_v21 = vcombine.low %v17515_v0, %v17533_v25 }
 0x202   :  { %v6294_v63 = vrot.slane %v6292_v32, 4  ;;  %v12176_v53 = vld [vmem:[%s21441_s0 + $0x19c] sm:$0xf]  ;;  %5832 = vst.msk [vmem:[#allocation2 + $0x40] sm:$0xff] %vm22_vm9, %v5768_v20  ;;  %4295 = vst.msk [vmem:[#allocation2 + $0x68] sm:$0xff] %vm22_vm9, %v4231_v15  ;;  %v5769_v42 = vadd.f32 %v5540_v39, %v5219_v6  ;;  %v12209_v55 = vrot.slane %v12175_v43, 9  ;;  %v12235_v35 = vcombine.low %v17541_v56, %v17563_v45  ;;  %13562 = vmatprep.mubr.msk.bf16.mxu1 %vm376_vm2, %v12233_v28 }
 0x203   :  { %v12177_v58 = vld [vmem:[%s21441_s0 + $0x1a0] sm:$0x1]  ;;  %v6299_v17 = vrot.slane %v12176_v53, 5  ;;  %5835 = vst.msk [vmem:[#allocation2 + $0x58] sm:$0xff] %vm22_vm9, %v5771_v19  ;;  %v12236_v13 = vcombine.low %v17571_v59, %v17578_v38  ;;  %v12237_v14 = vcombine.low %v17599_v29, %v17618_v24  ;;  %v12238_v47 = vcombine.low %v17607_v54, %v17626_v5  ;;  %v3622_v0 = vld [vmem:[#allocation2 + $0x90] sm:$0xff]  ;;  %v13404_v25 = vpop.f32.mrb[112].mxu1 }
 0x204   :  { %v6302_v2 = vrot.slane %v12177_v58, 5  ;;  %5833 = vst.msk [vmem:[#allocation2 + $0x48] sm:$0xff] %vm22_vm9, %v5769_v42  ;;  %v3623_v26 = vld [vmem:[#allocation2 + $0x98] sm:$0xff]  ;;  %v13872_v41 = vld [vmem:[%s21441_s0 + $0x12c] sm:$0xff]   ;;  %v12239_v28 = vcombine.low %v17634_v48, %v17646_v62  ;;  %v17684_v40 = vsel %vm14113_vm8, %v12207_v16, %v6285_v18  ;;  %v17690_v57 = vsel %vm14113_vm8, %v6287_v11, %v6288_v44  ;;  %v4027_v34 = vpop.f32.mrb[113].mxu1  ;;  %v13466_v49 = vpop.f32.mrb[108].mxu0 }
 0x205   :  { %v6301_v27 = vrot.slane %v6299_v17, 4  ;;  %v4236_v12 = vadd.f32 %v13404_v25, %v3622_v0  ;;  %v3621_v4 = vld [vmem:[#allocation2 + $0x88] sm:$0xff]  ;;  %v4234_v9 = vadd.f32 %v4027_v34, %v3620_v36  ;;  %v13405_v23 = vpop.f32.mrb[114].mxu1  ;;  %v17694_v3 = vsel %vm14113_vm8, %v12208_v33, %v6292_v32  ;;  %v12404_v18 = vld [vmem:[%s21441_s0 + $0x18] sm:$0xf]  ;;  %13625 = vmatmul.mubr.msk.bf16.gmra.mrb[200].mxu0 %vm376_vm2, %v13872_v41  ;;  %v3626_v41 = vld [vmem:[#allocation2 + $0xb0] sm:$0xff] }
 0x206   :  { %v5224_v37 = vld [vmem:[#allocation2 + $0x70] sm:$0xff]  ;;  %v17698_v46 = vsel %vm14113_vm8, %v6294_v63, %v6295_v1  ;;  %v17702_v61 = vsel %vm14113_vm8, %v12209_v55, %v6299_v17  ;;  %v12405_v16 = vld [vmem:[%s21441_s0 + $0x1c] sm:$0xf]  ;;  %v4237_v31 = vadd.f32 %v13405_v23, %v3623_v26  ;;  %v4030_v10 = vpop.f32.mrb[115].mxu1  ;;  %v12406_v30 = vld [vmem:[%s21441_s0 + $0x20] sm:$0x1]  ;;  %v12240_v39 = vcombine.low %v17684_v40, %v17690_v57 }
 0x207   :  { %4300 = vst.msk [vmem:[#allocation2 + $0x90] sm:$0xff] %vm22_vm9, %v4236_v12  ;;  %v5222_v44 = vld [vmem:[#allocation2 + $0x60] sm:$0xff]  ;;  %v17713_v11 = vsel %vm14113_vm8, %v6301_v27, %v6302_v2  ;;  %v7886_v22 = vshrl.u32 %v12404_v18, 16  ;;  %v7889_v60 = vshll.u32 %v12404_v18, 16  ;;  %v13873_v50 = vld [vmem:[%s21441_s0 + $0x138] sm:$0xff]   ;;  %4298 = vst.msk [vmem:[#allocation2 + $0x80] sm:$0xff] %vm22_vm9, %v4234_v9  ;;  %v4235_v32 = vadd.f32 %v4030_v10, %v3621_v4 }
 0x208   :  { %v5225_v8 = vld [vmem:[#allocation2 + $0x78] sm:$0xff]  ;;  %v7895_v20 = vshll.u32 %v12405_v16, 16  ;;  %v7899_v7 = vshrl.u32 %v12405_v16, 16  ;;  %v7905_v15 = vshll.u32 %v12406_v30, 16  ;;  %v5774_v33 = vadd.f32 %v13466_v49, %v5224_v37  ;;  %v5553_v1 = vpop.f32.mrb[109].mxu0  ;;  %4301 = vst.msk [vmem:[#allocation2 + $0x98] sm:$0xff] %vm22_vm9, %v4237_v31  ;;  %13563 = vmatmul.mubr.msk.bf16.gmra.mrb[204].mxu1 %vm376_vm2, %v12234_v21  ;;  %13628 = vmatprep.mubr.msk.bf16.mxu0 %vm376_vm2, %v13873_v50 }
 0x209   :  { %v5223_v19 = vld [vmem:[#allocation2 + $0x68] sm:$0xff]  ;;  %v7888_v6 = vrot.slane %v7886_v22, 4  ;;  %v7891_v63 = vrot.slane %v7889_v60, 5  ;;  %v5772_v43 = vadd.f32 %v5553_v1, %v5222_v44  ;;  %v13467_v53 = vpop.f32.mrb[110].mxu0  ;;  %4299 = vst.msk [vmem:[#allocation2 + $0x88] sm:$0xff] %vm22_vm9, %v4235_v32  ;;  %v12241_v42 = vcombine.low %v17694_v3, %v17698_v46  ;;  %13566 = vmatprep.mubr.msk.bf16.mxu1 %vm376_vm2, %v12235_v35  ;;  %v13408_v12 = vpop.f32.mrb[116].mxu1 }
 0x20a   :  { %v7897_v58 = vrot.slane %v7895_v20, 5  ;;  %v7901_v55 = vrot.slane %v7899_v7, 4  ;;  %5838 = vst.msk [vmem:[#allocation2 + $0x70] sm:$0xff] %vm22_vm9, %v5774_v33  ;;  %v5775_v17 = vadd.f32 %v13467_v53, %v5225_v8  ;;  %v5556_v2 = vpop.f32.mrb[111].mxu0  ;;  %v12242_v0 = vcombine.low %v17702_v61, %v17713_v11  ;;  %v12407_v26 = vld [vmem:[%s21441_s0 + $0x24] sm:$0xf] }
 0x20b   :  { %v7892_v25 = vor.u32 %v7891_v63, %v7888_v6  ;;  %v7907_v36 = vrot.slane %v7905_v15, 5  ;;  %v12408_v27 = vld [vmem:[%s21441_s0 + $0x28] sm:$0xf]  ;;  %5836 = vst.msk [vmem:[#allocation2 + $0x60] sm:$0xff] %vm22_vm9, %v5772_v43  ;;  %v5773_v21 = vadd.f32 %v5556_v2, %v5223_v19  ;;  %v3624_v34 = vld [vmem:[#allocation2 + $0xa0] sm:$0xff]  ;;  %v7910_v37 = vshrl.u32 %v12407_v26, 16 }
 0x20c   :  { %v7902_v4 = vor.u32 %v7901_v55, %v7897_v58  ;;  %v7913_v9 = vshll.u32 %v12407_v26, 16  ;;  %5839 = vst.msk [vmem:[#allocation2 + $0x78] sm:$0xff] %vm22_vm9, %v5775_v17  ;;  %v4240_v23 = vadd.f32 %v13408_v12, %v3626_v41  ;;  %v4043_v18 = vpop.f32.mrb[117].mxu1  ;;  %v12409_v56 = vld [vmem:[%s21441_s0 + $0x2c] sm:$0x1]  ;;  %v7919_v45 = vshll.u32 %v12408_v27, 16 }
 0x20d   :  { %v7893_v16 = vrot.slane %v7892_v25, 4  ;;  %v7923_v35 = vshrl.u32 %v12408_v27, 16  ;;  %v13874_v44 = vld [vmem:[%s21441_s0 + $0x144] sm:$0xff]   ;;  %5837 = vst.msk [vmem:[#allocation2 + $0x68] sm:$0xff] %vm22_vm9, %v5773_v21  ;;  %v4238_v31 = vadd.f32 %v4043_v18, %v3624_v34  ;;  %v3627_v10 = vld [vmem:[#allocation2 + $0xb8] sm:$0xff]  ;;  %v13409_v30 = vpop.f32.mrb[118].mxu1 }
 0x20e   :  { %v7903_v22 = vrot.slane %v7902_v4, 4  ;;  %v7912_v60 = vrot.slane %v7910_v37, 4  ;;  %v7915_v50 = vrot.slane %v7913_v9, 5  ;;  %4304 = vst.msk [vmem:[#allocation2 + $0xb0] sm:$0xff] %vm22_vm9, %v4240_v23  ;;  %v4241_v49 = vadd.f32 %v13409_v30, %v3627_v10  ;;  %v3625_v8 = vld [vmem:[#allocation2 + $0xa8] sm:$0xff]  ;;  %v4046_v32 = vpop.f32.mrb[119].mxu1  ;;  %13629 = vmatmul.mubr.msk.bf16.gmra.mrb[204].mxu0 %vm376_vm2, %v13874_v44 }
 0x20f   :  { %v7898_v20 = vsel %vm14066_vm7, %v7893_v16, %v7897_v58  ;;  %v7921_v7 = vrot.slane %v7919_v45, 5  ;;  %v7925_v15 = vrot.slane %v7923_v35, 4  ;;  %v12410_v33 = vld [vmem:[%s21441_s0 + $0x30] sm:$0xf]  ;;  %4302 = vst.msk [vmem:[#allocation2 + $0xa0] sm:$0xff] %vm22_vm9, %v4238_v31  ;;  %v4239_v6 = vadd.f32 %v4046_v32, %v3625_v8  ;;  %v5226_v55 = vld [vmem:[#allocation2 + $0x80] sm:$0xff] }
 0x210   :  { %v13875_v1 = vld [vmem:[%s21441_s0 + $0x150] sm:$0xff]   ;;  %v7908_v63 = vsel %vm14066_vm7, %v7903_v22, %v7907_v36  ;;  %v7916_v43 = vor.u32 %v7915_v50, %v7912_v60  ;;  %v7929_v53 = vshll.u32 %v12409_v56, 16  ;;  %4305 = vst.msk [vmem:[#allocation2 + $0xb8] sm:$0xff] %vm22_vm9, %v4241_v49  ;;  %v7934_v25 = vshrl.u32 %v12410_v33, 16  ;;  %v13470_v27 = vpop.f32.mrb[112].mxu0  ;;  %v5229_v21 = vld [vmem:[#allocation2 + $0x98] sm:$0xff]  ;;  %13567 = vmatmul.mubr.msk.bf16.gmra.mrb[208].mxu1 %vm376_vm2, %v12236_v13 }
 0x211   :  { %v5228_v19 = vld [vmem:[#allocation2 + $0x90] sm:$0xff]  ;;  %v17769_v17 = vcombine.low %v7898_v20, %v7908_v63  ;;  %v7926_v2 = vor.u32 %v7925_v15, %v7921_v7  ;;  %v7937_v26 = vshll.u32 %v12410_v33, 16  ;;  %4303 = vst.msk [vmem:[#allocation2 + $0xa8] sm:$0xff] %vm22_vm9, %v4239_v6  ;;  %v12412_v34 = vld [vmem:[%s21441_s0 + $0x38] sm:$0x1]  ;;  %v5569_v23 = vpop.f32.mrb[113].mxu0  ;;  %13570 = vmatprep.mubr.msk.bf16.mxu1 %vm376_vm2, %v12237_v14  ;;  %13632 = vmatprep.mubr.msk.bf16.mxu0 %vm376_vm2, %v13875_v1 }
 0x212   :  { %v12411_v58 = vld [vmem:[%s21441_s0 + $0x34] sm:$0xf]  ;;  %v7917_v41 = vrot.slane %v7916_v43, 4  ;;  %v7931_v36 = vrot.slane %v7929_v53, 5  ;;  %v5778_v9 = vadd.f32 %v13470_v27, %v5228_v19  ;;  %v5227_v18 = vld [vmem:[#allocation2 + $0x88] sm:$0xff]  ;;  %v3628_v56 = vld [vmem:[#allocation2 + $0xc0] sm:$0xff]  ;;  %v5776_v31 = vadd.f32 %v5569_v23, %v5226_v55 }
 0x213   :  { %v3630_v12 = vld [vmem:[#allocation2 + $0xd0] sm:$0xff]  ;;  %v7943_v4 = vshll.u32 %v12411_v58, 16  ;;  %v7947_v37 = vshrl.u32 %v12411_v58, 16  ;;  %v7927_v16 = vrot.slane %v7926_v2, 4  ;;  %v7936_v45 = vrot.slane %v7934_v25, 4  ;;  %v13471_v59 = vpop.f32.mrb[114].mxu0 }
 0x214   :  { %v7939_v35 = vrot.slane %v7937_v26, 5  ;;  %v7922_v38 = vsel %vm14066_vm7, %v7917_v41, %v7921_v7  ;;  %v13412_v13 = vpop.f32.mrb[120].mxu1  ;;  %v12565_v30 = vld [vmem:[%s21441_s0 + $0x18] sm:$0xe]  ;;  %v13876_v29 = vld [vmem:[%s21441_s0 + $0x15c] sm:$0xff]   ;;  %5842 = vst.msk [vmem:[#allocation2 + $0x90] sm:$0xff] %vm22_vm9, %v5778_v9  ;;  %v5779_v24 = vadd.f32 %v13471_v59, %v5229_v21 }
 0x215   :  { %v17787_v44 = vrot.slane %v7943_v4, 5  ;;  %v7949_v10 = vrot.slane %v7947_v37, 4  ;;  %v5572_v14 = vpop.f32.mrb[115].mxu0  ;;  %v7932_v22 = vsel %vm14066_vm7, %v7927_v16, %v7931_v36  ;;  %v4244_v60 = vadd.f32 %v13412_v13, %v3630_v12  ;;  %v4059_v50 = vpop.f32.mrb[121].mxu1  ;;  %v12566_v8 = vld [vmem:[%s21441_s0 + $0x1c] sm:$0xf] }
 0x216   :  { %v7940_v49 = vor.u32 %v7939_v35, %v7936_v45  ;;  %v12567_v32 = vld [vmem:[%s21441_s0 + $0x20] sm:$0x1]  ;;  %5840 = vst.msk [vmem:[#allocation2 + $0x80] sm:$0xff] %vm22_vm9, %v5776_v31  ;;  %v5777_v20 = vadd.f32 %v5572_v14, %v5227_v18  ;;  %v17805_v7 = vcombine.low %v7922_v38, %v7932_v22  ;;  %v4242_v15 = vadd.f32 %v4059_v50, %v3628_v56  ;;  %v3631_v33 = vld [vmem:[#allocation2 + $0xd8] sm:$0xff]  ;;  %v13413_v1 = vpop.f32.mrb[122].mxu1  ;;  %v3629_v19 = vld [vmem:[#allocation2 + $0xc8] sm:$0xff] }
 0x217   :  { %v7950_v6 = vor.u32 %v7949_v10, %v17787_v44  ;;  %v12413_v63 = vld [vmem:[%s21441_s0 + $0x3c] sm:$0xf]  ;;  %5843 = vst.msk [vmem:[#allocation2 + $0x98] sm:$0xff] %vm22_vm9, %v5779_v24  ;;  %4308 = vst.msk [vmem:[#allocation2 + $0xd0] sm:$0xff] %vm22_vm9, %v4244_v60  ;;  %v4245_v43 = vadd.f32 %v13413_v1, %v3631_v33  ;;  %v4062_v53 = vpop.f32.mrb[123].mxu1  ;;  %v7953_v55 = vshll.u32 %v12412_v34, 16  ;;  %13633 = vmatmul.mubr.msk.bf16.gmra.mrb[208].mxu0 %vm376_vm2, %v13876_v29 }
 0x218   :  { %v7941_v58 = vrot.slane %v7940_v49, 4  ;;  %v12661_v2 = vrot.slane %v12565_v30, 9  ;;  %v12414_v25 = vld [vmem:[%s21441_s0 + $0x40] sm:$0xf]  ;;  %v13877_v26 = vld [vmem:[%s21441_s0 + $0x168] sm:$0xff]   ;;  %5841 = vst.msk [vmem:[#allocation2 + $0x88] sm:$0xff] %vm22_vm9, %v5777_v20  ;;  %v4243_v27 = vadd.f32 %v4062_v53, %v3629_v19  ;;  %13571 = vmatmul.mubr.msk.bf16.gmra.mrb[212].mxu1 %vm376_vm2, %v12238_v47 }
 0x219   :  { %4306 = vst.msk [vmem:[#allocation2 + $0xc0] sm:$0xff] %vm22_vm9, %v4242_v15  ;;  %v7951_v21 = vrot.slane %v7950_v6, 4  ;;  %v9525_v41 = vrot.slane %v12566_v8, 5  ;;  %v9528_v36 = vrot.slane %v12567_v32, 5  ;;  %v12415_v12 = vld [vmem:[%s21441_s0 + $0x44] sm:$0x1]  ;;  %13574 = vmatprep.mubr.msk.bf16.mxu1 %vm376_vm2, %v12239_v28  ;;  %13636 = vmatprep.mubr.msk.bf16.mxu0 %vm376_vm2, %v13877_v26 }
 0x21a   :  { %v5232_v34 = vld [vmem:[#allocation2 + $0xb0] sm:$0xff]  ;;  %4309 = vst.msk [vmem:[#allocation2 + $0xd8] sm:$0xff] %vm22_vm9, %v4245_v43  ;;  %v7946_v4 = vsel %vm14066_vm7, %v7941_v58, %v17787_v44  ;;  %v7955_v37 = vrot.slane %v7953_v55, 5  ;;  %v7958_v9 = vshrl.u32 %v12413_v63, 16  ;;  %v7961_v23 = vshll.u32 %v12413_v63, 16  ;;  %v5230_v18 = vld [vmem:[#allocation2 + $0xa0] sm:$0xff] }
 0x21b   :  { %4307 = vst.msk [vmem:[#allocation2 + $0xc8] sm:$0xff] %vm22_vm9, %v4243_v27  ;;  %v17831_v16 = vsel %vm14113_vm8, %v12661_v2, %v9525_v41  ;;  %v9527_v56 = vrot.slane %v9525_v41, 4  ;;  %v7967_v45 = vshll.u32 %v12414_v25, 16  ;;  %v7971_v35 = vshrl.u32 %v12414_v25, 16  ;;  %v12568_v31 = vld [vmem:[%s21441_s0 + $0x24] sm:$0xe] }
 0x21c   :  { %v5233_v59 = vld [vmem:[#allocation2 + $0xb8] sm:$0xff]  ;;  %v7956_v38 = vsel %vm14066_vm7, %v7951_v21, %v7955_v37  ;;  %v7960_v13 = vrot.slane %v7958_v9, 4  ;;  %v7963_v44 = vrot.slane %v7961_v23, 5  ;;  %v7977_v10 = vshll.u32 %v12415_v12, 16  ;;  %v12569_v30 = vld [vmem:[%s21441_s0 + $0x28] sm:$0xf] }
 0x21d   :  { %v13474_v54 = vpop.f32.mrb[116].mxu0  ;;  %v17851_v5 = vcombine.low %v7946_v4, %v7956_v38  ;;  %v17855_v47 = vsel %vm14113_vm8, %v9527_v56, %v9528_v36  ;;  %v7969_v29 = vrot.slane %v7967_v45, 5  ;;  %v7973_v24 = vrot.slane %v7971_v35, 4  ;;  %v12570_v14 = vld [vmem:[%s21441_s0 + $0x2c] sm:$0x1]  ;;  %v13416_v22 = vpop.f32.mrb[124].mxu1 }
 0x21e   :  { %v13878_v48 = vld [vmem:[%s21441_s0 + $0x174] sm:$0xff]   ;;  %v5782_v62 = vadd.f32 %v13474_v54, %v5232_v34  ;;  %v5585_v28 = vpop.f32.mrb[117].mxu0  ;;  %v5231_v60 = vld [vmem:[#allocation2 + $0xa8] sm:$0xff]  ;;  %v12694_v50 = vcombine.low %v17831_v16, %v17855_v47  ;;  %v7964_v49 = vor.u32 %v7963_v44, %v7960_v13  ;;  %v7979_v8 = vrot.slane %v7977_v10, 5  ;;  %v4075_v32 = vpop.f32.mrb[125].mxu1  ;;  %v13879_v20 = vld [vmem:[%s21441_s0 + $0x180] sm:$0xff]  }
 0x21f   :  { %v5780_v15 = vadd.f32 %v5585_v28, %v5230_v18  ;;  %v13475_v33 = vpop.f32.mrb[118].mxu0  ;;  %v7974_v1 = vor.u32 %v7973_v24, %v7969_v29  ;;  %v12662_v19 = vrot.slane %v12568_v31, 9  ;;  %v9532_v6 = vrot.slane %v12569_v30, 5  ;;  %v3634_v63 = vld [vmem:[#allocation2 + $0xf0] sm:$0xff]  ;;  %v3632_v43 = vld [vmem:[#allocation2 + $0xe0] sm:$0xff]  ;;  %v13417_v53 = vpop.f32.mrb[126].mxu1  ;;  %13637 = vmatmul.mubr.msk.bf16.gmra.mrb[212].mxu0 %vm376_vm2, %v13878_v48 }
 0x220   :  { %5846 = vst.msk [vmem:[#allocation2 + $0xb0] sm:$0xff] %vm22_vm9, %v5782_v62  ;;  %v5783_v58 = vadd.f32 %v13475_v33, %v5233_v59  ;;  %v5588_v55 = vpop.f32.mrb[119].mxu0  ;;  %v7965_v2 = vrot.slane %v7964_v49, 4  ;;  %v9535_v25 = vrot.slane %v12570_v14, 5  ;;  %v4248_v26 = vadd.f32 %v13416_v22, %v3634_v63  ;;  %v4078_v27 = vpop.f32.mrb[127].mxu1  ;;  %v3635_v4 = vld [vmem:[#allocation2 + $0xf8] sm:$0xff]  ;;  %13575 = vmatmul.mubr.msk.bf16.gmra.mrb[216].mxu1 %vm376_vm2, %v12240_v39  ;;  %13640 = vmatprep.mubr.msk.bf16.mxu0 %vm376_vm2, %v13879_v20 }
 0x221   :  { %v12416_v21 = vld [vmem:[%s21441_s0 + $0x48] sm:$0xf]  ;;  %5844 = vst.msk [vmem:[#allocation2 + $0xa0] sm:$0xff] %vm22_vm9, %v5780_v15  ;;  %v5781_v41 = vadd.f32 %v5588_v55, %v5231_v60  ;;  %v7975_v36 = vrot.slane %v7974_v1, 4  ;;  %v17875_v12 = vsel %vm14113_vm8, %v12662_v19, %v9532_v6  ;;  %v9534_v34 = vrot.slane %v9532_v6, 4  ;;  %v5236_v24 = vld [vmem:[#allocation2 + $0xd0] sm:$0xff]  ;;  %13578 = vmatprep.mubr.msk.bf16.mxu1 %vm376_vm2, %v12241_v42 }
 0x222   :  { %v3633_v37 = vld [vmem:[#allocation2 + $0xe8] sm:$0xff]  ;;  %5847 = vst.msk [vmem:[#allocation2 + $0xb8] sm:$0xff] %vm22_vm9, %v5783_v58  ;;  %v7970_v23 = vsel %vm14066_vm7, %v7965_v2, %v7969_v29  ;;  %4312 = vst.msk [vmem:[#allocation2 + $0xf0] sm:$0xff] %vm22_vm9, %v4248_v26  ;;  %v4246_v18 = vadd.f32 %v4075_v32, %v3632_v43  ;;  %v4249_v56 = vadd.f32 %v13417_v53, %v3635_v4  ;;  %v12418_v35 = vld [vmem:[%s21441_s0 + $0x50] sm:$0x1]  ;;  %v7982_v13 = vshrl.u32 %v12416_v21, 16 }
 0x223   :  { %v12417_v9 = vld [vmem:[%s21441_s0 + $0x4c] sm:$0xf]  ;;  %v4247_v45 = vadd.f32 %v4078_v27, %v3633_v37  ;;  %v12571_v31 = vld [vmem:[%s21441_s0 + $0x30] sm:$0xe]  ;;  %5845 = vst.msk [vmem:[#allocation2 + $0xa8] sm:$0xff] %vm22_vm9, %v5781_v41  ;;  %v7980_v59 = vsel %vm14066_vm7, %v7975_v36, %v7979_v8  ;;  %v17895_v38 = vsel %vm14113_vm8, %v9534_v34, %v9535_v25  ;;  %v7985_v44 = vshll.u32 %v12416_v21, 16 }
 0x224   :  { %v12572_v10 = vld [vmem:[%s21441_s0 + $0x34] sm:$0xf]  ;;  %v12573_v30 = vld [vmem:[%s21441_s0 + $0x38] sm:$0x1]  ;;  %v17908_v54 = vcombine.low %v7970_v23, %v7980_v59  ;;  %v12695_v29 = vcombine.low %v17875_v12, %v17895_v38  ;;  %4310 = vst.msk [vmem:[#allocation2 + $0xe0] sm:$0xff] %vm22_vm9, %v4246_v18  ;;  %4313 = vst.msk [vmem:[#allocation2 + $0xf8] sm:$0xff] %vm22_vm9, %v4249_v56 }
 0x225   :  { %4311 = vst.msk [vmem:[#allocation2 + $0xe8] sm:$0xff] %vm22_vm9, %v4247_v45  ;;  %v7991_v14 = vshll.u32 %v12417_v9, 16  ;;  %v7995_v22 = vshrl.u32 %v12417_v9, 16  ;;  %v12419_v40 = vld [vmem:[%s21441_s0 + $0x54] sm:$0xf]  ;;  %v5234_v57 = vld [vmem:[#allocation2 + $0xc0] sm:$0xff] }
 0x226   :  { %v7984_v39 = vrot.slane %v7982_v13, 4  ;;  %v7987_v48 = vrot.slane %v7985_v44, 5  ;;  %v8001_v62 = vshll.u32 %v12418_v35, 16  ;;  %v12663_v28 = vrot.slane %v12571_v31, 9  ;;  %v17926_v60 = vld [vmem:[%s21441_s0 + $0x58] sm:$0xf] }
 0x227   :  { %v13880_v49 = vld [vmem:[%s21441_s0 + $0x18c] sm:$0xff]   ;;  %v5237_v8 = vld [vmem:[#allocation2 + $0xd8] sm:$0xff]  ;;  %v7993_v3 = vrot.slane %v7991_v14, 5  ;;  %v7997_v46 = vrot.slane %v7995_v22, 4  ;;  %v9539_v42 = vrot.slane %v12572_v10, 5  ;;  %v9542_v32 = vrot.slane %v12573_v30, 5 }
 0x228   :  { %v13420_v20 = vpop.f32.mrb[128].mxu1  ;;  %v13881_v15 = vld [vmem:[%s21441_s0 + $0x198] sm:$0xff]   ;;  %v7988_v33 = vor.u32 %v7987_v48, %v7984_v39  ;;  %v8003_v1 = vrot.slane %v8001_v62, 5  ;;  %v8006_v6 = vshrl.u32 %v12419_v40, 16  ;;  %v8009_v63 = vshll.u32 %v12419_v40, 16  ;;  %v13478_v53 = vpop.f32.mrb[120].mxu0  ;;  %13579 = vmatmul.mubr.msk.bf16.gmra.mrb[220].mxu1 %vm376_vm2, %v12242_v0  ;;  %13641 = vmatmul.mubr.msk.bf16.gmra.mrb[216].mxu0 %vm376_vm2, %v13880_v49 }
 0x229   :  { %v12421_v19 = vld [vmem:[%s21441_s0 + $0x5c] sm:$0x1]  ;;  %v4091_v43 = vpop.f32.mrb[129].mxu1  ;;  %v7998_v58 = vor.u32 %v7997_v46, %v7993_v3  ;;  %v17939_v55 = vsel %vm14113_vm8, %v12663_v28, %v9539_v42  ;;  %v9541_v2 = vrot.slane %v9539_v42, 4  ;;  %v8015_v25 = vshll.u32 %v17926_v60, 16  ;;  %v5601_v41 = vpop.f32.mrb[121].mxu0  ;;  %13644 = vmatprep.mubr.msk.bf16.mxu0 %vm376_vm2, %v13881_v15  ;;  %13650 = vmatprep.mubr.msk.bf16.mxu1 %vm376_vm2, %v17769_v17 }
 0x22a   :  { %v12574_v26 = vld [vmem:[%s21441_s0 + $0x3c] sm:$0xe]  ;;  %v13421_v27 = vpop.f32.mrb[130].mxu1  ;;  %v5786_v21 = vadd.f32 %v13478_v53, %v5236_v24  ;;  %v5235_v36 = vld [vmem:[#allocation2 + $0xc8] sm:$0xff]  ;;  %v7989_v34 = vrot.slane %v7988_v33, 4  ;;  %v8008_v4 = vrot.slane %v8006_v6, 4  ;;  %v5784_v23 = vadd.f32 %v5601_v41, %v5234_v57 }
 0x22b   :  { %v8011_v37 = vrot.slane %v8009_v63, 5  ;;  %v4094_v9 = vpop.f32.mrb[131].mxu1  ;;  %v13479_v18 = vpop.f32.mrb[122].mxu0  ;;  %v7999_v56 = vrot.slane %v7998_v58, 4  ;;  %v17947_v45 = vsel %vm14113_vm8, %v9541_v2, %v9542_v32  ;;  %v17949_v35 = vrot.slane %v8015_v25, 5  ;;  %v3638_v39 = vld [vmem:[#allocation2 + $0x110] sm:$0xff] }
 0x22c   :  { %v12575_v31 = vld [vmem:[%s21441_s0 + $0x40] sm:$0xf]  ;;  %5850 = vst.msk [vmem:[#allocation2 + $0xd0] sm:$0xff] %vm22_vm9, %v5786_v21  ;;  %v5787_v59 = vadd.f32 %v13479_v18, %v5237_v8  ;;  %v5604_v13 = vpop.f32.mrb[123].mxu0  ;;  %v7994_v44 = vsel %vm14066_vm7, %v7989_v34, %v7993_v3  ;;  %v12696_v10 = vcombine.low %v17939_v55, %v17947_v45  ;;  %v12576_v24 = vld [vmem:[%s21441_s0 + $0x44] sm:$0x1]  ;;  %v4252_v42 = vadd.f32 %v13420_v20, %v3638_v39 }
 0x22d   :  { %v8012_v30 = vor.u32 %v8011_v37, %v8008_v4  ;;  %5848 = vst.msk [vmem:[#allocation2 + $0xc0] sm:$0xff] %vm22_vm9, %v5784_v23  ;;  %v5785_v14 = vadd.f32 %v5604_v13, %v5235_v36  ;;  %v8004_v22 = vsel %vm14066_vm7, %v7999_v56, %v8003_v1  ;;  %v8019_v40 = vshrl.u32 %v17926_v60, 16  ;;  %v3636_v48 = vld [vmem:[#allocation2 + $0x100] sm:$0xff]  ;;  %v3639_v28 = vld [vmem:[#allocation2 + $0x118] sm:$0xff]  ;;  %v17980_v49 = vpop.f32.mrb[132].mxu1  ;;  %v5240_v6 = vld [vmem:[#allocation2 + $0xf0] sm:$0xff] }
 0x22e   :  { %v8025_v57 = vshll.u32 %v12421_v19, 16  ;;  %5851 = vst.msk [vmem:[#allocation2 + $0xd8] sm:$0xff] %vm22_vm9, %v5787_v59  ;;  %v17975_v61 = vcombine.low %v7994_v44, %v8004_v22  ;;  %v12664_v0 = vrot.slane %v12574_v26, 9  ;;  %v9546_v62 = vrot.slane %v12575_v31, 5  ;;  %v12422_v60 = vld [vmem:[%s21441_s0 + $0x60] sm:$0xf] }
 0x22f   :  { %v8013_v11 = vrot.slane %v8012_v30, 4  ;;  %v13882_v8 = vld [vmem:[%s21441_s0 + $0x1a4] sm:$0xff]   ;;  %5849 = vst.msk [vmem:[#allocation2 + $0xc8] sm:$0xff] %vm22_vm9, %v5785_v14  ;;  %v8021_v17 = vrot.slane %v8019_v40, 4  ;;  %v9549_v46 = vrot.slane %v12576_v24, 5  ;;  %v17989_v15 = vpop.f32.mrb[133].mxu1  ;;  %v4250_v63 = vadd.f32 %v4091_v43, %v3636_v48 }
 0x230   :  { %v8027_v3 = vrot.slane %v8025_v57, 5  ;;  %v12423_v32 = vld [vmem:[%s21441_s0 + $0x64] sm:$0xf]  ;;  %v17996_v1 = vsel %vm14113_vm8, %v12664_v0, %v9546_v62  ;;  %v9548_v19 = vrot.slane %v9546_v62, 4  ;;  %v3637_v53 = vld [vmem:[#allocation2 + $0x108] sm:$0xff]  ;;  %v18001_v58 = vpop.f32.mrb[134].mxu1  ;;  %v4253_v26 = vadd.f32 %v13421_v27, %v3639_v28  ;;  %13645 = vmatmul.mubr.msk.bf16.gmra.mrb[220].mxu0 %vm376_vm2, %v13882_v8  ;;  %13651 = vmatmul.mubr.msk.bf16.vlgmr.msra.gmra.mrb[224].mxu1 %vm376_vm2, %v17805_v7 }
 0x231   :  { %v8018_v33 = vsel %vm14066_vm7, %v8013_v11, %v17949_v35  ;;  %v12424_v20 = vld [vmem:[%s21441_s0 + $0x68] sm:$0x1]  ;;  %v8022_v2 = vor.u32 %v8021_v17, %v17949_v35  ;;  %4316 = vst.msk [vmem:[#allocation2 + $0x110] sm:$0xff] %vm22_vm9, %v4252_v42  ;;  %v5238_v25 = vld [vmem:[#allocation2 + $0xe0] sm:$0xff]  ;;  %v5241_v21 = vld [vmem:[#allocation2 + $0xf8] sm:$0xff]  ;;  %v4251_v41 = vadd.f32 %v4094_v9, %v3637_v53  ;;  %v8030_v36 = vshrl.u32 %v12422_v60, 16  ;;  %13654 = vmatprep.mubr.msk.bf16.mxu1 %vm376_vm2, %v17851_v5 }
 0x232   :  { %v12577_v43 = vld [vmem:[%s21441_s0 + $0x48] sm:$0xe]  ;;  %v18008_v34 = vpop.f32.mrb[135].mxu1  ;;  %v18012_v4 = vsel %vm14113_vm8, %v9548_v19, %v9549_v46  ;;  %4314 = vst.msk [vmem:[#allocation2 + $0x100] sm:$0xff] %vm22_vm9, %v4250_v63  ;;  %v8033_v23 = vshll.u32 %v12422_v60, 16  ;;  %v8039_v18 = vshll.u32 %v12423_v32, 16  ;;  %13716 = vmatprep.mubr.msk.bf16.mxu0 %vm376_vm2, %v12694_v50 }
 0x233   :  { %v5239_v37 = vld [vmem:[#allocation2 + $0xe8] sm:$0xff]  ;;  %v8043_v56 = vshrl.u32 %v12423_v32, 16  ;;  %v8023_v9 = vrot.slane %v8022_v2, 4  ;;  %v12697_v35 = vcombine.low %v17996_v1, %v18012_v4  ;;  %v13482_v31 = vpop.f32.mrb[124].mxu0  ;;  %4317 = vst.msk [vmem:[#allocation2 + $0x118] sm:$0xff] %vm22_vm9, %v4253_v26  ;;  %4315 = vst.msk [vmem:[#allocation2 + $0x108] sm:$0xff] %vm22_vm9, %v4251_v41 }
 0x234   :  { %v12578_v27 = vld [vmem:[%s21441_s0 + $0x4c] sm:$0xf]  ;;  %v8032_v59 = vrot.slane %v8030_v36, 4  ;;  %v8049_v13 = vshll.u32 %v12424_v20, 16  ;;  %v12579_v44 = vld [vmem:[%s21441_s0 + $0x50] sm:$0x1]  ;;  %v5790_v30 = vadd.f32 %v13482_v31, %v5240_v6 }
 0x235   :  { %v5617_v24 = vpop.f32.mrb[125].mxu0  ;;  %v8035_v14 = vrot.slane %v8033_v23, 5  ;;  %v8041_v22 = vrot.slane %v8039_v18, 5  ;;  %v8045_v40 = vrot.slane %v8043_v56, 4  ;;  %v12425_v57 = vld [vmem:[%s21441_s0 + $0x6c] sm:$0xf]  ;;  %v8028_v39 = vsel %vm14066_vm7, %v8023_v9, %v8027_v3 }
 0x236   :  { %v5788_v48 = vadd.f32 %v5617_v24, %v5238_v25  ;;  %v13483_v11 = vpop.f32.mrb[126].mxu0  ;;  %v8051_v0 = vrot.slane %v8049_v13, 5  ;;  %v12665_v62 = vrot.slane %v12577_v43, 9  ;;  %v18039_v28 = vcombine.low %v8018_v33, %v8028_v39  ;;  %5854 = vst.msk [vmem:[#allocation2 + $0xf0] sm:$0xff] %vm22_vm9, %v5790_v30  ;;  %v12426_v3 = vld [vmem:[%s21441_s0 + $0x70] sm:$0xf] }
 0x237   :  { %v5791_v7 = vadd.f32 %v13483_v11, %v5241_v21  ;;  %v5620_v60 = vpop.f32.mrb[127].mxu0  ;;  %v8036_v8 = vor.u32 %v8035_v14, %v8032_v59  ;;  %v9553_v17 = vrot.slane %v12578_v27, 5  ;;  %v8046_v46 = vor.u32 %v8045_v40, %v8041_v22  ;;  %v12427_v16 = vld [vmem:[%s21441_s0 + $0x74] sm:$0x1]  ;;  %v12580_v6 = vld [vmem:[%s21441_s0 + $0x54] sm:$0xe] }
 0x238   :  { %5852 = vst.msk [vmem:[#allocation2 + $0xe0] sm:$0xff] %vm22_vm9, %v5788_v48  ;;  %v5789_v5 = vadd.f32 %v5620_v60, %v5239_v37  ;;  %v9556_v42 = vrot.slane %v12579_v44, 5  ;;  %v8054_v47 = vshrl.u32 %v12425_v57, 16  ;;  %v8057_v19 = vshll.u32 %v12425_v57, 16  ;;  %v18058_v25 = vpop.f32.mrb[136].mxu1  ;;  %v3642_v23 = vld [vmem:[#allocation2 + $0x130] sm:$0xff]  ;;  %13655 = vmatmul.mubr.msk.bf16.gmra.mrb[228].mxu1 %vm376_vm2, %v17908_v54  ;;  %13717 = vmatmul.mubr.msk.bf16.vlgmr.msra.gmra.mrb[224].mxu0 %vm376_vm2, %v12695_v29 }
 0x239   :  { %5855 = vst.msk [vmem:[#allocation2 + $0xf8] sm:$0xff] %vm22_vm9, %v5791_v7  ;;  %v8037_v50 = vrot.slane %v8036_v8, 4  ;;  %v18052_v32 = vsel %vm14113_vm8, %v12665_v62, %v9553_v17  ;;  %v9555_v33 = vrot.slane %v9553_v17, 4  ;;  %v8047_v63 = vrot.slane %v8046_v46, 4  ;;  %v12581_v43 = vld [vmem:[%s21441_s0 + $0x58] sm:$0xf]  ;;  %13658 = vmatprep.mubr.msk.bf16.mxu1 %vm376_vm2, %v17975_v61  ;;  %13720 = vmatprep.mubr.msk.bf16.mxu0 %vm376_vm2, %v12696_v10 }
 0x23a   :  { %5853 = vst.msk [vmem:[#allocation2 + $0xe8] sm:$0xff] %vm22_vm9, %v5789_v5  ;;  %v8056_v53 = vrot.slane %v8054_v47, 4  ;;  %v8063_v20 = vshll.u32 %v12426_v3, 16  ;;  %v8067_v2 = vshrl.u32 %v12426_v3, 16  ;;  %v8059_v41 = vrot.slane %v8057_v19, 5  ;;  %v3640_v31 = vld [vmem:[#allocation2 + $0x120] sm:$0xff] }
 0x23b   :  { %v8042_v26 = vsel %vm14066_vm7, %v8037_v50, %v8041_v22  ;;  %v18064_v21 = vsel %vm14113_vm8, %v9555_v33, %v9556_v42  ;;  %v8073_v36 = vshll.u32 %v12427_v16, 16  ;;  %v12582_v37 = vld [vmem:[%s21441_s0 + $0x5c] sm:$0x1]  ;;  %v8052_v18 = vsel %vm14066_vm7, %v8047_v63, %v8051_v0  ;;  %v3641_v13 = vld [vmem:[#allocation2 + $0x128] sm:$0xff]  ;;  %v5244_v22 = vld [vmem:[#allocation2 + $0x110] sm:$0xff]  ;;  %v18081_v57 = vpop.f32.mrb[137].mxu1 }
 0x23c   :  { %v12698_v56 = vcombine.low %v18052_v32, %v18064_v21  ;;  %v8065_v27 = vrot.slane %v8063_v20, 5  ;;  %v8069_v9 = vrot.slane %v8067_v2, 4  ;;  %v3643_v59 = vld [vmem:[#allocation2 + $0x138] sm:$0xff]  ;;  %v18076_v44 = vcombine.low %v8042_v26, %v8052_v18  ;;  %v5242_v62 = vld [vmem:[#allocation2 + $0x100] sm:$0xff]  ;;  %v18093_v60 = vpop.f32.mrb[138].mxu1  ;;  %v13486_v38 = vpop.f32.mrb[128].mxu0 }
 0x23d   :  { %v8060_v30 = vor.u32 %v8059_v41, %v8056_v53  ;;  %v8075_v24 = vrot.slane %v8073_v36, 5  ;;  %v12666_v14 = vrot.slane %v12580_v6, 9  ;;  %v12428_v40 = vld [vmem:[%s21441_s0 + $0x78] sm:$0xf]  ;;  %v9560_v48 = vrot.slane %v12581_v43, 5  ;;  %v18107_v3 = vpop.f32.mrb[139].mxu1 }
 0x23e   :  { %v8070_v39 = vor.u32 %v8069_v9, %v8065_v27  ;;  %v9563_v11 = vrot.slane %v12582_v37, 5  ;;  %v4256_v0 = vadd.f32 %v17980_v49, %v3642_v23  ;;  %v12429_v7 = vld [vmem:[%s21441_s0 + $0x7c] sm:$0xf]  ;;  %v4254_v54 = vadd.f32 %v17989_v15, %v3640_v31  ;;  %v12430_v17 = vld [vmem:[%s21441_s0 + $0x80] sm:$0x1]  ;;  %v5633_v15 = vpop.f32.mrb[129].mxu0 }
 0x23f   :  { %v8061_v12 = vrot.slane %v8060_v30, 4  ;;  %v4257_v29 = vadd.f32 %v18001_v58, %v3643_v59  ;;  %v5245_v49 = vld [vmem:[#allocation2 + $0x118] sm:$0xff]  ;;  %v4255_v8 = vadd.f32 %v18008_v34, %v3641_v13  ;;  %v18111_v55 = vsel %vm14113_vm8, %v12666_v14, %v9560_v48  ;;  %v5243_v58 = vld [vmem:[#allocation2 + $0x108] sm:$0xff]  ;;  %v12583_v34 = vld [vmem:[%s21441_s0 + $0x60] sm:$0xe]  ;;  %v18117_v5 = vpop.f32.mrb[140].mxu1 }
 0x240   :  { %v8071_v61 = vrot.slane %v8070_v39, 4  ;;  %v9562_v45 = vrot.slane %v9560_v48, 4  ;;  %4320 = vst.msk [vmem:[#allocation2 + $0x130] sm:$0xff] %vm22_vm9, %v4256_v0  ;;  %v5794_v10 = vadd.f32 %v13486_v38, %v5244_v22  ;;  %4318 = vst.msk [vmem:[#allocation2 + $0x120] sm:$0xff] %vm22_vm9, %v4254_v54  ;;  %v5792_v42 = vadd.f32 %v5633_v15, %v5242_v62  ;;  %v13487_v16 = vpop.f32.mrb[130].mxu0  ;;  %v18145_v23 = vpop.f32.mrb[141].mxu1  ;;  %13659 = vmatmul.mubr.msk.bf16.gmra.mrb[232].mxu1 %vm376_vm2, %v18039_v28 }
 0x241   :  { %v8066_v46 = vsel %vm14066_vm7, %v8061_v12, %v8065_v27  ;;  %4321 = vst.msk [vmem:[#allocation2 + $0x138] sm:$0xff] %vm22_vm9, %v4257_v29  ;;  %4319 = vst.msk [vmem:[#allocation2 + $0x128] sm:$0xff] %vm22_vm9, %v4255_v8  ;;  %v8078_v47 = vshrl.u32 %v12428_v40, 16  ;;  %v8081_v50 = vshll.u32 %v12428_v40, 16  ;;  %v12584_v33 = vld [vmem:[%s21441_s0 + $0x64] sm:$0xf]  ;;  %v5795_v63 = vadd.f32 %v13487_v16, %v5245_v49  ;;  %13721 = vmatmul.mubr.msk.bf16.gmra.mrb[228].mxu0 %vm376_vm2, %v12697_v35 }
 0x242   :  { %v8076_v19 = vsel %vm14066_vm7, %v8071_v61, %v8075_v24  ;;  %v18131_v6 = vsel %vm14113_vm8, %v9562_v45, %v9563_v11  ;;  %5858 = vst.msk [vmem:[#allocation2 + $0x110] sm:$0xff] %vm22_vm9, %v5794_v10  ;;  %v5636_v53 = vpop.f32.mrb[131].mxu0  ;;  %v8087_v20 = vshll.u32 %v12429_v7, 16  ;;  %v12585_v2 = vld [vmem:[%s21441_s0 + $0x68] sm:$0x1]  ;;  %5856 = vst.msk [vmem:[#allocation2 + $0x100] sm:$0xff] %vm22_vm9, %v5792_v42  ;;  %13662 = vmatprep.mubr.msk.bf16.mxu1 %vm376_vm2, %v18076_v44  ;;  %13724 = vmatprep.mubr.msk.bf16.mxu0 %vm376_vm2, %v12698_v56 }
 0x243   :  { %v12431_v26 = vld [vmem:[%s21441_s0 + $0x84] sm:$0xf]  ;;  %v18140_v41 = vcombine.low %v8066_v46, %v8076_v19  ;;  %v12699_v36 = vcombine.low %v18111_v55, %v18131_v6  ;;  %v5793_v43 = vadd.f32 %v5636_v53, %v5243_v58  ;;  %v8080_v37 = vrot.slane %v8078_v47, 4  ;;  %5859 = vst.msk [vmem:[#allocation2 + $0x118] sm:$0xff] %vm22_vm9, %v5795_v63  ;;  %v12432_v59 = vld [vmem:[%s21441_s0 + $0x88] sm:$0xf] }
 0x244   :  { %v8083_v18 = vrot.slane %v8081_v50, 5  ;;  %v8089_v27 = vrot.slane %v8087_v20, 5  ;;  %v8091_v9 = vshrl.u32 %v12429_v7, 16  ;;  %v8097_v31 = vshll.u32 %v12430_v17, 16  ;;  %v12433_v14 = vld [vmem:[%s21441_s0 + $0x8c] sm:$0x1] }
 0x245   :  { %5857 = vst.msk [vmem:[#allocation2 + $0x108] sm:$0xff] %vm22_vm9, %v5793_v43  ;;  %v12667_v13 = vrot.slane %v12583_v34, 9  ;;  %v9567_v30 = vrot.slane %v12584_v33, 5  ;;  %v9570_v24 = vrot.slane %v12585_v2, 5  ;;  %v8102_v22 = vshrl.u32 %v12431_v26, 16  ;;  %v3646_v49 = vld [vmem:[#allocation2 + $0x150] sm:$0xff] }
 0x246   :  { %v8084_v40 = vor.u32 %v8083_v18, %v8080_v37  ;;  %v8093_v39 = vrot.slane %v8091_v9, 4  ;;  %v8099_v48 = vrot.slane %v8097_v31, 5  ;;  %v8105_v11 = vshll.u32 %v12431_v26, 16  ;;  %v12586_v0 = vld [vmem:[%s21441_s0 + $0x6c] sm:$0xe]  ;;  %v13490_v17 = vpop.f32.mrb[132].mxu0 }
 0x247   :  { %v9568_v1 = vsel %vm14113_vm8, %v12667_v13, %v9567_v30  ;;  %v9569_v4 = vrot.slane %v9567_v30, 4  ;;  %v8104_v35 = vrot.slane %v8102_v22, 4  ;;  %v8111_v28 = vshll.u32 %v12432_v59, 16  ;;  %v12587_v62 = vld [vmem:[%s21441_s0 + $0x70] sm:$0xf]  ;;  %v18182_v61 = vpop.f32.mrb[142].mxu1 }
 0x248   :  { %v8085_v7 = vrot.slane %v8084_v40, 4  ;;  %v8094_v12 = vor.u32 %v8093_v39, %v8089_v27  ;;  %v8107_v38 = vrot.slane %v8105_v11, 5  ;;  %v8115_v54 = vshrl.u32 %v12432_v59, 16  ;;  %v12588_v32 = vld [vmem:[%s21441_s0 + $0x74] sm:$0x1]  ;;  %v5246_v34 = vld [vmem:[#allocation2 + $0x120] sm:$0xff]  ;;  %13663 = vmatmul.mubr.msk.bf16.gmra.mrb[236].mxu1 %vm376_vm2, %v18140_v41 }
 0x249   :  { %v9571_v21 = vsel %vm14113_vm8, %v9569_v4, %v9570_v24  ;;  %v18180_v56 = vrot.slane %v8111_v28, 5  ;;  %v8121_v44 = vshll.u32 %v12433_v14, 16  ;;  %v12668_v29 = vrot.slane %v12586_v0, 9  ;;  %v5248_v8 = vld [vmem:[#allocation2 + $0x130] sm:$0xff]  ;;  %v5649_v46 = vpop.f32.mrb[133].mxu0  ;;  %v18191_v16 = vpop.f32.mrb[143].mxu1  ;;  %13725 = vmatmul.mubr.msk.bf16.gmra.mrb[232].mxu0 %vm376_vm2, %v12699_v36 }
 0x24a   :  { %v8090_v45 = vsel %vm14066_vm7, %v8085_v7, %v8089_v27  ;;  %v8095_v10 = vrot.slane %v8094_v12, 4  ;;  %v12700_v15 = vcombine.low %v9568_v1, %v9571_v21  ;;  %v8108_v58 = vor.u32 %v8107_v38, %v8104_v35  ;;  %v18189_v42 = vld [vmem:[%s21441_s0 + $0x90] sm:$0xf]  ;;  %v13491_v63 = vpop.f32.mrb[134].mxu0  ;;  %v18193_v53 = vpop.f32.mrb[144].mxu1  ;;  %v5249_v37 = vld [vmem:[#allocation2 + $0x138] sm:$0xff] }
 0x24b   :  { %v8117_v47 = vrot.slane %v8115_v54, 4  ;;  %v8123_v50 = vrot.slane %v8121_v44, 5  ;;  %v9574_v33 = vrot.slane %v12587_v62, 5  ;;  %v9577_v19 = vrot.slane %v12588_v32, 5  ;;  %v5652_v18 = vpop.f32.mrb[135].mxu0  ;;  %v3644_v13 = vld [vmem:[#allocation2 + $0x140] sm:$0xff] }
 0x24c   :  { %v8100_v20 = vsel %vm14066_vm7, %v8095_v10, %v8099_v48  ;;  %v8109_v2 = vrot.slane %v8108_v58, 4  ;;  %v4260_v26 = vadd.f32 %v18058_v25, %v3646_v49  ;;  %v5798_v43 = vadd.f32 %v13490_v17, %v5248_v8  ;;  %v3647_v30 = vld [vmem:[#allocation2 + $0x158] sm:$0xff]  ;;  %v5247_v24 = vld [vmem:[#allocation2 + $0x128] sm:$0xff]  ;;  %v12435_v41 = vld [vmem:[%s21441_s0 + $0x94] sm:$0xf]  ;;  %v18222_v36 = vpop.f32.mrb[145].mxu1  ;;  %13728 = vmatprep.mubr.msk.bf16.mxu0 %vm376_vm2, %v12700_v15 }
 0x24d   :  { %v12509_v27 = vcombine.low %v8090_v45, %v8100_v20  ;;  %v8118_v9 = vor.u32 %v8117_v47, %v18180_v56  ;;  %v18201_v31 = vsel %vm14113_vm8, %v12668_v29, %v9574_v33  ;;  %v9576_v59 = vrot.slane %v9574_v33, 4  ;;  %v12436_v55 = vld [vmem:[%s21441_s0 + $0x98] sm:$0x1]  ;;  %v3645_v11 = vld [vmem:[#allocation2 + $0x148] sm:$0xff]  ;;  %v12589_v0 = vld [vmem:[%s21441_s0 + $0x78] sm:$0xe] }
 0x24e   :  { %v8114_v25 = vsel %vm14066_vm7, %v8109_v2, %v18180_v56  ;;  %4324 = vst.msk [vmem:[#allocation2 + $0x150] sm:$0xff] %vm22_vm9, %v4260_v26  ;;  %5862 = vst.msk [vmem:[#allocation2 + $0x130] sm:$0xff] %vm22_vm9, %v5798_v43  ;;  %v4258_v14 = vadd.f32 %v18081_v57, %v3644_v13  ;;  %v5796_v22 = vadd.f32 %v5649_v46, %v5246_v34  ;;  %v8126_v6 = vshrl.u32 %v18189_v42, 16  ;;  %v12590_v1 = vld [vmem:[%s21441_s0 + $0x7c] sm:$0xf]  ;;  %v18242_v7 = vpop.f32.mrb[146].mxu1 }
 0x24f   :  { %13666 = vmatprep.mubr.msk.bf16.mxu1 %vm376_vm2, %v12509_v27  ;;  %v8119_v40 = vrot.slane %v8118_v9, 4  ;;  %v9578_v57 = vsel %vm14113_vm8, %v9576_v59, %v9577_v19  ;;  %v4261_v39 = vadd.f32 %v18093_v60, %v3647_v30  ;;  %v5799_v48 = vadd.f32 %v13491_v63, %v5249_v37  ;;  %v12591_v62 = vld [vmem:[%s21441_s0 + $0x80] sm:$0x1]  ;;  %v18257_v8 = vpop.f32.mrb[147].mxu1  ;;  %v12439_v58 = vld [vmem:[%s21441_s0 + $0xa4] sm:$0x1] }
 0x250   :  { %v12701_v4 = vcombine.low %v18201_v31, %v9578_v57  ;;  %4322 = vst.msk [vmem:[#allocation2 + $0x140] sm:$0xff] %vm22_vm9, %v4258_v14  ;;  %5860 = vst.msk [vmem:[#allocation2 + $0x120] sm:$0xff] %vm22_vm9, %v5796_v22  ;;  %v4259_v35 = vadd.f32 %v18107_v3, %v3645_v11  ;;  %v5797_v28 = vadd.f32 %v5652_v18, %v5247_v24  ;;  %v8128_v60 = vrot.slane %v8126_v6, 4  ;;  %v12437_v3 = vld [vmem:[%s21441_s0 + $0x9c] sm:$0xf]  ;;  %v3650_v14 = vld [vmem:[#allocation2 + $0x170] sm:$0xff] }
 0x251   :  { %v8124_v12 = vsel %vm14066_vm7, %v8119_v40, %v8123_v50  ;;  %4325 = vst.msk [vmem:[#allocation2 + $0x158] sm:$0xff] %vm22_vm9, %v4261_v39  ;;  %5863 = vst.msk [vmem:[#allocation2 + $0x138] sm:$0xff] %vm22_vm9, %v5799_v48  ;;  %v8129_v38 = vshll.u32 %v18189_v42, 16  ;;  %v8135_v54 = vshll.u32 %v12435_v41, 16  ;;  %v8139_v32 = vshrl.u32 %v12435_v41, 16  ;;  %v13494_v50 = vpop.f32.mrb[136].mxu0 }
 0x252   :  { %v12510_v21 = vcombine.low %v8114_v25, %v8124_v12  ;;  %4323 = vst.msk [vmem:[#allocation2 + $0x148] sm:$0xff] %vm22_vm9, %v4259_v35  ;;  %5861 = vst.msk [vmem:[#allocation2 + $0x128] sm:$0xff] %vm22_vm9, %v5797_v28  ;;  %v8145_v56 = vshll.u32 %v12436_v55, 16  ;;  %v12669_v44 = vrot.slane %v12589_v0, 9  ;;  %v9581_v29 = vrot.slane %v12590_v1, 5  ;;  %v5665_v26 = vpop.f32.mrb[137].mxu0  ;;  %13729 = vmatmul.mubr.msk.bf16.gmra.mrb[236].mxu0 %vm376_vm2, %v12701_v4 }
 0x253   :  { %v12438_v49 = vld [vmem:[%s21441_s0 + $0xa0] sm:$0xf]  ;;  %v8131_v17 = vrot.slane %v8129_v38, 5  ;;  %v8137_v45 = vrot.slane %v8135_v54, 5  ;;  %v8141_v10 = vrot.slane %v8139_v32, 4  ;;  %v9584_v15 = vrot.slane %v12591_v62, 5 }
 0x254   :  { %v8147_v34 = vrot.slane %v8145_v56, 5  ;;  %v9582_v46 = vsel %vm14113_vm8, %v12669_v44, %v9581_v29  ;;  %v9583_v42 = vrot.slane %v9581_v29, 4  ;;  %v8150_v47 = vshrl.u32 %v12437_v3, 16  ;;  %v12592_v2 = vld [vmem:[%s21441_s0 + $0x84] sm:$0xe]  ;;  %13667 = vmatmul.mubr.msk.bf16.gmra.mrb[240].mxu1 %vm376_vm2, %v12510_v21  ;;  %v13495_v31 = vpop.f32.mrb[138].mxu0 }
 0x255   :  { %v8132_v33 = vor.u32 %v8131_v17, %v8128_v60  ;;  %v8142_v19 = vor.u32 %v8141_v10, %v8137_v45  ;;  %v8153_v63 = vshll.u32 %v12437_v3, 16  ;;  %v8159_v20 = vshll.u32 %v12438_v49, 16  ;;  %v12593_v9 = vld [vmem:[%s21441_s0 + $0x88] sm:$0xf]  ;;  %v12594_v25 = vld [vmem:[%s21441_s0 + $0x8c] sm:$0x1] }
 0x256   :  { %v9585_v43 = vsel %vm14113_vm8, %v9583_v42, %v9584_v15  ;;  %v8152_v37 = vrot.slane %v8150_v47, 4  ;;  %v8163_v18 = vshrl.u32 %v12438_v49, 16  ;;  %v8169_v27 = vshll.u32 %v12439_v58, 16  ;;  %v5668_v22 = vpop.f32.mrb[139].mxu0  ;;  %v5252_v57 = vld [vmem:[#allocation2 + $0x150] sm:$0xff]  ;;  %v18277_v39 = vpop.f32.mrb[148].mxu1 }
 0x257   :  { %v8133_v59 = vrot.slane %v8132_v33, 4  ;;  %v8143_v13 = vrot.slane %v8142_v19, 4  ;;  %v12702_v30 = vcombine.low %v9582_v46, %v9585_v43  ;;  %v8155_v24 = vrot.slane %v8153_v63, 5  ;;  %v3648_v4 = vld [vmem:[#allocation2 + $0x160] sm:$0xff]  ;;  %v3651_v28 = vld [vmem:[#allocation2 + $0x178] sm:$0xff]  ;;  %v3649_v49 = vld [vmem:[#allocation2 + $0x168] sm:$0xff] }
 0x258   :  { %v8161_v41 = vrot.slane %v8159_v20, 5  ;;  %v8165_v55 = vrot.slane %v8163_v18, 4  ;;  %v8171_v6 = vrot.slane %v8169_v27, 5  ;;  %v12670_v40 = vrot.slane %v12592_v2, 9  ;;  %v5250_v35 = vld [vmem:[#allocation2 + $0x140] sm:$0xff]  ;;  %v5253_v54 = vld [vmem:[#allocation2 + $0x158] sm:$0xff] }
 0x259   :  { %v8138_v48 = vsel %vm14066_vm7, %v8133_v59, %v8137_v45  ;;  %v8148_v11 = vsel %vm14066_vm7, %v8143_v13, %v8147_v34  ;;  %13732 = vmatprep.mubr.msk.bf16.mxu0 %vm376_vm2, %v12702_v30  ;;  %v8156_v0 = vor.u32 %v8155_v24, %v8152_v37  ;;  %v9588_v1 = vrot.slane %v12593_v9, 5  ;;  %v12440_v32 = vld [vmem:[%s21441_s0 + $0xa8] sm:$0xf]  ;;  %v12441_v3 = vld [vmem:[%s21441_s0 + $0xac] sm:$0xf]  ;;  %v18306_v42 = vpop.f32.mrb[149].mxu1 }
 0x25a   :  { %v12511_v60 = vcombine.low %v8138_v48, %v8148_v11  ;;  %v8166_v62 = vor.u32 %v8165_v55, %v8161_v41  ;;  %v9591_v12 = vrot.slane %v12594_v25, 5  ;;  %v4264_v38 = vadd.f32 %v18117_v5, %v3650_v14  ;;  %v5251_v17 = vld [vmem:[#allocation2 + $0x148] sm:$0xff]  ;;  %v12442_v5 = vld [vmem:[%s21441_s0 + $0xb0] sm:$0x1]  ;;  %v12595_v34 = vld [vmem:[%s21441_s0 + $0x90] sm:$0xe] }
 0x25b   :  { %v8157_v21 = vrot.slane %v8156_v0, 4  ;;  %v9589_v56 = vsel %vm14113_vm8, %v12670_v40, %v9588_v1  ;;  %v9590_v44 = vrot.slane %v9588_v1, 4  ;;  %v5802_v29 = vadd.f32 %v13494_v50, %v5252_v57  ;;  %v12596_v46 = vld [vmem:[%s21441_s0 + $0x94] sm:$0xf]  ;;  %v12597_v33 = vld [vmem:[%s21441_s0 + $0x98] sm:$0x1] }
 0x25c   :  { %13670 = vmatprep.mubr.msk.bf16.mxu1 %vm376_vm2, %v12511_v60  ;;  %v8167_v45 = vrot.slane %v8166_v62, 4  ;;  %4328 = vst.msk [vmem:[#allocation2 + $0x170] sm:$0xff] %vm22_vm9, %v4264_v38  ;;  %v4262_v10 = vadd.f32 %v18145_v23, %v3648_v4  ;;  %v5800_v15 = vadd.f32 %v5665_v26, %v5250_v35  ;;  %v4265_v58 = vadd.f32 %v18182_v61, %v3651_v28  ;;  %v12443_v19 = vld [vmem:[%s21441_s0 + $0xb4] sm:$0xf]  ;;  %v18320_v63 = vpop.f32.mrb[150].mxu1  ;;  %v18330_v37 = vpop.f32.mrb[140].mxu0 }
 0x25d   :  { %v8162_v47 = vsel %vm14066_vm7, %v8157_v21, %v8161_v41  ;;  %v9592_v50 = vsel %vm14113_vm8, %v9590_v44, %v9591_v12  ;;  %5866 = vst.msk [vmem:[#allocation2 + $0x150] sm:$0xff] %vm22_vm9, %v5802_v29  ;;  %v5803_v23 = vadd.f32 %v13495_v31, %v5253_v54  ;;  %v4263_v61 = vadd.f32 %v18191_v16, %v3649_v49  ;;  %v12444_v43 = vld [vmem:[%s21441_s0 + $0xb8] sm:$0xf]  ;;  %v18332_v18 = vpop.f32.mrb[151].mxu1  ;;  %v12445_v13 = vld [vmem:[%s21441_s0 + $0xbc] sm:$0x1] }
 0x25e   :  { %v8172_v20 = vsel %vm14066_vm7, %v8167_v45, %v8171_v6  ;;  %v12703_v2 = vcombine.low %v9589_v56, %v9592_v50  ;;  %4326 = vst.msk [vmem:[#allocation2 + $0x160] sm:$0xff] %vm22_vm9, %v4262_v10  ;;  %5864 = vst.msk [vmem:[#allocation2 + $0x140] sm:$0xff] %vm22_vm9, %v5800_v15  ;;  %v5801_v16 = vadd.f32 %v5668_v22, %v5251_v17  ;;  %v8174_v26 = vshrl.u32 %v12440_v32, 16  ;;  %v18339_v30 = vpop.f32.mrb[141].mxu0  ;;  %v18345_v55 = vpop.f32.mrb[152].mxu1 }
 0x25f   :  { %4329 = vst.msk [vmem:[#allocation2 + $0x178] sm:$0xff] %vm22_vm9, %v4265_v58  ;;  %v12512_v27 = vcombine.low %v8162_v47, %v8172_v20  ;;  %5867 = vst.msk [vmem:[#allocation2 + $0x158] sm:$0xff] %vm22_vm9, %v5803_v23  ;;  %v8177_v9 = vshll.u32 %v12440_v32, 16  ;;  %v8183_v31 = vshll.u32 %v12441_v3, 16  ;;  %v8187_v59 = vshrl.u32 %v12441_v3, 16  ;;  %v18343_v41 = vpop.f32.mrb[142].mxu0 }
 0x260   :  { %4327 = vst.msk [vmem:[#allocation2 + $0x168] sm:$0xff] %vm22_vm9, %v4263_v61  ;;  %13733 = vmatmul.mubr.msk.bf16.gmra.mrb[240].mxu0 %vm376_vm2, %v12703_v2  ;;  %5865 = vst.msk [vmem:[#allocation2 + $0x148] sm:$0xff] %vm22_vm9, %v5801_v16  ;;  %v8176_v24 = vrot.slane %v8174_v26, 4  ;;  %v8193_v25 = vshll.u32 %v12442_v5, 16  ;;  %v12671_v14 = vrot.slane %v12595_v34, 9  ;;  %v9595_v22 = vrot.slane %v12596_v46, 5 }
 0x261   :  { %13671 = vmatmul.mubr.msk.bf16.gmra.mrb[244].mxu1 %vm376_vm2, %v12512_v27  ;;  %v8179_v6 = vrot.slane %v8177_v9, 5  ;;  %v8185_v40 = vrot.slane %v8183_v31, 5  ;;  %v8189_v57 = vrot.slane %v8187_v59, 4  ;;  %v9598_v48 = vrot.slane %v12597_v33, 5  ;;  %v18348_v11 = vpop.f32.mrb[143].mxu0  ;;  %v18350_v0 = vpop.f32.mrb[153].mxu1 }
 0x262   :  { %v8195_v1 = vrot.slane %v8193_v25, 5  ;;  %v9596_v4 = vsel %vm14113_vm8, %v12671_v14, %v9595_v22  ;;  %v9597_v35 = vrot.slane %v9595_v22, 4  ;;  %v8198_v28 = vshrl.u32 %v12443_v19, 16  ;;  %v12598_v54 = vld [vmem:[%s21441_s0 + $0x9c] sm:$0xe]  ;;  %v18357_v32 = vpop.f32.mrb[154].mxu1 }
 0x263   :  { %v8180_v60 = vor.u32 %v8179_v6, %v8176_v24  ;;  %v8190_v62 = vor.u32 %v8189_v57, %v8185_v40  ;;  %v8201_v12 = vshll.u32 %v12443_v19, 16  ;;  %v8207_v38 = vshll.u32 %v12444_v43, 16  ;;  %v12599_v29 = vld [vmem:[%s21441_s0 + $0xa0] sm:$0xf]  ;;  %v12600_v10 = vld [vmem:[%s21441_s0 + $0xa4] sm:$0x1] }
 0x264   :  { %v9599_v3 = vsel %vm14113_vm8, %v9597_v35, %v9598_v48  ;;  %v8200_v21 = vrot.slane %v8198_v28, 4  ;;  %v8211_v56 = vshrl.u32 %v12444_v43, 16  ;;  %v8217_v44 = vshll.u32 %v12445_v13, 16  ;;  %v18367_v15 = vpop.f32.mrb[155].mxu1  ;;  %v5256_v50 = vld [vmem:[#allocation2 + $0x170] sm:$0xff]  ;;  %v3652_v2 = vld [vmem:[#allocation2 + $0x180] sm:$0xff] }
 0x265   :  { %v8181_v49 = vrot.slane %v8180_v60, 4  ;;  %v8191_v17 = vrot.slane %v8190_v62, 4  ;;  %v12704_v5 = vcombine.low %v9596_v4, %v9599_v3  ;;  %v8203_v45 = vrot.slane %v8201_v12, 5  ;;  %v3654_v20 = vld [vmem:[#allocation2 + $0x190] sm:$0xff]  ;;  %v5254_v16 = vld [vmem:[#allocation2 + $0x160] sm:$0xff]  ;;  %v18374_v26 = vpop.f32.mrb[156].mxu1 }
 0x266   :  { %v8209_v58 = vrot.slane %v8207_v38, 5  ;;  %v8213_v34 = vrot.slane %v8211_v56, 4  ;;  %v8219_v46 = vrot.slane %v8217_v44, 5  ;;  %v12672_v47 = vrot.slane %v12598_v54, 9  ;;  %v3655_v59 = vld [vmem:[#allocation2 + $0x198] sm:$0xff]  ;;  %v18383_v48 = vpop.f32.mrb[144].mxu0 }
 0x267   :  { %v8186_v23 = vsel %vm14066_vm7, %v8181_v49, %v8185_v40  ;;  %v8196_v61 = vsel %vm14066_vm7, %v8191_v17, %v8195_v1  ;;  %13736 = vmatprep.mubr.msk.bf16.mxu0 %vm376_vm2, %v12704_v5  ;;  %v8204_v33 = vor.u32 %v8203_v45, %v8200_v21  ;;  %v9602_v19 = vrot.slane %v12599_v29, 5  ;;  %v5257_v13 = vld [vmem:[#allocation2 + $0x178] sm:$0xff]  ;;  %v12446_v24 = vld [vmem:[%s21441_s0 + $0xc0] sm:$0xf]  ;;  %v3653_v40 = vld [vmem:[#allocation2 + $0x188] sm:$0xff]  ;;  %v18385_v1 = vpop.f32.mrb[157].mxu1 }
 0x268   :  { %v12513_v43 = vcombine.low %v8186_v23, %v8196_v61  ;;  %v8214_v27 = vor.u32 %v8213_v34, %v8209_v58  ;;  %v9605_v9 = vrot.slane %v12600_v10, 5  ;;  %v4268_v31 = vadd.f32 %v18193_v53, %v3654_v20  ;;  %v5255_v57 = vld [vmem:[#allocation2 + $0x168] sm:$0xff]  ;;  %v18398_v62 = vpop.f32.mrb[145].mxu0  ;;  %v12603_v44 = vld [vmem:[%s21441_s0 + $0xb0] sm:$0x1] }
 0x269   :  { %v8205_v25 = vrot.slane %v8204_v33, 4  ;;  %v9603_v14 = vsel %vm14113_vm8, %v12672_v47, %v9602_v19  ;;  %v9604_v22 = vrot.slane %v9602_v19, 4  ;;  %v5806_v6 = vadd.f32 %v18330_v37, %v5256_v50  ;;  %v12447_v37 = vld [vmem:[%s21441_s0 + $0xc4] sm:$0xf]  ;;  %v12448_v60 = vld [vmem:[%s21441_s0 + $0xc8] sm:$0x1] }
 0x26a   :  { %13674 = vmatprep.mubr.msk.bf16.mxu1 %vm376_vm2, %v12513_v43  ;;  %v8215_v53 = vrot.slane %v8214_v27, 4  ;;  %4332 = vst.msk [vmem:[#allocation2 + $0x190] sm:$0xff] %vm22_vm9, %v4268_v31  ;;  %v4266_v4 = vadd.f32 %v18222_v36, %v3652_v2  ;;  %v5804_v35 = vadd.f32 %v18339_v30, %v5254_v16  ;;  %v4269_v28 = vadd.f32 %v18242_v7, %v3655_v59  ;;  %v12601_v38 = vld [vmem:[%s21441_s0 + $0xa8] sm:$0xe]  ;;  %v12602_v54 = vld [vmem:[%s21441_s0 + $0xac] sm:$0xf] }
 0x26b   :  { %v8210_v12 = vsel %vm14066_vm7, %v8205_v25, %v8209_v58  ;;  %v9606_v36 = vsel %vm14113_vm8, %v9604_v22, %v9605_v9  ;;  %5870 = vst.msk [vmem:[#allocation2 + $0x170] sm:$0xff] %vm22_vm9, %v5806_v6  ;;  %v5807_v7 = vadd.f32 %v18343_v41, %v5257_v13  ;;  %v4267_v30 = vadd.f32 %v18257_v8, %v3653_v40  ;;  %v18413_v3 = vpop.f32.mrb[146].mxu0  ;;  %v12449_v10 = vld [vmem:[%s21441_s0 + $0xcc] sm:$0xf]  ;;  %v12450_v50 = vld [vmem:[%s21441_s0 + $0xd0] sm:$0xf] }
 0x26c   :  { %v8220_v21 = vsel %vm14066_vm7, %v8215_v53, %v8219_v46  ;;  %v12705_v56 = vcombine.low %v9603_v14, %v9606_v36  ;;  %4330 = vst.msk [vmem:[#allocation2 + $0x180] sm:$0xff] %vm22_vm9, %v4266_v4  ;;  %5868 = vst.msk [vmem:[#allocation2 + $0x160] sm:$0xff] %vm22_vm9, %v5804_v35  ;;  %v5805_v8 = vadd.f32 %v18348_v11, %v5255_v57  ;;  %v8222_v41 = vshrl.u32 %v12446_v24, 16  ;;  %v18424_v29 = vpop.f32.mrb[147].mxu0  ;;  %v18431_v11 = vpop.f32.mrb[158].mxu1 }
 0x26d   :  { %4333 = vst.msk [vmem:[#allocation2 + $0x198] sm:$0xff] %vm22_vm9, %v4269_v28  ;;  %v12514_v49 = vcombine.low %v8210_v12, %v8220_v21  ;;  %5871 = vst.msk [vmem:[#allocation2 + $0x178] sm:$0xff] %vm22_vm9, %v5807_v7  ;;  %v8225_v17 = vshll.u32 %v12446_v24, 16  ;;  %v8231_v5 = vshll.u32 %v12447_v37, 16  ;;  %v8235_v45 = vshrl.u32 %v12447_v37, 16  ;;  %v18447_v25 = vpop.f32.mrb[159].mxu1 }
 0x26e   :  { %4331 = vst.msk [vmem:[#allocation2 + $0x188] sm:$0xff] %vm22_vm9, %v4267_v30  ;;  %13737 = vmatmul.mubr.msk.bf16.gmra.mrb[244].mxu0 %vm376_vm2, %v12705_v56  ;;  %5869 = vst.msk [vmem:[#allocation2 + $0x168] sm:$0xff] %vm22_vm9, %v5805_v8  ;;  %v8224_v58 = vrot.slane %v8222_v41, 4  ;;  %v8241_v34 = vshll.u32 %v12448_v60, 16  ;;  %v12673_v46 = vrot.slane %v12601_v38, 9  ;;  %v9609_v47 = vrot.slane %v12602_v54, 5 }
 0x26f   :  { %13675 = vmatmul.mubr.msk.bf16.gmra.mrb[248].mxu1 %vm376_vm2, %v12514_v49  ;;  %v8227_v23 = vrot.slane %v8225_v17, 5  ;;  %v8233_v61 = vrot.slane %v8231_v5, 5  ;;  %v8237_v33 = vrot.slane %v8235_v45, 4  ;;  %v9612_v19 = vrot.slane %v12603_v44, 5  ;;  %v12451_v20 = vld [vmem:[%s21441_s0 + $0xd4] sm:$0x1] }
 0x270   :  { %v8243_v2 = vrot.slane %v8241_v34, 5  ;;  %v9610_v16 = vsel %vm14113_vm8, %v12673_v46, %v9609_v47  ;;  %v9611_v43 = vrot.slane %v9609_v47, 4  ;;  %v8246_v27 = vshrl.u32 %v12449_v10, 16  ;;  %v12604_v24 = vld [vmem:[%s21441_s0 + $0xb4] sm:$0xe]  ;;  %v18457_v60 = vpop.f32.mrb[148].mxu0 }
 0x271   :  { %v8228_v9 = vor.u32 %v8227_v23, %v8224_v58  ;;  %v8238_v31 = vor.u32 %v8237_v33, %v8233_v61  ;;  %v8249_v59 = vshll.u32 %v12449_v10, 16  ;;  %v8255_v13 = vshll.u32 %v12450_v50, 16  ;;  %v12605_v57 = vld [vmem:[%s21441_s0 + $0xb8] sm:$0xf]  ;;  %v12606_v37 = vld [vmem:[%s21441_s0 + $0xbc] sm:$0x1] }
 0x272   :  { %v9613_v14 = vsel %vm14113_vm8, %v9611_v43, %v9612_v19  ;;  %v8248_v22 = vrot.slane %v8246_v27, 4  ;;  %v8259_v6 = vshrl.u32 %v12450_v50, 16  ;;  %v8265_v40 = vshll.u32 %v12451_v20, 16  ;;  %v5260_v38 = vld [vmem:[#allocation2 + $0x190] sm:$0xff]  ;;  %v18459_v54 = vpop.f32.mrb[149].mxu0  ;;  %v3656_v34 = vld [vmem:[#allocation2 + $0x1a0] sm:$0xff] }
 0x273   :  { %v8229_v53 = vrot.slane %v8228_v9, 4  ;;  %v8239_v4 = vrot.slane %v8238_v31, 4  ;;  %v12706_v35 = vcombine.low %v9610_v16, %v9613_v14  ;;  %v8251_v28 = vrot.slane %v8249_v59, 5  ;;  %v3658_v44 = vld [vmem:[#allocation2 + $0x1b0] sm:$0xff]  ;;  %v5258_v49 = vld [vmem:[#allocation2 + $0x180] sm:$0xff]  ;;  %v18466_v17 = vpop.f32.mrb[150].mxu0 }
 0x274   :  { %v8257_v12 = vrot.slane %v8255_v13, 5  ;;  %v8261_v36 = vrot.slane %v8259_v6, 4  ;;  %v8267_v7 = vrot.slane %v8265_v40, 5  ;;  %v12674_v30 = vrot.slane %v12604_v24, 9  ;;  %v5261_v46 = vld [vmem:[#allocation2 + $0x198] sm:$0xff]  ;;  %v18469_v47 = vpop.f32.mrb[151].mxu0 }
 0x275   :  { %v8234_v21 = vsel %vm14066_vm7, %v8229_v53, %v8233_v61  ;;  %v8244_v56 = vsel %vm14066_vm7, %v8239_v4, %v8243_v2  ;;  %13740 = vmatprep.mubr.msk.bf16.mxu0 %vm376_vm2, %v12706_v35  ;;  %v8252_v8 = vor.u32 %v8251_v28, %v8248_v22  ;;  %v9616_v41 = vrot.slane %v12605_v57, 5  ;;  %v3659_v19 = vld [vmem:[#allocation2 + $0x1b8] sm:$0xff]  ;;  %v5259_v20 = vld [vmem:[#allocation2 + $0x188] sm:$0xff]  ;;  %v12452_v2 = vld [vmem:[%s21441_s0 + $0xf0] sm:$0xf] }
 0x276   :  { %v12515_v5 = vcombine.low %v8234_v21, %v8244_v56  ;;  %v8262_v45 = vor.u32 %v8261_v36, %v8257_v12  ;;  %v9619_v10 = vrot.slane %v12606_v37, 5  ;;  %v4272_v58 = vadd.f32 %v18277_v39, %v3658_v44  ;;  %v3657_v9 = vld [vmem:[#allocation2 + $0x1a8] sm:$0xff]  ;;  %v12608_v24 = vld [vmem:[%s21441_s0 + $0xc4] sm:$0xf]  ;;  %v12455_v35 = vld [vmem:[%s21441_s0 + $0xfc] sm:$0xf] }
 0x277   :  { %v8253_v50 = vrot.slane %v8252_v8, 4  ;;  %v9617_v23 = vsel %vm14113_vm8, %v12674_v30, %v9616_v41  ;;  %v9618_v61 = vrot.slane %v9616_v41, 4  ;;  %v5810_v33 = vadd.f32 %v18383_v48, %v5260_v38  ;;  %v12453_v48 = vld [vmem:[%s21441_s0 + $0xf4] sm:$0xf]  ;;  %v12609_v6 = vld [vmem:[%s21441_s0 + $0xc8] sm:$0x1] }
 0x278   :  { %13678 = vmatprep.mubr.msk.bf16.mxu1 %vm376_vm2, %v12515_v5  ;;  %v8263_v39 = vrot.slane %v8262_v45, 4  ;;  %4336 = vst.msk [vmem:[#allocation2 + $0x1b0] sm:$0xff] %vm22_vm9, %v4272_v58  ;;  %v4270_v16 = vadd.f32 %v18306_v42, %v3656_v34  ;;  %v5808_v43 = vadd.f32 %v18398_v62, %v5258_v49  ;;  %v4273_v27 = vadd.f32 %v18320_v63, %v3659_v19  ;;  %v12454_v63 = vld [vmem:[%s21441_s0 + $0xf8] sm:$0x1]  ;;  %v12607_v62 = vld [vmem:[%s21441_s0 + $0xc0] sm:$0xe] }
 0x279   :  { %v8258_v31 = vsel %vm14066_vm7, %v8253_v50, %v8257_v12  ;;  %v9620_v59 = vsel %vm14113_vm8, %v9618_v61, %v9619_v10  ;;  %5874 = vst.msk [vmem:[#allocation2 + $0x190] sm:$0xff] %vm22_vm9, %v5810_v33  ;;  %v5811_v13 = vadd.f32 %v18413_v3, %v5261_v46  ;;  %v4271_v42 = vadd.f32 %v18332_v18, %v3657_v9  ;;  %v12456_v36 = vld [vmem:[%s21441_s0 + $0x100] sm:$0xf]  ;;  %v12457_v56 = vld [vmem:[%s21441_s0 + $0x104] sm:$0x1]  ;;  %v18526_v5 = vpop.f32.mrb[152].mxu0 }
 0x27a   :  { %v8268_v14 = vsel %vm14066_vm7, %v8263_v39, %v8267_v7  ;;  %v12707_v22 = vcombine.low %v9617_v23, %v9620_v59  ;;  %4334 = vst.msk [vmem:[#allocation2 + $0x1a0] sm:$0xff] %vm22_vm9, %v4270_v16  ;;  %5872 = vst.msk [vmem:[#allocation2 + $0x180] sm:$0xff] %vm22_vm9, %v5808_v43  ;;  %v5809_v18 = vadd.f32 %v18424_v29, %v5259_v20  ;;  %v8270_v3 = vshrl.u32 %v12452_v2, 16  ;;  %v12610_v46 = vld [vmem:[%s21441_s0 + $0xcc] sm:$0xe]  ;;  %v18531_v50 = vpop.f32.mrb[153].mxu0 }
 0x27b   :  { %4337 = vst.msk [vmem:[#allocation2 + $0x1b8] sm:$0xff] %vm22_vm9, %v4273_v27  ;;  %v12516_v40 = vcombine.low %v8258_v31, %v8268_v14  ;;  %5875 = vst.msk [vmem:[#allocation2 + $0x198] sm:$0xff] %vm22_vm9, %v5811_v13  ;;  %v8273_v57 = vshll.u32 %v12452_v2, 16  ;;  %v8279_v53 = vshll.u32 %v12453_v48, 16  ;;  %v8283_v4 = vshrl.u32 %v12453_v48, 16  ;;  %v18538_v2 = vpop.f32.mrb[154].mxu0 }
 0x27c   :  { %4335 = vst.msk [vmem:[#allocation2 + $0x1a8] sm:$0xff] %vm22_vm9, %v4271_v42  ;;  %13741 = vmatmul.mubr.msk.bf16.gmra.mrb[248].mxu0 %vm376_vm2, %v12707_v22  ;;  %5873 = vst.msk [vmem:[#allocation2 + $0x188] sm:$0xff] %vm22_vm9, %v5809_v18  ;;  %v8272_v29 = vrot.slane %v8270_v3, 4  ;;  %v8289_v28 = vshll.u32 %v12454_v63, 16  ;;  %v12675_v37 = vrot.slane %v12607_v62, 9  ;;  %v9623_v12 = vrot.slane %v12608_v24, 5 }
 0x27d   :  { %13679 = vmatmul.mubr.msk.bf16.gmra.mrb[252].mxu1 %vm376_vm2, %v12516_v40  ;;  %v8275_v7 = vrot.slane %v8273_v57, 5  ;;  %v8281_v30 = vrot.slane %v8279_v53, 5  ;;  %v8285_v38 = vrot.slane %v8283_v4, 4  ;;  %v9626_v21 = vrot.slane %v12609_v6, 5  ;;  %v12611_v20 = vld [vmem:[%s21441_s0 + $0xd0] sm:$0xf] }
 0x27e   :  { %v8291_v8 = vrot.slane %v8289_v28, 5  ;;  %v9624_v41 = vsel %vm14113_vm8, %v12675_v37, %v9623_v12  ;;  %v9625_v44 = vrot.slane %v9623_v12, 4  ;;  %v8294_v49 = vshrl.u32 %v12455_v35, 16  ;;  %v12612_v9 = vld [vmem:[%s21441_s0 + $0xd4] sm:$0x1]  ;;  %v18543_v48 = vpop.f32.mrb[155].mxu0 }
 0x27f   :  { %v8276_v45 = vor.u32 %v8275_v7, %v8272_v29  ;;  %v8286_v10 = vor.u32 %v8285_v38, %v8281_v30  ;;  %v8297_v58 = vshll.u32 %v12455_v35, 16  ;;  %v8303_v34 = vshll.u32 %v12456_v36, 16  ;;  %v5264_v63 = vld [vmem:[#allocation2 + $0x1b0] sm:$0xff]  ;;  %v3660_v4 = vld [vmem:[#allocation2 + $0x1c0] sm:$0xff] }
 0x280   :  { %v9627_v23 = vsel %vm14113_vm8, %v9625_v44, %v9626_v21  ;;  %v8296_v61 = vrot.slane %v8294_v49, 4  ;;  %v8307_v33 = vshrl.u32 %v12456_v36, 16  ;;  %v8313_v19 = vshll.u32 %v12457_v56, 16  ;;  %v3662_v18 = vld [vmem:[#allocation2 + $0x1d0] sm:$0xff]  ;;  %v3663_v36 = vld [vmem:[#allocation2 + $0x1d8] sm:$0xff] }
 0x281   :  { %v8277_v39 = vrot.slane %v8276_v45, 4  ;;  %v8287_v16 = vrot.slane %v8286_v10, 4  ;;  %v12708_v43 = vcombine.low %v9624_v41, %v9627_v23  ;;  %v8299_v27 = vrot.slane %v8297_v58, 5  ;;  %v5262_v3 = vld [vmem:[#allocation2 + $0x1a0] sm:$0xff]  ;;  %v12460_v41 = vld [vmem:[%s21441_s0 + $0x110] sm:$0x1] }
 0x282   :  { %v8305_v31 = vrot.slane %v8303_v34, 5  ;;  %v8309_v59 = vrot.slane %v8307_v33, 4  ;;  %v8315_v13 = vrot.slane %v8313_v19, 5  ;;  %v12676_v42 = vrot.slane %v12610_v46, 9  ;;  %v5265_v35 = vld [vmem:[#allocation2 + $0x1b8] sm:$0xff] }
 0x283   :  { %v8282_v62 = vsel %vm14066_vm7, %v8277_v39, %v8281_v30  ;;  %v8292_v24 = vsel %vm14066_vm7, %v8287_v16, %v8291_v8  ;;  %13744 = vmatprep.mubr.msk.bf16.mxu0 %vm376_vm2, %v12708_v43  ;;  %v8300_v14 = vor.u32 %v8299_v27, %v8296_v61  ;;  %v9630_v22 = vrot.slane %v12611_v20, 5  ;;  %v5263_v7 = vld [vmem:[#allocation2 + $0x1a8] sm:$0xff]  ;;  %v12614_v45 = vld [vmem:[%s21441_s0 + $0xf4] sm:$0xf]  ;;  %v12615_v10 = vld [vmem:[%s21441_s0 + $0xf8] sm:$0x1] }
 0x284   :  { %v12517_v6 = vcombine.low %v8282_v62, %v8292_v24  ;;  %v8310_v40 = vor.u32 %v8309_v59, %v8305_v31  ;;  %v9633_v57 = vrot.slane %v12612_v9, 5  ;;  %v4276_v53 = vadd.f32 %v18345_v55, %v3662_v18  ;;  %v12458_v30 = vld [vmem:[%s21441_s0 + $0x108] sm:$0xf]  ;;  %v12461_v46 = vld [vmem:[%s21441_s0 + $0x114] sm:$0xf]  ;;  %v18601_v39 = vpop.f32.mrb[156].mxu0 }
 0x285   :  { %v8301_v29 = vrot.slane %v8300_v14, 4  ;;  %v9631_v28 = vsel %vm14113_vm8, %v12676_v42, %v9630_v22  ;;  %v9632_v37 = vrot.slane %v9630_v22, 4  ;;  %v5814_v12 = vadd.f32 %v18457_v60, %v5264_v63  ;;  %v3661_v8 = vld [vmem:[#allocation2 + $0x1c8] sm:$0xff]  ;;  %v12462_v23 = vld [vmem:[%s21441_s0 + $0x118] sm:$0xf]  ;;  %v18603_v16 = vpop.f32.mrb[160].mxu1 }
 0x286   :  { %13682 = vmatprep.mubr.msk.bf16.mxu1 %vm376_vm2, %v12517_v6  ;;  %v8311_v38 = vrot.slane %v8310_v40, 4  ;;  %4340 = vst.msk [vmem:[#allocation2 + $0x1d0] sm:$0xff] %vm22_vm9, %v4276_v53  ;;  %v4274_v55 = vadd.f32 %v18350_v0, %v3660_v4  ;;  %v5812_v21 = vadd.f32 %v18459_v54, %v5262_v3  ;;  %v4277_v56 = vadd.f32 %v18357_v32, %v3663_v36  ;;  %v12459_v60 = vld [vmem:[%s21441_s0 + $0x10c] sm:$0xf]  ;;  %v12613_v54 = vld [vmem:[%s21441_s0 + $0xf0] sm:$0xe] }
 0x287   :  { %v8306_v44 = vsel %vm14066_vm7, %v8301_v29, %v8305_v31  ;;  %v9634_v49 = vsel %vm14113_vm8, %v9632_v37, %v9633_v57  ;;  %5878 = vst.msk [vmem:[#allocation2 + $0x1b0] sm:$0xff] %vm22_vm9, %v5814_v12  ;;  %v5815_v0 = vadd.f32 %v18466_v17, %v5265_v35  ;;  %v4275_v32 = vadd.f32 %v18367_v15, %v3661_v8  ;;  %v18607_v59 = vpop.f32.mrb[157].mxu0  ;;  %v12616_v37 = vld [vmem:[%s21441_s0 + $0xfc] sm:$0xe] }
 0x288   :  { %v8316_v58 = vsel %vm14066_vm7, %v8311_v38, %v8315_v13  ;;  %v12709_v34 = vcombine.low %v9631_v28, %v9634_v49  ;;  %4338 = vst.msk [vmem:[#allocation2 + $0x1c0] sm:$0xff] %vm22_vm9, %v4274_v55  ;;  %5876 = vst.msk [vmem:[#allocation2 + $0x1a0] sm:$0xff] %vm22_vm9, %v5812_v21  ;;  %v5813_v15 = vadd.f32 %v18469_v47, %v5263_v7  ;;  %v8318_v17 = vshrl.u32 %v12458_v30, 16  ;;  %v12463_v47 = vld [vmem:[%s21441_s0 + $0x11c] sm:$0x1]  ;;  %v18609_v13 = vpop.f32.mrb[161].mxu1 }
 0x289   :  { %4341 = vst.msk [vmem:[#allocation2 + $0x1d8] sm:$0xff] %vm22_vm9, %v4277_v56  ;;  %v12518_v61 = vcombine.low %v8306_v44, %v8316_v58  ;;  %5879 = vst.msk [vmem:[#allocation2 + $0x1b8] sm:$0xff] %vm22_vm9, %v5815_v0  ;;  %v8321_v33 = vshll.u32 %v12458_v30, 16  ;;  %v8327_v19 = vshll.u32 %v12459_v60, 16  ;;  %v8331_v20 = vshrl.u32 %v12459_v60, 16  ;;  %v18612_v14 = vpop.f32.mrb[158].mxu0 }
 0x28a   :  { %4339 = vst.msk [vmem:[#allocation2 + $0x1c8] sm:$0xff] %vm22_vm9, %v4275_v32  ;;  %13745 = vmatmul.mubr.msk.bf16.gmra.mrb[252].mxu0 %vm376_vm2, %v12709_v34  ;;  %5877 = vst.msk [vmem:[#allocation2 + $0x1a8] sm:$0xff] %vm22_vm9, %v5813_v15  ;;  %v8320_v43 = vrot.slane %v8318_v17, 4  ;;  %v8337_v27 = vshll.u32 %v12460_v41, 16  ;;  %v12677_v9 = vrot.slane %v12613_v54, 9  ;;  %v9637_v31 = vrot.slane %v12614_v45, 5 }
 0x28b   :  { %13683 = vmatmul.mubr.msk.bf16.gmra.mrb[0].mxu1 %vm376_vm2, %v12518_v61  ;;  %v8323_v42 = vrot.slane %v8321_v33, 5  ;;  %v8329_v63 = vrot.slane %v8327_v19, 5  ;;  %v8333_v62 = vrot.slane %v8331_v20, 4  ;;  %v9640_v24 = vrot.slane %v12615_v10, 5  ;;  %v18614_v22 = vpop.f32.mrb[162].mxu1  ;;  %v18618_v57 = vpop.f32.mrb[159].mxu0 }
 0x28c   :  { %v8339_v18 = vrot.slane %v8337_v27, 5  ;;  %v9638_v3 = vsel %vm14113_vm8, %v12677_v9, %v9637_v31  ;;  %v9639_v6 = vrot.slane %v9637_v31, 4  ;;  %v8342_v40 = vshrl.u32 %v12461_v46, 16  ;;  %v18620_v53 = vpop.f32.mrb[163].mxu1  ;;  %v12617_v38 = vld [vmem:[%s21441_s0 + $0x100] sm:$0xf] }
 0x28d   :  { %v8324_v4 = vor.u32 %v8323_v42, %v8320_v43  ;;  %v8334_v35 = vor.u32 %v8333_v62, %v8329_v63  ;;  %v8345_v29 = vshll.u32 %v12461_v46, 16  ;;  %v8351_v28 = vshll.u32 %v12462_v23, 16  ;;  %v12618_v60 = vld [vmem:[%s21441_s0 + $0x104] sm:$0x1]  ;;  %v5268_v32 = vld [vmem:[#allocation2 + $0x1d0] sm:$0xff]  ;;  %v18638_v46 = vpop.f32.mrb[164].mxu1 }
 0x28e   :  { %v9641_v12 = vsel %vm14113_vm8, %v9639_v6, %v9640_v24  ;;  %v8344_v36 = vrot.slane %v8342_v40, 4  ;;  %v8355_v7 = vshrl.u32 %v12462_v23, 16  ;;  %v8361_v30 = vshll.u32 %v12463_v47, 16  ;;  %v3666_v34 = vld [vmem:[#allocation2 + $0x1f0] sm:$0xff]  ;;  %v3664_v15 = vld [vmem:[#allocation2 + $0x1e0] sm:$0xff]  ;;  %v18640_v23 = vpop.f32.mrb[160].mxu0 }
 0x28f   :  { %v8325_v55 = vrot.slane %v8324_v4, 4  ;;  %v8335_v21 = vrot.slane %v8334_v35, 4  ;;  %v12710_v56 = vcombine.low %v9638_v3, %v9641_v12  ;;  %v8347_v8 = vrot.slane %v8345_v29, 5  ;;  %v5266_v17 = vld [vmem:[#allocation2 + $0x1c0] sm:$0xff]  ;;  %v18646_v27 = vpop.f32.mrb[165].mxu1  ;;  %v18648_v9 = vpop.f32.mrb[161].mxu0 }
 0x290   :  { %v8353_v41 = vrot.slane %v8351_v28, 5  ;;  %v8357_v44 = vrot.slane %v8355_v7, 4  ;;  %v8363_v49 = vrot.slane %v8361_v30, 5  ;;  %v12678_v0 = vrot.slane %v12616_v37, 9  ;;  %v5269_v47 = vld [vmem:[#allocation2 + $0x1d8] sm:$0xff]  ;;  %v18653_v3 = vpop.f32.mrb[166].mxu1 }
 0x291   :  { %v8330_v54 = vsel %vm14066_vm7, %v8325_v55, %v8329_v63  ;;  %v8340_v45 = vsel %vm14066_vm7, %v8335_v21, %v8339_v18  ;;  %13748 = vmatprep.mubr.msk.bf16.mxu0 %vm376_vm2, %v12710_v56  ;;  %v8348_v10 = vor.u32 %v8347_v8, %v8344_v36  ;;  %v9644_v58 = vrot.slane %v12617_v38, 5  ;;  %v12464_v43 = vld [vmem:[%s21441_s0 + $0x120] sm:$0xf]  ;;  %v3667_v24 = vld [vmem:[#allocation2 + $0x1f8] sm:$0xff]  ;;  %v5267_v18 = vld [vmem:[#allocation2 + $0x1c8] sm:$0xff]  ;;  %v18665_v28 = vpop.f32.mrb[167].mxu1 }
 0x292   :  { %v12519_v61 = vcombine.low %v8330_v54, %v8340_v45  ;;  %v8358_v33 = vor.u32 %v8357_v44, %v8353_v41  ;;  %v9647_v19 = vrot.slane %v12618_v60, 5  ;;  %v4280_v20 = vadd.f32 %v18374_v26, %v3666_v34  ;;  %v18655_v26 = vpop.f32.mrb[162].mxu0  ;;  %v3665_v29 = vld [vmem:[#allocation2 + $0x1e8] sm:$0xff]  ;;  %v12621_v21 = vld [vmem:[%s21441_s0 + $0x110] sm:$0x1] }
 0x293   :  { %v8349_v31 = vrot.slane %v8348_v10, 4  ;;  %v9645_v42 = vsel %vm14113_vm8, %v12678_v0, %v9644_v58  ;;  %v9646_v63 = vrot.slane %v9644_v58, 4  ;;  %v5818_v62 = vadd.f32 %v18526_v5, %v5268_v32  ;;  %v12465_v5 = vld [vmem:[%s21441_s0 + $0x124] sm:$0xf]  ;;  %v18667_v37 = vpop.f32.mrb[163].mxu0 }
 0x294   :  { %13686 = vmatprep.mubr.msk.bf16.mxu1 %vm376_vm2, %v12519_v61  ;;  %v8359_v6 = vrot.slane %v8358_v33, 4  ;;  %4344 = vst.msk [vmem:[#allocation2 + $0x1f0] sm:$0xff] %vm22_vm9, %v4280_v20  ;;  %v4278_v40 = vadd.f32 %v18385_v1, %v3664_v15  ;;  %v5816_v4 = vadd.f32 %v18531_v50, %v5266_v17  ;;  %v4281_v35 = vadd.f32 %v18431_v11, %v3667_v24  ;;  %v12466_v50 = vld [vmem:[%s21441_s0 + $0x128] sm:$0x1]  ;;  %v12619_v7 = vld [vmem:[%s21441_s0 + $0x108] sm:$0xe] }
 0x295   :  { %v8354_v12 = vsel %vm14066_vm7, %v8349_v31, %v8353_v41  ;;  %v9648_v36 = vsel %vm14113_vm8, %v9646_v63, %v9647_v19  ;;  %5882 = vst.msk [vmem:[#allocation2 + $0x1d0] sm:$0xff] %vm22_vm9, %v5818_v62  ;;  %v5819_v1 = vadd.f32 %v18538_v2, %v5269_v47  ;;  %v4279_v11 = vadd.f32 %v18447_v25, %v3665_v29  ;;  %v12620_v30 = vld [vmem:[%s21441_s0 + $0x10c] sm:$0xf]  ;;  %v12469_v45 = vld [vmem:[%s21441_s0 + $0x134] sm:$0x1]  ;;  %v18711_v61 = vpop.f32.mrb[168].mxu1 }
 0x296   :  { %v8364_v38 = vsel %vm14066_vm7, %v8359_v6, %v8363_v49  ;;  %v12711_v55 = vcombine.low %v9645_v42, %v9648_v36  ;;  %4342 = vst.msk [vmem:[#allocation2 + $0x1e0] sm:$0xff] %vm22_vm9, %v4278_v40  ;;  %5880 = vst.msk [vmem:[#allocation2 + $0x1c0] sm:$0xff] %vm22_vm9, %v5816_v4  ;;  %v5817_v25 = vadd.f32 %v18543_v48, %v5267_v18  ;;  %v8366_v2 = vshrl.u32 %v12464_v43, 16  ;;  %v12467_v56 = vld [vmem:[%s21441_s0 + $0x12c] sm:$0xf]  ;;  %v18713_v33 = vpop.f32.mrb[164].mxu0 }
 0x297   :  { %4345 = vst.msk [vmem:[#allocation2 + $0x1f8] sm:$0xff] %vm22_vm9, %v4281_v35  ;;  %v12520_v8 = vcombine.low %v8354_v12, %v8364_v38  ;;  %5883 = vst.msk [vmem:[#allocation2 + $0x1d8] sm:$0xff] %vm22_vm9, %v5819_v1  ;;  %v8369_v60 = vshll.u32 %v12464_v43, 16  ;;  %v8375_v41 = vshll.u32 %v12465_v5, 16  ;;  %v8379_v44 = vshrl.u32 %v12465_v5, 16  ;;  %v18717_v31 = vpop.f32.mrb[169].mxu1 }
 0x298   :  { %4343 = vst.msk [vmem:[#allocation2 + $0x1e8] sm:$0xff] %vm22_vm9, %v4279_v11  ;;  %v12468_v48 = vld [vmem:[%s21441_s0 + $0x130] sm:$0xf]  ;;  %13749 = vmatmul.mubr.msk.bf16.gmra.mrb[0].mxu0 %vm376_vm2, %v12711_v55  ;;  %5881 = vst.msk [vmem:[#allocation2 + $0x1c8] sm:$0xff] %vm22_vm9, %v5817_v25  ;;  %v8368_v49 = vrot.slane %v8366_v2, 4  ;;  %v8385_v0 = vshll.u32 %v12466_v50, 16 }
 0x299   :  { %v12679_v32 = vrot.slane %v12619_v7, 9  ;;  %v9651_v54 = vrot.slane %v12620_v30, 5  ;;  %13687 = vmatmul.mubr.msk.bf16.gmra.mrb[4].mxu1 %vm376_vm2, %v12520_v8  ;;  %v8371_v10 = vrot.slane %v8369_v60, 5  ;;  %v8377_v58 = vrot.slane %v8375_v41, 5  ;;  %v12622_v17 = vld [vmem:[%s21441_s0 + $0x114] sm:$0xe] }
 0x29a   :  { %v8381_v34 = vrot.slane %v8379_v44, 4  ;;  %v9654_v15 = vrot.slane %v12621_v21, 5  ;;  %v8387_v19 = vrot.slane %v8385_v0, 5  ;;  %v8390_v43 = vshrl.u32 %v12467_v56, 16  ;;  %v18719_v42 = vpop.f32.mrb[165].mxu0  ;;  %v18724_v40 = vpop.f32.mrb[170].mxu1 }
 0x29b   :  { %v9652_v20 = vsel %vm14113_vm8, %v12679_v32, %v9651_v54  ;;  %v9653_v47 = vrot.slane %v9651_v54, 4  ;;  %v8372_v63 = vor.u32 %v8371_v10, %v8368_v49  ;;  %v8393_v24 = vshll.u32 %v12467_v56, 16  ;;  %v12623_v6 = vld [vmem:[%s21441_s0 + $0x118] sm:$0xf]  ;;  %v18726_v4 = vpop.f32.mrb[166].mxu0  ;;  %v18730_v36 = vpop.f32.mrb[171].mxu1 }
 0x29c   :  { %v8382_v62 = vor.u32 %v8381_v34, %v8377_v58  ;;  %v8399_v18 = vshll.u32 %v12468_v48, 16  ;;  %v8392_v29 = vrot.slane %v8390_v43, 4  ;;  %v8403_v5 = vshrl.u32 %v12468_v48, 16  ;;  %v18732_v1 = vpop.f32.mrb[167].mxu0  ;;  %v12624_v38 = vld [vmem:[%s21441_s0 + $0x11c] sm:$0x1] }
 0x29d   :  { %v9655_v35 = vsel %vm14113_vm8, %v9653_v47, %v9654_v15  ;;  %v8409_v12 = vshll.u32 %v12469_v45, 16  ;;  %v8373_v11 = vrot.slane %v8372_v63, 4  ;;  %v8395_v30 = vrot.slane %v8393_v24, 5  ;;  %v5272_v55 = vld [vmem:[#allocation2 + $0x1f0] sm:$0xff]  ;;  %v5270_v49 = vld [vmem:[#allocation2 + $0x1e0] sm:$0xff]  ;;  %v6307_v15 = vld [vmem:[#allocation2 + $0x18] sm:$0xff] }
 0x29e   :  { %v8383_v50 = vrot.slane %v8382_v62, 4  ;;  %v12712_v7 = vcombine.low %v9652_v20, %v9655_v35  ;;  %v8401_v25 = vrot.slane %v8399_v18, 5  ;;  %v8405_v2 = vrot.slane %v8403_v5, 4  ;;  %v6306_v8 = vld [vmem:[#allocation2 + $0x10] sm:$0xff]  ;;  %v6304_v0 = vld [vmem:[#allocation2] sm:$0xff]  ;;  %v5273_v32 = vld [vmem:[#allocation2 + $0x1f8] sm:$0xff] }
 0x29f   :  { %v8411_v21 = vrot.slane %v8409_v12, 5  ;;  %v12680_v56 = vrot.slane %v12622_v17, 9  ;;  %v8378_v60 = vsel %vm14066_vm7, %v8373_v11, %v8377_v58  ;;  %v8396_v44 = vor.u32 %v8395_v30, %v8392_v29  ;;  %v5271_v17 = vld [vmem:[#allocation2 + $0x1e8] sm:$0xff]  ;;  %v12470_v58 = vld [vmem:[%s21441_s0 + $0x138] sm:$0xf]  ;;  %v18752_v62 = vpop.f32.mrb[172].mxu1 }
 0x2a0   :  { %v8388_v41 = vsel %vm14066_vm7, %v8383_v50, %v8387_v19  ;;  %13752 = vmatprep.mubr.msk.bf16.mxu0 %vm376_vm2, %v12712_v7  ;;  %v9658_v48 = vrot.slane %v12623_v6, 5  ;;  %v8406_v45 = vor.u32 %v8405_v2, %v8401_v25  ;;  %v9661_v10 = vrot.slane %v12624_v38, 5  ;;  %v12471_v63 = vld [vmem:[%s21441_s0 + $0x13c] sm:$0xf]  ;;  %v12472_v29 = vld [vmem:[%s21441_s0 + $0x140] sm:$0x1] }
 0x2a1   :  { %v12521_v54 = vcombine.low %v8378_v60, %v8388_v41  ;;  %v5822_v34 = vadd.f32 %v18601_v39, %v5272_v55  ;;  %v8397_v20 = vrot.slane %v8396_v44, 4  ;;  %v6856_v43 = vadd.f32 %v18603_v16, %v6306_v8  ;;  %v18754_v39 = vpop.f32.mrb[168].mxu0  ;;  %v6305_v16 = vld [vmem:[#allocation2 + $0x8] sm:$0xff]  ;;  %v18764_v5 = vpop.f32.mrb[173].mxu1  ;;  %v12626_v7 = vld [vmem:[%s21441_s0 + $0x124] sm:$0xf] }
 0x2a2   :  { %v9659_v19 = vsel %vm14113_vm8, %v12680_v56, %v9658_v48  ;;  %v9660_v47 = vrot.slane %v9658_v48, 4  ;;  %v8407_v24 = vrot.slane %v8406_v45, 4  ;;  %v5820_v18 = vadd.f32 %v18607_v59, %v5270_v49  ;;  %v18766_v12 = vpop.f32.mrb[169].mxu0  ;;  %v18781_v30 = vpop.f32.mrb[174].mxu1  ;;  %v12627_v2 = vld [vmem:[%s21441_s0 + $0x128] sm:$0x1] }
 0x2a3   :  { %13690 = vmatprep.mubr.msk.bf16.mxu1 %vm376_vm2, %v12521_v54  ;;  %5886 = vst.msk [vmem:[#allocation2 + $0x1f0] sm:$0xff] %vm22_vm9, %v5822_v34  ;;  %v6854_v6 = vadd.f32 %v18609_v13, %v6304_v0  ;;  %v5823_v35 = vadd.f32 %v18612_v14, %v5273_v32  ;;  %v8402_v11 = vsel %vm14066_vm7, %v8397_v20, %v8401_v25  ;;  %6920 = vst.msk [vmem:[#allocation2 + $0x10] sm:$0xff] %vm22_vm9, %v6856_v43  ;;  %v12625_v14 = vld [vmem:[%s21441_s0 + $0x120] sm:$0xe]  ;;  %v18783_v38 = vpop.f32.mrb[170].mxu0  ;;  %v18794_v56 = vpop.f32.mrb[175].mxu1 }
 0x2a4   :  { %v9662_v50 = vsel %vm14113_vm8, %v9660_v47, %v9661_v10  ;;  %v6857_v59 = vadd.f32 %v18614_v22, %v6307_v15  ;;  %v5821_v13 = vadd.f32 %v18618_v57, %v5271_v17  ;;  %v8412_v55 = vsel %vm14066_vm7, %v8407_v24, %v8411_v21  ;;  %5884 = vst.msk [vmem:[#allocation2 + $0x1e0] sm:$0xff] %vm22_vm9, %v5820_v18  ;;  %v18796_v8 = vpop.f32.mrb[171].mxu0  ;;  %v12474_v54 = vld [vmem:[%s21441_s0 + $0x148] sm:$0xf]  ;;  %v12475_v17 = vld [vmem:[%s21441_s0 + $0x14c] sm:$0x1] }
 0x2a5   :  { %v12713_v25 = vcombine.low %v9659_v19, %v9662_v50  ;;  %6918 = vst.msk [vmem:[#allocation2] sm:$0xff] %vm22_vm9, %v6854_v6  ;;  %5887 = vst.msk [vmem:[#allocation2 + $0x1f8] sm:$0xff] %vm22_vm9, %v5823_v35  ;;  %v6855_v22 = vadd.f32 %v18620_v53, %v6305_v16  ;;  %v8414_v57 = vshrl.u32 %v12470_v58, 16  ;;  %v12522_v60 = vcombine.low %v8402_v11, %v8412_v55  ;;  %v12473_v53 = vld [vmem:[%s21441_s0 + $0x144] sm:$0xf] }
 0x2a6   :  { %6921 = vst.msk [vmem:[#allocation2 + $0x18] sm:$0xff] %vm22_vm9, %v6857_v59  ;;  %5885 = vst.msk [vmem:[#allocation2 + $0x1e8] sm:$0xff] %vm22_vm9, %v5821_v13  ;;  %v8417_v21 = vshll.u32 %v12470_v58, 16  ;;  %v8423_v41 = vshll.u32 %v12471_v63, 16  ;;  %v8427_v44 = vshrl.u32 %v12471_v63, 16  ;;  %v8433_v49 = vshll.u32 %v12472_v29, 16 }
 0x2a7   :  { %13753 = vmatmul.mubr.msk.bf16.gmra.mrb[4].mxu0 %vm376_vm2, %v12713_v25  ;;  %6919 = vst.msk [vmem:[#allocation2 + $0x8] sm:$0xff] %vm22_vm9, %v6855_v22  ;;  %v8416_v48 = vrot.slane %v8414_v57, 4  ;;  %v12681_v0 = vrot.slane %v12625_v14, 9  ;;  %v9665_v32 = vrot.slane %v12626_v7, 5  ;;  %13691 = vmatmul.mubr.msk.bf16.gmra.mrb[8].mxu1 %vm376_vm2, %v12522_v60  ;;  %v9668_v15 = vrot.slane %v12627_v2, 5  ;;  %v18825_v25 = vpop.f32.mrb[176].mxu1 }
 0x2a8   :  { %v8419_v45 = vrot.slane %v8417_v21, 5  ;;  %v8425_v10 = vrot.slane %v8423_v41, 5  ;;  %v8429_v34 = vrot.slane %v8427_v44, 4  ;;  %v8435_v58 = vrot.slane %v8433_v49, 5  ;;  %v12628_v6 = vld [vmem:[%s21441_s0 + $0x12c] sm:$0xe] }
 0x2a9   :  { %v9666_v20 = vsel %vm14113_vm8, %v12681_v0, %v9665_v32  ;;  %v9667_v19 = vrot.slane %v9665_v32, 4  ;;  %v8438_v47 = vshrl.u32 %v12473_v53, 16  ;;  %v8441_v24 = vshll.u32 %v12473_v53, 16  ;;  %v12629_v35 = vld [vmem:[%s21441_s0 + $0x130] sm:$0xf]  ;;  %v18827_v22 = vpop.f32.mrb[172].mxu0 }
 0x2aa   :  { %v8420_v43 = vor.u32 %v8419_v45, %v8416_v48  ;;  %v8430_v63 = vor.u32 %v8429_v34, %v8425_v10  ;;  %v8447_v18 = vshll.u32 %v12474_v54, 16  ;;  %v8451_v11 = vshrl.u32 %v12474_v54, 16  ;;  %v12630_v59 = vld [vmem:[%s21441_s0 + $0x134] sm:$0x1]  ;;  %v18829_v44 = vpop.f32.mrb[177].mxu1  ;;  %v18836_v45 = vpop.f32.mrb[173].mxu0 }
 0x2ab   :  { %v9669_v16 = vsel %vm14113_vm8, %v9667_v19, %v9668_v15  ;;  %v8440_v29 = vrot.slane %v8438_v47, 4  ;;  %v8457_v50 = vshll.u32 %v12475_v17, 16  ;;  %v8443_v55 = vrot.slane %v8441_v24, 5  ;;  %v7049_v41 = vld [vmem:[#allocation2 + $0x10] sm:$0xff]  ;;  %v18838_v34 = vpop.f32.mrb[178].mxu1  ;;  %v6308_v47 = vld [vmem:[#allocation2 + $0x20] sm:$0xff] }
 0x2ac   :  { %v8421_v13 = vrot.slane %v8420_v43, 4  ;;  %v8431_v14 = vrot.slane %v8430_v63, 4  ;;  %v12714_v7 = vcombine.low %v9666_v20, %v9669_v16  ;;  %v8449_v57 = vrot.slane %v8447_v18, 5  ;;  %v6310_v32 = vld [vmem:[#allocation2 + $0x30] sm:$0xff]  ;;  %v7047_v54 = vld [vmem:[#allocation2] sm:$0xff]  ;;  %v18841_v63 = vpop.f32.mrb[174].mxu0 }
 0x2ad   :  { %v8453_v2 = vrot.slane %v8451_v11, 4  ;;  %v8459_v60 = vrot.slane %v8457_v50, 5  ;;  %v12682_v21 = vrot.slane %v12628_v6, 9  ;;  %v8444_v49 = vor.u32 %v8443_v55, %v8440_v29  ;;  %v7050_v43 = vld [vmem:[#allocation2 + $0x18] sm:$0xff]  ;;  %v12476_v29 = vld [vmem:[%s21441_s0 + $0x150] sm:$0xf] }
 0x2ae   :  { %v8426_v53 = vsel %vm14066_vm7, %v8421_v13, %v8425_v10  ;;  %v8436_v48 = vsel %vm14066_vm7, %v8431_v14, %v8435_v58  ;;  %13756 = vmatprep.mubr.msk.bf16.mxu0 %vm376_vm2, %v12714_v7  ;;  %v9672_v0 = vrot.slane %v12629_v35, 5  ;;  %v9675_v20 = vrot.slane %v12630_v59, 5  ;;  %v6311_v10 = vld [vmem:[#allocation2 + $0x38] sm:$0xff]  ;;  %v18843_v58 = vpop.f32.mrb[179].mxu1  ;;  %v7048_v16 = vld [vmem:[#allocation2 + $0x8] sm:$0xff] }
 0x2af   :  { %v12523_v15 = vcombine.low %v8426_v53, %v8436_v48  ;;  %v8454_v17 = vor.u32 %v8453_v2, %v8449_v57  ;;  %v6860_v19 = vadd.f32 %v18638_v46, %v6310_v32  ;;  %v8445_v24 = vrot.slane %v8444_v49, 4  ;;  %v18851_v46 = vpop.f32.mrb[175].mxu0  ;;  %v6309_v14 = vld [vmem:[#allocation2 + $0x28] sm:$0xff]  ;;  %v12633_v53 = vld [vmem:[%s21441_s0 + $0x140] sm:$0x1]  ;;  %v18889_v49 = vpop.f32.mrb[180].mxu1 }
 0x2b0   :  { %v9673_v18 = vsel %vm14113_vm8, %v12682_v21, %v9672_v0  ;;  %v9674_v6 = vrot.slane %v9672_v0, 4  ;;  %v7663_v35 = vadd.f32 %v18640_v23, %v7049_v41  ;;  %v6858_v50 = vadd.f32 %v18646_v27, %v6308_v47  ;;  %v12477_v23 = vld [vmem:[%s21441_s0 + $0x154] sm:$0xf]  ;;  %v12479_v48 = vld [vmem:[%s21441_s0 + $0x15c] sm:$0xf] }
 0x2b1   :  { %13694 = vmatprep.mubr.msk.bf16.mxu1 %vm376_vm2, %v12523_v15  ;;  %v8455_v11 = vrot.slane %v8454_v17, 4  ;;  %6924 = vst.msk [vmem:[#allocation2 + $0x30] sm:$0xff] %vm22_vm9, %v6860_v19  ;;  %v7661_v59 = vadd.f32 %v18648_v9, %v7047_v54  ;;  %v6861_v13 = vadd.f32 %v18653_v3, %v6311_v10  ;;  %v8450_v7 = vsel %vm14066_vm7, %v8445_v24, %v8449_v57  ;;  %v12478_v9 = vld [vmem:[%s21441_s0 + $0x158] sm:$0x1]  ;;  %v12631_v3 = vld [vmem:[%s21441_s0 + $0x138] sm:$0xe] }
 0x2b2   :  { %v9676_v55 = vsel %vm14113_vm8, %v9674_v6, %v9675_v20  ;;  %7727 = vst.msk [vmem:[#allocation2 + $0x10] sm:$0xff] %vm22_vm9, %v7663_v35  ;;  %v7664_v2 = vadd.f32 %v18655_v26, %v7050_v43  ;;  %v6859_v27 = vadd.f32 %v18665_v28, %v6309_v14  ;;  %v12632_v57 = vld [vmem:[%s21441_s0 + $0x13c] sm:$0xf]  ;;  %6922 = vst.msk [vmem:[#allocation2 + $0x20] sm:$0xff] %vm22_vm9, %v6858_v50  ;;  %v8462_v28 = vshrl.u32 %v12476_v29, 16  ;;  %v18896_v15 = vpop.f32.mrb[176].mxu0 }
 0x2b3   :  { %v8460_v21 = vsel %vm14066_vm7, %v8455_v11, %v8459_v60  ;;  %v12715_v41 = vcombine.low %v9673_v18, %v9676_v55  ;;  %7725 = vst.msk [vmem:[#allocation2] sm:$0xff] %vm22_vm9, %v7661_v59  ;;  %6925 = vst.msk [vmem:[#allocation2 + $0x38] sm:$0xff] %vm22_vm9, %v6861_v13  ;;  %v7662_v26 = vadd.f32 %v18667_v37, %v7048_v16  ;;  %v8465_v0 = vshll.u32 %v12476_v29, 16  ;;  %v12480_v37 = vld [vmem:[%s21441_s0 + $0x160] sm:$0xf]  ;;  %v18904_v35 = vpop.f32.mrb[181].mxu1 }
 0x2b4   :  { %v12524_v60 = vcombine.low %v8450_v7, %v8460_v21  ;;  %7728 = vst.msk [vmem:[#allocation2 + $0x18] sm:$0xff] %vm22_vm9, %v7664_v2  ;;  %6923 = vst.msk [vmem:[#allocation2 + $0x28] sm:$0xff] %vm22_vm9, %v6859_v27  ;;  %v8471_v32 = vshll.u32 %v12477_v23, 16  ;;  %v8475_v54 = vshrl.u32 %v12477_v23, 16  ;;  %v8464_v17 = vrot.slane %v8462_v28, 4  ;;  %v18906_v16 = vpop.f32.mrb[177].mxu0 }
 0x2b5   :  { %13757 = vmatmul.mubr.msk.bf16.gmra.mrb[8].mxu0 %vm376_vm2, %v12715_v41  ;;  %7726 = vst.msk [vmem:[#allocation2 + $0x8] sm:$0xff] %vm22_vm9, %v7662_v26  ;;  %v8481_v20 = vshll.u32 %v12478_v9, 16  ;;  %v12683_v19 = vrot.slane %v12631_v3, 9  ;;  %v9679_v47 = vrot.slane %v12632_v57, 5  ;;  %v12481_v10 = vld [vmem:[%s21441_s0 + $0x164] sm:$0x1] }
 0x2b6   :  { %13695 = vmatmul.mubr.msk.bf16.gmra.mrb[12].mxu1 %vm376_vm2, %v12524_v60  ;;  %v8467_v43 = vrot.slane %v8465_v0, 5  ;;  %v8473_v24 = vrot.slane %v8471_v32, 5  ;;  %v8477_v18 = vrot.slane %v8475_v54, 4  ;;  %v9682_v6 = vrot.slane %v12633_v53, 5  ;;  %v18910_v13 = vpop.f32.mrb[182].mxu1  ;;  %v18912_v14 = vpop.f32.mrb[178].mxu0 }
 0x2b7   :  { %v8483_v29 = vrot.slane %v8481_v20, 5  ;;  %v9680_v11 = vsel %vm14113_vm8, %v12683_v19, %v9679_v47  ;;  %v9681_v50 = vrot.slane %v9679_v47, 4  ;;  %v8486_v59 = vshrl.u32 %v12479_v48, 16  ;;  %v12634_v27 = vld [vmem:[%s21441_s0 + $0x144] sm:$0xe]  ;;  %v18917_v9 = vpop.f32.mrb[183].mxu1 }
 0x2b8   :  { %v8468_v23 = vor.u32 %v8467_v43, %v8464_v17  ;;  %v8478_v7 = vor.u32 %v8477_v18, %v8473_v24  ;;  %v8489_v55 = vshll.u32 %v12479_v48, 16  ;;  %v8495_v2 = vshll.u32 %v12480_v37, 16  ;;  %v18919_v3 = vpop.f32.mrb[179].mxu0  ;;  %v12635_v28 = vld [vmem:[%s21441_s0 + $0x148] sm:$0xf]  ;;  %v18929_v54 = vpop.f32.mrb[184].mxu1 }
 0x2b9   :  { %v9683_v57 = vsel %vm14113_vm8, %v9681_v50, %v9682_v6  ;;  %v8488_v21 = vrot.slane %v8486_v59, 4  ;;  %v8499_v41 = vshrl.u32 %v12480_v37, 16  ;;  %v8505_v26 = vshll.u32 %v12481_v10, 16  ;;  %v12636_v32 = vld [vmem:[%s21441_s0 + $0x14c] sm:$0x1]  ;;  %v7053_v37 = vld [vmem:[#allocation2 + $0x30] sm:$0xff] }
 0x2ba   :  { %v8469_v53 = vrot.slane %v8468_v23, 4  ;;  %v8479_v48 = vrot.slane %v8478_v7, 4  ;;  %v12716_v60 = vcombine.low %v9680_v11, %v9683_v57  ;;  %v8491_v0 = vrot.slane %v8489_v55, 5  ;;  %v18931_v10 = vpop.f32.mrb[180].mxu0  ;;  %v6314_v50 = vld [vmem:[#allocation2 + $0x50] sm:$0xff]  ;;  %v7051_v59 = vld [vmem:[#allocation2 + $0x20] sm:$0xff] }
 0x2bb   :  { %v8497_v17 = vrot.slane %v8495_v2, 5  ;;  %v8501_v20 = vrot.slane %v8499_v41, 4  ;;  %v8507_v19 = vrot.slane %v8505_v26, 5  ;;  %v12684_v47 = vrot.slane %v12634_v27, 9  ;;  %v18941_v23 = vld [vmem:[%s21441_s0 + $0x168] sm:$0xf] }
 0x2bc   :  { %v8474_v43 = vsel %vm14066_vm7, %v8469_v53, %v8473_v24  ;;  %v8484_v18 = vsel %vm14066_vm7, %v8479_v48, %v8483_v29  ;;  %13760 = vmatprep.mubr.msk.bf16.mxu0 %vm376_vm2, %v12716_v60  ;;  %v8492_v6 = vor.u32 %v8491_v0, %v8488_v21  ;;  %v9686_v11 = vrot.slane %v12635_v28, 5  ;;  %v18943_v7 = vpop.f32.mrb[185].mxu1  ;;  %v6312_v57 = vld [vmem:[#allocation2 + $0x40] sm:$0xff]  ;;  %v7054_v29 = vld [vmem:[#allocation2 + $0x38] sm:$0xff]  ;;  %v12483_v21 = vld [vmem:[%s21441_s0 + $0x16c] sm:$0xf] }
 0x2bd   :  { %v12525_v55 = vcombine.low %v8474_v43, %v8484_v18  ;;  %v8502_v2 = vor.u32 %v8501_v20, %v8497_v17  ;;  %v9689_v27 = vrot.slane %v12636_v32, 5  ;;  %v6864_v24 = vadd.f32 %v18711_v61, %v6314_v50  ;;  %v18949_v41 = vpop.f32.mrb[181].mxu0  ;;  %v6315_v60 = vld [vmem:[#allocation2 + $0x58] sm:$0xff]  ;;  %v7052_v0 = vld [vmem:[#allocation2 + $0x28] sm:$0xff]  ;;  %v18954_v32 = vpop.f32.mrb[186].mxu1 }
 0x2be   :  { %v8493_v26 = vrot.slane %v8492_v6, 4  ;;  %v9687_v28 = vsel %vm14113_vm8, %v12684_v47, %v9686_v11  ;;  %v9688_v53 = vrot.slane %v9686_v11, 4  ;;  %v7667_v48 = vadd.f32 %v18713_v33, %v7053_v37  ;;  %v18956_v61 = vpop.f32.mrb[182].mxu0  ;;  %v6313_v6 = vld [vmem:[#allocation2 + $0x48] sm:$0xff]  ;;  %v12484_v33 = vld [vmem:[%s21441_s0 + $0x170] sm:$0x1] }
 0x2bf   :  { %13698 = vmatprep.mubr.msk.bf16.mxu1 %vm376_vm2, %v12525_v55  ;;  %v8503_v20 = vrot.slane %v8502_v2, 4  ;;  %6928 = vst.msk [vmem:[#allocation2 + $0x50] sm:$0xff] %vm22_vm9, %v6864_v24  ;;  %v6862_v43 = vadd.f32 %v18717_v31, %v6312_v57  ;;  %v7665_v18 = vadd.f32 %v18719_v42, %v7051_v59  ;;  %v6865_v47 = vadd.f32 %v18724_v40, %v6315_v60  ;;  %v18966_v37 = vpop.f32.mrb[187].mxu1  ;;  %v18968_v11 = vpop.f32.mrb[183].mxu0  ;;  %v12637_v40 = vld [vmem:[%s21441_s0 + $0x150] sm:$0xe] }
 0x2c0   :  { %21561 = vst [vmem:[#allocation9_spill] sm:$0xff] %v18968_v11  ;;  %v8498_v50 = vsel %vm14066_vm7, %v8493_v26, %v8497_v17  ;;  %v9690_v55 = vsel %vm14113_vm8, %v9688_v53, %v9689_v27  ;;  %7731 = vst.msk [vmem:[#allocation2 + $0x30] sm:$0xff] %vm22_vm9, %v7667_v48  ;;  %v7668_v31 = vadd.f32 %v18726_v4, %v7054_v29  ;;  %v12638_v59 = vld [vmem:[%s21441_s0 + $0x154] sm:$0xf]  ;;  %v12639_v17 = vld [vmem:[%s21441_s0 + $0x158] sm:$0x1] }
 0x2c1   :  { %v6863_v42 = vadd.f32 %v18730_v36, %v6313_v6  ;;  %v8508_v2 = vsel %vm14066_vm7, %v8503_v20, %v8507_v19  ;;  %v12717_v27 = vcombine.low %v9687_v28, %v9690_v55  ;;  %6926 = vst.msk [vmem:[#allocation2 + $0x40] sm:$0xff] %vm22_vm9, %v6862_v43  ;;  %7729 = vst.msk [vmem:[#allocation2 + $0x20] sm:$0xff] %vm22_vm9, %v7665_v18  ;;  %v8510_v36 = vshrl.u32 %v18941_v23, 16  ;;  %v12485_v24 = vld [vmem:[%s21441_s0 + $0x174] sm:$0xf]  ;;  %v19005_v53 = vpop.f32.mrb[188].mxu1 }
 0x2c2   :  { %6929 = vst.msk [vmem:[#allocation2 + $0x58] sm:$0xff] %vm22_vm9, %v6865_v47  ;;  %v7666_v4 = vadd.f32 %v18732_v1, %v7052_v0  ;;  %v12486_v57 = vld [vmem:[%s21441_s0 + $0x178] sm:$0xf]  ;;  %v12526_v19 = vcombine.low %v8498_v50, %v8508_v2  ;;  %7732 = vst.msk [vmem:[#allocation2 + $0x38] sm:$0xff] %vm22_vm9, %v7668_v31  ;;  %v8513_v29 = vshll.u32 %v18941_v23, 16  ;;  %v8519_v26 = vshll.u32 %v12483_v21, 16 }
 0x2c3   :  { %6927 = vst.msk [vmem:[#allocation2 + $0x48] sm:$0xff] %vm22_vm9, %v6863_v42  ;;  %v8523_v28 = vshrl.u32 %v12483_v21, 16  ;;  %v12487_v1 = vld [vmem:[%s21441_s0 + $0x17c] sm:$0x1]  ;;  %v19007_v48 = vpop.f32.mrb[184].mxu0  ;;  %13761 = vmatmul.mubr.msk.bf16.gmra.mrb[12].mxu0 %vm376_vm2, %v12717_v27  ;;  %v8512_v60 = vrot.slane %v8510_v36, 4 }
 0x2c4   :  { %21562 = vst [vmem:[#allocation10_spill] sm:$0xff] %v19007_v48  ;;  %7730 = vst.msk [vmem:[#allocation2 + $0x28] sm:$0xff] %vm22_vm9, %v7666_v4  ;;  %v8529_v0 = vshll.u32 %v12484_v33, 16  ;;  %v12685_v20 = vrot.slane %v12637_v40, 9  ;;  %v9693_v43 = vrot.slane %v12638_v59, 5  ;;  %v19011_v18 = vpop.f32.mrb[189].mxu1  ;;  %13699 = vmatmul.mubr.msk.bf16.gmra.mrb[16].mxu1 %vm376_vm2, %v12526_v19 }
 0x2c5   :  { %v19013_v23 = vpop.f32.mrb[185].mxu0  ;;  %v8515_v21 = vrot.slane %v8513_v29, 5  ;;  %v8521_v47 = vrot.slane %v8519_v26, 5  ;;  %v8525_v6 = vrot.slane %v8523_v28, 4  ;;  %v9696_v50 = vrot.slane %v12639_v17, 5  ;;  %v19016_v55 = vpop.f32.mrb[190].mxu1 }
 0x2c6   :  { %21563 = vst [vmem:[#allocation13_spill] sm:$0xff] %v19013_v23  ;;  %v19018_v31 = vpop.f32.mrb[186].mxu0  ;;  %v8531_v42 = vrot.slane %v8529_v0, 5  ;;  %v9694_v33 = vsel %vm14113_vm8, %v12685_v20, %v9693_v43  ;;  %v9695_v40 = vrot.slane %v9693_v43, 4  ;;  %v8534_v59 = vshrl.u32 %v12485_v24, 16  ;;  %v19022_v2 = vpop.f32.mrb[191].mxu1 }
 0x2c7   :  { %21564 = vst [vmem:[#allocation14_spill] sm:$0xff] %v19018_v31  ;;  %v19024_v27 = vpop.f32.mrb[187].mxu0  ;;  %v8516_v4 = vor.u32 %v8515_v21, %v8512_v60  ;;  %v8526_v36 = vor.u32 %v8525_v6, %v8521_v47  ;;  %v8537_v19 = vshll.u32 %v12485_v24, 16  ;;  %v8543_v29 = vshll.u32 %v12486_v57, 16  ;;  %v12640_v17 = vld [vmem:[%s21441_s0 + $0x15c] sm:$0xe] }
 0x2c8   :  { %21565 = vst [vmem:[#allocation6_spill] sm:$0xff] %v19024_v27  ;;  %v9697_v26 = vsel %vm14113_vm8, %v9695_v40, %v9696_v50  ;;  %v8536_v28 = vrot.slane %v8534_v59, 4  ;;  %v8547_v0 = vshrl.u32 %v12486_v57, 16  ;;  %v8553_v20 = vshll.u32 %v12487_v1, 16  ;;  %v12641_v43 = vld [vmem:[%s21441_s0 + $0x160] sm:$0xf] }
 0x2c9   :  { %v8517_v31 = vrot.slane %v8516_v4, 4  ;;  %v8527_v27 = vrot.slane %v8526_v36, 4  ;;  %v12718_v60 = vcombine.low %v9694_v33, %v9697_v26  ;;  %v8539_v21 = vrot.slane %v8537_v19, 5  ;;  %v12642_v24 = vld [vmem:[%s21441_s0 + $0x164] sm:$0x1]  ;;  %v6318_v50 = vld [vmem:[#allocation2 + $0x70] sm:$0xff] }
 0x2ca   :  { %v8545_v6 = vrot.slane %v8543_v29, 5  ;;  %v8549_v23 = vrot.slane %v8547_v0, 4  ;;  %v8555_v48 = vrot.slane %v8553_v20, 5  ;;  %v12686_v11 = vrot.slane %v12640_v17, 9  ;;  %v7057_v40 = vld [vmem:[#allocation2 + $0x50] sm:$0xff]  ;;  %v6316_v4 = vld [vmem:[#allocation2 + $0x60] sm:$0xff] }
 0x2cb   :  { %v8522_v57 = vsel %vm14066_vm7, %v8517_v31, %v8521_v47  ;;  %v8532_v1 = vsel %vm14066_vm7, %v8527_v27, %v8531_v42  ;;  %13764 = vmatprep.mubr.msk.bf16.mxu0 %vm376_vm2, %v12718_v60  ;;  %v8540_v33 = vor.u32 %v8539_v21, %v8536_v28  ;;  %v9700_v59 = vrot.slane %v12641_v43, 5  ;;  %v7055_v36 = vld [vmem:[#allocation2 + $0x40] sm:$0xff]  ;;  %v19045_v29 = vpop.f32.mrb[192].mxu1  ;;  %v19047_v17 = vpop.f32.mrb[188].mxu0  ;;  %v7058_v42 = vld [vmem:[#allocation2 + $0x58] sm:$0xff] }
 0x2cc   :  { %v12488_v19 = vld [vmem:[%s21441_s0 + $0x180] sm:$0xf]  ;;  %21566 = vst [vmem:[#allocation11_spill] sm:$0xff] %v19047_v17  ;;  %v12527_v26 = vcombine.low %v8522_v57, %v8532_v1  ;;  %v8550_v0 = vor.u32 %v8549_v23, %v8545_v6  ;;  %v9703_v47 = vrot.slane %v12642_v24, 5  ;;  %v6868_v31 = vadd.f32 %v18752_v62, %v6318_v50  ;;  %v12489_v27 = vld [vmem:[%s21441_s0 + $0x184] sm:$0xf] }
 0x2cd   :  { %v19053_v28 = vpop.f32.mrb[193].mxu1  ;;  %v19055_v20 = vpop.f32.mrb[189].mxu0  ;;  %v8541_v43 = vrot.slane %v8540_v33, 4  ;;  %v9701_v60 = vsel %vm14113_vm8, %v12686_v11, %v9700_v59  ;;  %v9702_v21 = vrot.slane %v9700_v59, 4  ;;  %v7671_v57 = vadd.f32 %v18754_v39, %v7057_v40  ;;  %v6319_v23 = vld [vmem:[#allocation2 + $0x78] sm:$0xff]  ;;  %v7056_v24 = vld [vmem:[#allocation2 + $0x48] sm:$0xff] }
 0x2ce   :  { %21567 = vst [vmem:[#allocation12_spill] sm:$0xff] %v19055_v20  ;;  %v19060_v1 = vpop.f32.mrb[194].mxu1  ;;  %v19062_v62 = vpop.f32.mrb[190].mxu0  ;;  %13702 = vmatprep.mubr.msk.bf16.mxu1 %vm376_vm2, %v12527_v26  ;;  %v8551_v50 = vrot.slane %v8550_v0, 4  ;;  %6932 = vst.msk [vmem:[#allocation2 + $0x70] sm:$0xff] %vm22_vm9, %v6868_v31  ;;  %v6866_v20 = vadd.f32 %v18764_v5, %v6316_v4  ;;  %v7669_v33 = vadd.f32 %v18766_v12, %v7055_v36  ;;  %v6317_v59 = vld [vmem:[#allocation2 + $0x68] sm:$0xff] }
 0x2cf   :  { %21568 = vst [vmem:[#allocation8_spill] sm:$0xff] %v19062_v62  ;;  %v6869_v11 = vadd.f32 %v18781_v30, %v6319_v23  ;;  %v12490_v39 = vld [vmem:[%s21441_s0 + $0x188] sm:$0x1]  ;;  %v19072_v40 = vpop.f32.mrb[195].mxu1  ;;  %v19074_v17 = vpop.f32.mrb[191].mxu0  ;;  %v8546_v26 = vsel %vm14066_vm7, %v8541_v43, %v8545_v6  ;;  %v9704_v0 = vsel %vm14113_vm8, %v9702_v21, %v9703_v47  ;;  %7735 = vst.msk [vmem:[#allocation2 + $0x50] sm:$0xff] %vm22_vm9, %v7671_v57 }
 0x2d0   :  { %21569 = vst [vmem:[#allocation15_spill] sm:$0xff] %v19074_v17  ;;  %v7672_v5 = vadd.f32 %v18783_v38, %v7058_v42  ;;  %v6867_v12 = vadd.f32 %v18794_v56, %v6317_v59  ;;  %v12643_v30 = vld [vmem:[%s21441_s0 + $0x168] sm:$0xe]  ;;  %v12644_v4 = vld [vmem:[%s21441_s0 + $0x16c] sm:$0xf]  ;;  %v8556_v36 = vsel %vm14066_vm7, %v8551_v50, %v8555_v48  ;;  %v12719_v47 = vcombine.low %v9701_v60, %v9704_v0 }
 0x2d1   :  { %v12645_v6 = vld [vmem:[%s21441_s0 + $0x170] sm:$0x1]  ;;  %6930 = vst.msk [vmem:[#allocation2 + $0x60] sm:$0xff] %vm22_vm9, %v6866_v20  ;;  %7733 = vst.msk [vmem:[#allocation2 + $0x40] sm:$0xff] %vm22_vm9, %v7669_v33  ;;  %v7670_v38 = vadd.f32 %v18796_v8, %v7056_v24  ;;  %v8558_v56 = vshrl.u32 %v12488_v19, 16  ;;  %v12528_v43 = vcombine.low %v8546_v26, %v8556_v36  ;;  %v8561_v48 = vshll.u32 %v12488_v19, 16 }
 0x2d2   :  { %6933 = vst.msk [vmem:[#allocation2 + $0x78] sm:$0xff] %vm22_vm9, %v6869_v11  ;;  %v12491_v31 = vld [vmem:[%s21441_s0 + $0x18c] sm:$0xf]  ;;  %v12492_v42 = vld [vmem:[%s21441_s0 + $0x190] sm:$0xf]  ;;  %7736 = vst.msk [vmem:[#allocation2 + $0x58] sm:$0xff] %vm22_vm9, %v7672_v5  ;;  %13765 = vmatmul.mubr.msk.bf16.gmra.mrb[16].mxu0 %vm376_vm2, %v12719_v47 }
 0x2d3   :  { %6931 = vst.msk [vmem:[#allocation2 + $0x68] sm:$0xff] %vm22_vm9, %v6867_v12  ;;  %v8567_v20 = vshll.u32 %v12489_v27, 16  ;;  %v8571_v60 = vshrl.u32 %v12489_v27, 16  ;;  %v12493_v8 = vld [vmem:[%s21441_s0 + $0x194] sm:$0x1]  ;;  %7734 = vst.msk [vmem:[#allocation2 + $0x48] sm:$0xff] %vm22_vm9, %v7670_v38 }
 0x2d4   :  { %v8560_v21 = vrot.slane %v8558_v56, 4  ;;  %v8577_v57 = vshll.u32 %v12490_v39, 16  ;;  %v12687_v23 = vrot.slane %v12643_v30, 9  ;;  %v9707_v24 = vrot.slane %v12644_v4, 5 }
 0x2d5   :  { %10 = vsyncpa [#allocation4], 0  ;;  %13703 = vmatmul.mubr.msk.bf16.gmra.mrb[20].mxu1 %vm376_vm2, %v12528_v43  ;;  %v8563_v50 = vrot.slane %v8561_v48, 5  ;;  %v8569_v33 = vrot.slane %v8567_v20, 5  ;;  %v8573_v19 = vrot.slane %v8571_v60, 4  ;;  %v9710_v11 = vrot.slane %v12645_v6, 5 }
 0x2d6   :  { %v12646_v27 = vld [vmem:[%s21441_s0 + $0x174] sm:$0xe]  ;;  %v19115_v59 = vpop.f32.mrb[196].mxu1  ;;  %v19117_v26 = vpop.f32.mrb[192].mxu0  ;;  %v8579_v0 = vrot.slane %v8577_v57, 5  ;;  %v9708_v39 = vsel %vm14113_vm8, %v12687_v23, %v9707_v24  ;;  %v9709_v5 = vrot.slane %v9707_v24, 4 }
 0x2d7   :  { %21570 = vst [vmem:[#allocation7_spill] sm:$0xff] %v19117_v26  ;;  %v8582_v12 = vshrl.u32 %v12491_v31, 16  ;;  %v19121_v30 = vpop.f32.mrb[197].mxu1  ;;  %v19123_v4 = vpop.f32.mrb[193].mxu0  ;;  %v8564_v36 = vor.u32 %v8563_v50, %v8560_v21  ;;  %v8574_v6 = vor.u32 %v8573_v19, %v8569_v33  ;;  %v8585_v47 = vshll.u32 %v12491_v31, 16 }
 0x2d8   :  { %21571 = vst [vmem:[#allocation16_spill] sm:$0xff] %v19123_v4  ;;  %v8591_v38 = vshll.u32 %v12492_v42, 16  ;;  %v12647_v56 = vld [vmem:[%s21441_s0 + $0x178] sm:$0xf]  ;;  %v19128_v43 = vpop.f32.mrb[198].mxu1  ;;  %v19130_v48 = vpop.f32.mrb[194].mxu0  ;;  %v9711_v20 = vsel %vm14113_vm8, %v9709_v5, %v9710_v11 }
 0x2d9   :  { %21572 = vst [vmem:[#allocation17_spill] sm:$0xff] %v19128_v43  ;;  %21573 = vst [vmem:[#allocation18_spill] sm:$0xff] %v19130_v48  ;;  %v8584_v60 = vrot.slane %v8582_v12, 4  ;;  %v8595_v57 = vshrl.u32 %v12492_v42, 16  ;;  %v8601_v23 = vshll.u32 %v12493_v8, 16  ;;  %v19134_v24 = vpop.f32.mrb[199].mxu1  ;;  %v12720_v19 = vcombine.low %v9708_v39, %v9711_v20 }
 0x2da   :  { %v19136_v21 = vpop.f32.mrb[195].mxu0  ;;  %v8565_v31 = vrot.slane %v8564_v36, 4  ;;  %v8575_v50 = vrot.slane %v8574_v6, 4  ;;  %v8587_v4 = vrot.slane %v8585_v47, 5  ;;  %v12648_v26 = vld [vmem:[%s21441_s0 + $0x17c] sm:$0x1] }
 0x2db   :  { %v8593_v17 = vrot.slane %v8591_v38, 5  ;;  %v8597_v48 = vrot.slane %v8595_v57, 4  ;;  %v8603_v62 = vrot.slane %v8601_v23, 5  ;;  %v12688_v43 = vrot.slane %v12646_v27, 9  ;;  %v7061_v11 = vld [vmem:[#allocation2 + $0x70] sm:$0xff]  ;;  %13768 = vmatprep.mubr.msk.bf16.mxu0 %vm376_vm2, %v12720_v19  ;;  %v6320_v36 = vld [vmem:[#allocation2 + $0x80] sm:$0xff] }
 0x2dc   :  { %v8570_v42 = vsel %vm14066_vm7, %v8565_v31, %v8569_v33  ;;  %v8580_v8 = vsel %vm14066_vm7, %v8575_v50, %v8579_v0  ;;  %v8588_v5 = vor.u32 %v8587_v4, %v8584_v60  ;;  %v9714_v39 = vrot.slane %v12647_v56, 5  ;;  %v6322_v12 = vld [vmem:[#allocation2 + $0x90] sm:$0xff]  ;;  %v7059_v6 = vld [vmem:[#allocation2 + $0x60] sm:$0xff]  ;;  %v7062_v27 = vld [vmem:[#allocation2 + $0x78] sm:$0xff]  ;;  %v19156_v31 = vpop.f32.mrb[200].mxu1 }
 0x2dd   :  { %v12529_v47 = vcombine.low %v8570_v42, %v8580_v8  ;;  %v8598_v20 = vor.u32 %v8597_v48, %v8593_v17  ;;  %v9717_v38 = vrot.slane %v12648_v26, 5  ;;  %v6872_v57 = vadd.f32 %v18825_v25, %v6322_v12  ;;  %v12494_v33 = vld [vmem:[%s21441_s0 + $0x198] sm:$0xf]  ;;  %v12495_v0 = vld [vmem:[%s21441_s0 + $0x19c] sm:$0xf]  ;;  %v7060_v26 = vld [vmem:[#allocation2 + $0x68] sm:$0xff] }
 0x2de   :  { %v8589_v23 = vrot.slane %v8588_v5, 4  ;;  %v9715_v4 = vsel %vm14113_vm8, %v12688_v43, %v9714_v39  ;;  %v9716_v56 = vrot.slane %v9714_v39, 4  ;;  %v7675_v60 = vadd.f32 %v18827_v22, %v7061_v11  ;;  %v6323_v48 = vld [vmem:[#allocation2 + $0x98] sm:$0xff]  ;;  %v19158_v25 = vpop.f32.mrb[196].mxu0  ;;  %v6321_v8 = vld [vmem:[#allocation2 + $0x88] sm:$0xff]  ;;  %v19168_v11 = vpop.f32.mrb[201].mxu1 }
 0x2df   :  { %13706 = vmatprep.mubr.msk.bf16.mxu1 %vm376_vm2, %v12529_v47  ;;  %v8599_v50 = vrot.slane %v8598_v20, 4  ;;  %6936 = vst.msk [vmem:[#allocation2 + $0x90] sm:$0xff] %vm22_vm9, %v6872_v57  ;;  %v6870_v19 = vadd.f32 %v18829_v44, %v6320_v36  ;;  %v7673_v42 = vadd.f32 %v18836_v45, %v7059_v6  ;;  %v6873_v43 = vadd.f32 %v18838_v34, %v6323_v48  ;;  %v12496_v22 = vld [vmem:[%s21441_s0 + $0x1a0] sm:$0x1]  ;;  %v19170_v5 = vpop.f32.mrb[197].mxu0  ;;  %v19185_v6 = vpop.f32.mrb[202].mxu1 }
 0x2e0   :  { %21574 = vst [vmem:[#allocation19_spill] sm:$0xff] %v19170_v5  ;;  %v8594_v39 = vsel %vm14066_vm7, %v8589_v23, %v8593_v17  ;;  %v9718_v12 = vsel %vm14113_vm8, %v9716_v56, %v9717_v38  ;;  %7739 = vst.msk [vmem:[#allocation2 + $0x70] sm:$0xff] %vm22_vm9, %v7675_v60  ;;  %v7676_v44 = vadd.f32 %v18841_v63, %v7062_v27  ;;  %v12649_v34 = vld [vmem:[%s21441_s0 + $0x180] sm:$0xe]  ;;  %v12650_v36 = vld [vmem:[%s21441_s0 + $0x184] sm:$0xf] }
 0x2e1   :  { %v6871_v45 = vadd.f32 %v18843_v58, %v6321_v8  ;;  %v19187_v17 = vpop.f32.mrb[198].mxu0  ;;  %v8604_v47 = vsel %vm14066_vm7, %v8599_v50, %v8603_v62  ;;  %v12721_v20 = vcombine.low %v9715_v4, %v9718_v12  ;;  %6934 = vst.msk [vmem:[#allocation2 + $0x80] sm:$0xff] %vm22_vm9, %v6870_v19  ;;  %7737 = vst.msk [vmem:[#allocation2 + $0x60] sm:$0xff] %vm22_vm9, %v7673_v42  ;;  %v8606_v58 = vshrl.u32 %v12494_v33, 16  ;;  %v12651_v38 = vld [vmem:[%s21441_s0 + $0x188] sm:$0x1] }
 0x2e2   :  { %21575 = vst [vmem:[#allocation20_spill] sm:$0xff] %v19187_v17  ;;  %6937 = vst.msk [vmem:[#allocation2 + $0x98] sm:$0xff] %vm22_vm9, %v6873_v43  ;;  %v7674_v63 = vadd.f32 %v18851_v46, %v7060_v26  ;;  %v19198_v57 = vpop.f32.mrb[203].mxu1  ;;  %v19200_v27 = vpop.f32.mrb[199].mxu0  ;;  %v12530_v23 = vcombine.low %v8594_v39, %v8604_v47  ;;  %v8609_v62 = vshll.u32 %v12494_v33, 16  ;;  %v8615_v4 = vshll.u32 %v12495_v0, 16 }
 0x2e3   :  { %21576 = vst [vmem:[#allocation21_spill] sm:$0xff] %v19200_v27  ;;  %7740 = vst.msk [vmem:[#allocation2 + $0x78] sm:$0xff] %vm22_vm9, %v7676_v44  ;;  %v8619_v56 = vshrl.u32 %v12495_v0, 16  ;;  %v12497_v46 = vld [vmem:[%s21441_s0 + $0x1a4] sm:$0xf]  ;;  %13769 = vmatmul.mubr.msk.bf16.gmra.mrb[20].mxu0 %vm376_vm2, %v12721_v20  ;;  %v8608_v60 = vrot.slane %v8606_v58, 4 }
 0x2e4   :  { %6935 = vst.msk [vmem:[#allocation2 + $0x88] sm:$0xff] %vm22_vm9, %v6871_v45  ;;  %7738 = vst.msk [vmem:[#allocation2 + $0x68] sm:$0xff] %vm22_vm9, %v7674_v63  ;;  %v8625_v48 = vshll.u32 %v12496_v22, 16  ;;  %v12689_v26 = vrot.slane %v12649_v34, 9  ;;  %v9721_v50 = vrot.slane %v12650_v36, 5  ;;  %13707 = vmatmul.mubr.msk.bf16.gmra.mrb[24].mxu1 %vm376_vm2, %v12530_v23  ;;  %v8611_v33 = vrot.slane %v8609_v62, 5 }
 0x2e5   :  { %v12498_v19 = vld [vmem:[%s21441_s0 + $0x1a8] sm:$0xf]  ;;  %v8617_v0 = vrot.slane %v8615_v4, 5  ;;  %v8621_v42 = vrot.slane %v8619_v56, 4  ;;  %v9724_v43 = vrot.slane %v12651_v38, 5  ;;  %v8630_v44 = vshrl.u32 %v12497_v46, 16 }
 0x2e6   :  { %v12499_v8 = vld [vmem:[%s21441_s0 + $0x1ac] sm:$0x1]  ;;  %v8627_v39 = vrot.slane %v8625_v48, 5  ;;  %v9722_v22 = vsel %vm14113_vm8, %v12689_v26, %v9721_v50  ;;  %v9723_v12 = vrot.slane %v9721_v50, 4  ;;  %v12652_v45 = vld [vmem:[%s21441_s0 + $0x18c] sm:$0xe]  ;;  %v8612_v34 = vor.u32 %v8611_v33, %v8608_v60 }
 0x2e7   :  { %v8622_v36 = vor.u32 %v8621_v42, %v8617_v0  ;;  %v8633_v47 = vshll.u32 %v12497_v46, 16  ;;  %v8639_v20 = vshll.u32 %v12498_v19, 16  ;;  %v12653_v63 = vld [vmem:[%s21441_s0 + $0x190] sm:$0xf]  ;;  %v19224_v58 = vpop.f32.mrb[204].mxu1  ;;  %v19226_v38 = vpop.f32.mrb[200].mxu0 }
 0x2e8   :  { %21577 = vst [vmem:[#allocation22_spill] sm:$0xff] %v19226_v38  ;;  %v9725_v23 = vsel %vm14113_vm8, %v9723_v12, %v9724_v43  ;;  %v8632_v62 = vrot.slane %v8630_v44, 4  ;;  %v8643_v4 = vshrl.u32 %v12498_v19, 16  ;;  %v8649_v56 = vshll.u32 %v12499_v8, 16  ;;  %v19230_v48 = vpop.f32.mrb[205].mxu1  ;;  %v19232_v60 = vpop.f32.mrb[201].mxu0 }
 0x2e9   :  { %21578 = vst [vmem:[#allocation23_spill] sm:$0xff] %v19232_v60  ;;  %v8613_v46 = vrot.slane %v8612_v34, 4  ;;  %v8623_v26 = vrot.slane %v8622_v36, 4  ;;  %v12722_v50 = vcombine.low %v9722_v22, %v9725_v23  ;;  %v8635_v33 = vrot.slane %v8633_v47, 5  ;;  %v12654_v42 = vld [vmem:[%s21441_s0 + $0x194] sm:$0x1] }
 0x2ea   :  { %v19237_v27 = vpop.f32.mrb[206].mxu1  ;;  %v8641_v38 = vrot.slane %v8639_v20, 5  ;;  %v8645_v17 = vrot.slane %v8643_v4, 4  ;;  %v8651_v43 = vrot.slane %v8649_v56, 5  ;;  %v12690_v12 = vrot.slane %v12652_v45, 9  ;;  %v7065_v19 = vld [vmem:[#allocation2 + $0x90] sm:$0xff] }
 0x2eb   :  { %v19239_v8 = vpop.f32.mrb[202].mxu0  ;;  %v8618_v44 = vsel %vm14066_vm7, %v8613_v46, %v8617_v0  ;;  %v8628_v22 = vsel %vm14066_vm7, %v8623_v26, %v8627_v39  ;;  %13772 = vmatprep.mubr.msk.bf16.mxu0 %vm376_vm2, %v12722_v50  ;;  %v8636_v34 = vor.u32 %v8635_v33, %v8632_v62  ;;  %v9728_v36 = vrot.slane %v12653_v63, 5  ;;  %v6326_v47 = vld [vmem:[#allocation2 + $0xb0] sm:$0xff]  ;;  %v7063_v23 = vld [vmem:[#allocation2 + $0x80] sm:$0xff]  ;;  %v19246_v60 = vpop.f32.mrb[207].mxu1  ;;  %v7066_v0 = vld [vmem:[#allocation2 + $0x98] sm:$0xff] }
 0x2ec   :  { %21579 = vst [vmem:[#allocation24_spill] sm:$0xff] %v19239_v8  ;;  %v19248_v20 = vpop.f32.mrb[203].mxu0  ;;  %v12531_v45 = vcombine.low %v8618_v44, %v8628_v22  ;;  %v8646_v4 = vor.u32 %v8645_v17, %v8641_v38  ;;  %v9731_v56 = vrot.slane %v12654_v42, 5  ;;  %v6876_v8 = vadd.f32 %v18889_v49, %v6326_v47  ;;  %v6324_v5 = vld [vmem:[#allocation2 + $0xa0] sm:$0xff]  ;;  %v12655_v39 = vld [vmem:[%s21441_s0 + $0x198] sm:$0xe] }
 0x2ed   :  { %v8637_v46 = vrot.slane %v8636_v34, 4  ;;  %v9729_v63 = vsel %vm14113_vm8, %v12690_v12, %v9728_v36  ;;  %v9730_v62 = vrot.slane %v9728_v36, 4  ;;  %v7679_v26 = vadd.f32 %v18896_v15, %v7065_v19  ;;  %v6327_v50 = vld [vmem:[#allocation2 + $0xb8] sm:$0xff]  ;;  %v7064_v33 = vld [vmem:[#allocation2 + $0x88] sm:$0xff]  ;;  %v12657_v15 = vld [vmem:[%s21441_s0 + $0x1a0] sm:$0x1] }
 0x2ee   :  { %v12656_v17 = vld [vmem:[%s21441_s0 + $0x19c] sm:$0xf]  ;;  %13710 = vmatprep.mubr.msk.bf16.mxu1 %vm376_vm2, %v12531_v45  ;;  %v8647_v49 = vrot.slane %v8646_v4, 4  ;;  %6940 = vst.msk [vmem:[#allocation2 + $0xb0] sm:$0xff] %vm22_vm9, %v6876_v8  ;;  %v6874_v42 = vadd.f32 %v18904_v35, %v6324_v5  ;;  %v7677_v44 = vadd.f32 %v18906_v16, %v7063_v23  ;;  %v6877_v12 = vadd.f32 %v18910_v13, %v6327_v50  ;;  %v6325_v22 = vld [vmem:[#allocation2 + $0xa8] sm:$0xff]  ;;  %v6330_v36 = vld [vmem:[#allocation2 + $0xd0] sm:$0xff] }
 0x2ef   :  { %v12658_v19 = vld [vmem:[%s21441_s0 + $0x1a4] sm:$0xe]  ;;  %v8642_v34 = vsel %vm14066_vm7, %v8637_v46, %v8641_v38  ;;  %v9732_v8 = vsel %vm14113_vm8, %v9730_v62, %v9731_v56  ;;  %7743 = vst.msk [vmem:[#allocation2 + $0x90] sm:$0xff] %vm22_vm9, %v7679_v26  ;;  %v7680_v35 = vadd.f32 %v18912_v14, %v7066_v0  ;;  %v6875_v16 = vadd.f32 %v18917_v9, %v6325_v22  ;;  %v12659_v13 = vld [vmem:[%s21441_s0 + $0x1a8] sm:$0xf]  ;;  %v19286_v38 = vpop.f32.mrb[208].mxu1 }
 0x2f0   :  { %v19284_v5 = vld [vmem:[%s21441_s0 + $0x1ac] sm:$0x1]  ;;  %v19288_v47 = vpop.f32.mrb[204].mxu0  ;;  %v8652_v23 = vsel %vm14066_vm7, %v8647_v49, %v8651_v43  ;;  %v12723_v14 = vcombine.low %v9729_v63, %v9732_v8  ;;  %6938 = vst.msk [vmem:[#allocation2 + $0xa0] sm:$0xff] %vm22_vm9, %v6874_v42  ;;  %7741 = vst.msk [vmem:[#allocation2 + $0x80] sm:$0xff] %vm22_vm9, %v7677_v44  ;;  %v7678_v9 = vadd.f32 %v18919_v3, %v7064_v33  ;;  %v12691_v45 = vrot.slane %v12655_v39, 9 }
 0x2f1   :  { %6941 = vst.msk [vmem:[#allocation2 + $0xb8] sm:$0xff] %vm22_vm9, %v6877_v12  ;;  %v6328_v4 = vld [vmem:[#allocation2 + $0xc0] sm:$0xff]  ;;  %v6331_v56 = vld [vmem:[#allocation2 + $0xd8] sm:$0xff]  ;;  %v6329_v0 = vld [vmem:[#allocation2 + $0xc8] sm:$0xff]  ;;  %v19296_v46 = vpop.f32.mrb[209].mxu1  ;;  %v19298_v62 = vpop.f32.mrb[205].mxu0  ;;  %v12532_v26 = vcombine.low %v8642_v34, %v8652_v23  ;;  %v6880_v42 = vadd.f32 %v18929_v54, %v6330_v36 }
 0x2f2   :  { %7744 = vst.msk [vmem:[#allocation2 + $0x98] sm:$0xff] %vm22_vm9, %v7680_v35  ;;  %6939 = vst.msk [vmem:[#allocation2 + $0xa8] sm:$0xff] %vm22_vm9, %v6875_v16  ;;  %v9735_v52 = vrot.slane %v12656_v17, 5  ;;  %v9738_v43 = vrot.slane %v12657_v15, 5  ;;  %v12692_v63 = vrot.slane %v12658_v19, 9  ;;  %v6334_v50 = vld [vmem:[#allocation2 + $0xf0] sm:$0xff]  ;;  %13773 = vmatmul.mubr.msk.bf16.gmra.mrb[24].mxu0 %vm376_vm2, %v12723_v14  ;;  %v6878_v44 = vadd.f32 %v18943_v7, %v6328_v4 }
 0x2f3   :  { %v19302_v49 = vpop.f32.mrb[210].mxu1  ;;  %v19304_v3 = vpop.f32.mrb[206].mxu0  ;;  %7742 = vst.msk [vmem:[#allocation2 + $0x88] sm:$0xff] %vm22_vm9, %v7678_v9  ;;  %v9742_v39 = vrot.slane %v12659_v13, 5  ;;  %v9745_v33 = vrot.slane %v19284_v5, 5  ;;  %v6332_v12 = vld [vmem:[#allocation2 + $0xe0] sm:$0xff]  ;;  %13711 = vmatmul.mubr.msk.bf16.gmra.mrb[28].mxu1 %vm376_vm2, %v12532_v26  ;;  %v6881_v8 = vadd.f32 %v18954_v32, %v6331_v56  ;;  %v6879_v35 = vadd.f32 %v18966_v37, %v6329_v0 }
 0x2f4   :  { %v6335_v17 = vld [vmem:[#allocation2 + $0xf8] sm:$0xff]  ;;  %v19311_v22 = vpop.f32.mrb[211].mxu1  ;;  %v19313_v15 = vpop.f32.mrb[207].mxu0  ;;  %v9736_v19 = vsel %vm14113_vm8, %v12691_v45, %v9735_v52  ;;  %v9737_v34 = vrot.slane %v9735_v52, 4  ;;  %v6333_v16 = vld [vmem:[#allocation2 + $0xe8] sm:$0xff]  ;;  %v6338_v54 = vld [vmem:[#allocation2 + $0x110] sm:$0xff]  ;;  %v6884_v36 = vadd.f32 %v19005_v53, %v6334_v50  ;;  %v6882_v23 = vadd.f32 %v19011_v18, %v6332_v12 }
 0x2f5   :  { %v6336_v13 = vld [vmem:[#allocation2 + $0x100] sm:$0xff]  ;;  %v19322_v7 = vsel %vm14113_vm8, %v12692_v63, %v9742_v39  ;;  %v9744_v5 = vrot.slane %v9742_v39, 4  ;;  %6944 = vst.msk [vmem:[#allocation2 + $0xd0] sm:$0xff] %vm22_vm9, %v6880_v42  ;;  %6942 = vst.msk [vmem:[#allocation2 + $0xc0] sm:$0xff] %vm22_vm9, %v6878_v44  ;;  %v6339_v14 = vld [vmem:[#allocation2 + $0x118] sm:$0xff]  ;;  %v6885_v4 = vadd.f32 %v19016_v55, %v6335_v17  ;;  %v6883_v56 = vadd.f32 %v19022_v2, %v6333_v16 }
 0x2f6   :  { %v6337_v32 = vld [vmem:[#allocation2 + $0x108] sm:$0xff]  ;;  %v6342_v9 = vld [vmem:[#allocation2 + $0x130] sm:$0xff]  ;;  %v9739_v37 = vsel %vm14113_vm8, %v9737_v34, %v9738_v43  ;;  %6945 = vst.msk [vmem:[#allocation2 + $0xd8] sm:$0xff] %vm22_vm9, %v6881_v8  ;;  %6943 = vst.msk [vmem:[#allocation2 + $0xc8] sm:$0xff] %vm22_vm9, %v6879_v35  ;;  %v6888_v0 = vadd.f32 %v19045_v29, %v6338_v54  ;;  %v6886_v43 = vadd.f32 %v19053_v28, %v6336_v13  ;;  %v19350_v34 = vpop.f32.mrb[208].mxu0  ;;  %vm11485_vm10 = vcmask 519168  }
 0x2f7   :  { %v7069_v45 = vld [vmem:[#allocation2 + $0xb0] sm:$0xff]  ;;  %v6340_v53 = vld [vmem:[#allocation2 + $0x120] sm:$0xff]  ;;  %v6343_v26 = vld [vmem:[#allocation2 + $0x138] sm:$0xff]  ;;  %v12724_v18 = vcombine.low %v9736_v19, %v9739_v37  ;;  %v9746_v52 = vsel %vm14113_vm8, %v9744_v5, %v9745_v33  ;;  %6948 = vst.msk [vmem:[#allocation2 + $0xf0] sm:$0xff] %vm22_vm9, %v6884_v36  ;;  %v6889_v51 = vadd.f32 %v19060_v1, %v6339_v14  ;;  %v6892_v33 = vadd.f32 %v19115_v59, %v6342_v9  ;;  %v19348_v19 = vpop.f32.mrb[212].mxu1  ;;  %v19359_v5 = vpop.f32.mrb[209].mxu0 }
 0x2f8   :  { %v7683_v63 = vadd.f32 %v18931_v10, %v7069_v45  ;;  %6946 = vst.msk [vmem:[#allocation2 + $0xe0] sm:$0xff] %vm22_vm9, %v6882_v23  ;;  %v6341_v50 = vld [vmem:[#allocation2 + $0x128] sm:$0xff]  ;;  %v6346_v55 = vld [vmem:[#allocation2 + $0x150] sm:$0xff]  ;;  %v6344_v39 = vld [vmem:[#allocation2 + $0x140] sm:$0xff]  ;;  %v12725_v2 = vcombine.low %v19322_v7, %v9746_v52  ;;  %v6887_v10 = vadd.f32 %v19072_v40, %v6337_v32  ;;  %v6890_v40 = vadd.f32 %v19121_v30, %v6340_v53  ;;  %v6807_v7 = vpop.f32.mrb[213].mxu1  ;;  %v19368_v45 = vpop.f32.mrb[210].mxu0 }
 0x2f9   :  { %v7067_v29 = vld [vmem:[#allocation2 + $0xa0] sm:$0xff]  ;;  %v7070_v42 = vld [vmem:[#allocation2 + $0xb8] sm:$0xff]  ;;  %6949 = vst.msk [vmem:[#allocation2 + $0xf8] sm:$0xff] %vm22_vm9, %v6885_v4  ;;  %6947 = vst.msk [vmem:[#allocation2 + $0xe8] sm:$0xff] %vm22_vm9, %v6883_v56  ;;  %13776 = vmatprep.mubr.msk.bf16.mxu0 %vm376_vm2, %v12724_v18  ;;  %v6894_v30 = vadd.f32 %v19168_v11, %v6344_v39  ;;  %v13573_v37 = vpop.f32.mrb[214].mxu1  ;;  %v19379_v18 = vpop.f32.mrb[211].mxu0 }
 0x2fa   :  { %6952 = vst.msk [vmem:[#allocation2 + $0x110] sm:$0xff] %vm22_vm9, %v6888_v0  ;;  %v6347_v28 = vld [vmem:[#allocation2 + $0x158] sm:$0xff]  ;;  %v6345_v44 = vld [vmem:[#allocation2 + $0x148] sm:$0xff]  ;;  %v6350_v12 = vld [vmem:[#allocation2 + $0x170] sm:$0xff]  ;;  %v7681_v8 = vadd.f32 %v18949_v41, %v7067_v29  ;;  %v7684_v1 = vadd.f32 %v18956_v61, %v7070_v42  ;;  %v6891_v41 = vadd.f32 %v19134_v24, %v6341_v50  ;;  %v6896_v61 = vadd.f32 %v19156_v31, %v6346_v55 }
 0x2fb   :  { %v6348_v17 = vld [vmem:[#allocation2 + $0x160] sm:$0xff]  ;;  %7747 = vst.msk [vmem:[#allocation2 + $0xb0] sm:$0xff] %vm22_vm9, %v7683_v63  ;;  %v7068_v35 = vld [vmem:[#allocation2 + $0xa8] sm:$0xff]  ;;  %6950 = vst.msk [vmem:[#allocation2 + $0x100] sm:$0xff] %vm22_vm9, %v6886_v43  ;;  %13777 = vmatmul.mubr.msk.bf16.gmra.mrb[28].mxu0 %vm376_vm2, %v12725_v2  ;;  %v6897_v24 = vadd.f32 %v19185_v6, %v6347_v28  ;;  %v6895_v31 = vadd.f32 %v19198_v57, %v6345_v44  ;;  %v6900_v11 = vadd.f32 %v19224_v58, %v6350_v12 }
 0x2fc   :  { %v21580_v59 = vld [vmem:[#allocation17_spill] sm:$0xff]  ;;  %v6349_v13 = vld [vmem:[#allocation2 + $0x168] sm:$0xff]  ;;  %6953 = vst.msk [vmem:[#allocation2 + $0x118] sm:$0xff] %vm22_vm9, %v6889_v51  ;;  %6951 = vst.msk [vmem:[#allocation2 + $0x108] sm:$0xff] %vm22_vm9, %v6887_v10  ;;  %v6898_v4 = vadd.f32 %v19230_v48, %v6348_v17 }
 0x2fd   :  { %v6893_v16 = vadd.f32 %v21580_v59, %v6343_v26  ;;  %v6351_v54 = vld [vmem:[#allocation2 + $0x178] sm:$0xff]  ;;  %6956 = vst.msk [vmem:[#allocation2 + $0x130] sm:$0xff] %vm22_vm9, %v6892_v33  ;;  %v6354_v14 = vld [vmem:[#allocation2 + $0x190] sm:$0xff]  ;;  %v6352_v32 = vld [vmem:[#allocation2 + $0x180] sm:$0xff]  ;;  %v6810_v26 = vpop.f32.mrb[215].mxu1  ;;  %v6899_v57 = vadd.f32 %v19246_v60, %v6349_v13 }
 0x2fe   :  { %v21581_v36 = vld [vmem:[#allocation9_spill] sm:$0xff]  ;;  %7745 = vst.msk [vmem:[#allocation2 + $0xa0] sm:$0xff] %vm22_vm9, %v7681_v8  ;;  %7748 = vst.msk [vmem:[#allocation2 + $0xb8] sm:$0xff] %vm22_vm9, %v7684_v1  ;;  %v6353_v56 = vld [vmem:[#allocation2 + $0x188] sm:$0xff]  ;;  %v6901_v6 = vadd.f32 %v19237_v27, %v6351_v54  ;;  %v6904_v58 = vadd.f32 %v19286_v38, %v6354_v14  ;;  %v6902_v48 = vadd.f32 %v19296_v46, %v6352_v32  ;;  %v13576_v14 = vpop.f32.mrb[216].mxu1  ;;  %v19417_v32 = vpop.f32.mrb[212].mxu0 }
 0x2ff   :  { %v7682_v23 = vadd.f32 %v21581_v36, %v7068_v35  ;;  %v6355_v9 = vld [vmem:[#allocation2 + $0x198] sm:$0xff]  ;;  %6954 = vst.msk [vmem:[#allocation2 + $0x120] sm:$0xff] %vm22_vm9, %v6890_v40  ;;  %6957 = vst.msk [vmem:[#allocation2 + $0x138] sm:$0xff] %vm22_vm9, %v6893_v16  ;;  %v6358_v0 = vld [vmem:[#allocation2 + $0x1b0] sm:$0xff]  ;;  %v6903_v60 = vadd.f32 %v19311_v22, %v6353_v56 }
 0x300   :  { %v6356_v53 = vld [vmem:[#allocation2 + $0x1a0] sm:$0xff]  ;;  %v7073_v52 = vld [vmem:[#allocation2 + $0xd0] sm:$0xff]  ;;  %6955 = vst.msk [vmem:[#allocation2 + $0x128] sm:$0xff] %vm22_vm9, %v6891_v41  ;;  %6960 = vst.msk [vmem:[#allocation2 + $0x150] sm:$0xff] %vm22_vm9, %v6896_v61  ;;  %v6905_v27 = vadd.f32 %v19302_v49, %v6355_v9  ;;  %v6908_v12 = vadd.f32 %v19348_v19, %v6358_v0 }
 0x301   :  { %7746 = vst.msk [vmem:[#allocation2 + $0xa8] sm:$0xff] %vm22_vm9, %v7682_v23  ;;  %v7071_v63 = vld [vmem:[#allocation2 + $0xc0] sm:$0xff]  ;;  %6958 = vst.msk [vmem:[#allocation2 + $0x140] sm:$0xff] %vm22_vm9, %v6894_v30  ;;  %v6359_v43 = vld [vmem:[#allocation2 + $0x1b8] sm:$0xff]  ;;  %v6906_v49 = vadd.f32 %v6807_v7, %v6356_v53  ;;  %v6823_v53 = vpop.f32.mrb[217].mxu1 }
 0x302   :  { %v21582_v50 = vld [vmem:[#allocation10_spill] sm:$0xff]  ;;  %v21583_v39 = vld [vmem:[#allocation13_spill] sm:$0xff]  ;;  %v7072_v42 = vld [vmem:[#allocation2 + $0xc8] sm:$0xff]  ;;  %6961 = vst.msk [vmem:[#allocation2 + $0x158] sm:$0xff] %vm22_vm9, %v6897_v24  ;;  %v6909_v54 = vadd.f32 %v13573_v37, %v6359_v43 }
 0x303   :  { %v7687_v55 = vadd.f32 %v21582_v50, %v7073_v52  ;;  %v7685_v2 = vadd.f32 %v21583_v39, %v7071_v63  ;;  %v7074_v29 = vld [vmem:[#allocation2 + $0xd8] sm:$0xff]  ;;  %6959 = vst.msk [vmem:[#allocation2 + $0x148] sm:$0xff] %vm22_vm9, %v6895_v31  ;;  %6964 = vst.msk [vmem:[#allocation2 + $0x170] sm:$0xff] %vm22_vm9, %v6900_v11  ;;  %v6357_v38 = vld [vmem:[#allocation2 + $0x1a8] sm:$0xff]  ;;  %v13577_v50 = vpop.f32.mrb[218].mxu1 }
 0x304   :  { %6962 = vst.msk [vmem:[#allocation2 + $0x160] sm:$0xff] %vm22_vm9, %v6898_v4  ;;  %v21584_v46 = vld [vmem:[#allocation14_spill] sm:$0xff]  ;;  %v7077_v28 = vld [vmem:[#allocation2 + $0xf0] sm:$0xff]  ;;  %6965 = vst.msk [vmem:[#allocation2 + $0x178] sm:$0xff] %vm22_vm9, %v6901_v6  ;;  %v6907_v13 = vadd.f32 %v6810_v26, %v6357_v38  ;;  %v19424_v26 = vpop.f32.mrb[213].mxu0 }
 0x305   :  { %v7688_v51 = vadd.f32 %v21584_v46, %v7074_v29  ;;  %v21585_v10 = vld [vmem:[#allocation6_spill] sm:$0xff]  ;;  %6963 = vst.msk [vmem:[#allocation2 + $0x168] sm:$0xff] %vm22_vm9, %v6899_v57  ;;  %6968 = vst.msk [vmem:[#allocation2 + $0x190] sm:$0xff] %vm22_vm9, %v6904_v58  ;;  %v6362_v17 = vld [vmem:[#allocation2 + $0x1d0] sm:$0xff] }
 0x306   :  { %v7686_v33 = vadd.f32 %v21585_v10, %v7072_v42  ;;  %v7075_v44 = vld [vmem:[#allocation2 + $0xe0] sm:$0xff]  ;;  %6966 = vst.msk [vmem:[#allocation2 + $0x180] sm:$0xff] %vm22_vm9, %v6902_v48  ;;  %7751 = vst.msk [vmem:[#allocation2 + $0xd0] sm:$0xff] %vm22_vm9, %v7687_v55  ;;  %v21586_v22 = vld [vmem:[#allocation11_spill] sm:$0xff]  ;;  %v6912_v0 = vadd.f32 %v13576_v14, %v6362_v17  ;;  %v19432_v55 = vpop.f32.mrb[214].mxu0 }
 0x307   :  { %7749 = vst.msk [vmem:[#allocation2 + $0xc0] sm:$0xff] %vm22_vm9, %v7685_v2  ;;  %v7691_v8 = vadd.f32 %v21586_v22, %v7077_v28  ;;  %v21587_v1 = vld [vmem:[#allocation12_spill] sm:$0xff]  ;;  %v7078_v40 = vld [vmem:[#allocation2 + $0xf8] sm:$0xff]  ;;  %v7076_v59 = vld [vmem:[#allocation2 + $0xe8] sm:$0xff] }
 0x308   :  { %v7689_v35 = vadd.f32 %v21587_v1, %v7075_v44  ;;  %v7081_v16 = vld [vmem:[#allocation2 + $0x110] sm:$0xff]  ;;  %6969 = vst.msk [vmem:[#allocation2 + $0x198] sm:$0xff] %vm22_vm9, %v6905_v27  ;;  %6967 = vst.msk [vmem:[#allocation2 + $0x188] sm:$0xff] %vm22_vm9, %v6903_v60  ;;  %v21589_v36 = vld [vmem:[#allocation15_spill] sm:$0xff] }
 0x309   :  { %7752 = vst.msk [vmem:[#allocation2 + $0xd8] sm:$0xff] %vm22_vm9, %v7688_v51  ;;  %7750 = vst.msk [vmem:[#allocation2 + $0xc8] sm:$0xff] %vm22_vm9, %v7686_v33  ;;  %v21588_v19 = vld [vmem:[#allocation8_spill] sm:$0xff]  ;;  %v7690_v23 = vadd.f32 %v21589_v36, %v7076_v59  ;;  %v21590_v41 = vld [vmem:[#allocation7_spill] sm:$0xff]  ;;  %v7617_v51 = vpop.f32.mrb[215].mxu0 }
 0x30a   :  { %v7692_v7 = vadd.f32 %v21588_v19, %v7078_v40  ;;  %v7695_v61 = vadd.f32 %v21590_v41, %v7081_v16  ;;  %v7079_v30 = vld [vmem:[#allocation2 + $0x100] sm:$0xff]  ;;  %6972 = vst.msk [vmem:[#allocation2 + $0x1b0] sm:$0xff] %vm22_vm9, %v6908_v12  ;;  %6970 = vst.msk [vmem:[#allocation2 + $0x1a0] sm:$0xff] %vm22_vm9, %v6906_v49  ;;  %v6363_v37 = vld [vmem:[#allocation2 + $0x1d8] sm:$0xff] }
 0x30b   :  { %v6360_v9 = vld [vmem:[#allocation2 + $0x1c0] sm:$0xff]  ;;  %7755 = vst.msk [vmem:[#allocation2 + $0xf0] sm:$0xff] %vm22_vm9, %v7691_v8  ;;  %7753 = vst.msk [vmem:[#allocation2 + $0xe0] sm:$0xff] %vm22_vm9, %v7689_v35  ;;  %v21591_v24 = vld [vmem:[#allocation16_spill] sm:$0xff] }
 0x30c   :  { %v7693_v31 = vadd.f32 %v21591_v24, %v7079_v30  ;;  %v7082_v11 = vld [vmem:[#allocation2 + $0x118] sm:$0xff]  ;;  %v7080_v4 = vld [vmem:[#allocation2 + $0x108] sm:$0xff]  ;;  %v7085_v56 = vld [vmem:[#allocation2 + $0x130] sm:$0xff]  ;;  %6973 = vst.msk [vmem:[#allocation2 + $0x1b8] sm:$0xff] %vm22_vm9, %v6909_v54  ;;  %v6910_v43 = vadd.f32 %v6823_v53, %v6360_v9 }
 0x30d   :  { %6971 = vst.msk [vmem:[#allocation2 + $0x1a8] sm:$0xff] %vm22_vm9, %v6907_v13  ;;  %7756 = vst.msk [vmem:[#allocation2 + $0xf8] sm:$0xff] %vm22_vm9, %v7692_v7  ;;  %v21592_v52 = vld [vmem:[#allocation18_spill] sm:$0xff]  ;;  %v7694_v6 = vadd.f32 %v19136_v21, %v7080_v4  ;;  %v7699_v57 = vadd.f32 %v19158_v25, %v7085_v56  ;;  %v7086_v48 = vld [vmem:[#allocation2 + $0x138] sm:$0xff]  ;;  %v6913_v21 = vadd.f32 %v13577_v50, %v6363_v37  ;;  %v6826_v25 = vpop.f32.mrb[219].mxu1 }
 0x30e   :  { %7754 = vst.msk [vmem:[#allocation2 + $0xe8] sm:$0xff] %vm22_vm9, %v7690_v23  ;;  %7759 = vst.msk [vmem:[#allocation2 + $0x110] sm:$0xff] %vm22_vm9, %v7695_v61  ;;  %v7696_v63 = vadd.f32 %v21592_v52, %v7082_v11  ;;  %v7083_v58 = vld [vmem:[#allocation2 + $0x120] sm:$0xff]  ;;  %v6361_v39 = vld [vmem:[#allocation2 + $0x1c8] sm:$0xff]  ;;  %v13580_v11 = vpop.f32.mrb[220].mxu1 }
 0x30f   :  { %7757 = vst.msk [vmem:[#allocation2 + $0x100] sm:$0xff] %vm22_vm9, %v7693_v31  ;;  %v21593_v2 = vld [vmem:[#allocation19_spill] sm:$0xff]  ;;  %v21594_v42 = vld [vmem:[#allocation20_spill] sm:$0xff]  ;;  %v7087_v46 = vld [vmem:[#allocation2 + $0x140] sm:$0xff]  ;;  %v6911_v1 = vadd.f32 %v6826_v25, %v6361_v39  ;;  %v6839_v53 = vpop.f32.mrb[221].mxu1 }
 0x310   :  { %v7697_v29 = vadd.f32 %v21593_v2, %v7083_v58  ;;  %v7700_v27 = vadd.f32 %v21594_v42, %v7086_v48  ;;  %v7084_v60 = vld [vmem:[#allocation2 + $0x128] sm:$0xff]  ;;  %v7089_v38 = vld [vmem:[#allocation2 + $0x150] sm:$0xff]  ;;  %6976 = vst.msk [vmem:[#allocation2 + $0x1d0] sm:$0xff] %vm22_vm9, %v6912_v0  ;;  %7760 = vst.msk [vmem:[#allocation2 + $0x118] sm:$0xff] %vm22_vm9, %v7696_v63 }
 0x311   :  { %7758 = vst.msk [vmem:[#allocation2 + $0x108] sm:$0xff] %vm22_vm9, %v7694_v6  ;;  %7763 = vst.msk [vmem:[#allocation2 + $0x130] sm:$0xff] %vm22_vm9, %v7699_v57  ;;  %v21595_v10 = vld [vmem:[#allocation21_spill] sm:$0xff]  ;;  %v21596_v28 = vld [vmem:[#allocation22_spill] sm:$0xff]  ;;  %v13581_v6 = vpop.f32.mrb[222].mxu1 }
 0x312   :  { %v7698_v33 = vadd.f32 %v21595_v10, %v7084_v60  ;;  %v7703_v44 = vadd.f32 %v21596_v28, %v7089_v38  ;;  %v21597_v12 = vld [vmem:[#allocation23_spill] sm:$0xff]  ;;  %v7090_v17 = vld [vmem:[#allocation2 + $0x158] sm:$0xff]  ;;  %v7093_v8 = vld [vmem:[#allocation2 + $0x170] sm:$0xff]  ;;  %6974 = vst.msk [vmem:[#allocation2 + $0x1c0] sm:$0xff] %vm22_vm9, %v6910_v43 }
 0x313   :  { %v7701_v49 = vadd.f32 %v21597_v12, %v7087_v46  ;;  %v7088_v22 = vld [vmem:[#allocation2 + $0x148] sm:$0xff]  ;;  %7761 = vst.msk [vmem:[#allocation2 + $0x120] sm:$0xff] %vm22_vm9, %v7697_v29  ;;  %7764 = vst.msk [vmem:[#allocation2 + $0x138] sm:$0xff] %vm22_vm9, %v7700_v27  ;;  %v21598_v35 = vld [vmem:[#allocation24_spill] sm:$0xff]  ;;  %v7707_v16 = vadd.f32 %v19288_v47, %v7093_v8 }
 0x314   :  { %v7704_v40 = vadd.f32 %v21598_v35, %v7090_v17  ;;  %v7702_v59 = vadd.f32 %v19248_v20, %v7088_v22  ;;  %v7091_v54 = vld [vmem:[#allocation2 + $0x160] sm:$0xff]  ;;  %v7094_v13 = vld [vmem:[#allocation2 + $0x178] sm:$0xff]  ;;  %v7092_v19 = vld [vmem:[#allocation2 + $0x168] sm:$0xff]  ;;  %6977 = vst.msk [vmem:[#allocation2 + $0x1d8] sm:$0xff] %vm22_vm9, %v6913_v21 }
 0x315   :  { %7762 = vst.msk [vmem:[#allocation2 + $0x128] sm:$0xff] %vm22_vm9, %v7698_v33  ;;  %7767 = vst.msk [vmem:[#allocation2 + $0x150] sm:$0xff] %vm22_vm9, %v7703_v44  ;;  %v7705_v7 = vadd.f32 %v19298_v62, %v7091_v54  ;;  %v7708_v36 = vadd.f32 %v19304_v3, %v7094_v13  ;;  %v7706_v23 = vadd.f32 %v19313_v15, %v7092_v19  ;;  %v7097_v20 = vld [vmem:[#allocation2 + $0x190] sm:$0xff]  ;;  %v7095_v41 = vld [vmem:[#allocation2 + $0x180] sm:$0xff] }
 0x316   :  { %7765 = vst.msk [vmem:[#allocation2 + $0x140] sm:$0xff] %vm22_vm9, %v7701_v49  ;;  %v7098_v47 = vld [vmem:[#allocation2 + $0x198] sm:$0xff]  ;;  %6975 = vst.msk [vmem:[#allocation2 + $0x1c8] sm:$0xff] %vm22_vm9, %v6911_v1  ;;  %v7711_v61 = vadd.f32 %v19350_v34, %v7097_v20  ;;  %v7709_v30 = vadd.f32 %v19359_v5, %v7095_v41  ;;  %v7096_v3 = vld [vmem:[#allocation2 + $0x188] sm:$0xff] }
 0x317   :  { %7768 = vst.msk [vmem:[#allocation2 + $0x158] sm:$0xff] %vm22_vm9, %v7704_v40  ;;  %7766 = vst.msk [vmem:[#allocation2 + $0x148] sm:$0xff] %vm22_vm9, %v7702_v59  ;;  %v7712_v62 = vadd.f32 %v19368_v45, %v7098_v47  ;;  %v7101_v14 = vld [vmem:[#allocation2 + $0x1b0] sm:$0xff]  ;;  %v7099_v15 = vld [vmem:[#allocation2 + $0x1a0] sm:$0xff]  ;;  %v7710_v9 = vadd.f32 %v19379_v18, %v7096_v3  ;;  %v13642_v45 = vpop.f32.mrb[216].mxu0 }
 0x318   :  { %7771 = vst.msk [vmem:[#allocation2 + $0x170] sm:$0xff] %vm22_vm9, %v7707_v16  ;;  %7769 = vst.msk [vmem:[#allocation2 + $0x160] sm:$0xff] %vm22_vm9, %v7705_v7  ;;  %v7715_v37 = vadd.f32 %v19417_v32, %v7101_v14  ;;  %v7713_v24 = vadd.f32 %v19424_v26, %v7099_v15  ;;  %v7102_v34 = vld [vmem:[#allocation2 + $0x1b8] sm:$0xff]  ;;  %v7100_v31 = vld [vmem:[#allocation2 + $0x1a8] sm:$0xff]  ;;  %v7630_v32 = vpop.f32.mrb[217].mxu0 }
 0x319   :  { %7772 = vst.msk [vmem:[#allocation2 + $0x178] sm:$0xff] %vm22_vm9, %v7708_v36  ;;  %7770 = vst.msk [vmem:[#allocation2 + $0x168] sm:$0xff] %vm22_vm9, %v7706_v23  ;;  %v6366_v5 = vld [vmem:[#allocation2 + $0x1f0] sm:$0xff]  ;;  %v7716_v4 = vadd.f32 %v19432_v55, %v7102_v34  ;;  %v7714_v56 = vadd.f32 %v7617_v51, %v7100_v31  ;;  %v6364_v18 = vld [vmem:[#allocation2 + $0x1e0] sm:$0xff]  ;;  %v13643_v57 = vpop.f32.mrb[218].mxu0  ;;  %v6842_v55 = vpop.f32.mrb[223].mxu1 }
 0x31a   :  { %7775 = vst.msk [vmem:[#allocation2 + $0x190] sm:$0xff] %vm22_vm9, %v7711_v61  ;;  %7773 = vst.msk [vmem:[#allocation2 + $0x180] sm:$0xff] %vm22_vm9, %v7709_v30  ;;  %v6916_v0 = vadd.f32 %v13580_v11, %v6366_v5  ;;  %v7105_v26 = vld [vmem:[#allocation2 + $0x1d0] sm:$0xff]  ;;  %v6914_v52 = vadd.f32 %v6839_v53, %v6364_v18  ;;  %v6367_v63 = vld [vmem:[#allocation2 + $0x1f8] sm:$0xff]  ;;  %v7633_v39 = vpop.f32.mrb[219].mxu0  ;;  %v13652_v25 = vpop.f32.mrb[224].mxu1 }
 0x31b   :  { %7776 = vst.msk [vmem:[#allocation2 + $0x198] sm:$0xff] %vm22_vm9, %v7712_v62  ;;  %7774 = vst.msk [vmem:[#allocation2 + $0x188] sm:$0xff] %vm22_vm9, %v7710_v9  ;;  %v7719_v58 = vadd.f32 %v13642_v45, %v7105_v26  ;;  %v7103_v48 = vld [vmem:[#allocation2 + $0x1c0] sm:$0xff]  ;;  %v6917_v43 = vadd.f32 %v13581_v6, %v6367_v63  ;;  %v6365_v50 = vld [vmem:[#allocation2 + $0x1e8] sm:$0xff]  ;;  %v13646_v46 = vpop.f32.mrb[220].mxu0  ;;  %v8948_v28 = vpop.f32.mrb[225].mxu1 }
 0x31c   :  { %7779 = vst.msk [vmem:[#allocation2 + $0x1b0] sm:$0xff] %vm22_vm9, %v7715_v37  ;;  %7777 = vst.msk [vmem:[#allocation2 + $0x1a0] sm:$0xff] %vm22_vm9, %v7713_v24  ;;  %v7717_v2 = vadd.f32 %v7630_v32, %v7103_v48  ;;  %v7106_v29 = vld [vmem:[#allocation2 + $0x1d8] sm:$0xff]  ;;  %v6915_v42 = vadd.f32 %v6842_v55, %v6365_v50  ;;  %v8655_v21 = vld [vmem:[#allocation2 + $0x10] sm:$0xff]  ;;  %v7646_v10 = vpop.f32.mrb[221].mxu0  ;;  %v13653_v22 = vpop.f32.mrb[226].mxu1 }
 0x31d   :  { %7780 = vst.msk [vmem:[#allocation2 + $0x1b8] sm:$0xff] %vm22_vm9, %v7716_v4  ;;  %7778 = vst.msk [vmem:[#allocation2 + $0x1a8] sm:$0xff] %vm22_vm9, %v7714_v56  ;;  %v7720_v27 = vadd.f32 %v13643_v57, %v7106_v29  ;;  %v7104_v60 = vld [vmem:[#allocation2 + $0x1c8] sm:$0xff]  ;;  %v9205_v51 = vadd.f32 %v13652_v25, %v8655_v21  ;;  %v8653_v33 = vld [vmem:[#allocation2] sm:$0xff]  ;;  %v13647_v49 = vpop.f32.mrb[222].mxu0  ;;  %v8951_v16 = vpop.f32.mrb[227].mxu1 }
 0x31e   :  { %6980 = vst.msk [vmem:[#allocation2 + $0x1f0] sm:$0xff] %vm22_vm9, %v6916_v0  ;;  %6978 = vst.msk [vmem:[#allocation2 + $0x1e0] sm:$0xff] %vm22_vm9, %v6914_v52  ;;  %v7718_v38 = vadd.f32 %v7633_v39, %v7104_v60  ;;  %v9203_v12 = vadd.f32 %v8948_v28, %v8653_v33  ;;  %v8656_v17 = vld [vmem:[#allocation2 + $0x18] sm:$0xff]  ;;  %v7649_v40 = vpop.f32.mrb[223].mxu0  ;;  %v8654_v59 = vld [vmem:[#allocation2 + $0x8] sm:$0xff]  ;;  %v13656_v41 = vpop.f32.mrb[228].mxu1 }
 0x31f   :  { %7783 = vst.msk [vmem:[#allocation2 + $0x1d0] sm:$0xff] %vm22_vm9, %v7719_v58  ;;  %6981 = vst.msk [vmem:[#allocation2 + $0x1f8] sm:$0xff] %vm22_vm9, %v6917_v43  ;;  %v9206_v35 = vadd.f32 %v13653_v22, %v8656_v17  ;;  %v9204_v19 = vadd.f32 %v8951_v16, %v8654_v59  ;;  %v8659_v20 = vld [vmem:[#allocation2 + $0x30] sm:$0xff]  ;;  %v13718_v47 = vpop.f32.mrb[224].mxu0  ;;  %v8657_v30 = vld [vmem:[#allocation2 + $0x20] sm:$0xff]  ;;  %v8964_v62 = vpop.f32.mrb[229].mxu1 }
 0x320   :  { %7781 = vst.msk [vmem:[#allocation2 + $0x1c0] sm:$0xff] %vm22_vm9, %v7717_v2  ;;  %6979 = vst.msk [vmem:[#allocation2 + $0x1e8] sm:$0xff] %vm22_vm9, %v6915_v42  ;;  %v9209_v61 = vadd.f32 %v13656_v41, %v8659_v20  ;;  %v10042_v3 = vpop.f32.mrb[225].mxu0  ;;  %v9207_v15 = vadd.f32 %v8964_v62, %v8657_v30  ;;  %v8660_v9 = vld [vmem:[#allocation2 + $0x38] sm:$0xff]  ;;  %v13657_v37 = vpop.f32.mrb[230].mxu1  ;;  %v8658_v11 = vld [vmem:[#allocation2 + $0x28] sm:$0xff] }
 0x321   :  { %7784 = vst.msk [vmem:[#allocation2 + $0x1d8] sm:$0xff] %vm22_vm9, %v7720_v27  ;;  %7782 = vst.msk [vmem:[#allocation2 + $0x1c8] sm:$0xff] %vm22_vm9, %v7718_v38  ;;  %v13719_v24 = vpop.f32.mrb[226].mxu0  ;;  %v9210_v5 = vadd.f32 %v13657_v37, %v8660_v9  ;;  %v8967_v45 = vpop.f32.mrb[231].mxu1  ;;  %v8663_v52 = vld [vmem:[#allocation2 + $0x50] sm:$0xff]  ;;  %v8661_v58 = vld [vmem:[#allocation2 + $0x40] sm:$0xff] }
 0x322   :  { %9269 = vst.msk [vmem:[#allocation2 + $0x10] sm:$0xff] %vm22_vm9, %v9205_v51  ;;  %9267 = vst.msk [vmem:[#allocation2] sm:$0xff] %vm22_vm9, %v9203_v12  ;;  %v10045_v4 = vpop.f32.mrb[227].mxu0  ;;  %v9208_v18 = vadd.f32 %v8967_v45, %v8658_v11  ;;  %v13660_v63 = vpop.f32.mrb[232].mxu1  ;;  %v8664_v39 = vld [vmem:[#allocation2 + $0x58] sm:$0xff]  ;;  %v8667_v59 = vld [vmem:[#allocation2 + $0x70] sm:$0xff] }
 0x323   :  { %9270 = vst.msk [vmem:[#allocation2 + $0x18] sm:$0xff] %vm22_vm9, %v9206_v35  ;;  %9268 = vst.msk [vmem:[#allocation2 + $0x8] sm:$0xff] %vm22_vm9, %v9204_v19  ;;  %v13722_v6 = vpop.f32.mrb[228].mxu0  ;;  %v9213_v57 = vadd.f32 %v13660_v63, %v8663_v52  ;;  %v8980_v48 = vpop.f32.mrb[233].mxu1  ;;  %v19506_v42 = vld [vmem:[%s21443_s2] ss:$0 sm:$0xff] }
 0x324   :  { %9273 = vst.msk [vmem:[#allocation2 + $0x30] sm:$0xff] %vm22_vm9, %v9209_v61  ;;  %9271 = vst.msk [vmem:[#allocation2 + $0x20] sm:$0xff] %vm22_vm9, %v9207_v15  ;;  %v10058_v43 = vpop.f32.mrb[229].mxu0  ;;  %v9211_v55 = vadd.f32 %v8980_v48, %v8661_v58  ;;  %v13661_v2 = vpop.f32.mrb[234].mxu1  ;;  %v8665_v19 = vld [vmem:[#allocation2 + $0x60] sm:$0xff]  ;;  %v8668_v30 = vld [vmem:[#allocation2 + $0x78] sm:$0xff] }
 0x325   :  { %v7109_v44 = vld [vmem:[#allocation2 + $0x1f0] sm:$0xff]  ;;  %v7107_v1 = vld [vmem:[#allocation2 + $0x1e0] sm:$0xff]  ;;  %9274 = vst.msk [vmem:[#allocation2 + $0x38] sm:$0xff] %vm22_vm9, %v9210_v5  ;;  %9272 = vst.msk [vmem:[#allocation2 + $0x28] sm:$0xff] %vm22_vm9, %v9208_v18  ;;  %v13723_v29 = vpop.f32.mrb[230].mxu0  ;;  %v9214_v38 = vadd.f32 %v13661_v2, %v8664_v39  ;;  %v8983_v21 = vpop.f32.mrb[235].mxu1 }
 0x326   :  { %v7723_v8 = vadd.f32 %v13646_v46, %v7109_v44  ;;  %v7721_v54 = vadd.f32 %v7646_v10, %v7107_v1  ;;  %v7110_v13 = vld [vmem:[#allocation2 + $0x1f8] sm:$0xff]  ;;  %9277 = vst.msk [vmem:[#allocation2 + $0x50] sm:$0xff] %vm22_vm9, %v9213_v57  ;;  %v8662_v46 = vld [vmem:[#allocation2 + $0x48] sm:$0xff]  ;;  %v10061_v25 = vpop.f32.mrb[231].mxu0  ;;  %9275 = vst.msk [vmem:[#allocation2 + $0x40] sm:$0xff] %vm22_vm9, %v9211_v55  ;;  %v13664_v16 = vpop.f32.mrb[236].mxu1 }
 0x327   :  { %v7724_v7 = vadd.f32 %v13647_v49, %v7110_v13  ;;  %v7108_v36 = vld [vmem:[#allocation2 + $0x1e8] sm:$0xff]  ;;  %v9212_v33 = vadd.f32 %v8983_v21, %v8662_v46  ;;  %9278 = vst.msk [vmem:[#allocation2 + $0x58] sm:$0xff] %vm22_vm9, %v9214_v38  ;;  %v9217_v13 = vadd.f32 %v13664_v16, %v8667_v59  ;;  %v8671_v55 = vld [vmem:[#allocation2 + $0x90] sm:$0xff] }
 0x328   :  { %7787 = vst.msk [vmem:[#allocation2 + $0x1f0] sm:$0xff] %vm22_vm9, %v7723_v8  ;;  %7785 = vst.msk [vmem:[#allocation2 + $0x1e0] sm:$0xff] %vm22_vm9, %v7721_v54  ;;  %v7722_v23 = vadd.f32 %v7649_v40, %v7108_v36  ;;  %v13726_v54 = vpop.f32.mrb[232].mxu0 }
 0x329   :  { %7788 = vst.msk [vmem:[#allocation2 + $0x1f8] sm:$0xff] %vm22_vm9, %v7724_v7  ;;  %v9749_v14 = vld [vmem:[#allocation2 + $0x10] sm:$0xff]  ;;  %v9747_v31 = vld [vmem:[#allocation2] sm:$0xff]  ;;  %9276 = vst.msk [vmem:[#allocation2 + $0x48] sm:$0xff] %vm22_vm9, %v9212_v33  ;;  %v8996_v7 = vpop.f32.mrb[237].mxu1  ;;  %v10074_v36 = vpop.f32.mrb[233].mxu0 }
 0x32a   :  { %7786 = vst.msk [vmem:[#allocation2 + $0x1e8] sm:$0xff] %vm22_vm9, %v7722_v23  ;;  %v10299_v34 = vadd.f32 %v13718_v47, %v9749_v14  ;;  %v10297_v56 = vadd.f32 %v10042_v3, %v9747_v31  ;;  %v9750_v0 = vld [vmem:[#allocation2 + $0x18] sm:$0xff]  ;;  %v9748_v32 = vld [vmem:[#allocation2 + $0x8] sm:$0xff]  ;;  %v9215_v61 = vadd.f32 %v8996_v7, %v8665_v19  ;;  %v13665_v62 = vpop.f32.mrb[238].mxu1  ;;  %v13727_v3 = vpop.f32.mrb[234].mxu0  ;;  %9281 = vst.msk [vmem:[#allocation2 + $0x70] sm:$0xff] %vm22_vm9, %v9217_v13 }
 0x32b   :  { %v10300_v53 = vadd.f32 %v13719_v24, %v9750_v0  ;;  %v10298_v26 = vadd.f32 %v10045_v4, %v9748_v32  ;;  %v9753_v50 = vld [vmem:[#allocation2 + $0x30] sm:$0xff]  ;;  %v9751_v60 = vld [vmem:[#allocation2 + $0x20] sm:$0xff]  ;;  %v9218_v37 = vadd.f32 %v13665_v62, %v8668_v30  ;;  %v8666_v24 = vld [vmem:[#allocation2 + $0x68] sm:$0xff]  ;;  %v10077_v31 = vpop.f32.mrb[235].mxu0 }
 0x32c   :  { %10363 = vst.msk [vmem:[#allocation2 + $0x10] sm:$0xff] %vm22_vm9, %v10299_v34  ;;  %10361 = vst.msk [vmem:[#allocation2] sm:$0xff] %vm22_vm9, %v10297_v56  ;;  %v10303_v27 = vadd.f32 %v13722_v6, %v9753_v50  ;;  %v10301_v51 = vadd.f32 %v10058_v43, %v9751_v60  ;;  %v9754_v10 = vld [vmem:[#allocation2 + $0x38] sm:$0xff]  ;;  %v9752_v49 = vld [vmem:[#allocation2 + $0x28] sm:$0xff]  ;;  %v8999_v34 = vpop.f32.mrb[239].mxu1  ;;  %v13730_v2 = vpop.f32.mrb[236].mxu0 }
 0x32d   :  { %10364 = vst.msk [vmem:[#allocation2 + $0x18] sm:$0xff] %vm22_vm9, %v10300_v53  ;;  %10362 = vst.msk [vmem:[#allocation2 + $0x8] sm:$0xff] %vm22_vm9, %v10298_v26  ;;  %v10304_v12 = vadd.f32 %v13723_v29, %v9754_v10  ;;  %v10302_v22 = vadd.f32 %v10061_v25, %v9752_v49  ;;  %v9757_v47 = vld [vmem:[#allocation2 + $0x50] sm:$0xff]  ;;  %v9755_v9 = vld [vmem:[#allocation2 + $0x40] sm:$0xff]  ;;  %v9216_v4 = vadd.f32 %v8999_v34, %v8666_v24  ;;  %v13668_v39 = vpop.f32.mrb[240].mxu1  ;;  %v10090_v46 = vpop.f32.mrb[237].mxu0 }
 0x32e   :  { %10367 = vst.msk [vmem:[#allocation2 + $0x30] sm:$0xff] %vm22_vm9, %v10303_v27  ;;  %10365 = vst.msk [vmem:[#allocation2 + $0x20] sm:$0xff] %vm22_vm9, %v10301_v51  ;;  %v10307_v15 = vadd.f32 %v13726_v54, %v9757_v47  ;;  %v10305_v11 = vadd.f32 %v10074_v36, %v9755_v9  ;;  %v9758_v45 = vld [vmem:[#allocation2 + $0x58] sm:$0xff]  ;;  %v9221_v27 = vadd.f32 %v13668_v39, %v8671_v55  ;;  %v8669_v60 = vld [vmem:[#allocation2 + $0x80] sm:$0xff]  ;;  %v9012_v38 = vpop.f32.mrb[241].mxu1 }
 0x32f   :  { %10368 = vst.msk [vmem:[#allocation2 + $0x38] sm:$0xff] %vm22_vm9, %v10304_v12  ;;  %10366 = vst.msk [vmem:[#allocation2 + $0x28] sm:$0xff] %vm22_vm9, %v10302_v22  ;;  %v10308_v53 = vadd.f32 %v13727_v3, %v9758_v45  ;;  %v9219_v10 = vadd.f32 %v9012_v38, %v8669_v60  ;;  %v8672_v33 = vld [vmem:[#allocation2 + $0x98] sm:$0xff] }
 0x330   :  { %9279 = vst.msk [vmem:[#allocation2 + $0x60] sm:$0xff] %vm22_vm9, %v9215_v61  ;;  %10371 = vst.msk [vmem:[#allocation2 + $0x50] sm:$0xff] %vm22_vm9, %v10307_v15  ;;  %v9756_v32 = vld [vmem:[#allocation2 + $0x48] sm:$0xff]  ;;  %v8676_v55 = vld [vmem:[#allocation2 + $0xb8] sm:$0xff] }
 0x331   :  { %9282 = vst.msk [vmem:[#allocation2 + $0x78] sm:$0xff] %vm22_vm9, %v9218_v37  ;;  %10369 = vst.msk [vmem:[#allocation2 + $0x40] sm:$0xff] %vm22_vm9, %v10305_v11  ;;  %v10306_v63 = vadd.f32 %v10077_v31, %v9756_v32  ;;  %v9761_v51 = vld [vmem:[#allocation2 + $0x70] sm:$0xff] }
 0x332   :  { %9280 = vst.msk [vmem:[#allocation2 + $0x68] sm:$0xff] %vm22_vm9, %v9216_v4  ;;  %10372 = vst.msk [vmem:[#allocation2 + $0x58] sm:$0xff] %vm22_vm9, %v10308_v53  ;;  %v10311_v49 = vadd.f32 %v13730_v2, %v9761_v51 }
 0x333   :  { %v10427_v28 = vld [vmem:[#allocation2 + $0x10] sm:$0xff]  ;;  %v10425_v44 = vld [vmem:[#allocation2] sm:$0xff]  ;;  %10370 = vst.msk [vmem:[#allocation2 + $0x48] sm:$0xff] %vm22_vm9, %v10306_v63  ;;  %9285 = vst.msk [vmem:[#allocation2 + $0x90] sm:$0xff] %vm22_vm9, %v9221_v27 }
 0x334   :  { %v19513_v17 = vadd.f32 %v19506_v42, %v10425_v44  ;;  %v10428_v8 = vld [vmem:[#allocation2 + $0x18] sm:$0xff]  ;;  %v10426_v1 = vld [vmem:[#allocation2 + $0x8] sm:$0xff]  ;;  %v19519_v35 = vadd.f32 %v19506_v42, %v10427_v28  ;;  %v13669_v28 = vpop.f32.mrb[242].mxu1  ;;  %v13731_v44 = vpop.f32.mrb[238].mxu0  ;;  %9283 = vst.msk [vmem:[#allocation2 + $0x80] sm:$0xff] %vm22_vm9, %v9219_v10  ;;  %10375 = vst.msk [vmem:[#allocation2 + $0x70] sm:$0xff] %vm22_vm9, %v10311_v49 }
 0x335   :  { %v19522_v40 = vadd.f32 %v19506_v42, %v10426_v1  ;;  %v19528_v20 = vadd.f32 %v19506_v42, %v10428_v8  ;;  %v10431_v0 = vld [vmem:[#allocation2 + $0x30] sm:$0xff]  ;;  %v10429_v18 = vld [vmem:[#allocation2 + $0x20] sm:$0xff]  ;;  %v9222_v8 = vadd.f32 %v13669_v28, %v8672_v33  ;;  %v8670_v1 = vld [vmem:[#allocation2 + $0x88] sm:$0xff]  ;;  %v9015_v59 = vpop.f32.mrb[243].mxu1  ;;  %v10093_v16 = vpop.f32.mrb[239].mxu0 }
 0x336   :  { %v10560_v23 = vsel %vm22_vm9, %v19513_v17, 0.0  ;;  %v10563_v5 = vsel %vm22_vm9, %v19519_v35, 0.0  ;;  %v19541_v52 = vadd.f32 %v19506_v42, %v10429_v18  ;;  %v10432_v57 = vld [vmem:[#allocation2 + $0x38] sm:$0xff]  ;;  %v10430_v58 = vld [vmem:[#allocation2 + $0x28] sm:$0xff]  ;;  %v19547_v48 = vadd.f32 %v19506_v42, %v10431_v0  ;;  %v13734_v4 = vpop.f32.mrb[240].mxu0  ;;  %v8675_v0 = vld [vmem:[#allocation2 + $0xb0] sm:$0xff] }
 0x337   :  { %v10561_v41 = vsel %vm22_vm9, %v19522_v40, 0.0  ;;  %v10565_v26 = vsel %vm22_vm9, %v19528_v20, 0.0  ;;  %v19552_v50 = vadd.f32 %v19506_v42, %v10430_v58  ;;  %v19556_v21 = vadd.f32 %v19506_v42, %v10432_v57  ;;  %v9759_v22 = vld [vmem:[#allocation2 + $0x60] sm:$0xff]  ;;  %9286 = vst.msk [vmem:[#allocation2 + $0x98] sm:$0xff] %vm22_vm9, %v9222_v8  ;;  %v13672_v18 = vpop.f32.mrb[244].mxu1 }
 0x338   :  { %v10562_v14 = vadd.f32 %v10561_v41, %v10560_v23  ;;  %v10567_v43 = vsel %vm22_vm9, %v19541_v52, 0.0  ;;  %v10571_v54 = vsel %vm22_vm9, %v19547_v48, 0.0  ;;  %v10309_v13 = vadd.f32 %v10090_v46, %v9759_v22  ;;  %v9762_v19 = vld [vmem:[#allocation2 + $0x78] sm:$0xff]  ;;  %v10435_v23 = vld [vmem:[#allocation2 + $0x50] sm:$0xff]  ;;  %v10433_v41 = vld [vmem:[#allocation2 + $0x40] sm:$0xff]  ;;  %v9028_v58 = vpop.f32.mrb[245].mxu1 }
 0x339   :  { %v10569_v25 = vsel %vm22_vm9, %v19552_v50, 0.0  ;;  %v9220_v7 = vadd.f32 %v9015_v59, %v8670_v1  ;;  %v10312_v47 = vadd.f32 %v13731_v44, %v9762_v19  ;;  %v9760_v61 = vld [vmem:[#allocation2 + $0x68] sm:$0xff]  ;;  %v10573_v30 = vsel %vm22_vm9, %v19556_v21, 0.0  ;;  %v10436_v15 = vld [vmem:[#allocation2 + $0x58] sm:$0xff]  ;;  %v8673_v57 = vld [vmem:[#allocation2 + $0xa0] sm:$0xff]  ;;  %v13673_v46 = vpop.f32.mrb[246].mxu1 }
 0x33a   :  { %v10564_v56 = vadd.f32 %v10563_v5, %v10562_v14  ;;  %v19569_v62 = vadd.f32 %v19506_v42, %v10433_v41  ;;  %10373 = vst.msk [vmem:[#allocation2 + $0x60] sm:$0xff] %vm22_vm9, %v10309_v13  ;;  %v10310_v3 = vadd.f32 %v10093_v16, %v9760_v61  ;;  %v10434_v9 = vld [vmem:[#allocation2 + $0x48] sm:$0xff]  ;;  %v19575_v37 = vadd.f32 %v19506_v42, %v10435_v23  ;;  %v9765_v45 = vld [vmem:[#allocation2 + $0x90] sm:$0xff]  ;;  %v9031_v49 = vpop.f32.mrb[247].mxu1 }
 0x33b   :  { %9284 = vst.msk [vmem:[#allocation2 + $0x88] sm:$0xff] %vm22_vm9, %v9220_v7  ;;  %10376 = vst.msk [vmem:[#allocation2 + $0x78] sm:$0xff] %vm22_vm9, %v10312_v47  ;;  %v19580_v34 = vadd.f32 %v19506_v42, %v10434_v9  ;;  %v19584_v5 = vadd.f32 %v19506_v42, %v10436_v15  ;;  %v10315_v53 = vadd.f32 %v13734_v4, %v9765_v45  ;;  %v9763_v32 = vld [vmem:[#allocation2 + $0x80] sm:$0xff]  ;;  %v10439_v27 = vld [vmem:[#allocation2 + $0x70] sm:$0xff] }
 0x33c   :  { %v10566_v6 = vadd.f32 %v10565_v26, %v10564_v56  ;;  %v10575_v24 = vsel %vm22_vm9, %v19569_v62, 0.0  ;;  %10374 = vst.msk [vmem:[#allocation2 + $0x68] sm:$0xff] %vm22_vm9, %v10310_v3  ;;  %v10106_v26 = vpop.f32.mrb[241].mxu0  ;;  %v10579_v63 = vsel %vm22_vm9, %v19575_v37, 0.0  ;;  %v9223_v38 = vadd.f32 %v9028_v58, %v8673_v57 }
 0x33d   :  { %v10577_v11 = vsel %vm22_vm9, %v19580_v34, 0.0  ;;  %v13735_v2 = vpop.f32.mrb[242].mxu0  ;;  %10379 = vst.msk [vmem:[#allocation2 + $0x90] sm:$0xff] %vm22_vm9, %v10315_v53  ;;  %v10581_v33 = vsel %vm22_vm9, %v19584_v5, 0.0  ;;  %v9226_v44 = vadd.f32 %v13673_v46, %v8676_v55  ;;  %v8679_v53 = vld [vmem:[#allocation2 + $0xd0] sm:$0xff]  ;;  %v8677_v55 = vld [vmem:[#allocation2 + $0xc0] sm:$0xff] }
 0x33e   :  { %v10568_v29 = vadd.f32 %v10567_v43, %v10566_v6  ;;  %v9225_v6 = vadd.f32 %v13672_v18, %v8675_v0  ;;  %v10313_v43 = vadd.f32 %v10106_v26, %v9763_v32  ;;  %v9766_v39 = vld [vmem:[#allocation2 + $0x98] sm:$0xff]  ;;  %v10109_v10 = vpop.f32.mrb[243].mxu0  ;;  %9287 = vst.msk [vmem:[#allocation2 + $0xa0] sm:$0xff] %vm22_vm9, %v9223_v38 }
 0x33f   :  { %9290 = vst.msk [vmem:[#allocation2 + $0xb8] sm:$0xff] %vm22_vm9, %v9226_v44  ;;  %v8680_v46 = vld [vmem:[#allocation2 + $0xd8] sm:$0xff]  ;;  %v8678_v44 = vld [vmem:[#allocation2 + $0xc8] sm:$0xff] }
 0x340   :  { %v10570_v12 = vadd.f32 %v10569_v25, %v10568_v29  ;;  %v10316_v25 = vadd.f32 %v13735_v2, %v9766_v39  ;;  %9289 = vst.msk [vmem:[#allocation2 + $0xb0] sm:$0xff] %vm22_vm9, %v9225_v6  ;;  %10377 = vst.msk [vmem:[#allocation2 + $0x80] sm:$0xff] %vm22_vm9, %v10313_v43 }
 0x341   :  { %v10437_v60 = vld [vmem:[#allocation2 + $0x60] sm:$0xff] }
 0x342   :  { %v10572_v36 = vadd.f32 %v10571_v54, %v10570_v12  ;;  %v9764_v51 = vld [vmem:[#allocation2 + $0x88] sm:$0xff]  ;;  %v19594_v28 = vadd.f32 %v19506_v42, %v10437_v60  ;;  %v10440_v1 = vld [vmem:[#allocation2 + $0x78] sm:$0xff]  ;;  %10380 = vst.msk [vmem:[#allocation2 + $0x98] sm:$0xff] %vm22_vm9, %v10316_v25  ;;  %v19601_v54 = vadd.f32 %v19506_v42, %v10439_v27  ;;  %v13676_v32 = vpop.f32.mrb[248].mxu1 }
 0x343   :  { %v8674_v12 = vld [vmem:[#allocation2 + $0xa8] sm:$0xff]  ;;  %v10314_v22 = vadd.f32 %v10109_v10, %v9764_v51  ;;  %v9229_v43 = vadd.f32 %v13676_v32, %v8679_v53  ;;  %v9044_v39 = vpop.f32.mrb[249].mxu1 }
 0x344   :  { %v10574_v14 = vadd.f32 %v10573_v30, %v10572_v36  ;;  %v10438_v59 = vld [vmem:[#allocation2 + $0x68] sm:$0xff]  ;;  %v9224_v16 = vadd.f32 %v9031_v49, %v8674_v12  ;;  %v10583_v13 = vsel %vm22_vm9, %v19594_v28, 0.0  ;;  %v19612_v36 = vadd.f32 %v19506_v42, %v10440_v1  ;;  %v10443_v9 = vld [vmem:[#allocation2 + $0x90] sm:$0xff]  ;;  %v13677_v25 = vpop.f32.mrb[250].mxu1 }
 0x345   :  { %v19606_v19 = vadd.f32 %v19506_v42, %v10438_v59  ;;  %10378 = vst.msk [vmem:[#allocation2 + $0x88] sm:$0xff] %vm22_vm9, %v10314_v22  ;;  %v10587_v47 = vsel %vm22_vm9, %v19601_v54, 0.0  ;;  %v19629_v57 = vadd.f32 %v19506_v42, %v10443_v9  ;;  %v9227_v38 = vadd.f32 %v9044_v39, %v8677_v55  ;;  %9293 = vst.msk [vmem:[#allocation2 + $0xd0] sm:$0xff] %vm22_vm9, %v9229_v43  ;;  %v9047_v12 = vpop.f32.mrb[251].mxu1 }
 0x346   :  { %v10576_v31 = vadd.f32 %v10575_v24, %v10574_v14  ;;  %9288 = vst.msk [vmem:[#allocation2 + $0xa8] sm:$0xff] %vm22_vm9, %v9224_v16  ;;  %v10589_v3 = vsel %vm22_vm9, %v19612_v36, 0.0  ;;  %v9770_v0 = vld [vmem:[#allocation2 + $0xb8] sm:$0xff]  ;;  %v9228_v22 = vadd.f32 %v9047_v12, %v8678_v44 }
 0x347   :  { %v10585_v23 = vsel %vm22_vm9, %v19606_v19, 0.0  ;;  %v10441_v30 = vld [vmem:[#allocation2 + $0x80] sm:$0xff]  ;;  %v9769_v15 = vld [vmem:[#allocation2 + $0xb0] sm:$0xff]  ;;  %9291 = vst.msk [vmem:[#allocation2 + $0xc0] sm:$0xff] %vm22_vm9, %v9227_v38 }
 0x348   :  { %v10578_v56 = vadd.f32 %v10577_v11, %v10576_v31  ;;  %v19621_v14 = vadd.f32 %v19506_v42, %v10441_v30  ;;  %v9767_v11 = vld [vmem:[#allocation2 + $0xa0] sm:$0xff]  ;;  %9292 = vst.msk [vmem:[#allocation2 + $0xc8] sm:$0xff] %vm22_vm9, %v9228_v22 }
 0x349   :  { %v10444_v27 = vld [vmem:[#allocation2 + $0x98] sm:$0xff] }
 0x34a   :  { %v10580_v29 = vadd.f32 %v10579_v63, %v10578_v56  ;;  %v10591_v45 = vsel %vm22_vm9, %v19621_v14, 0.0  ;;  %v13738_v56 = vpop.f32.mrb[244].mxu0  ;;  %v19641_v1 = vadd.f32 %v19506_v42, %v10444_v27 }
 0x34b   :  { %v10319_v26 = vadd.f32 %v13738_v56, %v9769_v15  ;;  %v10122_v63 = vpop.f32.mrb[245].mxu0 }
 0x34c   :  { %v10582_v8 = vadd.f32 %v10581_v33, %v10580_v29  ;;  %v10442_v31 = vld [vmem:[#allocation2 + $0x88] sm:$0xff]  ;;  %v10317_v2 = vadd.f32 %v10122_v63, %v9767_v11  ;;  %v13739_v29 = vpop.f32.mrb[246].mxu0  ;;  %v9230_v33 = vadd.f32 %v13677_v25, %v8680_v46  ;;  %v10597_v16 = vsel %vm22_vm9, %v19641_v1, 0.0  ;;  %v8683_v11 = vld [vmem:[#allocation2 + $0xf0] sm:$0xff]  ;;  %v8681_v63 = vld [vmem:[#allocation2 + $0xe0] sm:$0xff] }
 0x34d   :  { %v19626_v4 = vadd.f32 %v19506_v42, %v10442_v31  ;;  %v9768_v6 = vld [vmem:[#allocation2 + $0xa8] sm:$0xff]  ;;  %10383 = vst.msk [vmem:[#allocation2 + $0xb0] sm:$0xff] %vm22_vm9, %v10319_v26  ;;  %v10320_v51 = vadd.f32 %v13739_v29, %v9770_v0  ;;  %v10125_v10 = vpop.f32.mrb[247].mxu0  ;;  %v8684_v29 = vld [vmem:[#allocation2 + $0xf8] sm:$0xff] }
 0x34e   :  { %v10584_v7 = vadd.f32 %v10583_v13, %v10582_v8  ;;  %10381 = vst.msk [vmem:[#allocation2 + $0xa0] sm:$0xff] %vm22_vm9, %v10317_v2  ;;  %v10318_v49 = vadd.f32 %v10125_v10, %v9768_v6  ;;  %v10595_v8 = vsel %vm22_vm9, %v19629_v57, 0.0  ;;  %9294 = vst.msk [vmem:[#allocation2 + $0xd8] sm:$0xff] %vm22_vm9, %v9230_v33  ;;  %v9771_v30 = vld [vmem:[#allocation2 + $0xc0] sm:$0xff]  ;;  %v8682_v25 = vld [vmem:[#allocation2 + $0xe8] sm:$0xff] }
 0x34f   :  { %v10593_v58 = vsel %vm22_vm9, %v19626_v4, 0.0  ;;  %10384 = vst.msk [vmem:[#allocation2 + $0xb8] sm:$0xff] %vm22_vm9, %v10320_v51  ;;  %v13742_v9 = vpop.f32.mrb[248].mxu0 }
 0x350   :  { %v10586_v41 = vadd.f32 %v10585_v23, %v10584_v7  ;;  %10382 = vst.msk [vmem:[#allocation2 + $0xa8] sm:$0xff] %vm22_vm9, %v10318_v49  ;;  %v10138_v0 = vpop.f32.mrb[249].mxu0 }
 0x351   :  { %v13743_v43 = vpop.f32.mrb[250].mxu0 }
 0x352   :  { %v10588_v61 = vadd.f32 %v10587_v47, %v10586_v41  ;;  %v9773_v41 = vld [vmem:[#allocation2 + $0xd0] sm:$0xff]  ;;  %v10141_v38 = vpop.f32.mrb[251].mxu0 }
 0x353   :  { %v10323_v56 = vadd.f32 %v13742_v9, %v9773_v41 }
 0x354   :  { %v10590_v24 = vadd.f32 %v10589_v3, %v10588_v61  ;;  %v10447_v47 = vld [vmem:[#allocation2 + $0xb0] sm:$0xff] }
 0x355   :  { %v10445_v13 = vld [vmem:[#allocation2 + $0xa0] sm:$0xff]  ;;  %v19657_v53 = vadd.f32 %v19506_v42, %v10447_v47  ;;  %10387 = vst.msk [vmem:[#allocation2 + $0xd0] sm:$0xff] %vm22_vm9, %v10323_v56 }
 0x356   :  { %v10592_v18 = vadd.f32 %v10591_v45, %v10590_v24  ;;  %v19649_v23 = vadd.f32 %v19506_v42, %v10445_v13  ;;  %v9774_v24 = vld [vmem:[#allocation2 + $0xd8] sm:$0xff]  ;;  %v13680_v45 = vpop.f32.mrb[252].mxu1 }
 0x357   :  { %v10446_v61 = vld [vmem:[#allocation2 + $0xa8] sm:$0xff]  ;;  %v9233_v26 = vadd.f32 %v13680_v45, %v8683_v11  ;;  %v9060_v6 = vpop.f32.mrb[253].mxu1  ;;  %v10448_v55 = vld [vmem:[#allocation2 + $0xb8] sm:$0xff]  ;;  %v10603_v44 = vsel %vm22_vm9, %v19657_v53, 0.0 }
 0x358   :  { %v10594_v60 = vadd.f32 %v10593_v58, %v10592_v18  ;;  %v10599_v3 = vsel %vm22_vm9, %v19649_v23, 0.0  ;;  %v19654_v15 = vadd.f32 %v19506_v42, %v10446_v61  ;;  %v9772_v18 = vld [vmem:[#allocation2 + $0xc8] sm:$0xff]  ;;  %v10321_v58 = vadd.f32 %v10138_v0, %v9771_v30  ;;  %v13681_v27 = vpop.f32.mrb[254].mxu1 }
 0x359   :  { %v9231_v2 = vadd.f32 %v9060_v6, %v8681_v63  ;;  %9297 = vst.msk [vmem:[#allocation2 + $0xf0] sm:$0xff] %vm22_vm9, %v9233_v26  ;;  %v9234_v46 = vadd.f32 %v13681_v27, %v8684_v29  ;;  %v9063_v51 = vpop.f32.mrb[255].mxu1  ;;  %v10322_v10 = vadd.f32 %v10141_v38, %v9772_v18  ;;  %v19669_v12 = vadd.f32 %v19506_v42, %v10448_v55  ;;  %v8685_v63 = vld [vmem:[#allocation2 + $0x100] sm:$0xff]  ;;  %v8688_v29 = vld [vmem:[#allocation2 + $0x118] sm:$0xff] }
 0x35a   :  { %v10596_v59 = vadd.f32 %v10595_v8, %v10594_v60  ;;  %v10601_v32 = vsel %vm22_vm9, %v19654_v15, 0.0  ;;  %v10324_v60 = vadd.f32 %v13743_v43, %v9774_v24  ;;  %10385 = vst.msk [vmem:[#allocation2 + $0xc0] sm:$0xff] %vm22_vm9, %v10321_v58  ;;  %v9232_v33 = vadd.f32 %v9063_v51, %v8682_v25  ;;  %v8686_v25 = vld [vmem:[#allocation2 + $0x108] sm:$0xff] }
 0x35b   :  { %9295 = vst.msk [vmem:[#allocation2 + $0xe0] sm:$0xff] %vm22_vm9, %v9231_v2  ;;  %9298 = vst.msk [vmem:[#allocation2 + $0xf8] sm:$0xff] %vm22_vm9, %v9234_v46  ;;  %v10605_v22 = vsel %vm22_vm9, %v19669_v12, 0.0 }
 0x35c   :  { %v10598_v7 = vadd.f32 %v10597_v16, %v10596_v59  ;;  %10388 = vst.msk [vmem:[#allocation2 + $0xd8] sm:$0xff] %vm22_vm9, %v10324_v60  ;;  %10386 = vst.msk [vmem:[#allocation2 + $0xc8] sm:$0xff] %vm22_vm9, %v10322_v10 }
 0x35d   :  { %9296 = vst.msk [vmem:[#allocation2 + $0xe8] sm:$0xff] %vm22_vm9, %v9232_v33 }
 0x35e   :  { %v10600_v31 = vadd.f32 %v10599_v3, %v10598_v7  ;;  %v10451_v7 = vld [vmem:[#allocation2 + $0xd0] sm:$0xff]  ;;  %v13746_v3 = vpop.f32.mrb[252].mxu0  ;;  %v13684_v11 = vpop.f32.mrb[0].mxu1 }
 0x35f   :  { %v10154_v56 = vpop.f32.mrb[253].mxu0  ;;  %v19685_v18 = vadd.f32 %v19506_v42, %v10451_v7  ;;  %v9076_v6 = vpop.f32.mrb[1].mxu1 }
 0x360   :  { %v10602_v39 = vadd.f32 %v10601_v32, %v10600_v31  ;;  %v9777_v13 = vld [vmem:[#allocation2 + $0xf0] sm:$0xff]  ;;  %v13747_v43 = vpop.f32.mrb[254].mxu0  ;;  %v9235_v2 = vadd.f32 %v9076_v6, %v8685_v63  ;;  %v13685_v27 = vpop.f32.mrb[2].mxu1 }
 0x361   :  { %v10449_v8 = vld [vmem:[#allocation2 + $0xc0] sm:$0xff]  ;;  %v8687_v31 = vld [vmem:[#allocation2 + $0x110] sm:$0xff]  ;;  %v10327_v45 = vadd.f32 %v13746_v3, %v9777_v13  ;;  %v10157_v38 = vpop.f32.mrb[255].mxu0  ;;  %v9238_v46 = vadd.f32 %v13685_v27, %v8688_v29  ;;  %v9079_v51 = vpop.f32.mrb[3].mxu1 }
 0x362   :  { %v10604_v49 = vadd.f32 %v10603_v44, %v10602_v39  ;;  %v19677_v16 = vadd.f32 %v19506_v42, %v10449_v8  ;;  %v9775_v47 = vld [vmem:[#allocation2 + $0xe0] sm:$0xff]  ;;  %v9778_v9 = vld [vmem:[#allocation2 + $0xf8] sm:$0xff]  ;;  %v9237_v26 = vadd.f32 %v13684_v11, %v8687_v31  ;;  %9299 = vst.msk [vmem:[#allocation2 + $0x100] sm:$0xff] %vm22_vm9, %v9235_v2  ;;  %v9236_v33 = vadd.f32 %v9079_v51, %v8686_v25 }
 0x363   :  { %v10450_v41 = vld [vmem:[#allocation2 + $0xc8] sm:$0xff]  ;;  %v10325_v58 = vadd.f32 %v10154_v56, %v9775_v47  ;;  %v10452_v55 = vld [vmem:[#allocation2 + $0xd8] sm:$0xff]  ;;  %10391 = vst.msk [vmem:[#allocation2 + $0xf0] sm:$0xff] %vm22_vm9, %v10327_v45  ;;  %v10328_v60 = vadd.f32 %v13747_v43, %v9778_v9  ;;  %v10611_v44 = vsel %vm22_vm9, %v19685_v18, 0.0  ;;  %9302 = vst.msk [vmem:[#allocation2 + $0x118] sm:$0xff] %vm22_vm9, %v9238_v46 }
 0x364   :  { %v10606_v59 = vadd.f32 %v10605_v22, %v10604_v49  ;;  %v10607_v61 = vsel %vm22_vm9, %v19677_v16, 0.0  ;;  %v19682_v30 = vadd.f32 %v19506_v42, %v10450_v41  ;;  %v9776_v0 = vld [vmem:[#allocation2 + $0xe8] sm:$0xff]  ;;  %9301 = vst.msk [vmem:[#allocation2 + $0x110] sm:$0xff] %vm22_vm9, %v9237_v26  ;;  %v19697_v49 = vadd.f32 %v19506_v42, %v10452_v55  ;;  %9300 = vst.msk [vmem:[#allocation2 + $0x108] sm:$0xff] %vm22_vm9, %v9236_v33  ;;  %v8691_v56 = vld [vmem:[#allocation2 + $0x130] sm:$0xff] }
 0x365   :  { %10389 = vst.msk [vmem:[#allocation2 + $0xe0] sm:$0xff] %vm22_vm9, %v10325_v58  ;;  %v10326_v10 = vadd.f32 %v10157_v38, %v9776_v0  ;;  %10392 = vst.msk [vmem:[#allocation2 + $0xf8] sm:$0xff] %vm22_vm9, %v10328_v60  ;;  %v8689_v55 = vld [vmem:[#allocation2 + $0x120] sm:$0xff]  ;;  %v8692_v46 = vld [vmem:[#allocation2 + $0x138] sm:$0xff] }
 0x366   :  { %v10608_v24 = vadd.f32 %v10607_v61, %v10606_v59  ;;  %v10609_v32 = vsel %vm22_vm9, %v19682_v30, 0.0  ;;  %v10613_v8 = vsel %vm22_vm9, %v19697_v49, 0.0 }
 0x367   :  { %10390 = vst.msk [vmem:[#allocation2 + $0xe8] sm:$0xff] %vm22_vm9, %v10326_v10 }
 0x368   :  { %v10610_v39 = vadd.f32 %v10609_v32, %v10608_v24 }
 0x369   :  { %v9779_v3 = vld [vmem:[#allocation2 + $0x100] sm:$0xff] }
 0x36a   :  { %v10612_v22 = vadd.f32 %v10611_v44, %v10610_v39  ;;  %v10455_v47 = vld [vmem:[#allocation2 + $0xf0] sm:$0xff]  ;;  %v9782_v11 = vld [vmem:[#allocation2 + $0x118] sm:$0xff]  ;;  %v8690_v44 = vld [vmem:[#allocation2 + $0x128] sm:$0xff] }
 0x36b   :  { %v9781_v41 = vld [vmem:[#allocation2 + $0x110] sm:$0xff]  ;;  %v13750_v31 = vpop.f32.mrb[0].mxu0  ;;  %v9780_v63 = vld [vmem:[#allocation2 + $0x108] sm:$0xff]  ;;  %v19713_v6 = vadd.f32 %v19506_v42, %v10455_v47 }
 0x36c   :  { %v10453_v59 = vld [vmem:[#allocation2 + $0xe0] sm:$0xff]  ;;  %v10614_v13 = vadd.f32 %v10613_v8, %v10612_v22  ;;  %v13688_v0 = vpop.f32.mrb[4].mxu1  ;;  %v10331_v32 = vadd.f32 %v13750_v31, %v9781_v41  ;;  %v10170_v26 = vpop.f32.mrb[1].mxu0  ;;  %v10456_v27 = vld [vmem:[#allocation2 + $0xf8] sm:$0xff] }
 0x36d   :  { %v19705_v7 = vadd.f32 %v19506_v42, %v10453_v59  ;;  %v9241_v43 = vadd.f32 %v13688_v0, %v8691_v56  ;;  %v9092_v39 = vpop.f32.mrb[5].mxu1  ;;  %v10329_v2 = vadd.f32 %v10170_v26, %v9779_v3  ;;  %v13751_v29 = vpop.f32.mrb[2].mxu0  ;;  %v19725_v41 = vadd.f32 %v19506_v42, %v10456_v27 }
 0x36e   :  { %v10454_v61 = vld [vmem:[#allocation2 + $0xe8] sm:$0xff]  ;;  %10395 = vst.msk [vmem:[#allocation2 + $0x110] sm:$0xff] %vm22_vm9, %v10331_v32  ;;  %v9239_v38 = vadd.f32 %v9092_v39, %v8689_v55  ;;  %v13689_v25 = vpop.f32.mrb[6].mxu1  ;;  %v10332_v51 = vadd.f32 %v13751_v29, %v9782_v11  ;;  %v10173_v10 = vpop.f32.mrb[3].mxu0  ;;  %v8695_v55 = vld [vmem:[#allocation2 + $0x150] sm:$0xff] }
 0x36f   :  { %v10615_v9 = vsel %vm22_vm9, %v19705_v7, 0.0  ;;  %v19710_v24 = vadd.f32 %v19506_v42, %v10454_v61  ;;  %9305 = vst.msk [vmem:[#allocation2 + $0x130] sm:$0xff] %vm22_vm9, %v9241_v43  ;;  %10393 = vst.msk [vmem:[#allocation2 + $0x100] sm:$0xff] %vm22_vm9, %v10329_v2  ;;  %v9242_v33 = vadd.f32 %v13689_v25, %v8692_v46  ;;  %v9095_v22 = vpop.f32.mrb[7].mxu1  ;;  %v10330_v8 = vadd.f32 %v10173_v10, %v9780_v63  ;;  %v8693_v25 = vld [vmem:[#allocation2 + $0x140] sm:$0xff] }
 0x370   :  { %v10616_v45 = vadd.f32 %v10615_v9, %v10614_v13  ;;  %9303 = vst.msk [vmem:[#allocation2 + $0x120] sm:$0xff] %vm22_vm9, %v9239_v38  ;;  %10396 = vst.msk [vmem:[#allocation2 + $0x118] sm:$0xff] %vm22_vm9, %v10332_v51  ;;  %v9240_v59 = vadd.f32 %v9095_v22, %v8690_v44  ;;  %v10619_v13 = vsel %vm22_vm9, %v19713_v6, 0.0  ;;  %v10621_v61 = vsel %vm22_vm9, %v19725_v41, 0.0 }
 0x371   :  { %v10617_v58 = vsel %vm22_vm9, %v19710_v24, 0.0  ;;  %9306 = vst.msk [vmem:[#allocation2 + $0x138] sm:$0xff] %vm22_vm9, %v9242_v33  ;;  %10394 = vst.msk [vmem:[#allocation2 + $0x108] sm:$0xff] %vm22_vm9, %v10330_v8 }
 0x372   :  { %v10618_v60 = vadd.f32 %v10617_v58, %v10616_v45  ;;  %9304 = vst.msk [vmem:[#allocation2 + $0x128] sm:$0xff] %vm22_vm9, %v9240_v59  ;;  %v8696_v59 = vld [vmem:[#allocation2 + $0x158] sm:$0xff] }
 0x374   :  { %v10620_v47 = vadd.f32 %v10619_v13, %v10618_v60 }
 0x375   :  { %v10459_v45 = vld [vmem:[#allocation2 + $0x110] sm:$0xff] }
 0x376   :  { %v10457_v3 = vld [vmem:[#allocation2 + $0x100] sm:$0xff]  ;;  %v10622_v9 = vadd.f32 %v10621_v61, %v10620_v47  ;;  %v9785_v11 = vld [vmem:[#allocation2 + $0x130] sm:$0xff]  ;;  %v19741_v60 = vadd.f32 %v19506_v42, %v10459_v45 }
 0x377   :  { %v19733_v31 = vadd.f32 %v19506_v42, %v10457_v3  ;;  %v9783_v0 = vld [vmem:[#allocation2 + $0x120] sm:$0xff]  ;;  %v10460_v44 = vld [vmem:[#allocation2 + $0x118] sm:$0xff] }
 0x378   :  { %v10458_v56 = vld [vmem:[#allocation2 + $0x108] sm:$0xff]  ;;  %v9786_v58 = vld [vmem:[#allocation2 + $0x138] sm:$0xff]  ;;  %21600 = vst [vmem:[#allocation9_spill] sm:$0xff] %v19741_v60 }
 0x379   :  { %v10623_v32 = vsel %vm22_vm9, %v19733_v31, 0.0  ;;  %v19738_v26 = vadd.f32 %v19506_v42, %v10458_v56  ;;  %v9784_v27 = vld [vmem:[#allocation2 + $0x128] sm:$0xff] }
 0x37a   :  { %v13754_v63 = vpop.f32.mrb[4].mxu0  ;;  %v10624_v43 = vadd.f32 %v10623_v32, %v10622_v9  ;;  %v13692_v39 = vpop.f32.mrb[8].mxu1  ;;  %v8694_v9 = vld [vmem:[#allocation2 + $0x148] sm:$0xff]  ;;  %v19753_v32 = vadd.f32 %v19506_v42, %v10460_v44  ;;  %v8699_v44 = vld [vmem:[#allocation2 + $0x170] sm:$0xff] }
 0x37b   :  { %21599 = vst [vmem:[#allocation17_spill] sm:$0xff] %v19738_v26  ;;  %v10335_v2 = vadd.f32 %v13754_v63, %v9785_v11  ;;  %v10186_v29 = vpop.f32.mrb[5].mxu0  ;;  %v10625_v38 = vsel %vm22_vm9, %v19738_v26, 0.0  ;;  %v9245_v46 = vadd.f32 %v13692_v39, %v8695_v55  ;;  %v9108_v51 = vpop.f32.mrb[9].mxu1 }
 0x37c   :  { %v10333_v10 = vadd.f32 %v10186_v29, %v9783_v0  ;;  %v13755_v33 = vpop.f32.mrb[6].mxu0  ;;  %v10626_v22 = vadd.f32 %v10625_v38, %v10624_v43  ;;  %v9243_v8 = vadd.f32 %v9108_v51, %v8693_v25  ;;  %v13693_v13 = vpop.f32.mrb[10].mxu1  ;;  %v10627_v0 = vsel %vm22_vm9, %v19741_v60, 0.0  ;;  %21601 = vst [vmem:[#allocation10_spill] sm:$0xff] %v19753_v32 }
 0x37d   :  { %10399 = vst.msk [vmem:[#allocation2 + $0x130] sm:$0xff] %vm22_vm9, %v10335_v2  ;;  %v10336_v47 = vadd.f32 %v13755_v33, %v9786_v58  ;;  %v10189_v61 = vpop.f32.mrb[7].mxu0  ;;  %9309 = vst.msk [vmem:[#allocation2 + $0x150] sm:$0xff] %vm22_vm9, %v9245_v46  ;;  %v9246_v3 = vadd.f32 %v13693_v13, %v8696_v59  ;;  %v9111_v11 = vpop.f32.mrb[11].mxu1  ;;  %v10629_v58 = vsel %vm22_vm9, %v19753_v32, 0.0 }
 0x37e   :  { %10397 = vst.msk [vmem:[#allocation2 + $0x120] sm:$0xff] %vm22_vm9, %v10333_v10  ;;  %v10334_v45 = vadd.f32 %v10189_v61, %v9784_v27  ;;  %9307 = vst.msk [vmem:[#allocation2 + $0x140] sm:$0xff] %vm22_vm9, %v9243_v8  ;;  %v9244_v56 = vadd.f32 %v9111_v11, %v8694_v9  ;;  %v10628_v63 = vadd.f32 %v10627_v0, %v10626_v22  ;;  %v8697_v9 = vld [vmem:[#allocation2 + $0x160] sm:$0xff] }
 0x37f   :  { %10400 = vst.msk [vmem:[#allocation2 + $0x138] sm:$0xff] %vm22_vm9, %v10336_v47  ;;  %9310 = vst.msk [vmem:[#allocation2 + $0x158] sm:$0xff] %vm22_vm9, %v9246_v3 }
 0x380   :  { %10398 = vst.msk [vmem:[#allocation2 + $0x128] sm:$0xff] %vm22_vm9, %v10334_v45  ;;  %9308 = vst.msk [vmem:[#allocation2 + $0x148] sm:$0xff] %vm22_vm9, %v9244_v56  ;;  %v10630_v55 = vadd.f32 %v10629_v58, %v10628_v63 }
 0x384   :  { %v9789_v2 = vld [vmem:[#allocation2 + $0x150] sm:$0xff] }
 0x385   :  { %v10461_v43 = vld [vmem:[#allocation2 + $0x120] sm:$0xff]  ;;  %v10463_v29 = vld [vmem:[#allocation2 + $0x130] sm:$0xff] }
 0x386   :  { %v19761_v39 = vadd.f32 %v19506_v42, %v10461_v43  ;;  %v9787_v38 = vld [vmem:[#allocation2 + $0x140] sm:$0xff]  ;;  %v9790_v10 = vld [vmem:[#allocation2 + $0x158] sm:$0xff]  ;;  %v19769_v47 = vadd.f32 %v19506_v42, %v10463_v29 }
 0x387   :  { %v10462_v27 = vld [vmem:[#allocation2 + $0x128] sm:$0xff]  ;;  %v10464_v0 = vld [vmem:[#allocation2 + $0x138] sm:$0xff] }
 0x388   :  { %21602 = vst [vmem:[#allocation13_spill] sm:$0xff] %v19761_v39  ;;  %v10631_v46 = vsel %vm22_vm9, %v19761_v39, 0.0  ;;  %v19766_v25 = vadd.f32 %v19506_v42, %v10462_v27  ;;  %v13758_v51 = vpop.f32.mrb[8].mxu0  ;;  %v9788_v13 = vld [vmem:[#allocation2 + $0x148] sm:$0xff]  ;;  %21604 = vst [vmem:[#allocation6_spill] sm:$0xff] %v19769_v47  ;;  %v8700_v43 = vld [vmem:[#allocation2 + $0x178] sm:$0xff] }
 0x389   :  { %v10632_v33 = vadd.f32 %v10631_v46, %v10630_v55  ;;  %v13696_v22 = vpop.f32.mrb[12].mxu1  ;;  %v10339_v8 = vadd.f32 %v13758_v51, %v9789_v2  ;;  %v10202_v59 = vpop.f32.mrb[9].mxu0  ;;  %v8698_v46 = vld [vmem:[#allocation2 + $0x168] sm:$0xff] }
 0x38a   :  { %21603 = vst [vmem:[#allocation14_spill] sm:$0xff] %v19766_v25  ;;  %v10633_v61 = vsel %vm22_vm9, %v19766_v25, 0.0  ;;  %v9249_v3 = vadd.f32 %v13696_v22, %v8699_v44  ;;  %v9124_v11 = vpop.f32.mrb[13].mxu1  ;;  %v10337_v45 = vadd.f32 %v10202_v59, %v9787_v38  ;;  %v13759_v56 = vpop.f32.mrb[10].mxu0  ;;  %v19781_v22 = vadd.f32 %v19506_v42, %v10464_v0  ;;  %v8714_v25 = vld [vmem:[#allocation2 + $0x1e8] sm:$0xff] }
 0x38b   :  { %v10634_v63 = vadd.f32 %v10633_v61, %v10632_v33  ;;  %10403 = vst.msk [vmem:[#allocation2 + $0x150] sm:$0xff] %vm22_vm9, %v10339_v8  ;;  %v9247_v58 = vadd.f32 %v9124_v11, %v8697_v9  ;;  %v13697_v55 = vpop.f32.mrb[14].mxu1  ;;  %v10340_v2 = vadd.f32 %v13759_v56, %v9790_v10  ;;  %v10205_v27 = vpop.f32.mrb[11].mxu0  ;;  %v10635_v33 = vsel %vm22_vm9, %v19769_v47, 0.0 }
 0x38c   :  { %9313 = vst.msk [vmem:[#allocation2 + $0x170] sm:$0xff] %vm22_vm9, %v9249_v3  ;;  %10401 = vst.msk [vmem:[#allocation2 + $0x140] sm:$0xff] %vm22_vm9, %v10337_v45  ;;  %v9250_v29 = vadd.f32 %v13697_v55, %v8700_v43  ;;  %v9127_v51 = vpop.f32.mrb[15].mxu1  ;;  %v10338_v44 = vadd.f32 %v10205_v27, %v9788_v13  ;;  %v10637_v8 = vsel %vm22_vm9, %v19781_v22, 0.0  ;;  %v8703_v55 = vld [vmem:[#allocation2 + $0x190] sm:$0xff] }
 0x38d   :  { %9311 = vst.msk [vmem:[#allocation2 + $0x160] sm:$0xff] %vm22_vm9, %v9247_v58  ;;  %10404 = vst.msk [vmem:[#allocation2 + $0x158] sm:$0xff] %vm22_vm9, %v10340_v2  ;;  %v9248_v38 = vadd.f32 %v9127_v51, %v8698_v46  ;;  %v10636_v10 = vadd.f32 %v10635_v33, %v10634_v63  ;;  %v8701_v33 = vld [vmem:[#allocation2 + $0x180] sm:$0xff] }
 0x38e   :  { %21605 = vst [vmem:[#allocation11_spill] sm:$0xff] %v19781_v22  ;;  %9314 = vst.msk [vmem:[#allocation2 + $0x178] sm:$0xff] %vm22_vm9, %v9250_v29 }
 0x38f   :  { %10402 = vst.msk [vmem:[#allocation2 + $0x148] sm:$0xff] %vm22_vm9, %v10338_v44  ;;  %9312 = vst.msk [vmem:[#allocation2 + $0x168] sm:$0xff] %vm22_vm9, %v9248_v38  ;;  %v10638_v13 = vadd.f32 %v10637_v8, %v10636_v10 }
 0x392   :  { %v10467_v9 = vld [vmem:[#allocation2 + $0x150] sm:$0xff] }
 0x393   :  { %v10465_v59 = vld [vmem:[#allocation2 + $0x140] sm:$0xff]  ;;  %v9793_v3 = vld [vmem:[#allocation2 + $0x170] sm:$0xff]  ;;  %v19797_v51 = vadd.f32 %v19506_v42, %v10467_v9 }
 0x394   :  { %v19789_v61 = vadd.f32 %v19506_v42, %v10465_v59  ;;  %v9791_v45 = vld [vmem:[#allocation2 + $0x160] sm:$0xff] }
 0x395   :  { %v9794_v58 = vld [vmem:[#allocation2 + $0x178] sm:$0xff]  ;;  %21608 = vst [vmem:[#allocation15_spill] sm:$0xff] %v19797_v51 }
 0x396   :  { %21606 = vst [vmem:[#allocation12_spill] sm:$0xff] %v19789_v61  ;;  %v10466_v11 = vld [vmem:[#allocation2 + $0x148] sm:$0xff]  ;;  %v10639_v56 = vsel %vm22_vm9, %v19789_v61, 0.0  ;;  %v13762_v63 = vpop.f32.mrb[12].mxu0 }
 0x397   :  { %v19794_v0 = vadd.f32 %v19506_v42, %v10466_v11  ;;  %v10640_v43 = vadd.f32 %v10639_v56, %v10638_v13  ;;  %v13700_v2 = vpop.f32.mrb[16].mxu1  ;;  %v10343_v27 = vadd.f32 %v13762_v63, %v9793_v3  ;;  %v10218_v29 = vpop.f32.mrb[13].mxu0  ;;  %v9792_v46 = vld [vmem:[#allocation2 + $0x168] sm:$0xff]  ;;  %v10468_v11 = vld [vmem:[#allocation2 + $0x158] sm:$0xff] }
 0x398   :  { %v9253_v38 = vadd.f32 %v13700_v2, %v8703_v55  ;;  %v9140_v10 = vpop.f32.mrb[17].mxu1  ;;  %v10341_v8 = vadd.f32 %v10218_v29, %v9791_v45  ;;  %v13763_v59 = vpop.f32.mrb[14].mxu0  ;;  %v8704_v56 = vld [vmem:[#allocation2 + $0x198] sm:$0xff] }
 0x399   :  { %21607 = vst [vmem:[#allocation8_spill] sm:$0xff] %v19794_v0  ;;  %v10641_v44 = vsel %vm22_vm9, %v19794_v0, 0.0  ;;  %10407 = vst.msk [vmem:[#allocation2 + $0x170] sm:$0xff] %vm22_vm9, %v10343_v27  ;;  %v9251_v13 = vadd.f32 %v9140_v10, %v8701_v33  ;;  %v13701_v3 = vpop.f32.mrb[18].mxu1  ;;  %v10344_v63 = vadd.f32 %v13763_v59, %v9794_v58  ;;  %v10221_v22 = vpop.f32.mrb[15].mxu0  ;;  %v8702_v0 = vld [vmem:[#allocation2 + $0x188] sm:$0xff]  ;;  %v19809_v27 = vadd.f32 %v19506_v42, %v10468_v11 }
 0x39a   :  { %v10642_v61 = vadd.f32 %v10641_v44, %v10640_v43  ;;  %9317 = vst.msk [vmem:[#allocation2 + $0x190] sm:$0xff] %vm22_vm9, %v9253_v38  ;;  %10405 = vst.msk [vmem:[#allocation2 + $0x160] sm:$0xff] %vm22_vm9, %v10341_v8  ;;  %v9254_v9 = vadd.f32 %v13701_v3, %v8704_v56  ;;  %v9143_v55 = vpop.f32.mrb[19].mxu1  ;;  %v10342_v2 = vadd.f32 %v10221_v22, %v9792_v46  ;;  %v10643_v43 = vsel %vm22_vm9, %v19797_v51, 0.0  ;;  %v8707_v56 = vld [vmem:[#allocation2 + $0x1b0] sm:$0xff] }
 0x39b   :  { %9315 = vst.msk [vmem:[#allocation2 + $0x180] sm:$0xff] %vm22_vm9, %v9251_v13  ;;  %10408 = vst.msk [vmem:[#allocation2 + $0x178] sm:$0xff] %vm22_vm9, %v10344_v63  ;;  %v9252_v45 = vadd.f32 %v9143_v55, %v8702_v0  ;;  %v10645_v22 = vsel %vm22_vm9, %v19809_v27, 0.0  ;;  %v19819_v0 = vld [vmem:[%s21443_s2] ss:$0 sm:$0xff] }
 0x39c   :  { %21609 = vst [vmem:[#allocation7_spill] sm:$0xff] %v19809_v27  ;;  %9318 = vst.msk [vmem:[#allocation2 + $0x198] sm:$0xff] %vm22_vm9, %v9254_v9  ;;  %v10644_v58 = vadd.f32 %v10643_v43, %v10642_v61 }
 0x39d   :  { %10406 = vst.msk [vmem:[#allocation2 + $0x168] sm:$0xff] %vm22_vm9, %v10342_v2  ;;  %9316 = vst.msk [vmem:[#allocation2 + $0x188] sm:$0xff] %vm22_vm9, %v9252_v45 }
 0x39e   :  { %v10646_v46 = vadd.f32 %v10645_v22, %v10644_v58  ;;  %v8705_v58 = vld [vmem:[#allocation2 + $0x1a0] sm:$0xff] }
 0x3a0   :  { %v10471_v38 = vld [vmem:[#allocation2 + $0x170] sm:$0xff] }
 0x3a1   :  { %v10469_v29 = vld [vmem:[#allocation2 + $0x160] sm:$0xff]  ;;  %v9797_v44 = vld [vmem:[#allocation2 + $0x190] sm:$0xff]  ;;  %v19830_v2 = vadd.f32 %v19819_v0, %v10471_v38 }
 0x3a2   :  { %v19822_v42 = vadd.f32 %v19819_v0, %v10469_v29  ;;  %v9795_v10 = vld [vmem:[#allocation2 + $0x180] sm:$0xff] }
 0x3a3   :  { %v9798_v11 = vld [vmem:[#allocation2 + $0x198] sm:$0xff]  ;;  %21612 = vst [vmem:[#allocation19_spill] sm:$0xff] %v19830_v2 }
 0x3a4   :  { %21610 = vst [vmem:[#allocation16_spill] sm:$0xff] %v19822_v42  ;;  %v10470_v33 = vld [vmem:[#allocation2 + $0x168] sm:$0xff]  ;;  %v10647_v61 = vsel %vm22_vm9, %v19822_v42, 0.0  ;;  %v10472_v42 = vld [vmem:[#allocation2 + $0x178] sm:$0xff] }
 0x3a5   :  { %v19827_v8 = vadd.f32 %v19819_v0, %v10470_v33  ;;  %v13766_v59 = vpop.f32.mrb[16].mxu0  ;;  %v10648_v13 = vadd.f32 %v10647_v61, %v10646_v46  ;;  %v9796_v55 = vld [vmem:[#allocation2 + $0x188] sm:$0xff]  ;;  %v8708_v61 = vld [vmem:[#allocation2 + $0x1b8] sm:$0xff] }
 0x3a6   :  { %v10347_v63 = vadd.f32 %v13766_v59, %v9797_v44  ;;  %v10234_v9 = vpop.f32.mrb[17].mxu0 }
 0x3a7   :  { %21611 = vst [vmem:[#allocation18_spill] sm:$0xff] %v19827_v8  ;;  %v10649_v45 = vsel %vm22_vm9, %v19827_v8, 0.0  ;;  %v10345_v29 = vadd.f32 %v10234_v9, %v9795_v10  ;;  %v13767_v33 = vpop.f32.mrb[18].mxu0  ;;  %v8706_v8 = vld [vmem:[#allocation2 + $0x1a8] sm:$0xff] }
 0x3a8   :  { %v13704_v3 = vpop.f32.mrb[20].mxu1  ;;  %v10650_v27 = vadd.f32 %v10649_v45, %v10648_v13  ;;  %10411 = vst.msk [vmem:[#allocation2 + $0x190] sm:$0xff] %vm22_vm9, %v10347_v63  ;;  %v10348_v59 = vadd.f32 %v13767_v33, %v9798_v11  ;;  %v10237_v51 = vpop.f32.mrb[19].mxu0  ;;  %v10651_v13 = vsel %vm22_vm9, %v19830_v2, 0.0  ;;  %v19842_v63 = vadd.f32 %v19819_v0, %v10472_v42 }
 0x3a9   :  { %v9257_v43 = vadd.f32 %v13704_v3, %v8707_v56  ;;  %v9156_v22 = vpop.f32.mrb[21].mxu1  ;;  %10409 = vst.msk [vmem:[#allocation2 + $0x180] sm:$0xff] %vm22_vm9, %v10345_v29  ;;  %v10346_v3 = vadd.f32 %v10237_v51, %v9796_v55 }
 0x3aa   :  { %v9255_v46 = vadd.f32 %v9156_v22, %v8705_v58  ;;  %v13705_v44 = vpop.f32.mrb[22].mxu1  ;;  %10412 = vst.msk [vmem:[#allocation2 + $0x198] sm:$0xff] %vm22_vm9, %v10348_v59  ;;  %21613 = vst [vmem:[#allocation20_spill] sm:$0xff] %v19842_v63  ;;  %v10652_v11 = vadd.f32 %v10651_v13, %v10650_v27  ;;  %v10653_v51 = vsel %vm22_vm9, %v19842_v63, 0.0 }
 0x3ab   :  { %9321 = vst.msk [vmem:[#allocation2 + $0x1b0] sm:$0xff] %vm22_vm9, %v9257_v43  ;;  %v9258_v38 = vadd.f32 %v13705_v44, %v8708_v61  ;;  %v9159_v56 = vpop.f32.mrb[23].mxu1  ;;  %10410 = vst.msk [vmem:[#allocation2 + $0x188] sm:$0xff] %vm22_vm9, %v10346_v3  ;;  %v8711_v61 = vld [vmem:[#allocation2 + $0x1d0] sm:$0xff] }
 0x3ac   :  { %9319 = vst.msk [vmem:[#allocation2 + $0x1a0] sm:$0xff] %vm22_vm9, %v9255_v46  ;;  %v9256_v10 = vadd.f32 %v9159_v56, %v8706_v8  ;;  %v10654_v55 = vadd.f32 %v10653_v51, %v10652_v11  ;;  %v8709_v11 = vld [vmem:[#allocation2 + $0x1c0] sm:$0xff] }
 0x3ad   :  { %9322 = vst.msk [vmem:[#allocation2 + $0x1b8] sm:$0xff] %vm22_vm9, %v9258_v38 }
 0x3ae   :  { %9320 = vst.msk [vmem:[#allocation2 + $0x1a8] sm:$0xff] %vm22_vm9, %v9256_v10 }
 0x3af   :  { %v10475_v43 = vld [vmem:[#allocation2 + $0x190] sm:$0xff] }
 0x3b0   :  { %v10473_v9 = vld [vmem:[#allocation2 + $0x180] sm:$0xff]  ;;  %v19858_v3 = vadd.f32 %v19819_v0, %v10475_v43 }
 0x3b1   :  { %v19850_v8 = vadd.f32 %v19819_v0, %v10473_v9 }
 0x3b2   :  { %v9801_v45 = vld [vmem:[#allocation2 + $0x1b0] sm:$0xff]  ;;  %v10474_v58 = vld [vmem:[#allocation2 + $0x188] sm:$0xff]  ;;  %21616 = vst [vmem:[#allocation23_spill] sm:$0xff] %v19858_v3 }
 0x3b3   :  { %21614 = vst [vmem:[#allocation21_spill] sm:$0xff] %v19850_v8  ;;  %v9799_v42 = vld [vmem:[#allocation2 + $0x1a0] sm:$0xff]  ;;  %v10655_v22 = vsel %vm22_vm9, %v19850_v8, 0.0  ;;  %v19855_v29 = vadd.f32 %v19819_v0, %v10474_v58  ;;  %v10476_v8 = vld [vmem:[#allocation2 + $0x198] sm:$0xff] }
 0x3b4   :  { %v9802_v33 = vld [vmem:[#allocation2 + $0x1b8] sm:$0xff]  ;;  %v10656_v46 = vadd.f32 %v10655_v22, %v10654_v55 }
 0x3b5   :  { %21615 = vst [vmem:[#allocation22_spill] sm:$0xff] %v19855_v29  ;;  %v9800_v56 = vld [vmem:[#allocation2 + $0x1a8] sm:$0xff]  ;;  %v10657_v10 = vsel %vm22_vm9, %v19855_v29, 0.0  ;;  %v8712_v22 = vld [vmem:[#allocation2 + $0x1d8] sm:$0xff] }
 0x3b6   :  { %v13770_v27 = vpop.f32.mrb[20].mxu0  ;;  %v10658_v63 = vadd.f32 %v10657_v10, %v10656_v46  ;;  %v8710_v29 = vld [vmem:[#allocation2 + $0x1c8] sm:$0xff]  ;;  %v10659_v46 = vsel %vm22_vm9, %v19858_v3, 0.0 }
 0x3b7   :  { %v13708_v44 = vpop.f32.mrb[24].mxu1  ;;  %v10351_v59 = vadd.f32 %v13770_v27, %v9801_v45  ;;  %v10250_v38 = vpop.f32.mrb[21].mxu0 }
 0x3b8   :  { %v9261_v13 = vadd.f32 %v13708_v44, %v8711_v61  ;;  %v9172_v51 = vpop.f32.mrb[25].mxu1  ;;  %v10349_v9 = vadd.f32 %v10250_v38, %v9799_v42  ;;  %v13771_v58 = vpop.f32.mrb[22].mxu0 }
 0x3b9   :  { %10415 = vst.msk [vmem:[#allocation2 + $0x1b0] sm:$0xff] %vm22_vm9, %v10351_v59  ;;  %v9259_v55 = vadd.f32 %v9172_v51, %v8709_v11  ;;  %v13709_v45 = vpop.f32.mrb[26].mxu1  ;;  %v10352_v27 = vadd.f32 %v13771_v58, %v9802_v33  ;;  %v10253_v2 = vpop.f32.mrb[23].mxu0  ;;  %v19870_v59 = vadd.f32 %v19819_v0, %v10476_v8  ;;  %v10660_v33 = vadd.f32 %v10659_v46, %v10658_v63 }
 0x3ba   :  { %9325 = vst.msk [vmem:[#allocation2 + $0x1d0] sm:$0xff] %vm22_vm9, %v9261_v13  ;;  %10413 = vst.msk [vmem:[#allocation2 + $0x1a0] sm:$0xff] %vm22_vm9, %v10349_v9  ;;  %v9262_v43 = vadd.f32 %v13709_v45, %v8712_v22  ;;  %v9175_v61 = vpop.f32.mrb[27].mxu1  ;;  %v10350_v44 = vadd.f32 %v10253_v2, %v9800_v56  ;;  %v8715_v22 = vld [vmem:[#allocation2 + $0x1f0] sm:$0xff] }
 0x3bb   :  { %9323 = vst.msk [vmem:[#allocation2 + $0x1c0] sm:$0xff] %vm22_vm9, %v9259_v55  ;;  %10416 = vst.msk [vmem:[#allocation2 + $0x1b8] sm:$0xff] %vm22_vm9, %v10352_v27  ;;  %v9260_v42 = vadd.f32 %v9175_v61, %v8710_v29  ;;  %v10661_v2 = vsel %vm22_vm9, %v19870_v59, 0.0 }
 0x3bc   :  { %21617 = vst [vmem:[#allocation24_spill] sm:$0xff] %v19870_v59  ;;  %9326 = vst.msk [vmem:[#allocation2 + $0x1d8] sm:$0xff] %vm22_vm9, %v9262_v43  ;;  %v10662_v56 = vadd.f32 %v10661_v2, %v10660_v33  ;;  %v8713_v33 = vld [vmem:[#allocation2 + $0x1e0] sm:$0xff] }
 0x3bd   :  { %10414 = vst.msk [vmem:[#allocation2 + $0x1a8] sm:$0xff] %vm22_vm9, %v10350_v44  ;;  %9324 = vst.msk [vmem:[#allocation2 + $0x1c8] sm:$0xff] %vm22_vm9, %v9260_v42 }
 0x3c0   :  { %v10479_v13 = vld [vmem:[#allocation2 + $0x1b0] sm:$0xff] }
 0x3c1   :  { %v10477_v38 = vld [vmem:[#allocation2 + $0x1a0] sm:$0xff]  ;;  %v9805_v10 = vld [vmem:[#allocation2 + $0x1d0] sm:$0xff]  ;;  %v19886_v44 = vadd.f32 %v19819_v0, %v10479_v13 }
 0x3c2   :  { %v19878_v29 = vadd.f32 %v19819_v0, %v10477_v38  ;;  %v9803_v8 = vld [vmem:[#allocation2 + $0x1c0] sm:$0xff]  ;;  %v10480_v59 = vld [vmem:[#allocation2 + $0x1b8] sm:$0xff] }
 0x3c3   :  { %v9806_v58 = vld [vmem:[#allocation2 + $0x1d8] sm:$0xff] }
 0x3c4   :  { %v10478_v11 = vld [vmem:[#allocation2 + $0x1a8] sm:$0xff]  ;;  %v10663_v51 = vsel %vm22_vm9, %v19878_v29, 0.0 }
 0x3c5   :  { %v19883_v9 = vadd.f32 %v19819_v0, %v10478_v11  ;;  %v13774_v63 = vpop.f32.mrb[24].mxu0  ;;  %v10664_v55 = vadd.f32 %v10663_v51, %v10662_v56  ;;  %v9804_v61 = vld [vmem:[#allocation2 + $0x1c8] sm:$0xff]  ;;  %v8716_v51 = vld [vmem:[#allocation2 + $0x1f8] sm:$0xff] }
 0x3c6   :  { %v13712_v45 = vpop.f32.mrb[28].mxu1  ;;  %v10355_v27 = vadd.f32 %v13774_v63, %v9805_v10  ;;  %v10266_v43 = vpop.f32.mrb[25].mxu0 }
 0x3c7   :  { %v10665_v42 = vsel %vm22_vm9, %v19883_v9, 0.0  ;;  %v9265_v46 = vadd.f32 %v13712_v45, %v8715_v22  ;;  %v9188_v2 = vpop.f32.mrb[29].mxu1  ;;  %v10353_v38 = vadd.f32 %v10266_v43, %v9803_v8  ;;  %v13775_v11 = vpop.f32.mrb[26].mxu0 }
 0x3c8   :  { %v10666_v3 = vadd.f32 %v10665_v42, %v10664_v55  ;;  %10419 = vst.msk [vmem:[#allocation2 + $0x1d0] sm:$0xff] %vm22_vm9, %v10355_v27  ;;  %v9263_v56 = vadd.f32 %v9188_v2, %v8713_v33  ;;  %v13713_v10 = vpop.f32.mrb[30].mxu1  ;;  %v10356_v63 = vadd.f32 %v13775_v11, %v9806_v58  ;;  %v10269_v47 = vpop.f32.mrb[27].mxu0  ;;  %v10667_v55 = vsel %vm22_vm9, %v19886_v44, 0.0 }
 0x3c9   :  { %9329 = vst.msk [vmem:[#allocation2 + $0x1f0] sm:$0xff] %vm22_vm9, %v9265_v46  ;;  %10417 = vst.msk [vmem:[#allocation2 + $0x1c0] sm:$0xff] %vm22_vm9, %v10353_v38  ;;  %v9266_v13 = vadd.f32 %v13713_v10, %v8716_v51  ;;  %v9191_v22 = vpop.f32.mrb[31].mxu1  ;;  %v10354_v45 = vadd.f32 %v10269_v47, %v9804_v61  ;;  %v19898_v27 = vadd.f32 %v19819_v0, %v10480_v59 }
 0x3ca   :  { %9327 = vst.msk [vmem:[#allocation2 + $0x1e0] sm:$0xff] %vm22_vm9, %v9263_v56  ;;  %10420 = vst.msk [vmem:[#allocation2 + $0x1d8] sm:$0xff] %vm22_vm9, %v10356_v63  ;;  %v9264_v8 = vadd.f32 %v9191_v22, %v8714_v25  ;;  %v10668_v58 = vadd.f32 %v10667_v55, %v10666_v3 }
 0x3cb   :  { %9330 = vst.msk [vmem:[#allocation2 + $0x1f8] sm:$0xff] %vm22_vm9, %v9266_v13  ;;  %10418 = vst.msk [vmem:[#allocation2 + $0x1c8] sm:$0xff] %vm22_vm9, %v10354_v45  ;;  %v10669_v61 = vsel %vm22_vm9, %v19898_v27, 0.0 }
 0x3cc   :  { %9328 = vst.msk [vmem:[#allocation2 + $0x1e8] sm:$0xff] %vm22_vm9, %v9264_v8  ;;  %v10670_v33 = vadd.f32 %v10669_v61, %v10668_v58 }
 0x3ce   :  { %v13778_v43 = vpop.f32.mrb[28].mxu0 }
 0x3cf   :  { %v10282_v47 = vpop.f32.mrb[29].mxu0  ;;  %v10483_v25 = vld [vmem:[#allocation2 + $0x1d0] sm:$0xff] }
 0x3d0   :  { %v13779_v42 = vpop.f32.mrb[30].mxu0  ;;  %v10481_v46 = vld [vmem:[#allocation2 + $0x1c0] sm:$0xff]  ;;  %v9809_v2 = vld [vmem:[#allocation2 + $0x1f0] sm:$0xff]  ;;  %v10554_v63 = vadd.f32 %v19819_v0, %v10483_v25 }
 0x3d1   :  { %v10285_v38 = vpop.f32.mrb[31].mxu0  ;;  %v10552_v59 = vadd.f32 %v19819_v0, %v10481_v46  ;;  %v10359_v11 = vadd.f32 %v13778_v43, %v9809_v2  ;;  %v9807_v56 = vld [vmem:[#allocation2 + $0x1e0] sm:$0xff]  ;;  %v10484_v22 = vld [vmem:[#allocation2 + $0x1d8] sm:$0xff] }
 0x3d2   :  { %v10482_v51 = vld [vmem:[#allocation2 + $0x1c8] sm:$0xff]  ;;  %v10357_v10 = vadd.f32 %v10282_v47, %v9807_v56  ;;  %v9810_v3 = vld [vmem:[#allocation2 + $0x1f8] sm:$0xff]  ;;  %v10555_v47 = vadd.f32 %v19819_v0, %v10484_v22  ;;  %v10675_v46 = vsel %vm22_vm9, %v10554_v63, 0.0 }
 0x3d3   :  { %v10671_v13 = vsel %vm22_vm9, %v10552_v59, 0.0  ;;  %v10553_v45 = vadd.f32 %v19819_v0, %v10482_v51  ;;  %10423 = vst.msk [vmem:[#allocation2 + $0x1f0] sm:$0xff] %vm22_vm9, %v10359_v11  ;;  %v10360_v8 = vadd.f32 %v13779_v42, %v9810_v3  ;;  %v9808_v55 = vld [vmem:[#allocation2 + $0x1e8] sm:$0xff] }
 0x3d4   :  { %v10672_v58 = vadd.f32 %v10671_v13, %v10670_v33  ;;  %10421 = vst.msk [vmem:[#allocation2 + $0x1e0] sm:$0xff] %vm22_vm9, %v10357_v10  ;;  %v10358_v61 = vadd.f32 %v10285_v38, %v9808_v55  ;;  %v10677_v11 = vsel %vm22_vm9, %v10555_v47, 0.0 }
 0x3d5   :  { %v10673_v43 = vsel %vm22_vm9, %v10553_v45, 0.0  ;;  %10424 = vst.msk [vmem:[#allocation2 + $0x1f8] sm:$0xff] %vm22_vm9, %v10360_v8 }
 0x3d6   :  { %v10674_v25 = vadd.f32 %v10673_v43, %v10672_v58  ;;  %10422 = vst.msk [vmem:[#allocation2 + $0x1e8] sm:$0xff] %vm22_vm9, %v10358_v61 }
 0x3d8   :  { %v10676_v2 = vadd.f32 %v10675_v46, %v10674_v25 }
 0x3da   :  { %v10487_v42 = vld [vmem:[#allocation2 + $0x1f0] sm:$0xff]  ;;  %v10678_v33 = vadd.f32 %v10677_v11, %v10676_v2 }
 0x3db   :  { %v10485_v56 = vld [vmem:[#allocation2 + $0x1e0] sm:$0xff]  ;;  %v10558_v3 = vadd.f32 %v19819_v0, %v10487_v42 }
 0x3dc   :  { %v10556_v51 = vadd.f32 %v19819_v0, %v10485_v56  ;;  %v10488_v38 = vld [vmem:[#allocation2 + $0x1f8] sm:$0xff] }
 0x3dd   :  { %v10486_v10 = vld [vmem:[#allocation2 + $0x1e8] sm:$0xff]  ;;  %v10559_v55 = vadd.f32 %v19819_v0, %v10488_v38  ;;  %v10683_v43 = vsel %vm22_vm9, %v10558_v3, 0.0 }
 0x3de   :  { %v10679_v13 = vsel %vm22_vm9, %v10556_v51, 0.0  ;;  %v10557_v22 = vadd.f32 %v19819_v0, %v10486_v10 }
 0x3df   :  { %v10680_v8 = vadd.f32 %v10679_v13, %v10678_v33  ;;  %v10685_v46 = vsel %vm22_vm9, %v10559_v55, 0.0 }
 0x3e0   :  { %v10681_v58 = vsel %vm22_vm9, %v10557_v22, 0.0 }
 0x3e1   :  { %v10682_v61 = vadd.f32 %v10681_v58, %v10680_v8 }
 0x3e3   :  { %v10684_v25 = vadd.f32 %v10683_v43, %v10682_v61 }
 0x3e5   :  { %v10686_v2 = vadd.f32 %v10685_v46, %v10684_v25 }
 0x3e7   :  { %v10687_v11 = vrot.slane %v10686_v2, 4 }
 0x3e9   :  { %v10688_v56 = vadd.f32 %v10687_v11, %v10686_v2 }
 0x3eb   :  { %v10689_v39 = vrot.slane %v10688_v56, 2 }
 0x3ed   :  { %v10690_v42 = vadd.f32 %v10689_v39, %v10688_v56 }
 0x3ef   :  { %v10691_v32 = vrot.slane %v10690_v42, 1 }
 0x3f1   :  { %v10692_v60 = vadd.f32 %v10691_v32, %v10690_v42 }
 0x3f3   :  { %v19925_v26 = vmul.f32 0.001953125, %v10692_v60 }
 0x3f5   :  { %v19929_v0 = vsub.f32 %v19878_v29, %v19925_v26  ;;  %v19933_v33 = vsub.f32 %v19883_v9, %v19925_v26  ;;  %v19937_v38 = vsub.f32 %v19886_v44, %v19925_v26  ;;  %v19941_v10 = vsub.f32 %v19898_v27, %v19925_v26 }
 0x3f6   :  { %v19944_v32 = vsub.f32 %v10552_v59, %v19925_v26  ;;  %v19947_v60 = vsub.f32 %v10553_v45, %v19925_v26  ;;  %v19950_v39 = vsub.f32 %v10554_v63, %v19925_v26  ;;  %v19953_v29 = vsub.f32 %v10555_v47, %v19925_v26 }
 0x3f7   :  { %v19956_v9 = vsub.f32 %v10556_v51, %v19925_v26  ;;  %v19959_v44 = vsub.f32 %v10557_v22, %v19925_v26  ;;  %v19962_v27 = vsub.f32 %v10558_v3, %v19925_v26  ;;  %v19965_v59 = vsub.f32 %v10559_v55, %v19925_v26 }
 0x3f8   :  { %21618 = vst [vmem:[#allocation25_spill] sm:$0xff] %v19950_v39  ;;  %21619 = vst [vmem:[#allocation26_spill] sm:$0xff] %v19953_v29  ;;  %v19969_v45 = vsub.f32 %v19513_v17, %v19925_v26  ;;  %v19973_v63 = vsub.f32 %v19522_v40, %v19925_v26  ;;  %v19977_v47 = vsub.f32 %v19519_v35, %v19925_v26 }
 0x3f9   :  { %21620 = vst [vmem:[#allocation27_spill] sm:$0xff] %v19956_v9  ;;  %21621 = vst [vmem:[#allocation28_spill] sm:$0xff] %v19962_v27  ;;  %v19981_v51 = vsub.f32 %v19528_v20, %v19925_v26  ;;  %v19989_v17 = vsub.f32 %v19541_v52, %v19925_v26  ;;  %v19995_v35 = vsub.f32 %v19552_v50, %v19925_v26 }
 0x3fa   :  { %v10759_v3 = vmul.f32 %v19969_v45, %v19969_v45  ;;  %v10760_v13 = vmul.f32 %v19973_v63, %v19973_v63  ;;  %v10761_v40 = vmul.f32 %v19977_v47, %v19977_v47  ;;  %v20003_v58 = vsub.f32 %v19547_v48, %v19925_v26 }
 0x3fb   :  { %v10762_v20 = vmul.f32 %v19981_v51, %v19981_v51  ;;  %v10763_v52 = vmul.f32 %v19989_v17, %v19989_v17  ;;  %v20010_v50 = vsub.f32 %v19556_v21, %v19925_v26  ;;  %v10764_v25 = vmul.f32 %v19995_v35, %v19995_v35 }
 0x3fc   :  { %v10823_v22 = vsel %vm22_vm9, %v10759_v3, 0.0  ;;  %v10824_v8 = vsel %vm22_vm9, %v10760_v13, 0.0  ;;  %v10826_v61 = vsel %vm22_vm9, %v10761_v40, 0.0  ;;  %v20017_v48 = vsub.f32 %v19569_v62, %v19925_v26 }
 0x3fd   :  { %v10825_v55 = vadd.f32 %v10824_v8, %v10823_v22  ;;  %v10828_v46 = vsel %vm22_vm9, %v10762_v20, 0.0  ;;  %v10765_v11 = vmul.f32 %v20003_v58, %v20003_v58  ;;  %v10830_v56 = vsel %vm22_vm9, %v10763_v52, 0.0 }
 0x3fe   :  { %v20024_v21 = vsub.f32 %v19580_v34, %v19925_v26  ;;  %v10766_v3 = vmul.f32 %v20010_v50, %v20010_v50  ;;  %v10832_v13 = vsel %vm22_vm9, %v10764_v25, 0.0  ;;  %v20031_v62 = vsub.f32 %v19575_v37, %v19925_v26 }
 0x3ff   :  { %v10827_v43 = vadd.f32 %v10826_v61, %v10825_v55  ;;  %v10767_v20 = vmul.f32 %v20017_v48, %v20017_v48  ;;  %v10834_v22 = vsel %vm22_vm9, %v10765_v11, 0.0  ;;  %v20038_v34 = vsub.f32 %v19584_v5, %v19925_v26 }
 0x400   :  { %v10768_v55 = vmul.f32 %v20024_v21, %v20024_v21  ;;  %v10836_v52 = vsel %vm22_vm9, %v10766_v3, 0.0  ;;  %v20045_v37 = vsub.f32 %v19594_v28, %v19925_v26  ;;  %v20052_v5 = vsub.f32 %v19606_v19, %v19925_v26 }
 0x401   :  { %v10829_v2 = vadd.f32 %v10828_v46, %v10827_v43  ;;  %v10769_v43 = vmul.f32 %v20031_v62, %v20031_v62  ;;  %v10838_v25 = vsel %vm22_vm9, %v10767_v20, 0.0  ;;  %v20059_v28 = vsub.f32 %v19601_v54, %v19925_v26 }
 0x402   :  { %v10840_v11 = vsel %vm22_vm9, %v10768_v55, 0.0  ;;  %v20066_v19 = vsub.f32 %v19612_v36, %v19925_v26  ;;  %v20073_v54 = vsub.f32 %v19621_v14, %v19925_v26  ;;  %v20080_v36 = vsub.f32 %v19626_v4, %v19925_v26 }
 0x403   :  { %v10831_v42 = vadd.f32 %v10830_v56, %v10829_v2  ;;  %v10770_v2 = vmul.f32 %v20038_v34, %v20038_v34  ;;  %v10842_v3 = vsel %vm22_vm9, %v10769_v43, 0.0  ;;  %v20087_v14 = vsub.f32 %v19629_v57, %v19925_v26 }
 0x404   :  { %v20094_v4 = vsub.f32 %v19641_v1, %v19925_v26  ;;  %v20101_v57 = vsub.f32 %v19649_v23, %v19925_v26  ;;  %v20108_v1 = vsub.f32 %v19654_v15, %v19925_v26  ;;  %v20115_v23 = vsub.f32 %v19657_v53, %v19925_v26 }
 0x405   :  { %v10833_v40 = vadd.f32 %v10832_v13, %v10831_v42  ;;  %v10771_v42 = vmul.f32 %v20045_v37, %v20045_v37  ;;  %v10844_v20 = vsel %vm22_vm9, %v10770_v2, 0.0  ;;  %v20122_v15 = vsub.f32 %v19669_v12, %v19925_v26 }
 0x406   :  { %v20129_v53 = vsub.f32 %v19677_v16, %v19925_v26  ;;  %v20136_v12 = vsub.f32 %v19682_v30, %v19925_v26  ;;  %v20143_v16 = vsub.f32 %v19685_v18, %v19925_v26  ;;  %v20150_v30 = vsub.f32 %v19697_v49, %v19925_v26 }
 0x407   :  { %v10835_v8 = vadd.f32 %v10834_v22, %v10833_v40  ;;  %v10772_v40 = vmul.f32 %v20052_v5, %v20052_v5  ;;  %v10846_v55 = vsel %vm22_vm9, %v10771_v42, 0.0  ;;  %v20157_v18 = vsub.f32 %v19705_v7, %v19925_v26 }
 0x408   :  { %v20164_v49 = vsub.f32 %v19710_v24, %v19925_v26  ;;  %v20171_v7 = vsub.f32 %v19713_v6, %v19925_v26  ;;  %v20178_v24 = vsub.f32 %v19725_v41, %v19925_v26  ;;  %v20185_v6 = vsub.f32 %v19733_v31, %v19925_v26 }
 0x409   :  { %v10837_v61 = vadd.f32 %v10836_v52, %v10835_v8  ;;  %v10773_v8 = vmul.f32 %v20059_v28, %v20059_v28  ;;  %v10848_v43 = vsel %vm22_vm9, %v10772_v40, 0.0 }
 0x40b   :  { %v10839_v46 = vadd.f32 %v10838_v25, %v10837_v61  ;;  %v10774_v61 = vmul.f32 %v20066_v19, %v20066_v19  ;;  %v10850_v2 = vsel %vm22_vm9, %v10773_v8, 0.0 }
 0x40d   :  { %v10841_v56 = vadd.f32 %v10840_v11, %v10839_v46  ;;  %v10775_v46 = vmul.f32 %v20073_v54, %v20073_v54  ;;  %v10852_v42 = vsel %vm22_vm9, %v10774_v61, 0.0 }
 0x40f   :  { %v10843_v13 = vadd.f32 %v10842_v3, %v10841_v56  ;;  %v10776_v56 = vmul.f32 %v20080_v36, %v20080_v36  ;;  %v10854_v40 = vsel %vm22_vm9, %v10775_v46, 0.0 }
 0x411   :  { %v10845_v22 = vadd.f32 %v10844_v20, %v10843_v13  ;;  %v10777_v13 = vmul.f32 %v20087_v14, %v20087_v14  ;;  %v10856_v8 = vsel %vm22_vm9, %v10776_v56, 0.0 }
 0x413   :  { %v10847_v52 = vadd.f32 %v10846_v55, %v10845_v22  ;;  %v10778_v22 = vmul.f32 %v20094_v4, %v20094_v4  ;;  %v10858_v61 = vsel %vm22_vm9, %v10777_v13, 0.0 }
 0x415   :  { %v10849_v25 = vadd.f32 %v10848_v43, %v10847_v52  ;;  %v10779_v52 = vmul.f32 %v20101_v57, %v20101_v57  ;;  %v10860_v46 = vsel %vm22_vm9, %v10778_v22, 0.0 }
 0x417   :  { %v10851_v11 = vadd.f32 %v10850_v2, %v10849_v25  ;;  %v10780_v25 = vmul.f32 %v20108_v1, %v20108_v1  ;;  %v10862_v56 = vsel %vm22_vm9, %v10779_v52, 0.0 }
 0x419   :  { %v10853_v3 = vadd.f32 %v10852_v42, %v10851_v11  ;;  %v10781_v11 = vmul.f32 %v20115_v23, %v20115_v23  ;;  %v10864_v13 = vsel %vm22_vm9, %v10780_v25, 0.0 }
 0x41b   :  { %v10855_v20 = vadd.f32 %v10854_v40, %v10853_v3  ;;  %v10782_v3 = vmul.f32 %v20122_v15, %v20122_v15  ;;  %v10866_v22 = vsel %vm22_vm9, %v10781_v11, 0.0 }
 0x41d   :  { %v10857_v55 = vadd.f32 %v10856_v8, %v10855_v20  ;;  %v10783_v20 = vmul.f32 %v20129_v53, %v20129_v53  ;;  %v10868_v52 = vsel %vm22_vm9, %v10782_v3, 0.0 }
 0x41f   :  { %v10859_v43 = vadd.f32 %v10858_v61, %v10857_v55  ;;  %v10784_v55 = vmul.f32 %v20136_v12, %v20136_v12  ;;  %v10870_v25 = vsel %vm22_vm9, %v10783_v20, 0.0 }
 0x421   :  { %v10861_v2 = vadd.f32 %v10860_v46, %v10859_v43  ;;  %v10785_v43 = vmul.f32 %v20143_v16, %v20143_v16  ;;  %v10872_v11 = vsel %vm22_vm9, %v10784_v55, 0.0 }
 0x423   :  { %v10863_v42 = vadd.f32 %v10862_v56, %v10861_v2  ;;  %v10786_v2 = vmul.f32 %v20150_v30, %v20150_v30  ;;  %v10874_v3 = vsel %vm22_vm9, %v10785_v43, 0.0  ;;  %v10790_v43 = vmul.f32 %v20178_v24, %v20178_v24 }
 0x425   :  { %v10865_v40 = vadd.f32 %v10864_v13, %v10863_v42  ;;  %v10787_v42 = vmul.f32 %v20157_v18, %v20157_v18  ;;  %v10876_v20 = vsel %vm22_vm9, %v10786_v2, 0.0  ;;  %v21623_v2 = vld [vmem:[#allocation9_spill] sm:$0xff] }
 0x426   :  { %v20199_v31 = vsub.f32 %v21623_v2, %v19925_v26 }
 0x427   :  { %v10867_v8 = vadd.f32 %v10866_v22, %v10865_v40  ;;  %v10788_v40 = vmul.f32 %v20164_v49, %v20164_v49  ;;  %v10878_v55 = vsel %vm22_vm9, %v10787_v42, 0.0 }
 0x429   :  { %v10869_v61 = vadd.f32 %v10868_v52, %v10867_v8  ;;  %v10789_v8 = vmul.f32 %v20171_v7, %v20171_v7 }
 0x42b   :  { %v10871_v46 = vadd.f32 %v10870_v25, %v10869_v61  ;;  %v21622_v61 = vld [vmem:[#allocation17_spill] sm:$0xff]  ;;  %v10880_v25 = vsel %vm22_vm9, %v10788_v40, 0.0  ;;  %v10884_v40 = vsel %vm22_vm9, %v10790_v43, 0.0 }
 0x42c   :  { %v20192_v41 = vsub.f32 %v21622_v61, %v19925_v26  ;;  %21624 = vst [vmem:[#allocation17_spill] sm:$0xff] %v20199_v31  ;;  %v10793_v61 = vmul.f32 %v20199_v31, %v20199_v31 }
 0x42d   :  { %v10873_v56 = vadd.f32 %v10872_v11, %v10871_v46  ;;  %v10791_v11 = vmul.f32 %v20185_v6, %v20185_v6 }
 0x42f   :  { %v10875_v13 = vadd.f32 %v10874_v3, %v10873_v56  ;;  %v10882_v56 = vsel %vm22_vm9, %v10789_v8, 0.0  ;;  %v21625_v3 = vld [vmem:[#allocation10_spill] sm:$0xff]  ;;  %v10886_v8 = vsel %vm22_vm9, %v10791_v11, 0.0  ;;  %v10890_v11 = vsel %vm22_vm9, %v10793_v61, 0.0 }
 0x431   :  { %v10877_v22 = vadd.f32 %v10876_v20, %v10875_v13  ;;  %v20206_v13 = vsub.f32 %v21625_v3, %v19925_v26  ;;  %v10792_v20 = vmul.f32 %v20192_v41, %v20192_v41  ;;  %v21631_v3 = vld [vmem:[#allocation6_spill] sm:$0xff] }
 0x433   :  { %v10879_v52 = vadd.f32 %v10878_v55, %v10877_v22  ;;  %21626 = vst [vmem:[#allocation9_spill] sm:$0xff] %v20206_v13  ;;  %v21627_v55 = vld [vmem:[#allocation13_spill] sm:$0xff]  ;;  %v10888_v43 = vsel %vm22_vm9, %v10792_v20, 0.0 }
 0x435   :  { %v10881_v46 = vadd.f32 %v10880_v25, %v10879_v52  ;;  %v20213_v52 = vsub.f32 %v21627_v55, %v19925_v26 }
 0x437   :  { %v10883_v42 = vadd.f32 %v10882_v56, %v10881_v46  ;;  %21628 = vst [vmem:[#allocation10_spill] sm:$0xff] %v20213_v52  ;;  %v21629_v46 = vld [vmem:[#allocation14_spill] sm:$0xff]  ;;  %v10794_v56 = vmul.f32 %v20206_v13, %v20206_v13  ;;  %v10795_v55 = vmul.f32 %v20213_v52, %v20213_v52 }
 0x438   :  { %v20220_v2 = vsub.f32 %v21629_v46, %v19925_v26 }
 0x439   :  { %v10885_v22 = vadd.f32 %v10884_v40, %v10883_v42  ;;  %v20227_v40 = vsub.f32 %v21631_v3, %v19925_v26  ;;  %v10892_v20 = vsel %vm22_vm9, %v10794_v56, 0.0  ;;  %v10894_v61 = vsel %vm22_vm9, %v10795_v55, 0.0 }
 0x43a   :  { %21630 = vst [vmem:[#allocation13_spill] sm:$0xff] %v20220_v2  ;;  %v10796_v13 = vmul.f32 %v20220_v2, %v20220_v2 }
 0x43b   :  { %v10887_v25 = vadd.f32 %v10886_v8, %v10885_v22  ;;  %21632 = vst [vmem:[#allocation14_spill] sm:$0xff] %v20227_v40  ;;  %v21633_v8 = vld [vmem:[#allocation11_spill] sm:$0xff]  ;;  %v10797_v52 = vmul.f32 %v20227_v40, %v20227_v40 }
 0x43c   :  { %v20234_v46 = vsub.f32 %v21633_v8, %v19925_v26  ;;  %v10896_v56 = vsel %vm22_vm9, %v10796_v13, 0.0 }
 0x43d   :  { %v10889_v42 = vadd.f32 %v10888_v43, %v10887_v25  ;;  %v21635_v43 = vld [vmem:[#allocation12_spill] sm:$0xff]  ;;  %v10898_v55 = vsel %vm22_vm9, %v10797_v52, 0.0 }
 0x43e   :  { %21634 = vst [vmem:[#allocation6_spill] sm:$0xff] %v20234_v46  ;;  %v20241_v3 = vsub.f32 %v21635_v43, %v19925_v26  ;;  %v10798_v2 = vmul.f32 %v20234_v46, %v20234_v46 }
 0x43f   :  { %v10891_v22 = vadd.f32 %v10890_v11, %v10889_v42  ;;  %v21637_v11 = vld [vmem:[#allocation8_spill] sm:$0xff] }
 0x440   :  { %21636 = vst [vmem:[#allocation11_spill] sm:$0xff] %v20241_v3  ;;  %v20248_v8 = vsub.f32 %v21637_v11, %v19925_v26  ;;  %v10799_v40 = vmul.f32 %v20241_v3, %v20241_v3  ;;  %v10900_v13 = vsel %vm22_vm9, %v10798_v2, 0.0 }
 0x441   :  { %v10893_v25 = vadd.f32 %v10892_v20, %v10891_v22  ;;  %v21639_v20 = vld [vmem:[#allocation15_spill] sm:$0xff] }
 0x442   :  { %21638 = vst [vmem:[#allocation12_spill] sm:$0xff] %v20248_v8  ;;  %v20255_v43 = vsub.f32 %v21639_v20, %v19925_v26  ;;  %v10800_v46 = vmul.f32 %v20248_v8, %v20248_v8  ;;  %v10902_v52 = vsel %vm22_vm9, %v10799_v40, 0.0 }
 0x443   :  { %v10895_v42 = vadd.f32 %v10894_v61, %v10893_v25  ;;  %v21641_v61 = vld [vmem:[#allocation7_spill] sm:$0xff] }
 0x444   :  { %21640 = vst [vmem:[#allocation8_spill] sm:$0xff] %v20255_v43  ;;  %v20262_v11 = vsub.f32 %v21641_v61, %v19925_v26  ;;  %v10801_v3 = vmul.f32 %v20255_v43, %v20255_v43  ;;  %v10904_v2 = vsel %vm22_vm9, %v10800_v46, 0.0 }
 0x445   :  { %v10897_v22 = vadd.f32 %v10896_v56, %v10895_v42  ;;  %v21643_v56 = vld [vmem:[#allocation16_spill] sm:$0xff] }
 0x446   :  { %21642 = vst [vmem:[#allocation15_spill] sm:$0xff] %v20262_v11  ;;  %v20269_v20 = vsub.f32 %v21643_v56, %v19925_v26  ;;  %v10802_v8 = vmul.f32 %v20262_v11, %v20262_v11  ;;  %v10906_v40 = vsel %vm22_vm9, %v10801_v3, 0.0 }
 0x447   :  { %v10899_v25 = vadd.f32 %v10898_v55, %v10897_v22  ;;  %v21645_v55 = vld [vmem:[#allocation18_spill] sm:$0xff] }
 0x448   :  { %21644 = vst [vmem:[#allocation7_spill] sm:$0xff] %v20269_v20  ;;  %v20276_v61 = vsub.f32 %v21645_v55, %v19925_v26  ;;  %v10803_v43 = vmul.f32 %v20269_v20, %v20269_v20  ;;  %v10908_v46 = vsel %vm22_vm9, %v10802_v8, 0.0 }
 0x449   :  { %v10901_v42 = vadd.f32 %v10900_v13, %v10899_v25  ;;  %v21647_v13 = vld [vmem:[#allocation19_spill] sm:$0xff] }
 0x44a   :  { %21646 = vst [vmem:[#allocation16_spill] sm:$0xff] %v20276_v61  ;;  %v20283_v56 = vsub.f32 %v21647_v13, %v19925_v26  ;;  %v10804_v11 = vmul.f32 %v20276_v61, %v20276_v61  ;;  %v10910_v3 = vsel %vm22_vm9, %v10803_v43, 0.0 }
 0x44b   :  { %v10903_v22 = vadd.f32 %v10902_v52, %v10901_v42  ;;  %v21649_v52 = vld [vmem:[#allocation20_spill] sm:$0xff] }
 0x44c   :  { %21648 = vst [vmem:[#allocation18_spill] sm:$0xff] %v20283_v56  ;;  %v20290_v55 = vsub.f32 %v21649_v52, %v19925_v26  ;;  %v10805_v20 = vmul.f32 %v20283_v56, %v20283_v56  ;;  %v10912_v8 = vsel %vm22_vm9, %v10804_v11, 0.0 }
 0x44d   :  { %v10905_v25 = vadd.f32 %v10904_v2, %v10903_v22  ;;  %v21651_v2 = vld [vmem:[#allocation21_spill] sm:$0xff] }
 0x44e   :  { %21650 = vst [vmem:[#allocation19_spill] sm:$0xff] %v20290_v55  ;;  %v20297_v13 = vsub.f32 %v21651_v2, %v19925_v26  ;;  %v10806_v61 = vmul.f32 %v20290_v55, %v20290_v55  ;;  %v10914_v43 = vsel %vm22_vm9, %v10805_v20, 0.0 }
 0x44f   :  { %v10907_v42 = vadd.f32 %v10906_v40, %v10905_v25  ;;  %v21652_v40 = vld [vmem:[#allocation22_spill] sm:$0xff] }
 0x450   :  { %v20304_v52 = vsub.f32 %v21652_v40, %v19925_v26  ;;  %v10807_v56 = vmul.f32 %v20297_v13, %v20297_v13  ;;  %v10916_v11 = vsel %vm22_vm9, %v10806_v61, 0.0  ;;  %v10812_v61 = vmul.f32 %v19933_v33, %v19933_v33 }
 0x451   :  { %v10909_v22 = vadd.f32 %v10908_v46, %v10907_v42  ;;  %v21654_v46 = vld [vmem:[#allocation23_spill] sm:$0xff] }
 0x452   :  { %21653 = vst [vmem:[#allocation20_spill] sm:$0xff] %v20304_v52  ;;  %v20311_v2 = vsub.f32 %v21654_v46, %v19925_v26  ;;  %v10808_v55 = vmul.f32 %v20304_v52, %v20304_v52  ;;  %v10918_v46 = vsel %vm22_vm9, %v10807_v56, 0.0  ;;  %v10813_v56 = vmul.f32 %v19937_v38, %v19937_v38 }
 0x453   :  { %v10911_v25 = vadd.f32 %v10910_v3, %v10909_v22  ;;  %v21655_v3 = vld [vmem:[#allocation24_spill] sm:$0xff] }
 0x454   :  { %v20318_v40 = vsub.f32 %v21655_v3, %v19925_v26  ;;  %v10811_v26 = vmul.f32 %v19929_v0, %v19929_v0 }
 0x455   :  { %v10913_v42 = vadd.f32 %v10912_v8, %v10911_v25  ;;  %v10809_v8 = vmul.f32 %v20311_v2, %v20311_v2 }
 0x456   :  { %v10810_v20 = vmul.f32 %v20318_v40, %v20318_v40 }
 0x457   :  { %v10915_v22 = vadd.f32 %v10914_v43, %v10913_v42  ;;  %v10920_v42 = vsel %vm22_vm9, %v10808_v55, 0.0  ;;  %v10922_v3 = vsel %vm22_vm9, %v10809_v8, 0.0  ;;  %v10928_v55 = vsel %vm22_vm9, %v10812_v61, 0.0 }
 0x458   :  { %v10815_v8 = vmul.f32 %v19944_v32, %v19944_v32  ;;  %v10818_v61 = vmul.f32 %v19953_v29, %v19953_v29 }
 0x459   :  { %v10917_v25 = vadd.f32 %v10916_v11, %v10915_v22  ;;  %v10924_v22 = vsel %vm22_vm9, %v10810_v20, 0.0 }
 0x45b   :  { %v10919_v31 = vadd.f32 %v10918_v46, %v10917_v25  ;;  %v10926_v25 = vsel %vm22_vm9, %v10811_v26, 0.0  ;;  %v10817_v26 = vmul.f32 %v19950_v39, %v19950_v39 }
 0x45d   :  { %v10921_v43 = vadd.f32 %v10920_v42, %v10919_v31  ;;  %v10814_v31 = vmul.f32 %v19941_v10, %v19941_v10 }
 0x45f   :  { %v10923_v52 = vadd.f32 %v10922_v3, %v10921_v43  ;;  %v10930_v43 = vsel %vm22_vm9, %v10813_v56, 0.0  ;;  %v10932_v20 = vsel %vm22_vm9, %v10814_v31, 0.0  ;;  %v10819_v56 = vmul.f32 %v19956_v9, %v19956_v9 }
 0x460   :  { %v10820_v31 = vmul.f32 %v19959_v44, %v19959_v44 }
 0x461   :  { %v10925_v11 = vadd.f32 %v10924_v22, %v10923_v52  ;;  %v10816_v52 = vmul.f32 %v19947_v60, %v19947_v60 }
 0x463   :  { %v10927_v46 = vadd.f32 %v10926_v25, %v10925_v11  ;;  %v10934_v11 = vsel %vm22_vm9, %v10815_v8, 0.0  ;;  %v10821_v8 = vmul.f32 %v19962_v27, %v19962_v27 }
 0x465   :  { %v10929_v42 = vadd.f32 %v10928_v55, %v10927_v46  ;;  %v10936_v46 = vsel %vm22_vm9, %v10816_v52, 0.0  ;;  %v10822_v52 = vmul.f32 %v19965_v59, %v19965_v59 }
 0x467   :  { %v10931_v3 = vadd.f32 %v10930_v43, %v10929_v42  ;;  %v10938_v42 = vsel %vm22_vm9, %v10817_v26, 0.0  ;;  %v10946_v26 = vsel %vm22_vm9, %v10821_v8, 0.0 }
 0x469   :  { %v10933_v22 = vadd.f32 %v10932_v20, %v10931_v3  ;;  %v10940_v3 = vsel %vm22_vm9, %v10818_v61, 0.0 }
 0x46b   :  { %v10935_v25 = vadd.f32 %v10934_v11, %v10933_v22  ;;  %v10942_v22 = vsel %vm22_vm9, %v10819_v56, 0.0 }
 0x46d   :  { %v10937_v55 = vadd.f32 %v10936_v46, %v10935_v25  ;;  %v10944_v25 = vsel %vm22_vm9, %v10820_v31, 0.0  ;;  %v20372_v31 = vld [vmem:[%s21444_s3] ss:$0 sm:$0xff]  ;;  %s13912_s3 = smov [#allocation3]  }
 0x46f   :  { %v10939_v43 = vadd.f32 %v10938_v42, %v10937_v55  ;;  %v10948_v42 = vsel %vm22_vm9, %v10822_v52, 0.0 }
 0x471   :  { %v10941_v20 = vadd.f32 %v10940_v3, %v10939_v43 }
 0x473   :  { %v10943_v11 = vadd.f32 %v10942_v22, %v10941_v20 }
 0x475   :  { %v10945_v46 = vadd.f32 %v10944_v25, %v10943_v11 }
 0x477   :  { %v10947_v55 = vadd.f32 %v10946_v26, %v10945_v46 }
 0x479   :  { %v10949_v9 = vadd.f32 %v10948_v42, %v10947_v55  ;;  %v21657_v55 = vld [vmem:[#allocation17_spill] sm:$0xff] }
 0x47b   :  { %v10950_v61 = vrot.slane %v10949_v9, 4 }
 0x47d   :  { %v10951_v43 = vadd.f32 %v10950_v61, %v10949_v9 }
 0x47f   :  { %v10952_v3 = vrot.slane %v10951_v43, 2 }
 0x481   :  { %v10953_v29 = vadd.f32 %v10952_v3, %v10951_v43 }
 0x483   :  { %v10954_v27 = vrot.slane %v10953_v29, 1 }
 0x485   :  { %v10955_v39 = vadd.f32 %v10954_v27, %v10953_v29  ;;  %v20391_v27 = vld [vmem:[%s21445_s4] ss:$0 sm:$0xff]  ;;  %s11555_s4 = sshll.u32 %s13912_s3, 4  ;;  %s21398_s4 = int_to_ptr.vmem [resolvable:$true] %s11555_s4 }
 0x486   :  { %21656 = vst [vmem:[#allocation21_spill] sm:$0xff] %v20391_v27  ;;  %s13886_s12 = scalar_lea.vmem %s21398_s4, 4096  ;;  %p13891_p1 = scmp.lt.s32.totalorder %s21398_s4, %s21398_s4 }
 0x487   :  { %v10956_v56 = vmul.f32 0.001953125, %v10955_v39  ;;  %p13887_p0 = scmp.ne.s32.totalorder %s21398_s4, %s13886_s12  ;;  %p13892_p2 = scmp.lt.s32.totalorder %s13886_s12, %s13886_s12 }
 0x489   :  { %v10957_v20 = vadd.f32 1e-05, %v10956_v56  ;;  %v21662_v56 = vld [vmem:[#allocation6_spill] sm:$0xff]  ;;  %p13893_p3 = por %p13892_p2, %p13891_p1 }
 0x48b   :  { %13883 = vrsqrt.f32 %v10957_v20  ;;  %p13894_p4 = pnand %p13893_p3, %p13887_p0 }
 0x495   :  { %v20367_v22 = vpop.eup %13883 }
 0x496   :  { %v11020_v8 = vmul.f32 %v20367_v22, %v19959_v44  ;;  %v20378_v9 = vmul.f32 %v20367_v22, %v19969_v45  ;;  %v20382_v39 = vmul.f32 %v20367_v22, %v19973_v63  ;;  %v20386_v29 = vmul.f32 %v20367_v22, %v19977_v47 }
 0x497   :  { %v20395_v44 = vmul.f32 %v20367_v22, %v19981_v51  ;;  %v20399_v45 = vmul.f32 %v20367_v22, %v19989_v17  ;;  %v20403_v63 = vmul.f32 %v20367_v22, %v19995_v35  ;;  %v20407_v47 = vmul.f32 %v20367_v22, %v20003_v58 }
 0x498   :  { %v11091_v11 = vmul.f32 %v20372_v31, %v11020_v8  ;;  %v20412_v52 = vmul.f32 %v20367_v22, %v20010_v50  ;;  %v20416_v51 = vmul.f32 %v20367_v22, %v20017_v48  ;;  %v20420_v17 = vmul.f32 %v20367_v22, %v20024_v21  ;;  %v21663_v8 = vld [vmem:[#allocation11_spill] sm:$0xff] }
 0x499   :  { %v20424_v35 = vmul.f32 %v20367_v22, %v20031_v62  ;;  %v20428_v58 = vmul.f32 %v20367_v22, %v20038_v34  ;;  %v20432_v50 = vmul.f32 %v20367_v22, %v20045_v37  ;;  %v20436_v48 = vmul.f32 %v20367_v22, %v20052_v5 }
 0x49a   :  { %v11162_v25 = vadd.f32 %v20391_v27, %v11091_v11  ;;  %v20441_v21 = vmul.f32 %v20367_v22, %v20059_v28  ;;  %v20445_v62 = vmul.f32 %v20367_v22, %v20066_v19  ;;  %v20449_v34 = vmul.f32 %v20367_v22, %v20073_v54  ;;  %v21671_v27 = vld [vmem:[#allocation18_spill] sm:$0xff] }
 0x49b   :  { %v20453_v37 = vmul.f32 %v20367_v22, %v20080_v36  ;;  %v20457_v5 = vmul.f32 %v20367_v22, %v20087_v14  ;;  %v20461_v28 = vmul.f32 %v20367_v22, %v20094_v4  ;;  %v20465_v19 = vmul.f32 %v20367_v22, %v20101_v57 }
 0x49c   :  { %v11226_v46 = vmax.f32 %v11162_v25, 0.0  ;;  %v20469_v54 = vmul.f32 %v20367_v22, %v20108_v1  ;;  %v20473_v36 = vmul.f32 %v20367_v22, %v20115_v23  ;;  %v20477_v14 = vmul.f32 %v20367_v22, %v20122_v15  ;;  %v21664_v25 = vld [vmem:[#allocation12_spill] sm:$0xff] }
 0x49d   :  { %v20481_v4 = vmul.f32 %v20367_v22, %v20129_v53  ;;  %v20485_v57 = vmul.f32 %v20367_v22, %v20136_v12  ;;  %v20489_v1 = vmul.f32 %v20367_v22, %v20143_v16  ;;  %v20493_v23 = vmul.f32 %v20367_v22, %v20150_v30 }
 0x49e   :  { %v12886_v26 = vpack.c.bf16 %v11226_v46, %v11226_v46  ;;  %v20497_v15 = vmul.f32 %v20367_v22, %v20157_v18  ;;  %v20501_v53 = vmul.f32 %v20367_v22, %v20164_v49  ;;  %v20505_v12 = vmul.f32 %v20367_v22, %v20171_v7  ;;  %v21658_v7 = vld [vmem:[#allocation9_spill] sm:$0xff] }
 0x49f   :  { %v20509_v16 = vmul.f32 %v20367_v22, %v20178_v24  ;;  %v20513_v30 = vmul.f32 %v20367_v22, %v20185_v6  ;;  %v20517_v18 = vmul.f32 %v20367_v22, %v20192_v41  ;;  %v20521_v49 = vmul.f32 %v20367_v22, %v21657_v55  ;;  %v21659_v24 = vld [vmem:[#allocation10_spill] sm:$0xff]  ;;  %v21660_v6 = vld [vmem:[#allocation13_spill] sm:$0xff] }
 0x4a0   :  { %11547 = vst.msk [vmem:[#allocation3 + $0xf4] sm:$0xf] %vm11485_vm10, %v12886_v26  ;;  %v20526_v42 = vmul.f32 %v20367_v22, %v21658_v7  ;;  %v20530_v61 = vmul.f32 %v20367_v22, %v21659_v24  ;;  %v20534_v43 = vmul.f32 %v20367_v22, %v21660_v6  ;;  %v21661_v41 = vld [vmem:[#allocation14_spill] sm:$0xff]  ;;  %v20542_v20 = vmul.f32 %v20367_v22, %v21662_v56  ;;  %v21666_v26 = vld [vmem:[#allocation8_spill] sm:$0xff]  ;;  %v21667_v7 = vld [vmem:[#allocation15_spill] sm:$0xff] }
 0x4a1   :  { %v20538_v3 = vmul.f32 %v20367_v22, %v21661_v41  ;;  %v20546_v11 = vmul.f32 %v20367_v22, %v21663_v8  ;;  %v20550_v46 = vmul.f32 %v20367_v22, %v21664_v25  ;;  %v20554_v55 = vmul.f32 %v20367_v22, %v21666_v26  ;;  %v21669_v6 = vld [vmem:[#allocation7_spill] sm:$0xff]  ;;  %v21670_v56 = vld [vmem:[#allocation16_spill] sm:$0xff] }
 0x4a2   :  { %v20558_v24 = vmul.f32 %v20367_v22, %v21667_v7  ;;  %v20562_v41 = vmul.f32 %v20367_v22, %v21669_v6  ;;  %v20566_v8 = vmul.f32 %v20367_v22, %v21670_v56  ;;  %v20570_v25 = vmul.f32 %v20367_v22, %v21671_v27 }
 0x4a3   :  { %21665 = vst [vmem:[#allocation22_spill] sm:$0xff] %v20550_v46  ;;  %v21672_v46 = vld [vmem:[#allocation19_spill] sm:$0xff]  ;;  %v20578_v7 = vmul.f32 %v20367_v22, %v20297_v13  ;;  %v20586_v56 = vmul.f32 %v20367_v22, %v20311_v2  ;;  %v20590_v27 = vmul.f32 %v20367_v22, %v20318_v40  ;;  %v20598_v13 = vmul.f32 %v20367_v22, %v19933_v33 }
 0x4a4   :  { %21668 = vst [vmem:[#allocation23_spill] sm:$0xff] %v20558_v24  ;;  %v20574_v26 = vmul.f32 %v20367_v22, %v21672_v46  ;;  %v21673_v24 = vld [vmem:[#allocation20_spill] sm:$0xff]  ;;  %v20594_v46 = vmul.f32 %v20367_v22, %v19929_v0  ;;  %v20606_v2 = vmul.f32 %v20367_v22, %v19941_v10  ;;  %v20610_v40 = vmul.f32 %v20367_v22, %v19944_v32 }
 0x4a5   :  { %v20582_v6 = vmul.f32 %v20367_v22, %v21673_v24  ;;  %21675 = vst [vmem:[#allocation17_spill] sm:$0xff] %v20598_v13  ;;  %v20602_v24 = vmul.f32 %v20367_v22, %v19937_v38  ;;  %v20614_v0 = vmul.f32 %v20367_v22, %v19947_v60  ;;  %v21679_v13 = vld [vmem:[#allocation26_spill] sm:$0xff]  ;;  %v20634_v60 = vmul.f32 %v20367_v22, %v19965_v59 }
 0x4a6   :  { %21674 = vst [vmem:[#allocation24_spill] sm:$0xff] %v20594_v46  ;;  %21677 = vst [vmem:[#allocation10_spill] sm:$0xff] %v20606_v2  ;;  %v21678_v46 = vld [vmem:[#allocation25_spill] sm:$0xff]  ;;  %v20622_v38 = vmul.f32 %v20367_v22, %v21679_v13  ;;  %v21681_v2 = vld [vmem:[#allocation28_spill] sm:$0xff]  ;;  %v20642_v13 = vmul.f32 %v20372_v31, %v20382_v39  ;;  %v20654_v59 = vmul.f32 %v20372_v31, %v20399_v45 }
 0x4a7   :  { %21676 = vst [vmem:[#allocation9_spill] sm:$0xff] %v20602_v24  ;;  %v20618_v33 = vmul.f32 %v20367_v22, %v21678_v46  ;;  %v21680_v24 = vld [vmem:[#allocation27_spill] sm:$0xff]  ;;  %v20630_v32 = vmul.f32 %v20367_v22, %v21681_v2  ;;  %v20638_v46 = vmul.f32 %v20372_v31, %v20378_v9  ;;  %v20650_v2 = vmul.f32 %v20372_v31, %v20395_v44 }
 0x4a8   :  { %v20626_v10 = vmul.f32 %v20367_v22, %v21680_v24  ;;  %v20646_v24 = vmul.f32 %v20372_v31, %v20386_v29  ;;  %v20658_v22 = vmul.f32 %v20372_v31, %v20403_v63  ;;  %v20662_v9 = vmul.f32 %v20372_v31, %v20407_v47 }
 0x4a9   :  { %v20666_v39 = vmul.f32 %v20372_v31, %v20412_v52  ;;  %v20670_v29 = vmul.f32 %v20372_v31, %v20416_v51  ;;  %v20674_v44 = vmul.f32 %v20372_v31, %v20420_v17  ;;  %v20678_v45 = vmul.f32 %v20372_v31, %v20424_v35 }
 0x4aa   :  { %v20682_v63 = vmul.f32 %v20372_v31, %v20428_v58  ;;  %v20686_v47 = vmul.f32 %v20372_v31, %v20432_v50  ;;  %v20690_v52 = vmul.f32 %v20372_v31, %v20436_v48  ;;  %v20694_v51 = vmul.f32 %v20372_v31, %v20441_v21 }
 0x4ab   :  { %v20698_v17 = vmul.f32 %v20372_v31, %v20445_v62  ;;  %v20702_v35 = vmul.f32 %v20372_v31, %v20449_v34  ;;  %v20706_v58 = vmul.f32 %v20372_v31, %v20453_v37  ;;  %v20710_v50 = vmul.f32 %v20372_v31, %v20457_v5 }
 0x4ac   :  { %v20714_v48 = vmul.f32 %v20372_v31, %v20461_v28  ;;  %v20718_v21 = vmul.f32 %v20372_v31, %v20465_v19  ;;  %v20722_v62 = vmul.f32 %v20372_v31, %v20469_v54  ;;  %v20726_v34 = vmul.f32 %v20372_v31, %v20473_v36 }
 0x4ad   :  { %v20730_v37 = vmul.f32 %v20372_v31, %v20477_v14  ;;  %v20734_v5 = vmul.f32 %v20372_v31, %v20481_v4  ;;  %v20738_v28 = vmul.f32 %v20372_v31, %v20485_v57  ;;  %v20742_v19 = vmul.f32 %v20372_v31, %v20489_v1 }
 0x4ae   :  { %v20746_v54 = vmul.f32 %v20372_v31, %v20493_v23  ;;  %v20750_v36 = vmul.f32 %v20372_v31, %v20497_v15  ;;  %v20754_v14 = vmul.f32 %v20372_v31, %v20501_v53  ;;  %v20758_v4 = vmul.f32 %v20372_v31, %v20505_v12 }
 0x4af   :  { %v20762_v57 = vmul.f32 %v20372_v31, %v20509_v16  ;;  %v20766_v1 = vmul.f32 %v20372_v31, %v20513_v30  ;;  %v20770_v23 = vmul.f32 %v20372_v31, %v20517_v18  ;;  %v20774_v15 = vmul.f32 %v20372_v31, %v20521_v49 }
 0x4b0   :  { %v20778_v53 = vmul.f32 %v20372_v31, %v20526_v42  ;;  %v20782_v12 = vmul.f32 %v20372_v31, %v20530_v61  ;;  %v20786_v16 = vmul.f32 %v20372_v31, %v20534_v43  ;;  %v20790_v30 = vmul.f32 %v20372_v31, %v20538_v3  ;;  %v21683_v42 = vld [vmem:[#allocation22_spill] sm:$0xff] }
 0x4b1   :  { %v20794_v18 = vmul.f32 %v20372_v31, %v20542_v20  ;;  %v20798_v49 = vmul.f32 %v20372_v31, %v20546_v11  ;;  %v20802_v61 = vmul.f32 %v20372_v31, %v21683_v42  ;;  %v20806_v43 = vmul.f32 %v20372_v31, %v20554_v55 }
 0x4b2   :  { %21682 = vst [vmem:[#allocation13_spill] sm:$0xff] %v20786_v16  ;;  %v21684_v16 = vld [vmem:[#allocation23_spill] sm:$0xff]  ;;  %v20814_v20 = vmul.f32 %v20372_v31, %v20562_v41  ;;  %v20818_v11 = vmul.f32 %v20372_v31, %v20566_v8  ;;  %v20822_v42 = vmul.f32 %v20372_v31, %v20570_v25  ;;  %v20826_v55 = vmul.f32 %v20372_v31, %v20574_v26 }
 0x4b3   :  { %v20810_v3 = vmul.f32 %v20372_v31, %v21684_v16  ;;  %v20830_v16 = vmul.f32 %v20372_v31, %v20578_v7  ;;  %v20834_v41 = vmul.f32 %v20372_v31, %v20582_v6  ;;  %v20838_v8 = vmul.f32 %v20372_v31, %v20586_v56 }
 0x4b4   :  { %21685 = vst [vmem:[#allocation14_spill] sm:$0xff] %v20822_v42  ;;  %21686 = vst [vmem:[#allocation6_spill] sm:$0xff] %v20826_v55  ;;  %v20842_v25 = vmul.f32 %v20372_v31, %v20590_v27  ;;  %v21689_v42 = vld [vmem:[#allocation24_spill] sm:$0xff]  ;;  %v21690_v55 = vld [vmem:[#allocation17_spill] sm:$0xff]  ;;  %v20862_v27 = vmul.f32 %v20372_v31, %v20610_v40  ;;  %v20882_v40 = vmul.f32 %v20372_v31, %v20630_v32 }
 0x4b5   :  { %21687 = vst [vmem:[#allocation11_spill] sm:$0xff] %v20830_v16  ;;  %21688 = vst [vmem:[#allocation12_spill] sm:$0xff] %v20834_v41  ;;  %v20846_v26 = vmul.f32 %v20372_v31, %v21689_v42  ;;  %v20850_v7 = vmul.f32 %v20372_v31, %v21690_v55  ;;  %v21691_v16 = vld [vmem:[#allocation9_spill] sm:$0xff]  ;;  %v21692_v41 = vld [vmem:[#allocation10_spill] sm:$0xff]  ;;  %v20866_v42 = vmul.f32 %v20372_v31, %v20614_v0 }
 0x4b6   :  { %v20854_v6 = vmul.f32 %v20372_v31, %v21691_v16  ;;  %v20858_v56 = vmul.f32 %v20372_v31, %v21692_v41  ;;  %v20870_v55 = vmul.f32 %v20372_v31, %v20618_v33  ;;  %v20874_v16 = vmul.f32 %v20372_v31, %v20622_v38 }
 0x4b7   :  { %21693 = vst [vmem:[#allocation8_spill] sm:$0xff] %v20866_v42  ;;  %v20878_v41 = vmul.f32 %v20372_v31, %v20626_v10  ;;  %v20886_v0 = vmul.f32 %v20372_v31, %v20634_v60  ;;  %v21694_v42 = vld [vmem:[#allocation21_spill] sm:$0xff] }
 0x4b8   :  { %v20890_v33 = vadd.f32 %v21694_v42, %v20638_v46  ;;  %v20894_v38 = vadd.f32 %v21694_v42, %v20642_v13  ;;  %v20898_v10 = vadd.f32 %v21694_v42, %v20646_v24  ;;  %v20902_v32 = vadd.f32 %v21694_v42, %v20650_v2 }
 0x4b9   :  { %v20906_v31 = vadd.f32 %v21694_v42, %v20654_v59  ;;  %v20910_v60 = vadd.f32 %v21694_v42, %v20658_v22  ;;  %v20914_v46 = vadd.f32 %v21694_v42, %v20662_v9  ;;  %v20918_v13 = vadd.f32 %v21694_v42, %v20666_v39 }
 0x4ba   :  { %v20922_v24 = vadd.f32 %v21694_v42, %v20670_v29  ;;  %v20926_v2 = vadd.f32 %v21694_v42, %v20674_v44  ;;  %v20930_v59 = vadd.f32 %v21694_v42, %v20678_v45  ;;  %v20934_v22 = vadd.f32 %v21694_v42, %v20682_v63 }
 0x4bb   :  { %v20938_v9 = vadd.f32 %v21694_v42, %v20686_v47  ;;  %v20942_v39 = vadd.f32 %v21694_v42, %v20690_v52  ;;  %v20946_v29 = vadd.f32 %v21694_v42, %v20694_v51  ;;  %v20950_v44 = vadd.f32 %v21694_v42, %v20698_v17 }
 0x4bc   :  { %v20954_v45 = vadd.f32 %v21694_v42, %v20702_v35  ;;  %v20958_v63 = vadd.f32 %v21694_v42, %v20706_v58  ;;  %v20962_v47 = vadd.f32 %v21694_v42, %v20710_v50  ;;  %v20966_v52 = vadd.f32 %v21694_v42, %v20714_v48 }
 0x4bd   :  { %v20970_v51 = vadd.f32 %v21694_v42, %v20718_v21  ;;  %v20974_v17 = vadd.f32 %v21694_v42, %v20722_v62  ;;  %v20978_v35 = vadd.f32 %v21694_v42, %v20726_v34  ;;  %v20982_v58 = vadd.f32 %v21694_v42, %v20730_v37 }
 0x4be   :  { %v20986_v50 = vadd.f32 %v21694_v42, %v20734_v5  ;;  %v20990_v48 = vadd.f32 %v21694_v42, %v20738_v28  ;;  %v20994_v21 = vadd.f32 %v21694_v42, %v20742_v19  ;;  %v20998_v62 = vadd.f32 %v21694_v42, %v20746_v54 }
 0x4bf   :  { %v21002_v34 = vadd.f32 %v21694_v42, %v20750_v36  ;;  %v21006_v37 = vadd.f32 %v21694_v42, %v20754_v14  ;;  %v21010_v5 = vadd.f32 %v21694_v42, %v20758_v4  ;;  %v21014_v28 = vadd.f32 %v21694_v42, %v20762_v57  ;;  %v21698_v57 = vld [vmem:[#allocation13_spill] sm:$0xff] }
 0x4c0   :  { %v21018_v19 = vadd.f32 %v21694_v42, %v20766_v1  ;;  %v21022_v54 = vadd.f32 %v21694_v42, %v20770_v23  ;;  %v21026_v36 = vadd.f32 %v21694_v42, %v20774_v15  ;;  %v21030_v14 = vadd.f32 %v21694_v42, %v20778_v53 }
 0x4c1   :  { %21695 = vst [vmem:[#allocation15_spill] sm:$0xff] %v21010_v5  ;;  %21696 = vst [vmem:[#allocation7_spill] sm:$0xff] %v21014_v28  ;;  %v21034_v4 = vadd.f32 %v21694_v42, %v20782_v12  ;;  %v21038_v1 = vadd.f32 %v21694_v42, %v21698_v57  ;;  %v21042_v23 = vadd.f32 %v21694_v42, %v20790_v30 }
 0x4c2   :  { %21697 = vst [vmem:[#allocation16_spill] sm:$0xff] %v21018_v19  ;;  %v21046_v15 = vadd.f32 %v21694_v42, %v20794_v18  ;;  %v21050_v53 = vadd.f32 %v21694_v42, %v20798_v49  ;;  %v21054_v12 = vadd.f32 %v21694_v42, %v20802_v61  ;;  %v21058_v57 = vadd.f32 %v21694_v42, %v20806_v43 }
 0x4c3   :  { %v21062_v30 = vadd.f32 %v21694_v42, %v20810_v3  ;;  %v21066_v18 = vadd.f32 %v21694_v42, %v20814_v20  ;;  %v21070_v49 = vadd.f32 %v21694_v42, %v20818_v11  ;;  %v21090_v11 = vadd.f32 %v21694_v42, %v20838_v8 }
 0x4c4   :  { %21699 = vst [vmem:[#allocation18_spill] sm:$0xff] %v21050_v53  ;;  %21700 = vst [vmem:[#allocation19_spill] sm:$0xff] %v21054_v12  ;;  %v21703_v53 = vld [vmem:[#allocation14_spill] sm:$0xff]  ;;  %v21110_v8 = vadd.f32 %v21694_v42, %v20858_v56  ;;  %v21130_v56 = vadd.f32 %v21694_v42, %v20878_v41  ;;  %v11170_v41 = vmax.f32 %v20910_v60, 0.0 }
 0x4c5   :  { %21701 = vst [vmem:[#allocation20_spill] sm:$0xff] %v21058_v57  ;;  %21702 = vst [vmem:[#allocation25_spill] sm:$0xff] %v21062_v30  ;;  %v21074_v61 = vadd.f32 %v21694_v42, %v21703_v53  ;;  %v21705_v12 = vld [vmem:[#allocation6_spill] sm:$0xff]  ;;  %v21707_v57 = vld [vmem:[#allocation11_spill] sm:$0xff]  ;;  %v21094_v53 = vadd.f32 %v21694_v42, %v20842_v25  ;;  %v21114_v25 = vadd.f32 %v21694_v42, %v20862_v27 }
 0x4c6   :  { %v21078_v43 = vadd.f32 %v21694_v42, %v21705_v12  ;;  %v21082_v3 = vadd.f32 %v21694_v42, %v21707_v57  ;;  %v21709_v30 = vld [vmem:[#allocation12_spill] sm:$0xff]  ;;  %21711 = vst [vmem:[#allocation23_spill] sm:$0xff] %v21090_v11  ;;  %v21098_v12 = vadd.f32 %v21694_v42, %v20846_v26  ;;  %v21102_v57 = vadd.f32 %v21694_v42, %v20850_v7 }
 0x4c7   :  { %21704 = vst [vmem:[#allocation26_spill] sm:$0xff] %v21074_v61  ;;  %v21086_v20 = vadd.f32 %v21694_v42, %v21709_v30  ;;  %21712 = vst [vmem:[#allocation24_spill] sm:$0xff] %v21094_v53  ;;  %v21106_v30 = vadd.f32 %v21694_v42, %v20854_v6  ;;  %v21718_v53 = vld [vmem:[#allocation8_spill] sm:$0xff]  ;;  %v21122_v7 = vadd.f32 %v21694_v42, %v20870_v55  ;;  %v11166_v55 = vmax.f32 %v20894_v38, 0.0 }
 0x4c8   :  { %21706 = vst [vmem:[#allocation27_spill] sm:$0xff] %v21078_v43  ;;  %21708 = vst [vmem:[#allocation28_spill] sm:$0xff] %v21082_v3  ;;  %v21118_v26 = vadd.f32 %v21694_v42, %v21718_v53  ;;  %v21126_v6 = vadd.f32 %v21694_v42, %v20874_v16  ;;  %v21134_v27 = vadd.f32 %v21694_v42, %v20882_v40  ;;  %v11168_v16 = vmax.f32 %v20902_v32, 0.0 }
 0x4c9   :  { %21710 = vst [vmem:[#allocation22_spill] sm:$0xff] %v21086_v20  ;;  %21713 = vst [vmem:[#allocation17_spill] sm:$0xff] %v21098_v12  ;;  %v21138_v53 = vadd.f32 %v21694_v42, %v20886_v0  ;;  %v11172_v40 = vmax.f32 %v20918_v13, 0.0  ;;  %v11174_v42 = vmax.f32 %v20926_v2, 0.0  ;;  %v11175_v0 = vmax.f32 %v20930_v59, 0.0 }
 0x4ca   :  { %21714 = vst [vmem:[#allocation9_spill] sm:$0xff] %v21102_v57  ;;  %21715 = vst [vmem:[#allocation10_spill] sm:$0xff] %v21106_v30  ;;  %v12828_v32 = vpack.c.bf16 %v11168_v16, %v11168_v16  ;;  %v21734_v59 = vmax.f32 %v20934_v22, 0.0  ;;  %v21738_v22 = vmax.f32 %v20950_v44, 0.0  ;;  %v21742_v44 = vmax.f32 %v20966_v52, 0.0 }
 0x4cb   :  { %21716 = vst [vmem:[#allocation21_spill] sm:$0xff] %v21110_v8  ;;  %21717 = vst [vmem:[#allocation13_spill] sm:$0xff] %v21114_v25  ;;  %v21725_v5 = vld [vmem:[#allocation19_spill] sm:$0xff]  ;;  %v11228_v38 = vmax.f32 %v21138_v53, 0.0  ;;  %v12832_v60 = vpack.c.bf16 %v11172_v40, %v11172_v40  ;;  %v12835_v61 = vpack.c.bf16 %v11175_v0, %v11175_v0  ;;  %v21746_v52 = vmax.f32 %v20982_v58, 0.0 }
 0x4cc   :  { %21719 = vst [vmem:[#allocation14_spill] sm:$0xff] %v21118_v26  ;;  %21720 = vst [vmem:[#allocation6_spill] sm:$0xff] %v21122_v7  ;;  %v11165_v26 = vmax.f32 %v20890_v33, 0.0  ;;  %v11167_v7 = vmax.f32 %v20898_v10, 0.0  ;;  %v21726_v28 = vld [vmem:[#allocation20_spill] sm:$0xff]  ;;  %v21727_v19 = vld [vmem:[#allocation25_spill] sm:$0xff]  ;;  %v12826_v10 = vpack.c.bf16 %v11166_v55, %v11166_v55 }
 0x4cd   :  { %21721 = vst [vmem:[#allocation11_spill] sm:$0xff] %v21126_v6  ;;  %21722 = vst [vmem:[#allocation12_spill] sm:$0xff] %v21130_v56  ;;  %v11169_v6 = vmax.f32 %v20906_v31, 0.0  ;;  %v11171_v56 = vmax.f32 %v20914_v46, 0.0  ;;  %v12830_v31 = vpack.c.bf16 %v11170_v41, %v11170_v41  ;;  %v12834_v46 = vpack.c.bf16 %v11174_v42, %v11174_v42 }
 0x4ce   :  { %21723 = vst [vmem:[#allocation8_spill] sm:$0xff] %v21134_v27  ;;  %v11173_v27 = vmax.f32 %v20922_v24, 0.0  ;;  %v21728_v33 = vld [vmem:[#allocation24_spill] sm:$0xff]  ;;  %v12825_v12 = vpack.c.bf16 %v11165_v26, %v11165_v26  ;;  %v12827_v57 = vpack.c.bf16 %v11167_v7, %v11167_v7  ;;  %11487 = vst.msk [vmem:[#allocation3 + $0x4] sm:$0xf] %vm11485_vm10, %v12826_v10  ;;  %v12836_v26 = vpack.c.bf16 %v21734_v59, %v21734_v59 }
 0x4cf   :  { %v12829_v30 = vpack.c.bf16 %v11169_v6, %v11169_v6  ;;  %v12831_v8 = vpack.c.bf16 %v11171_v56, %v11171_v56  ;;  %v21735_v7 = vmax.f32 %v20938_v9, 0.0  ;;  %v21736_v56 = vmax.f32 %v20942_v39, 0.0  ;;  %11489 = vst.msk [vmem:[#allocation3 + $0xc] sm:$0xf] %vm11485_vm10, %v12828_v32  ;;  %11491 = vst.msk [vmem:[#allocation3 + $0x14] sm:$0xf] %vm11485_vm10, %v12830_v31 }
 0x4d0   :  { %v12833_v25 = vpack.c.bf16 %v11173_v27, %v11173_v27  ;;  %11486 = vst.msk [vmem:[#allocation3] sm:$0xf] %vm11485_vm10, %v12825_v12  ;;  %11488 = vst.msk [vmem:[#allocation3 + $0x8] sm:$0xf] %vm11485_vm10, %v12827_v57  ;;  %v21737_v55 = vmax.f32 %v20946_v29, 0.0  ;;  %v12840_v9 = vpack.c.bf16 %v21738_v22, %v21738_v22  ;;  %v21739_v39 = vmax.f32 %v20954_v45, 0.0 }
 0x4d1   :  { %v12837_v6 = vpack.c.bf16 %v21735_v7, %v21735_v7  ;;  %v12838_v27 = vpack.c.bf16 %v21736_v56, %v21736_v56  ;;  %11490 = vst.msk [vmem:[#allocation3 + $0x10] sm:$0xf] %vm11485_vm10, %v12829_v30  ;;  %11492 = vst.msk [vmem:[#allocation3 + $0x18] sm:$0xf] %vm11485_vm10, %v12831_v8  ;;  %v21740_v29 = vmax.f32 %v20958_v63, 0.0  ;;  %v21741_v41 = vmax.f32 %v20962_v47, 0.0 }
 0x4d2   :  { %v12839_v12 = vpack.c.bf16 %v21737_v55, %v21737_v55  ;;  %v12841_v57 = vpack.c.bf16 %v21739_v39, %v21739_v39  ;;  %11493 = vst.msk [vmem:[#allocation3 + $0x1c] sm:$0xf] %vm11485_vm10, %v12832_v60  ;;  %11494 = vst.msk [vmem:[#allocation3 + $0x20] sm:$0xf] %vm11485_vm10, %v12833_v25  ;;  %v12844_v45 = vpack.c.bf16 %v21742_v44, %v21742_v44  ;;  %v21743_v63 = vmax.f32 %v20970_v51, 0.0 }
 0x4d3   :  { %v21730_v43 = vld [vmem:[#allocation6_spill] sm:$0xff]  ;;  %v12842_v16 = vpack.c.bf16 %v21740_v29, %v21740_v29  ;;  %v12843_v30 = vpack.c.bf16 %v21741_v41, %v21741_v41  ;;  %11495 = vst.msk [vmem:[#allocation3 + $0x24] sm:$0xf] %vm11485_vm10, %v12834_v46  ;;  %11496 = vst.msk [vmem:[#allocation3 + $0x28] sm:$0xf] %vm11485_vm10, %v12835_v61  ;;  %v21744_v47 = vmax.f32 %v20974_v17, 0.0  ;;  %v12848_v51 = vpack.c.bf16 %v21746_v52, %v21746_v52 }
 0x4d4   :  { %v11223_v13 = vmax.f32 %v21730_v43, 0.0  ;;  %v21731_v3 = vld [vmem:[#allocation11_spill] sm:$0xff]  ;;  %v21732_v20 = vld [vmem:[#allocation12_spill] sm:$0xff]  ;;  %v12845_v8 = vpack.c.bf16 %v21743_v63, %v21743_v63  ;;  %v21745_v42 = vmax.f32 %v20978_v35, 0.0  ;;  %11497 = vst.msk [vmem:[#allocation3 + $0x2c] sm:$0xf] %vm11485_vm10, %v12836_v26 }
 0x4d5   :  { %v11224_v24 = vmax.f32 %v21731_v3, 0.0  ;;  %v11225_v2 = vmax.f32 %v21732_v20, 0.0  ;;  %v21733_v11 = vld [vmem:[#allocation8_spill] sm:$0xff]  ;;  %v12846_v40 = vpack.c.bf16 %v21744_v47, %v21744_v47  ;;  %11498 = vst.msk [vmem:[#allocation3 + $0x30] sm:$0xf] %vm11485_vm10, %v12837_v6  ;;  %v21747_v17 = vmax.f32 %v20986_v50, 0.0 }
 0x4d6   :  { %v12847_v25 = vpack.c.bf16 %v21745_v42, %v21745_v42  ;;  %11499 = vst.msk [vmem:[#allocation3 + $0x34] sm:$0xf] %vm11485_vm10, %v12838_v27  ;;  %11500 = vst.msk [vmem:[#allocation3 + $0x38] sm:$0xf] %vm11485_vm10, %v12839_v12  ;;  %v21748_v35 = vmax.f32 %v20990_v48, 0.0  ;;  %v21749_v10 = vmax.f32 %v20994_v21, 0.0 }
 0x4d7   :  { %v12849_v61 = vpack.c.bf16 %v21747_v17, %v21747_v17  ;;  %11501 = vst.msk [vmem:[#allocation3 + $0x3c] sm:$0xf] %vm11485_vm10, %v12840_v9  ;;  %11502 = vst.msk [vmem:[#allocation3 + $0x40] sm:$0xf] %vm11485_vm10, %v12841_v57  ;;  %v21750_v58 = vmax.f32 %v20998_v62, 0.0  ;;  %v21751_v48 = vmax.f32 %v21002_v34, 0.0  ;;  %v12885_v43 = vpack.c.bf16 %v11225_v2, %v11225_v2 }
 0x4d8   :  { %v12850_v0 = vpack.c.bf16 %v21748_v35, %v21748_v35  ;;  %v12851_v32 = vpack.c.bf16 %v21749_v10, %v21749_v10  ;;  %11503 = vst.msk [vmem:[#allocation3 + $0x44] sm:$0xf] %vm11485_vm10, %v12842_v16  ;;  %11504 = vst.msk [vmem:[#allocation3 + $0x48] sm:$0xf] %vm11485_vm10, %v12843_v30  ;;  %v21752_v21 = vmax.f32 %v21006_v37, 0.0  ;;  %v21753_v46 = vld [vmem:[#allocation15_spill] sm:$0xff] }
 0x4d9   :  { %v12852_v50 = vpack.c.bf16 %v21750_v58, %v21750_v58  ;;  %v12853_v31 = vpack.c.bf16 %v21751_v48, %v21751_v48  ;;  %v21754_v59 = vmax.f32 %v21753_v46, 0.0  ;;  %11505 = vst.msk [vmem:[#allocation3 + $0x4c] sm:$0xf] %vm11485_vm10, %v12844_v45  ;;  %11506 = vst.msk [vmem:[#allocation3 + $0x50] sm:$0xf] %vm11485_vm10, %v12845_v8  ;;  %v21755_v62 = vld [vmem:[#allocation7_spill] sm:$0xff] }
 0x4da   :  { %v12854_v60 = vpack.c.bf16 %v21752_v21, %v21752_v21  ;;  %11507 = vst.msk [vmem:[#allocation3 + $0x54] sm:$0xf] %vm11485_vm10, %v12846_v40  ;;  %11508 = vst.msk [vmem:[#allocation3 + $0x58] sm:$0xf] %vm11485_vm10, %v12847_v25  ;;  %v21756_v34 = vmax.f32 %v21755_v62, 0.0  ;;  %v21757_v6 = vld [vmem:[#allocation16_spill] sm:$0xff] }
 0x4db   :  { %v12855_v26 = vpack.c.bf16 %v21754_v59, %v21754_v59  ;;  %v21758_v37 = vmax.f32 %v21757_v6, 0.0  ;;  %v21759_v27 = vmax.f32 %v21022_v54, 0.0  ;;  %v21760_v12 = vmax.f32 %v21026_v36, 0.0  ;;  %11509 = vst.msk [vmem:[#allocation3 + $0x5c] sm:$0xf] %vm11485_vm10, %v12848_v51  ;;  %v21766_v30 = vld [vmem:[#allocation18_spill] sm:$0xff] }
 0x4dc   :  { %v12856_v7 = vpack.c.bf16 %v21756_v34, %v21756_v34  ;;  %11510 = vst.msk [vmem:[#allocation3 + $0x60] sm:$0xf] %vm11485_vm10, %v12849_v61  ;;  %11511 = vst.msk [vmem:[#allocation3 + $0x64] sm:$0xf] %vm11485_vm10, %v12850_v0  ;;  %v21761_v9 = vmax.f32 %v21030_v14, 0.0  ;;  %v21762_v54 = vmax.f32 %v21034_v4, 0.0 }
 0x4dd   :  { %v12857_v56 = vpack.c.bf16 %v21758_v37, %v21758_v37  ;;  %v12858_v55 = vpack.c.bf16 %v21759_v27, %v21759_v27  ;;  %v12859_v22 = vpack.c.bf16 %v21760_v12, %v21760_v12  ;;  %11512 = vst.msk [vmem:[#allocation3 + $0x68] sm:$0xf] %vm11485_vm10, %v12851_v32  ;;  %v21763_v36 = vmax.f32 %v21038_v1, 0.0  ;;  %11513 = vst.msk [vmem:[#allocation3 + $0x6c] sm:$0xf] %vm11485_vm10, %v12852_v50  ;;  %v21773_v25 = vld [vmem:[#allocation26_spill] sm:$0xff] }
 0x4de   :  { %v12860_v39 = vpack.c.bf16 %v21761_v9, %v21761_v9  ;;  %v12861_v57 = vpack.c.bf16 %v21762_v54, %v21762_v54  ;;  %v21764_v16 = vmax.f32 %v21042_v23, 0.0  ;;  %11514 = vst.msk [vmem:[#allocation3 + $0x70] sm:$0xf] %vm11485_vm10, %v12853_v31  ;;  %11515 = vst.msk [vmem:[#allocation3 + $0x74] sm:$0xf] %vm11485_vm10, %v12854_v60  ;;  %v21765_v14 = vmax.f32 %v21046_v15, 0.0 }
 0x4df   :  { %v12862_v29 = vpack.c.bf16 %v21763_v36, %v21763_v36  ;;  %11516 = vst.msk [vmem:[#allocation3 + $0x78] sm:$0xf] %vm11485_vm10, %v12855_v26  ;;  %v21767_v1 = vmax.f32 %v21766_v30, 0.0  ;;  %v21768_v23 = vmax.f32 %v21725_v5, 0.0  ;;  %v21769_v63 = vmax.f32 %v21726_v28, 0.0  ;;  %v21777_v17 = vld [vmem:[#allocation28_spill] sm:$0xff] }
 0x4e0   :  { %v12863_v41 = vpack.c.bf16 %v21764_v16, %v21764_v16  ;;  %v12864_v4 = vpack.c.bf16 %v21765_v14, %v21765_v14  ;;  %11517 = vst.msk [vmem:[#allocation3 + $0x7c] sm:$0xf] %vm11485_vm10, %v12856_v7  ;;  %11518 = vst.msk [vmem:[#allocation3 + $0x80] sm:$0xf] %vm11485_vm10, %v12857_v56  ;;  %v21770_v15 = vmax.f32 %v21727_v19, 0.0  ;;  %v21771_v5 = vmax.f32 %v21066_v18, 0.0 }
 0x4e1   :  { %v12865_v44 = vpack.c.bf16 %v21767_v1, %v21767_v1  ;;  %v12866_v45 = vpack.c.bf16 %v21768_v23, %v21768_v23  ;;  %v12867_v8 = vpack.c.bf16 %v21769_v63, %v21769_v63  ;;  %11519 = vst.msk [vmem:[#allocation3 + $0x84] sm:$0xf] %vm11485_vm10, %v12858_v55  ;;  %11520 = vst.msk [vmem:[#allocation3 + $0x88] sm:$0xf] %vm11485_vm10, %v12859_v22  ;;  %v21772_v28 = vmax.f32 %v21070_v49, 0.0  ;;  %v21775_v19 = vld [vmem:[#allocation27_spill] sm:$0xff] }
 0x4e2   :  { %v12868_v47 = vpack.c.bf16 %v21770_v15, %v21770_v15  ;;  %v12869_v40 = vpack.c.bf16 %v21771_v5, %v21771_v5  ;;  %v21774_v52 = vmax.f32 %v21773_v25, 0.0  ;;  %11521 = vst.msk [vmem:[#allocation3 + $0x8c] sm:$0xf] %vm11485_vm10, %v12860_v39  ;;  %11522 = vst.msk [vmem:[#allocation3 + $0x90] sm:$0xf] %vm11485_vm10, %v12861_v57  ;;  %v21776_v18 = vmax.f32 %v21775_v19, 0.0 }
 0x4e3   :  { %v12870_v42 = vpack.c.bf16 %v21772_v28, %v21772_v28  ;;  %11523 = vst.msk [vmem:[#allocation3 + $0x94] sm:$0xf] %vm11485_vm10, %v12862_v29  ;;  %11524 = vst.msk [vmem:[#allocation3 + $0x98] sm:$0xf] %vm11485_vm10, %v12863_v41  ;;  %v21778_v61 = vmax.f32 %v21777_v17, 0.0  ;;  %v21779_v0 = vld [vmem:[#allocation22_spill] sm:$0xff]  ;;  %v12883_v57 = vpack.c.bf16 %v11223_v13, %v11223_v13  ;;  %v12884_v36 = vpack.c.bf16 %v11224_v24, %v11224_v24 }
 0x4e4   :  { %v12871_v51 = vpack.c.bf16 %v21774_v52, %v21774_v52  ;;  %v12872_v49 = vpack.c.bf16 %v21776_v18, %v21776_v18  ;;  %v21780_v10 = vmax.f32 %v21779_v0, 0.0  ;;  %v21781_v58 = vld [vmem:[#allocation23_spill] sm:$0xff]  ;;  %11525 = vst.msk [vmem:[#allocation3 + $0x9c] sm:$0xf] %vm11485_vm10, %v12864_v4  ;;  %11526 = vst.msk [vmem:[#allocation3 + $0xa0] sm:$0xf] %vm11485_vm10, %v12865_v44  ;;  %v12888_v16 = vpack.c.bf16 %v11228_v38, %v11228_v38 }
 0x4e5   :  { %v12873_v35 = vpack.c.bf16 %v21778_v61, %v21778_v61  ;;  %v21782_v50 = vmax.f32 %v21781_v58, 0.0  ;;  %11527 = vst.msk [vmem:[#allocation3 + $0xa4] sm:$0xf] %vm11485_vm10, %v12866_v45  ;;  %11528 = vst.msk [vmem:[#allocation3 + $0xa8] sm:$0xf] %vm11485_vm10, %v12867_v8  ;;  %v21783_v31 = vmax.f32 %v21728_v33, 0.0 }
 0x4e6   :  { %v12874_v32 = vpack.c.bf16 %v21780_v10, %v21780_v10  ;;  %v21784_v60 = vld [vmem:[#allocation17_spill] sm:$0xff]  ;;  %v21788_v7 = vld [vmem:[#allocation10_spill] sm:$0xff]  ;;  %11529 = vst.msk [vmem:[#allocation3 + $0xac] sm:$0xf] %vm11485_vm10, %v12868_v47  ;;  %11530 = vst.msk [vmem:[#allocation3 + $0xb0] sm:$0xf] %vm11485_vm10, %v12869_v40 }
 0x4e7   :  { %v12875_v48 = vpack.c.bf16 %v21782_v50, %v21782_v50  ;;  %v12876_v21 = vpack.c.bf16 %v21783_v31, %v21783_v31  ;;  %v21785_v46 = vmax.f32 %v21784_v60, 0.0  ;;  %v21786_v26 = vld [vmem:[#allocation9_spill] sm:$0xff]  ;;  %v21789_v6 = vmax.f32 %v21788_v7, 0.0  ;;  %11531 = vst.msk [vmem:[#allocation3 + $0xb4] sm:$0xf] %vm11485_vm10, %v12870_v42  ;;  %v21794_v9 = vld [vmem:[#allocation14_spill] sm:$0xff] }
 0x4e8   :  { %v21787_v62 = vmax.f32 %v21786_v26, 0.0  ;;  %11532 = vst.msk [vmem:[#allocation3 + $0xb8] sm:$0xf] %vm11485_vm10, %v12871_v51  ;;  %v21790_v33 = vld [vmem:[#allocation21_spill] sm:$0xff]  ;;  %v21795_v39 = vmax.f32 %v21794_v9, 0.0  ;;  %v21796_v13 = vmax.f32 %v21733_v11, 0.0 }
 0x4e9   :  { %v12877_v59 = vpack.c.bf16 %v21785_v46, %v21785_v46  ;;  %v12879_v37 = vpack.c.bf16 %v21789_v6, %v21789_v6  ;;  %v21791_v56 = vmax.f32 %v21790_v33, 0.0  ;;  %v21792_v55 = vld [vmem:[#allocation13_spill] sm:$0xff]  ;;  %11533 = vst.msk [vmem:[#allocation3 + $0xbc] sm:$0xf] %vm11485_vm10, %v12872_v49  ;;  %11534 = vst.msk [vmem:[#allocation3 + $0xc0] sm:$0xf] %vm11485_vm10, %v12873_v35 }
 0x4ea   :  { %v12878_v34 = vpack.c.bf16 %v21787_v62, %v21787_v62  ;;  %v21793_v12 = vmax.f32 %v21792_v55, 0.0  ;;  %v12882_v54 = vpack.c.bf16 %v21795_v39, %v21795_v39  ;;  %11535 = vst.msk [vmem:[#allocation3 + $0xc4] sm:$0xf] %vm11485_vm10, %v12874_v32  ;;  %11536 = vst.msk [vmem:[#allocation3 + $0xc8] sm:$0xf] %vm11485_vm10, %v12875_v48  ;;  %v12887_v29 = vpack.c.bf16 %v21796_v13, %v21796_v13 }
 0x4eb   :  { %v12880_v27 = vpack.c.bf16 %v21791_v56, %v21791_v56  ;;  %11537 = vst.msk [vmem:[#allocation3 + $0xcc] sm:$0xf] %vm11485_vm10, %v12876_v21  ;;  %11538 = vst.msk [vmem:[#allocation3 + $0xd0] sm:$0xf] %vm11485_vm10, %v12877_v59 }
 0x4ec   :  { %v12881_v22 = vpack.c.bf16 %v21793_v12, %v21793_v12  ;;  %11539 = vst.msk [vmem:[#allocation3 + $0xd4] sm:$0xf] %vm11485_vm10, %v12878_v34  ;;  %11540 = vst.msk [vmem:[#allocation3 + $0xd8] sm:$0xf] %vm11485_vm10, %v12879_v37 }
 0x4ed   :  { %11541 = vst.msk [vmem:[#allocation3 + $0xdc] sm:$0xf] %vm11485_vm10, %v12880_v27  ;;  %11543 = vst.msk [vmem:[#allocation3 + $0xe4] sm:$0xf] %vm11485_vm10, %v12882_v54 }
 0x4ee   :  { %11542 = vst.msk [vmem:[#allocation3 + $0xe0] sm:$0xf] %vm11485_vm10, %v12881_v22  ;;  %11544 = vst.msk [vmem:[#allocation3 + $0xe8] sm:$0xf] %vm11485_vm10, %v12883_v57 }
 0x4ef   :  { %11545 = vst.msk [vmem:[#allocation3 + $0xec] sm:$0xf] %vm11485_vm10, %v12884_v36  ;;  %11546 = vst.msk [vmem:[#allocation3 + $0xf0] sm:$0xf] %vm11485_vm10, %v12885_v43 }
 0x4f0   :  { %11548 = vst.msk [vmem:[#allocation3 + $0xf8] sm:$0xf] %vm11485_vm10, %v12887_v29  ;;  %11549 = vst.msk [vmem:[#allocation3 + $0xfc] sm:$0xf] %vm11485_vm10, %v12888_v16 }
 0x4f1   :  { %13897 = shalt.err (!%p13894_p4)
}
 0x4f2   :  { %s13898_s15 = scalar_lea.hbm %s21446_s5, 4096 }
 0x4f3   :  { %p13899_p5 = scmp.ne.s32.totalorder %s21446_s5, %s13898_s15  ;;  %p13902_p6 = scmp.lt.u32.totalorder %s13898_s15, %s21446_s5 }
 0x4f5   :  { %p13904_p7 = pnand %p13902_p6, %p13899_p5 }
 0x4f7   :  { %13907 = shalt.err (!%p13904_p7)
}
 0x4f8   :  { %s13913_s19 = smov 64   ;;  %s13914_s20 = smov 4  }
 0x4f9   :  { %11561 = dma.vmem_to_hbm [thread:$0]  %s21398_s4, 4096, %s21446_s5, [#allocation4], %s13913_s19, %s13913_s19, %s13914_s20  }
 0x4fa   :  { %13908 = dma.done.wait [#allocation4], 4096  }
 0x4fb   :  { %13909 = vsyncadd [#allocation4], 4294963200 }
 0x4fc   :  { %11565 = vsyncpa [#allocation4], 1 }

</bundles_post_ra>
